<compile_context>
chip_gen: v7x
topology: tpu7x:2x2x1
jax: 0.10.0
libtpu: 0.0.40
codegen_flags: <defaults>
</compile_context>

<pallas_src>
import functools

import numpy as np
import jax
import jax.numpy as jnp
from jax import lax
from jax.experimental import pallas as pl
from jax.experimental.pallas import tpu as pltpu

# ---- LIF moment-activation constants (mnn_core defaults) ----
L_COND = 0.05          # leak conductance
VOL_TH = 20.0          # firing threshold
VOL_RESET = 0.0        # reset potential
T_REF = 5.0            # refractory period (ms)
SQRT_L = float(np.sqrt(L_COND))
SQRT_PI = float(np.sqrt(np.pi))
BN_EPS = 1e-5
SIG_EPS = 1e-6
X_MIN, X_MAX = -12.0, 6.0    # clipped integration domain (float32-safe)
N_QUAD = 24                  # Gauss-Legendre nodes per integral

_GL_T, _GL_W = np.polynomial.legendre.leggauss(N_QUAD)
_GL_T = _GL_T.astype(np.float32)
_GL_W = _GL_W.astype(np.float32)
# Compile-time immediates for the fully unrolled inner quadrature.
_GL_NODES = [(float(t), float(w)) for t, w in zip(_GL_T, _GL_W)]


def _dawson_g(x):
    """g(x) = sqrt(pi)/2 * exp(x^2) * erfc(-x) with exactly one exp per call.

    A&S 7.1.26: erfc(v) ~= poly(t)*exp(-v^2), t = 1/(1 + p*|v|).  For x <= 0 the exp cancels
    analytically (exp(x^2)*erfc(-x) = poly*t); for x > 0 it is 2*exp(x^2) - poly*t.  For
    x <= -3 an asymptotic erfcx series is used instead (the poly form is inaccurate there).
    """
    ax = jnp.abs(x)
    t = pl.reciprocal(1.0 + 0.3275911 * ax, approx=True)
    poly = ((((1.061405429 * t - 1.453152027) * t) + 1.421413741) * t
            - 0.284496736) * t + 0.254829592
    poly_t = poly * t
    xe = jnp.clip(x, 0.0, X_MAX)                         # exp only needed for x > 0
    direct = jnp.where(x > 0.0, 2.0 * jnp.exp(xe * xe) - poly_t, poly_t)
    z = jnp.maximum(-x, 3.0)
    zi = pl.reciprocal(z, approx=True)
    z2 = zi * zi
    asym = (1.0 / SQRT_PI) * zi * (1.0 - 0.5 * z2 + 0.75 * z2 * z2 - 1.875 * z2 * z2 * z2)
    return 0.5 * SQRT_PI * jnp.where(x <= -3.0, asym, direct)


def _ensemble_linear_duo_kernel(u_ref, cov_ref, w_ref, wbd_ref, s_col_ref, s_flat_ref,
                                shift_ref, mask_ref, blk_ref, glt_v_ref, glw_v_ref,
                                u_out_ref, cov_out_ref):
    # ---------------- LinearDuo: mean matmul + batched covariance congruence transform -----
    u_in = u_ref[0]                        # (1, B_TILE*Fin)
    cov_in = cov_ref[0]                    # (Fin, B_TILE*Fin)
    wbd = wbd_ref[...]                     # (B_TILE*Fin, B_TILE*Fout) = kron(I, W^T)
    u_lin = jnp.dot(u_in, wbd, preferred_element_type=jnp.float32)        # (1, BF)
    rhs = jnp.dot(cov_in, wbd, preferred_element_type=jnp.float32)        # (Fin, BF)
    cov_lin = jnp.dot(w_ref[...], rhs, preferred_element_type=jnp.float32)  # (Fout, BF)

    # ---------------- CustomBatchNorm1D (inference statistics) -----------------------------
    s_flat = s_flat_ref[...]               # (1, BF)   s[p] tiled over batch
    u_bn = u_lin * s_flat + shift_ref[...]
    cov_bn = (s_col_ref[...] * s_flat) * cov_lin          # s[o]*s[p]*cov

    # ---------------- OriginMnnActivation: LIF moment activation ---------------------------
    mask = mask_ref[...]                   # (Fout, BF) block-diagonal identity
    sig2 = jnp.maximum(jnp.sum(mask * cov_bn, axis=0, keepdims=True), SIG_EPS)   # (1, BF)
    inv_sig = lax.rsqrt(sig2)
    isl = inv_sig * (1.0 / SQRT_L)
    ub = jnp.clip((VOL_TH * L_COND - u_bn) * isl, X_MIN, X_MAX)
    lb = jnp.clip((VOL_RESET * L_COND - u_bn) * isl, X_MIN, X_MAX)
    mid = 0.5 * (ub + lb)
    half = 0.5 * (ub - lb)

    t_col = glt_v_ref[...]                 # (K, 1) GL nodes   (vectorized over sublanes)
    w_col = glw_v_ref[...]                 # (K, 1) GL weights
    x = mid + half * t_col                 # (K, BF) outer quadrature nodes

    # mean firing rate: mu = 1 / (T_ref + 2/L * int_lb^ub g(x) dx)
    int_g = half * jnp.sum(w_col * _dawson_g(x), axis=0, keepdims=True)
    isi_mean = T_REF + (2.0 / L_COND) * int_g
    mu = pl.reciprocal(isi_mean, approx=True)                             # (1, BF)

    # ISI variance: Var = 8/L^2 * int_lb^ub H(x) dx,
    #   H(x) = exp(x^2) * int_{lo}^{x} exp(-y^2) g(y)^2 dy  (inner tail truncated at lo)
    lo = -jnp.sqrt(x * x + 36.0)           # (K, BF)
    ci = 0.5 * (x + lo)
    hi = 0.5 * (x - lo)
    amp = jnp.exp(0.5 * x * x)             # overflow/underflow-safe folding of exp(x^2)

    # Inner quadrature: fully unrolled static loop, GL nodes/weights are compile-time
    # immediates (no SMEM reads, no fori_loop trip overhead, LLO can interleave nodes).
    inner = jnp.zeros_like(x)              # (K, BF)
    for tj, wj in _GL_NODES:
        y = ci + hi * tj
        q = amp * jnp.exp(-0.5 * y * y) * _dawson_g(y)
        inner = inner + wj * (q * q)

    int_h = half * jnp.sum(w_col * (hi * inner), axis=0, keepdims=True)   # (1, BF)
    isi_var = (8.0 / (L_COND * L_COND)) * int_h
    sig_out2 = jnp.maximum(mu * mu * mu * isi_var, 0.0)

    # linear-response coefficient d(mu)/d(u_bar) for correlation propagation
    dmu = (mu * mu) * (2.0 / (L_COND * SQRT_L)) * (_dawson_g(ub) - _dawson_g(lb)) * inv_sig

    # per-batch "column" copy of dmu in the packed layout via one small MXU matmul
    kd = mask * dmu                                                        # (Fout, BF)
    k_col = jnp.dot(kd, blk_ref[...], preferred_element_type=jnp.float32)  # (Fout, BF)
    cov_act = (k_col * dmu) * cov_bn * (1.0 - mask) + mask * sig_out2

    u_out_ref[0] = mu                       # (1, BF)   lane-dense store
    cov_out_ref[0] = cov_act                # (Fout, BF) lane-dense store


def make_ensemble_linear_duo_params(in_features, out_features, key):
    """Deterministic synthetic parameters (LinearDuo weight + CustomBatchNorm1D affine)."""
    weight = (jax.random.normal(key, (out_features, in_features), jnp.float32)
              / np.sqrt(in_features))
    gamma = jnp.full((out_features,), 2.5, jnp.float32)      # special_init
    beta = jnp.full((out_features,), 2.5, jnp.float32)
    running_mean = jnp.zeros((out_features,), jnp.float32)
    running_var = jnp.ones((out_features,), jnp.float32)
    bn_scale = gamma / jnp.sqrt(running_var + BN_EPS)
    bn_shift = beta - running_mean * bn_scale
    return dict(weight=weight, bn_scale=bn_scale, bn_shift=bn_shift)


@functools.partial(jax.jit, static_argnames=("b_tile",))
def ensemble_linear_duo_forward(u, cov, weight, bn_scale, bn_shift, *, b_tile=4):
    batch, fin = u.shape
    fout = weight.shape[0]
    assert batch % b_tile == 0, "batch must be divisible by b_tile"
    n_tiles = batch // b_tile
    bf_in = b_tile * fin
    bf = b_tile * fout          # lane width; pick b_tile so this is a multiple of 128

    # ---- layout plumbing (host/XLA side): lane-pack b_tile batch elements ----
    u3 = u.reshape(n_tiles, 1, bf_in)
    cov2 = (cov.reshape(n_tiles, b_tile, fin, fin)
            .transpose(0, 2, 1, 3).reshape(n_tiles, fin, bf_in))
    eye_bt = jnp.eye(b_tile, dtype=jnp.float32)
    wbd = jnp.kron(eye_bt, weight.T)                                     # (bf_in, bf)
    mask = jnp.tile(jnp.eye(fout, dtype=jnp.float32), (1, b_tile))       # (fout, bf)
    blk = jnp.kron(eye_bt, jnp.ones((fout, fout), jnp.float32))          # (bf, bf)
    s_col = bn_scale.reshape(fout, 1)
    s_flat = jnp.tile(bn_scale, (b_tile,)).reshape(1, bf)
    shift_flat = jnp.tile(bn_shift, (b_tile,)).reshape(1, bf)
    glt_col = jnp.asarray(_GL_T).reshape(N_QUAD, 1)
    glw_col = jnp.asarray(_GL_W).reshape(N_QUAD, 1)

    u_out_r, cov_out_r = pl.pallas_call(
        _ensemble_linear_duo_kernel,
        grid=(n_tiles,),
        in_specs=[
            pl.BlockSpec((1, 1, bf_in), lambda t: (t, 0, 0)),            # u (packed)
            pl.BlockSpec((1, fin, bf_in), lambda t: (t, 0, 0)),          # cov (packed)
            pl.BlockSpec((fout, fin), lambda t: (0, 0)),                 # W
            pl.BlockSpec((bf_in, bf), lambda t: (0, 0)),                 # kron(I, W^T)
            pl.BlockSpec((fout, 1), lambda t: (0, 0)),                   # bn scale (column)
            pl.BlockSpec((1, bf), lambda t: (0, 0)),                     # bn scale (tiled)
            pl.BlockSpec((1, bf), lambda t: (0, 0)),                     # bn shift (tiled)
            pl.BlockSpec((fout, bf), lambda t: (0, 0)),                  # block-diag eye mask
            pl.BlockSpec((bf, bf), lambda t: (0, 0)),                    # block-diag ones
            pl.BlockSpec((N_QUAD, 1), lambda t: (0, 0)),                 # GL nodes (VMEM col)
            pl.BlockSpec((N_QUAD, 1), lambda t: (0, 0)),                 # GL weights (VMEM col)
        ],
        out_specs=(
            pl.BlockSpec((1, 1, bf), lambda t: (t, 0, 0)),
            pl.BlockSpec((1, fout, bf), lambda t: (t, 0, 0)),
        ),
        out_shape=(
            jax.ShapeDtypeStruct((n_tiles, 1, bf), jnp.float32),
            jax.ShapeDtypeStruct((n_tiles, fout, bf), jnp.float32),
        ),
        compiler_params=pltpu.CompilerParams(
            dimension_semantics=("parallel",),
            vmem_limit_bytes=32 * 1024 * 1024,
        ),
    )(u3, cov2, weight, wbd, s_col, s_flat, shift_flat, mask, blk,
      glt_col, glw_col)

    # ---- unpack lane-packed outputs back to (B, Fout) / (B, Fout, Fout) ----
    u_out = u_out_r.reshape(batch, fout)
    cov_out = (cov_out_r.reshape(n_tiles, fout, b_tile, fout)
               .transpose(0, 2, 1, 3).reshape(batch, fout, fout))
    return u_out, cov_out


if __name__ == "__main__":
    key = jax.random.PRNGKey(0)
    k_param, k_u, k_cov = jax.random.split(key, 3)

    batch, in_features, out_features = 8, 32, 32      # b_tile=4 -> 128-lane tiles, 2 grid steps
    params = make_ensemble_linear_duo_params(in_features, out_features, k_param)

    # mean input and a PSD input covariance
    u = jax.random.normal(k_u, (batch, in_features), jnp.float32)
    a = jax.random.normal(k_cov, (batch, in_features, in_features), jnp.float32)
    cov = (jnp.einsum("bij,bkj->bik", a, a) / in_features
           + 0.1 * jnp.eye(in_features, dtype=jnp.float32)[None])

    u_out, cov_out = ensemble_linear_duo_forward(
        u, cov, params["weight"], params["bn_scale"], params["bn_shift"], b_tile=4)
    jax.block_until_ready((u_out, cov_out))

    assert u_out.shape == (batch, out_features)
    assert cov_out.shape == (batch, out_features, out_features)
    assert bool(jnp.all(jnp.isfinite(u_out))) and bool(jnp.all(jnp.isfinite(cov_out)))
    print("KERNEL_OK")
</pallas_src>

<mosaic_0001>
module attributes {stable_mosaic.version = 11 : i64} {
  func.func @_ensemble_linear_duo_kernel(%arg0: i32, %arg1: memref<1x1x128xf32, #tpu.memory_space<vmem>>, %arg2: memref<1x32x128xf32, #tpu.memory_space<vmem>>, %arg3: memref<32x32xf32, #tpu.memory_space<vmem>>, %arg4: memref<128x128xf32, #tpu.memory_space<vmem>>, %arg5: memref<32x1xf32, #tpu.memory_space<vmem>>, %arg6: memref<1x128xf32, #tpu.memory_space<vmem>>, %arg7: memref<1x128xf32, #tpu.memory_space<vmem>>, %arg8: memref<32x128xf32, #tpu.memory_space<vmem>>, %arg9: memref<128x128xf32, #tpu.memory_space<vmem>>, %arg10: memref<24x1xf32, #tpu.memory_space<vmem>>, %arg11: memref<24x1xf32, #tpu.memory_space<vmem>>, %arg12: memref<1x1x128xf32, #tpu.memory_space<vmem>>, %arg13: memref<1x32x128xf32, #tpu.memory_space<vmem>>) attributes {dimension_semantics = [#tpu.dimension_semantics<parallel>], iteration_bounds = array<i64: 2>, scalar_prefetch = 0 : i64, scratch_operands = 0 : i64, tpu.core_type = #tpu.core_type<tc>, window_params = [{transform_indices = @transform_0, window_bounds = array<i64: 1, 1, 128>}, {transform_indices = @transform_1, window_bounds = array<i64: 1, 32, 128>}, {pipeline_mode = #tpu.pipeline_mode<synchronous>, transform_indices = @transform_2, window_bounds = array<i64: 32, 32>}, {pipeline_mode = #tpu.pipeline_mode<synchronous>, transform_indices = @transform_3, window_bounds = array<i64: 128, 128>}, {pipeline_mode = #tpu.pipeline_mode<synchronous>, transform_indices = @transform_4, window_bounds = array<i64: 32, 1>}, {pipeline_mode = #tpu.pipeline_mode<synchronous>, transform_indices = @transform_5, window_bounds = array<i64: 1, 128>}, {pipeline_mode = #tpu.pipeline_mode<synchronous>, transform_indices = @transform_6, window_bounds = array<i64: 1, 128>}, {pipeline_mode = #tpu.pipeline_mode<synchronous>, transform_indices = @transform_7, window_bounds = array<i64: 32, 128>}, {pipeline_mode = #tpu.pipeline_mode<synchronous>, transform_indices = @transform_8, window_bounds = array<i64: 128, 128>}, {pipeline_mode = #tpu.pipeline_mode<synchronous>, transform_indices = @transform_9, window_bounds = array<i64: 24, 1>}, {pipeline_mode = #tpu.pipeline_mode<synchronous>, transform_indices = @transform_10, window_bounds = array<i64: 24, 1>}, {transform_indices = @transform_11, window_bounds = array<i64: 1, 1, 128>}, {transform_indices = @transform_12, window_bounds = array<i64: 1, 32, 128>}]} {
    %c0 = arith.constant 0 : index
    %c0_0 = arith.constant 0 : index
    %c0_1 = arith.constant 0 : index
    %0 = vector.load %arg1[%c0, %c0_0, %c0_1] : memref<1x1x128xf32, #tpu.memory_space<vmem>>, vector<1x1x128xf32>
    %1 = vector.shape_cast %0 : vector<1x1x128xf32> to vector<1x128xf32>
    %c0_2 = arith.constant 0 : index
    %c0_3 = arith.constant 0 : index
    %c0_4 = arith.constant 0 : index
    %2 = vector.load %arg2[%c0_2, %c0_3, %c0_4] : memref<1x32x128xf32, #tpu.memory_space<vmem>>, vector<1x32x128xf32>
    %3 = vector.shape_cast %2 : vector<1x32x128xf32> to vector<32x128xf32>
    %c0_5 = arith.constant 0 : index
    %c0_6 = arith.constant 0 : index
    %4 = vector.load %arg4[%c0_5, %c0_6] : memref<128x128xf32, #tpu.memory_space<vmem>>, vector<128x128xf32>
    %cst = arith.constant dense<0.000000e+00> : vector<1x128xf32>
    %5 = tpu.matmul %1, %4, %cst {dimension_numbers = #tpu.dot_dimension_numbers<[1], [0], [0], [1], [0, 0, 1, 1], [], []>} : vector<1x128xf32>, vector<128x128xf32>, vector<1x128xf32> -> vector<1x128xf32>
    %cst_7 = arith.constant dense<0.000000e+00> : vector<32x128xf32>
    %6 = tpu.matmul %3, %4, %cst_7 {dimension_numbers = #tpu.dot_dimension_numbers<[1], [0], [0], [1], [0, 0, 1, 1], [], []>} : vector<32x128xf32>, vector<128x128xf32>, vector<32x128xf32> -> vector<32x128xf32>
    %c0_8 = arith.constant 0 : index
    %c0_9 = arith.constant 0 : index
    %7 = vector.load %arg3[%c0_8, %c0_9] : memref<32x32xf32, #tpu.memory_space<vmem>>, vector<32x32xf32>
    %cst_10 = arith.constant dense<0.000000e+00> : vector<32x128xf32>
    %8 = tpu.matmul %7, %6, %cst_10 {dimension_numbers = #tpu.dot_dimension_numbers<[1], [0], [0], [1], [0, 0, 1, 1], [], []>} : vector<32x32xf32>, vector<32x128xf32>, vector<32x128xf32> -> vector<32x128xf32>
    %c0_11 = arith.constant 0 : index
    %c0_12 = arith.constant 0 : index
    %9 = vector.load %arg6[%c0_11, %c0_12] : memref<1x128xf32, #tpu.memory_space<vmem>>, vector<1x128xf32>
    %10 = arith.mulf %5, %9 : vector<1x128xf32>
    %c0_13 = arith.constant 0 : index
    %c0_14 = arith.constant 0 : index
    %11 = vector.load %arg7[%c0_13, %c0_14] : memref<1x128xf32, #tpu.memory_space<vmem>>, vector<1x128xf32>
    %12 = arith.addf %10, %11 : vector<1x128xf32>
    %c0_15 = arith.constant 0 : index
    %c0_16 = arith.constant 0 : index
    %13 = vector.load %arg5[%c0_15, %c0_16] : memref<32x1xf32, #tpu.memory_space<vmem>>, vector<32x1xf32>
    %14 = vector.broadcast %13 : vector<32x1xf32> to vector<32x128xf32>
    %15 = vector.broadcast %9 : vector<1x128xf32> to vector<32x128xf32>
    %16 = arith.mulf %14, %15 : vector<32x128xf32>
    %17 = arith.mulf %16, %8 : vector<32x128xf32>
    %c0_17 = arith.constant 0 : index
    %c0_18 = arith.constant 0 : index
    %18 = vector.load %arg8[%c0_17, %c0_18] : memref<32x128xf32, #tpu.memory_space<vmem>>, vector<32x128xf32>
    %19 = arith.mulf %18, %17 : vector<32x128xf32>
    %cst_19 = arith.constant dense<0.000000e+00> : vector<128xf32>
    %20 = vector.multi_reduction <add>, %19, %cst_19 [0] : vector<32x128xf32> to vector<128xf32>
    %21 = vector.shape_cast %20 : vector<128xf32> to vector<1x128xf32>
    %cst_20 = arith.constant 9.99999997E-7 : f32
    %22 = vector.broadcast %cst_20 : f32 to vector<1x128xf32>
    %23 = arith.maximumf %21, %22 : vector<1x128xf32>
    %24 = math.rsqrt %23 : vector<1x128xf32>
    %cst_21 = arith.constant 4.47213602 : f32
    %25 = vector.broadcast %cst_21 : f32 to vector<1x128xf32>
    %26 = arith.mulf %24, %25 : vector<1x128xf32>
    %cst_22 = arith.constant 1.000000e+00 : f32
    %27 = vector.broadcast %cst_22 : f32 to vector<1x128xf32>
    %28 = arith.subf %27, %12 : vector<1x128xf32>
    %29 = arith.mulf %28, %26 : vector<1x128xf32>
    %cst_23 = arith.constant -1.200000e+01 : f32
    %cst_24 = arith.constant 6.000000e+00 : f32
    %30 = vector.broadcast %cst_23 : f32 to vector<1x128xf32>
    %31 = arith.maximumf %30, %29 : vector<1x128xf32>
    %32 = vector.broadcast %cst_24 : f32 to vector<1x128xf32>
    %33 = arith.minimumf %32, %31 : vector<1x128xf32>
    %cst_25 = arith.constant 0.000000e+00 : f32
    %34 = vector.broadcast %cst_25 : f32 to vector<1x128xf32>
    %35 = arith.subf %34, %12 : vector<1x128xf32>
    %36 = arith.mulf %35, %26 : vector<1x128xf32>
    %cst_26 = arith.constant -1.200000e+01 : f32
    %cst_27 = arith.constant 6.000000e+00 : f32
    %37 = vector.broadcast %cst_26 : f32 to vector<1x128xf32>
    %38 = arith.maximumf %37, %36 : vector<1x128xf32>
    %39 = vector.broadcast %cst_27 : f32 to vector<1x128xf32>
    %40 = arith.minimumf %39, %38 : vector<1x128xf32>
    %41 = arith.addf %33, %40 : vector<1x128xf32>
    %cst_28 = arith.constant 5.000000e-01 : f32
    %42 = vector.broadcast %cst_28 : f32 to vector<1x128xf32>
    %43 = arith.mulf %42, %41 : vector<1x128xf32>
    %44 = arith.subf %33, %40 : vector<1x128xf32>
    %cst_29 = arith.constant 5.000000e-01 : f32
    %45 = vector.broadcast %cst_29 : f32 to vector<1x128xf32>
    %46 = arith.mulf %45, %44 : vector<1x128xf32>
    %c0_30 = arith.constant 0 : index
    %c0_31 = arith.constant 0 : index
    %47 = vector.load %arg10[%c0_30, %c0_31] : memref<24x1xf32, #tpu.memory_space<vmem>>, vector<24x1xf32>
    %c0_32 = arith.constant 0 : index
    %c0_33 = arith.constant 0 : index
    %48 = vector.load %arg11[%c0_32, %c0_33] : memref<24x1xf32, #tpu.memory_space<vmem>>, vector<24x1xf32>
    %49 = vector.broadcast %46 : vector<1x128xf32> to vector<24x128xf32>
    %50 = vector.broadcast %47 : vector<24x1xf32> to vector<24x128xf32>
    %51 = arith.mulf %49, %50 : vector<24x128xf32>
    %52 = vector.broadcast %43 : vector<1x128xf32> to vector<24x128xf32>
    %53 = arith.addf %52, %51 : vector<24x128xf32>
    %54 = math.absf %53 : vector<24x128xf32>
    %cst_34 = arith.constant 0.327591091 : f32
    %55 = vector.broadcast %cst_34 : f32 to vector<24x128xf32>
    %56 = arith.mulf %55, %54 : vector<24x128xf32>
    %cst_35 = arith.constant 1.000000e+00 : f32
    %57 = vector.broadcast %cst_35 : f32 to vector<24x128xf32>
    %58 = arith.addf %57, %56 : vector<24x128xf32>
    %59 = tpu.reciprocal %58 {approx = true} : vector<24x128xf32> -> vector<24x128xf32>
    %cst_36 = arith.constant 1.06140542 : f32
    %60 = vector.broadcast %cst_36 : f32 to vector<24x128xf32>
    %61 = arith.mulf %60, %59 : vector<24x128xf32>
    %cst_37 = arith.constant 1.45315206 : f32
    %62 = vector.broadcast %cst_37 : f32 to vector<24x128xf32>
    %63 = arith.subf %61, %62 : vector<24x128xf32>
    %64 = arith.mulf %63, %59 : vector<24x128xf32>
    %cst_38 = arith.constant 1.42141378 : f32
    %65 = vector.broadcast %cst_38 : f32 to vector<24x128xf32>
    %66 = arith.addf %64, %65 : vector<24x128xf32>
    %67 = arith.mulf %66, %59 : vector<24x128xf32>
    %cst_39 = arith.constant 0.284496725 : f32
    %68 = vector.broadcast %cst_39 : f32 to vector<24x128xf32>
    %69 = arith.subf %67, %68 : vector<24x128xf32>
    %70 = arith.mulf %69, %59 : vector<24x128xf32>
    %cst_40 = arith.constant 0.254829586 : f32
    %71 = vector.broadcast %cst_40 : f32 to vector<24x128xf32>
    %72 = arith.addf %70, %71 : vector<24x128xf32>
    %73 = arith.mulf %72, %59 : vector<24x128xf32>
    %cst_41 = arith.constant 0.000000e+00 : f32
    %cst_42 = arith.constant 6.000000e+00 : f32
    %74 = vector.broadcast %cst_41 : f32 to vector<24x128xf32>
    %75 = arith.maximumf %74, %53 : vector<24x128xf32>
    %76 = vector.broadcast %cst_42 : f32 to vector<24x128xf32>
    %77 = arith.minimumf %76, %75 : vector<24x128xf32>
    %cst_43 = arith.constant 0.000000e+00 : f32
    %78 = vector.broadcast %cst_43 : f32 to vector<24x128xf32>
    %79 = arith.cmpf ogt, %53, %78 : vector<24x128xf32>
    %80 = arith.mulf %77, %77 : vector<24x128xf32>
    %81 = math.exp %80 : vector<24x128xf32>
    %cst_44 = arith.constant 2.000000e+00 : f32
    %82 = vector.broadcast %cst_44 : f32 to vector<24x128xf32>
    %83 = arith.mulf %82, %81 : vector<24x128xf32>
    %84 = arith.subf %83, %73 : vector<24x128xf32>
    %85 = arith.select %79, %84, %73 : vector<24x128xi1>, vector<24x128xf32>
    %cst_45 = arith.constant 0.000000e+00 : f32
    %86 = vector.broadcast %cst_45 : f32 to vector<24x128xf32>
    %87 = arith.subf %86, %53 : vector<24x128xf32>
    %cst_46 = arith.constant 3.000000e+00 : f32
    %88 = vector.broadcast %cst_46 : f32 to vector<24x128xf32>
    %89 = arith.maximumf %87, %88 : vector<24x128xf32>
    %90 = tpu.reciprocal %89 {approx = true} : vector<24x128xf32> -> vector<24x128xf32>
    %91 = arith.mulf %90, %90 : vector<24x128xf32>
    %cst_47 = arith.constant 0.564189613 : f32
    %92 = vector.broadcast %cst_47 : f32 to vector<24x128xf32>
    %93 = arith.mulf %92, %90 : vector<24x128xf32>
    %cst_48 = arith.constant 5.000000e-01 : f32
    %94 = vector.broadcast %cst_48 : f32 to vector<24x128xf32>
    %95 = arith.mulf %94, %91 : vector<24x128xf32>
    %cst_49 = arith.constant 1.000000e+00 : f32
    %96 = vector.broadcast %cst_49 : f32 to vector<24x128xf32>
    %97 = arith.subf %96, %95 : vector<24x128xf32>
    %cst_50 = arith.constant 7.500000e-01 : f32
    %98 = vector.broadcast %cst_50 : f32 to vector<24x128xf32>
    %99 = arith.mulf %98, %91 : vector<24x128xf32>
    %100 = arith.mulf %99, %91 : vector<24x128xf32>
    %101 = arith.addf %97, %100 : vector<24x128xf32>
    %cst_51 = arith.constant 1.875000e+00 : f32
    %102 = vector.broadcast %cst_51 : f32 to vector<24x128xf32>
    %103 = arith.mulf %102, %91 : vector<24x128xf32>
    %104 = arith.mulf %103, %91 : vector<24x128xf32>
    %105 = arith.mulf %104, %91 : vector<24x128xf32>
    %106 = arith.subf %101, %105 : vector<24x128xf32>
    %107 = arith.mulf %93, %106 : vector<24x128xf32>
    %cst_52 = arith.constant -3.000000e+00 : f32
    %108 = vector.broadcast %cst_52 : f32 to vector<24x128xf32>
    %109 = arith.cmpf ole, %53, %108 : vector<24x128xf32>
    %110 = arith.select %109, %107, %85 : vector<24x128xi1>, vector<24x128xf32>
    %cst_53 = arith.constant 0.886226952 : f32
    %111 = vector.broadcast %cst_53 : f32 to vector<24x128xf32>
    %112 = arith.mulf %111, %110 : vector<24x128xf32>
    %113 = vector.broadcast %48 : vector<24x1xf32> to vector<24x128xf32>
    %114 = arith.mulf %113, %112 : vector<24x128xf32>
    %cst_54 = arith.constant dense<0.000000e+00> : vector<128xf32>
    %115 = vector.multi_reduction <add>, %114, %cst_54 [0] : vector<24x128xf32> to vector<128xf32>
    %116 = vector.shape_cast %115 : vector<128xf32> to vector<1x128xf32>
    %117 = arith.mulf %46, %116 : vector<1x128xf32>
    %cst_55 = arith.constant 4.000000e+01 : f32
    %118 = vector.broadcast %cst_55 : f32 to vector<1x128xf32>
    %119 = arith.mulf %118, %117 : vector<1x128xf32>
    %cst_56 = arith.constant 5.000000e+00 : f32
    %120 = vector.broadcast %cst_56 : f32 to vector<1x128xf32>
    %121 = arith.addf %120, %119 : vector<1x128xf32>
    %122 = tpu.reciprocal %121 {approx = true} : vector<1x128xf32> -> vector<1x128xf32>
    %123 = arith.mulf %53, %53 : vector<24x128xf32>
    %cst_57 = arith.constant 3.600000e+01 : f32
    %124 = vector.broadcast %cst_57 : f32 to vector<24x128xf32>
    %125 = arith.addf %123, %124 : vector<24x128xf32>
    %126 = math.sqrt %125 : vector<24x128xf32>
    %cst_58 = arith.constant 0.000000e+00 : f32
    %127 = vector.broadcast %cst_58 : f32 to vector<24x128xf32>
    %128 = arith.subf %127, %126 : vector<24x128xf32>
    %129 = arith.addf %53, %128 : vector<24x128xf32>
    %cst_59 = arith.constant 5.000000e-01 : f32
    %130 = vector.broadcast %cst_59 : f32 to vector<24x128xf32>
    %131 = arith.mulf %130, %129 : vector<24x128xf32>
    %132 = arith.subf %53, %128 : vector<24x128xf32>
    %cst_60 = arith.constant 5.000000e-01 : f32
    %133 = vector.broadcast %cst_60 : f32 to vector<24x128xf32>
    %134 = arith.mulf %133, %132 : vector<24x128xf32>
    %cst_61 = arith.constant 5.000000e-01 : f32
    %135 = vector.broadcast %cst_61 : f32 to vector<24x128xf32>
    %136 = arith.mulf %135, %53 : vector<24x128xf32>
    %137 = arith.mulf %136, %53 : vector<24x128xf32>
    %138 = math.exp %137 : vector<24x128xf32>
    %cst_62 = arith.constant 0.000000e+00 : f32
    %139 = vector.broadcast %cst_62 : f32 to vector<24x128xf32>
    %cst_63 = arith.constant -0.995187222 : f32
    %140 = vector.broadcast %cst_63 : f32 to vector<24x128xf32>
    %141 = arith.mulf %134, %140 : vector<24x128xf32>
    %142 = arith.addf %131, %141 : vector<24x128xf32>
    %cst_64 = arith.constant -5.000000e-01 : f32
    %143 = vector.broadcast %cst_64 : f32 to vector<24x128xf32>
    %144 = arith.mulf %143, %142 : vector<24x128xf32>
    %145 = arith.mulf %144, %142 : vector<24x128xf32>
    %146 = math.exp %145 : vector<24x128xf32>
    %147 = arith.mulf %138, %146 : vector<24x128xf32>
    %148 = math.absf %142 : vector<24x128xf32>
    %cst_65 = arith.constant 0.327591091 : f32
    %149 = vector.broadcast %cst_65 : f32 to vector<24x128xf32>
    %150 = arith.mulf %149, %148 : vector<24x128xf32>
    %cst_66 = arith.constant 1.000000e+00 : f32
    %151 = vector.broadcast %cst_66 : f32 to vector<24x128xf32>
    %152 = arith.addf %151, %150 : vector<24x128xf32>
    %153 = tpu.reciprocal %152 {approx = true} : vector<24x128xf32> -> vector<24x128xf32>
    %cst_67 = arith.constant 1.06140542 : f32
    %154 = vector.broadcast %cst_67 : f32 to vector<24x128xf32>
    %155 = arith.mulf %154, %153 : vector<24x128xf32>
    %cst_68 = arith.constant 1.45315206 : f32
    %156 = vector.broadcast %cst_68 : f32 to vector<24x128xf32>
    %157 = arith.subf %155, %156 : vector<24x128xf32>
    %158 = arith.mulf %157, %153 : vector<24x128xf32>
    %cst_69 = arith.constant 1.42141378 : f32
    %159 = vector.broadcast %cst_69 : f32 to vector<24x128xf32>
    %160 = arith.addf %158, %159 : vector<24x128xf32>
    %161 = arith.mulf %160, %153 : vector<24x128xf32>
    %cst_70 = arith.constant 0.284496725 : f32
    %162 = vector.broadcast %cst_70 : f32 to vector<24x128xf32>
    %163 = arith.subf %161, %162 : vector<24x128xf32>
    %164 = arith.mulf %163, %153 : vector<24x128xf32>
    %cst_71 = arith.constant 0.254829586 : f32
    %165 = vector.broadcast %cst_71 : f32 to vector<24x128xf32>
    %166 = arith.addf %164, %165 : vector<24x128xf32>
    %167 = arith.mulf %166, %153 : vector<24x128xf32>
    %cst_72 = arith.constant 0.000000e+00 : f32
    %cst_73 = arith.constant 6.000000e+00 : f32
    %168 = vector.broadcast %cst_72 : f32 to vector<24x128xf32>
    %169 = arith.maximumf %168, %142 : vector<24x128xf32>
    %170 = vector.broadcast %cst_73 : f32 to vector<24x128xf32>
    %171 = arith.minimumf %170, %169 : vector<24x128xf32>
    %cst_74 = arith.constant 0.000000e+00 : f32
    %172 = vector.broadcast %cst_74 : f32 to vector<24x128xf32>
    %173 = arith.cmpf ogt, %142, %172 : vector<24x128xf32>
    %174 = arith.mulf %171, %171 : vector<24x128xf32>
    %175 = math.exp %174 : vector<24x128xf32>
    %cst_75 = arith.constant 2.000000e+00 : f32
    %176 = vector.broadcast %cst_75 : f32 to vector<24x128xf32>
    %177 = arith.mulf %176, %175 : vector<24x128xf32>
    %178 = arith.subf %177, %167 : vector<24x128xf32>
    %179 = arith.select %173, %178, %167 : vector<24x128xi1>, vector<24x128xf32>
    %cst_76 = arith.constant 0.000000e+00 : f32
    %180 = vector.broadcast %cst_76 : f32 to vector<24x128xf32>
    %181 = arith.subf %180, %142 : vector<24x128xf32>
    %cst_77 = arith.constant 3.000000e+00 : f32
    %182 = vector.broadcast %cst_77 : f32 to vector<24x128xf32>
    %183 = arith.maximumf %181, %182 : vector<24x128xf32>
    %184 = tpu.reciprocal %183 {approx = true} : vector<24x128xf32> -> vector<24x128xf32>
    %185 = arith.mulf %184, %184 : vector<24x128xf32>
    %cst_78 = arith.constant 0.564189613 : f32
    %186 = vector.broadcast %cst_78 : f32 to vector<24x128xf32>
    %187 = arith.mulf %186, %184 : vector<24x128xf32>
    %cst_79 = arith.constant 5.000000e-01 : f32
    %188 = vector.broadcast %cst_79 : f32 to vector<24x128xf32>
    %189 = arith.mulf %188, %185 : vector<24x128xf32>
    %cst_80 = arith.constant 1.000000e+00 : f32
    %190 = vector.broadcast %cst_80 : f32 to vector<24x128xf32>
    %191 = arith.subf %190, %189 : vector<24x128xf32>
    %cst_81 = arith.constant 7.500000e-01 : f32
    %192 = vector.broadcast %cst_81 : f32 to vector<24x128xf32>
    %193 = arith.mulf %192, %185 : vector<24x128xf32>
    %194 = arith.mulf %193, %185 : vector<24x128xf32>
    %195 = arith.addf %191, %194 : vector<24x128xf32>
    %cst_82 = arith.constant 1.875000e+00 : f32
    %196 = vector.broadcast %cst_82 : f32 to vector<24x128xf32>
    %197 = arith.mulf %196, %185 : vector<24x128xf32>
    %198 = arith.mulf %197, %185 : vector<24x128xf32>
    %199 = arith.mulf %198, %185 : vector<24x128xf32>
    %200 = arith.subf %195, %199 : vector<24x128xf32>
    %201 = arith.mulf %187, %200 : vector<24x128xf32>
    %cst_83 = arith.constant -3.000000e+00 : f32
    %202 = vector.broadcast %cst_83 : f32 to vector<24x128xf32>
    %203 = arith.cmpf ole, %142, %202 : vector<24x128xf32>
    %204 = arith.select %203, %201, %179 : vector<24x128xi1>, vector<24x128xf32>
    %cst_84 = arith.constant 0.886226952 : f32
    %205 = vector.broadcast %cst_84 : f32 to vector<24x128xf32>
    %206 = arith.mulf %205, %204 : vector<24x128xf32>
    %207 = arith.mulf %147, %206 : vector<24x128xf32>
    %208 = arith.mulf %207, %207 : vector<24x128xf32>
    %cst_85 = arith.constant 0.0123412302 : f32
    %209 = vector.broadcast %cst_85 : f32 to vector<24x128xf32>
    %210 = arith.mulf %209, %208 : vector<24x128xf32>
    %211 = arith.addf %139, %210 : vector<24x128xf32>
    %cst_86 = arith.constant -0.974728584 : f32
    %212 = vector.broadcast %cst_86 : f32 to vector<24x128xf32>
    %213 = arith.mulf %134, %212 : vector<24x128xf32>
    %214 = arith.addf %131, %213 : vector<24x128xf32>
    %cst_87 = arith.constant -5.000000e-01 : f32
    %215 = vector.broadcast %cst_87 : f32 to vector<24x128xf32>
    %216 = arith.mulf %215, %214 : vector<24x128xf32>
    %217 = arith.mulf %216, %214 : vector<24x128xf32>
    %218 = math.exp %217 : vector<24x128xf32>
    %219 = arith.mulf %138, %218 : vector<24x128xf32>
    %220 = math.absf %214 : vector<24x128xf32>
    %cst_88 = arith.constant 0.327591091 : f32
    %221 = vector.broadcast %cst_88 : f32 to vector<24x128xf32>
    %222 = arith.mulf %221, %220 : vector<24x128xf32>
    %cst_89 = arith.constant 1.000000e+00 : f32
    %223 = vector.broadcast %cst_89 : f32 to vector<24x128xf32>
    %224 = arith.addf %223, %222 : vector<24x128xf32>
    %225 = tpu.reciprocal %224 {approx = true} : vector<24x128xf32> -> vector<24x128xf32>
    %cst_90 = arith.constant 1.06140542 : f32
    %226 = vector.broadcast %cst_90 : f32 to vector<24x128xf32>
    %227 = arith.mulf %226, %225 : vector<24x128xf32>
    %cst_91 = arith.constant 1.45315206 : f32
    %228 = vector.broadcast %cst_91 : f32 to vector<24x128xf32>
    %229 = arith.subf %227, %228 : vector<24x128xf32>
    %230 = arith.mulf %229, %225 : vector<24x128xf32>
    %cst_92 = arith.constant 1.42141378 : f32
    %231 = vector.broadcast %cst_92 : f32 to vector<24x128xf32>
    %232 = arith.addf %230, %231 : vector<24x128xf32>
    %233 = arith.mulf %232, %225 : vector<24x128xf32>
    %cst_93 = arith.constant 0.284496725 : f32
    %234 = vector.broadcast %cst_93 : f32 to vector<24x128xf32>
    %235 = arith.subf %233, %234 : vector<24x128xf32>
    %236 = arith.mulf %235, %225 : vector<24x128xf32>
    %cst_94 = arith.constant 0.254829586 : f32
    %237 = vector.broadcast %cst_94 : f32 to vector<24x128xf32>
    %238 = arith.addf %236, %237 : vector<24x128xf32>
    %239 = arith.mulf %238, %225 : vector<24x128xf32>
    %cst_95 = arith.constant 0.000000e+00 : f32
    %cst_96 = arith.constant 6.000000e+00 : f32
    %240 = vector.broadcast %cst_95 : f32 to vector<24x128xf32>
    %241 = arith.maximumf %240, %214 : vector<24x128xf32>
    %242 = vector.broadcast %cst_96 : f32 to vector<24x128xf32>
    %243 = arith.minimumf %242, %241 : vector<24x128xf32>
    %cst_97 = arith.constant 0.000000e+00 : f32
    %244 = vector.broadcast %cst_97 : f32 to vector<24x128xf32>
    %245 = arith.cmpf ogt, %214, %244 : vector<24x128xf32>
    %246 = arith.mulf %243, %243 : vector<24x128xf32>
    %247 = math.exp %246 : vector<24x128xf32>
    %cst_98 = arith.constant 2.000000e+00 : f32
    %248 = vector.broadcast %cst_98 : f32 to vector<24x128xf32>
    %249 = arith.mulf %248, %247 : vector<24x128xf32>
    %250 = arith.subf %249, %239 : vector<24x128xf32>
    %251 = arith.select %245, %250, %239 : vector<24x128xi1>, vector<24x128xf32>
    %cst_99 = arith.constant 0.000000e+00 : f32
    %252 = vector.broadcast %cst_99 : f32 to vector<24x128xf32>
    %253 = arith.subf %252, %214 : vector<24x128xf32>
    %cst_100 = arith.constant 3.000000e+00 : f32
    %254 = vector.broadcast %cst_100 : f32 to vector<24x128xf32>
    %255 = arith.maximumf %253, %254 : vector<24x128xf32>
    %256 = tpu.reciprocal %255 {approx = true} : vector<24x128xf32> -> vector<24x128xf32>
    %257 = arith.mulf %256, %256 : vector<24x128xf32>
    %cst_101 = arith.constant 0.564189613 : f32
    %258 = vector.broadcast %cst_101 : f32 to vector<24x128xf32>
    %259 = arith.mulf %258, %256 : vector<24x128xf32>
    %cst_102 = arith.constant 5.000000e-01 : f32
    %260 = vector.broadcast %cst_102 : f32 to vector<24x128xf32>
    %261 = arith.mulf %260, %257 : vector<24x128xf32>
    %cst_103 = arith.constant 1.000000e+00 : f32
    %262 = vector.broadcast %cst_103 : f32 to vector<24x128xf32>
    %263 = arith.subf %262, %261 : vector<24x128xf32>
    %cst_104 = arith.constant 7.500000e-01 : f32
    %264 = vector.broadcast %cst_104 : f32 to vector<24x128xf32>
    %265 = arith.mulf %264, %257 : vector<24x128xf32>
    %266 = arith.mulf %265, %257 : vector<24x128xf32>
    %267 = arith.addf %263, %266 : vector<24x128xf32>
    %cst_105 = arith.constant 1.875000e+00 : f32
    %268 = vector.broadcast %cst_105 : f32 to vector<24x128xf32>
    %269 = arith.mulf %268, %257 : vector<24x128xf32>
    %270 = arith.mulf %269, %257 : vector<24x128xf32>
    %271 = arith.mulf %270, %257 : vector<24x128xf32>
    %272 = arith.subf %267, %271 : vector<24x128xf32>
    %273 = arith.mulf %259, %272 : vector<24x128xf32>
    %cst_106 = arith.constant -3.000000e+00 : f32
    %274 = vector.broadcast %cst_106 : f32 to vector<24x128xf32>
    %275 = arith.cmpf ole, %214, %274 : vector<24x128xf32>
    %276 = arith.select %275, %273, %251 : vector<24x128xi1>, vector<24x128xf32>
    %cst_107 = arith.constant 0.886226952 : f32
    %277 = vector.broadcast %cst_107 : f32 to vector<24x128xf32>
    %278 = arith.mulf %277, %276 : vector<24x128xf32>
    %279 = arith.mulf %219, %278 : vector<24x128xf32>
    %280 = arith.mulf %279, %279 : vector<24x128xf32>
    %cst_108 = arith.constant 0.0285313893 : f32
    %281 = vector.broadcast %cst_108 : f32 to vector<24x128xf32>
    %282 = arith.mulf %281, %280 : vector<24x128xf32>
    %283 = arith.addf %211, %282 : vector<24x128xf32>
    %cst_109 = arith.constant -0.938274562 : f32
    %284 = vector.broadcast %cst_109 : f32 to vector<24x128xf32>
    %285 = arith.mulf %134, %284 : vector<24x128xf32>
    %286 = arith.addf %131, %285 : vector<24x128xf32>
    %cst_110 = arith.constant -5.000000e-01 : f32
    %287 = vector.broadcast %cst_110 : f32 to vector<24x128xf32>
    %288 = arith.mulf %287, %286 : vector<24x128xf32>
    %289 = arith.mulf %288, %286 : vector<24x128xf32>
    %290 = math.exp %289 : vector<24x128xf32>
    %291 = arith.mulf %138, %290 : vector<24x128xf32>
    %292 = math.absf %286 : vector<24x128xf32>
    %cst_111 = arith.constant 0.327591091 : f32
    %293 = vector.broadcast %cst_111 : f32 to vector<24x128xf32>
    %294 = arith.mulf %293, %292 : vector<24x128xf32>
    %cst_112 = arith.constant 1.000000e+00 : f32
    %295 = vector.broadcast %cst_112 : f32 to vector<24x128xf32>
    %296 = arith.addf %295, %294 : vector<24x128xf32>
    %297 = tpu.reciprocal %296 {approx = true} : vector<24x128xf32> -> vector<24x128xf32>
    %cst_113 = arith.constant 1.06140542 : f32
    %298 = vector.broadcast %cst_113 : f32 to vector<24x128xf32>
    %299 = arith.mulf %298, %297 : vector<24x128xf32>
    %cst_114 = arith.constant 1.45315206 : f32
    %300 = vector.broadcast %cst_114 : f32 to vector<24x128xf32>
    %301 = arith.subf %299, %300 : vector<24x128xf32>
    %302 = arith.mulf %301, %297 : vector<24x128xf32>
    %cst_115 = arith.constant 1.42141378 : f32
    %303 = vector.broadcast %cst_115 : f32 to vector<24x128xf32>
    %304 = arith.addf %302, %303 : vector<24x128xf32>
    %305 = arith.mulf %304, %297 : vector<24x128xf32>
    %cst_116 = arith.constant 0.284496725 : f32
    %306 = vector.broadcast %cst_116 : f32 to vector<24x128xf32>
    %307 = arith.subf %305, %306 : vector<24x128xf32>
    %308 = arith.mulf %307, %297 : vector<24x128xf32>
    %cst_117 = arith.constant 0.254829586 : f32
    %309 = vector.broadcast %cst_117 : f32 to vector<24x128xf32>
    %310 = arith.addf %308, %309 : vector<24x128xf32>
    %311 = arith.mulf %310, %297 : vector<24x128xf32>
    %cst_118 = arith.constant 0.000000e+00 : f32
    %cst_119 = arith.constant 6.000000e+00 : f32
    %312 = vector.broadcast %cst_118 : f32 to vector<24x128xf32>
    %313 = arith.maximumf %312, %286 : vector<24x128xf32>
    %314 = vector.broadcast %cst_119 : f32 to vector<24x128xf32>
    %315 = arith.minimumf %314, %313 : vector<24x128xf32>
    %cst_120 = arith.constant 0.000000e+00 : f32
    %316 = vector.broadcast %cst_120 : f32 to vector<24x128xf32>
    %317 = arith.cmpf ogt, %286, %316 : vector<24x128xf32>
    %318 = arith.mulf %315, %315 : vector<24x128xf32>
    %319 = math.exp %318 : vector<24x128xf32>
    %cst_121 = arith.constant 2.000000e+00 : f32
    %320 = vector.broadcast %cst_121 : f32 to vector<24x128xf32>
    %321 = arith.mulf %320, %319 : vector<24x128xf32>
    %322 = arith.subf %321, %311 : vector<24x128xf32>
    %323 = arith.select %317, %322, %311 : vector<24x128xi1>, vector<24x128xf32>
    %cst_122 = arith.constant 0.000000e+00 : f32
    %324 = vector.broadcast %cst_122 : f32 to vector<24x128xf32>
    %325 = arith.subf %324, %286 : vector<24x128xf32>
    %cst_123 = arith.constant 3.000000e+00 : f32
    %326 = vector.broadcast %cst_123 : f32 to vector<24x128xf32>
    %327 = arith.maximumf %325, %326 : vector<24x128xf32>
    %328 = tpu.reciprocal %327 {approx = true} : vector<24x128xf32> -> vector<24x128xf32>
    %329 = arith.mulf %328, %328 : vector<24x128xf32>
    %cst_124 = arith.constant 0.564189613 : f32
    %330 = vector.broadcast %cst_124 : f32 to vector<24x128xf32>
    %331 = arith.mulf %330, %328 : vector<24x128xf32>
    %cst_125 = arith.constant 5.000000e-01 : f32
    %332 = vector.broadcast %cst_125 : f32 to vector<24x128xf32>
    %333 = arith.mulf %332, %329 : vector<24x128xf32>
    %cst_126 = arith.constant 1.000000e+00 : f32
    %334 = vector.broadcast %cst_126 : f32 to vector<24x128xf32>
    %335 = arith.subf %334, %333 : vector<24x128xf32>
    %cst_127 = arith.constant 7.500000e-01 : f32
    %336 = vector.broadcast %cst_127 : f32 to vector<24x128xf32>
    %337 = arith.mulf %336, %329 : vector<24x128xf32>
    %338 = arith.mulf %337, %329 : vector<24x128xf32>
    %339 = arith.addf %335, %338 : vector<24x128xf32>
    %cst_128 = arith.constant 1.875000e+00 : f32
    %340 = vector.broadcast %cst_128 : f32 to vector<24x128xf32>
    %341 = arith.mulf %340, %329 : vector<24x128xf32>
    %342 = arith.mulf %341, %329 : vector<24x128xf32>
    %343 = arith.mulf %342, %329 : vector<24x128xf32>
    %344 = arith.subf %339, %343 : vector<24x128xf32>
    %345 = arith.mulf %331, %344 : vector<24x128xf32>
    %cst_129 = arith.constant -3.000000e+00 : f32
    %346 = vector.broadcast %cst_129 : f32 to vector<24x128xf32>
    %347 = arith.cmpf ole, %286, %346 : vector<24x128xf32>
    %348 = arith.select %347, %345, %323 : vector<24x128xi1>, vector<24x128xf32>
    %cst_130 = arith.constant 0.886226952 : f32
    %349 = vector.broadcast %cst_130 : f32 to vector<24x128xf32>
    %350 = arith.mulf %349, %348 : vector<24x128xf32>
    %351 = arith.mulf %291, %350 : vector<24x128xf32>
    %352 = arith.mulf %351, %351 : vector<24x128xf32>
    %cst_131 = arith.constant 0.044277437 : f32
    %353 = vector.broadcast %cst_131 : f32 to vector<24x128xf32>
    %354 = arith.mulf %353, %352 : vector<24x128xf32>
    %355 = arith.addf %283, %354 : vector<24x128xf32>
    %cst_132 = arith.constant -0.886415541 : f32
    %356 = vector.broadcast %cst_132 : f32 to vector<24x128xf32>
    %357 = arith.mulf %134, %356 : vector<24x128xf32>
    %358 = arith.addf %131, %357 : vector<24x128xf32>
    %cst_133 = arith.constant -5.000000e-01 : f32
    %359 = vector.broadcast %cst_133 : f32 to vector<24x128xf32>
    %360 = arith.mulf %359, %358 : vector<24x128xf32>
    %361 = arith.mulf %360, %358 : vector<24x128xf32>
    %362 = math.exp %361 : vector<24x128xf32>
    %363 = arith.mulf %138, %362 : vector<24x128xf32>
    %364 = math.absf %358 : vector<24x128xf32>
    %cst_134 = arith.constant 0.327591091 : f32
    %365 = vector.broadcast %cst_134 : f32 to vector<24x128xf32>
    %366 = arith.mulf %365, %364 : vector<24x128xf32>
    %cst_135 = arith.constant 1.000000e+00 : f32
    %367 = vector.broadcast %cst_135 : f32 to vector<24x128xf32>
    %368 = arith.addf %367, %366 : vector<24x128xf32>
    %369 = tpu.reciprocal %368 {approx = true} : vector<24x128xf32> -> vector<24x128xf32>
    %cst_136 = arith.constant 1.06140542 : f32
    %370 = vector.broadcast %cst_136 : f32 to vector<24x128xf32>
    %371 = arith.mulf %370, %369 : vector<24x128xf32>
    %cst_137 = arith.constant 1.45315206 : f32
    %372 = vector.broadcast %cst_137 : f32 to vector<24x128xf32>
    %373 = arith.subf %371, %372 : vector<24x128xf32>
    %374 = arith.mulf %373, %369 : vector<24x128xf32>
    %cst_138 = arith.constant 1.42141378 : f32
    %375 = vector.broadcast %cst_138 : f32 to vector<24x128xf32>
    %376 = arith.addf %374, %375 : vector<24x128xf32>
    %377 = arith.mulf %376, %369 : vector<24x128xf32>
    %cst_139 = arith.constant 0.284496725 : f32
    %378 = vector.broadcast %cst_139 : f32 to vector<24x128xf32>
    %379 = arith.subf %377, %378 : vector<24x128xf32>
    %380 = arith.mulf %379, %369 : vector<24x128xf32>
    %cst_140 = arith.constant 0.254829586 : f32
    %381 = vector.broadcast %cst_140 : f32 to vector<24x128xf32>
    %382 = arith.addf %380, %381 : vector<24x128xf32>
    %383 = arith.mulf %382, %369 : vector<24x128xf32>
    %cst_141 = arith.constant 0.000000e+00 : f32
    %cst_142 = arith.constant 6.000000e+00 : f32
    %384 = vector.broadcast %cst_141 : f32 to vector<24x128xf32>
    %385 = arith.maximumf %384, %358 : vector<24x128xf32>
    %386 = vector.broadcast %cst_142 : f32 to vector<24x128xf32>
    %387 = arith.minimumf %386, %385 : vector<24x128xf32>
    %cst_143 = arith.constant 0.000000e+00 : f32
    %388 = vector.broadcast %cst_143 : f32 to vector<24x128xf32>
    %389 = arith.cmpf ogt, %358, %388 : vector<24x128xf32>
    %390 = arith.mulf %387, %387 : vector<24x128xf32>
    %391 = math.exp %390 : vector<24x128xf32>
    %cst_144 = arith.constant 2.000000e+00 : f32
    %392 = vector.broadcast %cst_144 : f32 to vector<24x128xf32>
    %393 = arith.mulf %392, %391 : vector<24x128xf32>
    %394 = arith.subf %393, %383 : vector<24x128xf32>
    %395 = arith.select %389, %394, %383 : vector<24x128xi1>, vector<24x128xf32>
    %cst_145 = arith.constant 0.000000e+00 : f32
    %396 = vector.broadcast %cst_145 : f32 to vector<24x128xf32>
    %397 = arith.subf %396, %358 : vector<24x128xf32>
    %cst_146 = arith.constant 3.000000e+00 : f32
    %398 = vector.broadcast %cst_146 : f32 to vector<24x128xf32>
    %399 = arith.maximumf %397, %398 : vector<24x128xf32>
    %400 = tpu.reciprocal %399 {approx = true} : vector<24x128xf32> -> vector<24x128xf32>
    %401 = arith.mulf %400, %400 : vector<24x128xf32>
    %cst_147 = arith.constant 0.564189613 : f32
    %402 = vector.broadcast %cst_147 : f32 to vector<24x128xf32>
    %403 = arith.mulf %402, %400 : vector<24x128xf32>
    %cst_148 = arith.constant 5.000000e-01 : f32
    %404 = vector.broadcast %cst_148 : f32 to vector<24x128xf32>
    %405 = arith.mulf %404, %401 : vector<24x128xf32>
    %cst_149 = arith.constant 1.000000e+00 : f32
    %406 = vector.broadcast %cst_149 : f32 to vector<24x128xf32>
    %407 = arith.subf %406, %405 : vector<24x128xf32>
    %cst_150 = arith.constant 7.500000e-01 : f32
    %408 = vector.broadcast %cst_150 : f32 to vector<24x128xf32>
    %409 = arith.mulf %408, %401 : vector<24x128xf32>
    %410 = arith.mulf %409, %401 : vector<24x128xf32>
    %411 = arith.addf %407, %410 : vector<24x128xf32>
    %cst_151 = arith.constant 1.875000e+00 : f32
    %412 = vector.broadcast %cst_151 : f32 to vector<24x128xf32>
    %413 = arith.mulf %412, %401 : vector<24x128xf32>
    %414 = arith.mulf %413, %401 : vector<24x128xf32>
    %415 = arith.mulf %414, %401 : vector<24x128xf32>
    %416 = arith.subf %411, %415 : vector<24x128xf32>
    %417 = arith.mulf %403, %416 : vector<24x128xf32>
    %cst_152 = arith.constant -3.000000e+00 : f32
    %418 = vector.broadcast %cst_152 : f32 to vector<24x128xf32>
    %419 = arith.cmpf ole, %358, %418 : vector<24x128xf32>
    %420 = arith.select %419, %417, %395 : vector<24x128xi1>, vector<24x128xf32>
    %cst_153 = arith.constant 0.886226952 : f32
    %421 = vector.broadcast %cst_153 : f32 to vector<24x128xf32>
    %422 = arith.mulf %421, %420 : vector<24x128xf32>
    %423 = arith.mulf %363, %422 : vector<24x128xf32>
    %424 = arith.mulf %423, %423 : vector<24x128xf32>
    %cst_154 = arith.constant 0.0592985861 : f32
    %425 = vector.broadcast %cst_154 : f32 to vector<24x128xf32>
    %426 = arith.mulf %425, %424 : vector<24x128xf32>
    %427 = arith.addf %355, %426 : vector<24x128xf32>
    %cst_155 = arith.constant -0.820001959 : f32
    %428 = vector.broadcast %cst_155 : f32 to vector<24x128xf32>
    %429 = arith.mulf %134, %428 : vector<24x128xf32>
    %430 = arith.addf %131, %429 : vector<24x128xf32>
    %cst_156 = arith.constant -5.000000e-01 : f32
    %431 = vector.broadcast %cst_156 : f32 to vector<24x128xf32>
    %432 = arith.mulf %431, %430 : vector<24x128xf32>
    %433 = arith.mulf %432, %430 : vector<24x128xf32>
    %434 = math.exp %433 : vector<24x128xf32>
    %435 = arith.mulf %138, %434 : vector<24x128xf32>
    %436 = math.absf %430 : vector<24x128xf32>
    %cst_157 = arith.constant 0.327591091 : f32
    %437 = vector.broadcast %cst_157 : f32 to vector<24x128xf32>
    %438 = arith.mulf %437, %436 : vector<24x128xf32>
    %cst_158 = arith.constant 1.000000e+00 : f32
    %439 = vector.broadcast %cst_158 : f32 to vector<24x128xf32>
    %440 = arith.addf %439, %438 : vector<24x128xf32>
    %441 = tpu.reciprocal %440 {approx = true} : vector<24x128xf32> -> vector<24x128xf32>
    %cst_159 = arith.constant 1.06140542 : f32
    %442 = vector.broadcast %cst_159 : f32 to vector<24x128xf32>
    %443 = arith.mulf %442, %441 : vector<24x128xf32>
    %cst_160 = arith.constant 1.45315206 : f32
    %444 = vector.broadcast %cst_160 : f32 to vector<24x128xf32>
    %445 = arith.subf %443, %444 : vector<24x128xf32>
    %446 = arith.mulf %445, %441 : vector<24x128xf32>
    %cst_161 = arith.constant 1.42141378 : f32
    %447 = vector.broadcast %cst_161 : f32 to vector<24x128xf32>
    %448 = arith.addf %446, %447 : vector<24x128xf32>
    %449 = arith.mulf %448, %441 : vector<24x128xf32>
    %cst_162 = arith.constant 0.284496725 : f32
    %450 = vector.broadcast %cst_162 : f32 to vector<24x128xf32>
    %451 = arith.subf %449, %450 : vector<24x128xf32>
    %452 = arith.mulf %451, %441 : vector<24x128xf32>
    %cst_163 = arith.constant 0.254829586 : f32
    %453 = vector.broadcast %cst_163 : f32 to vector<24x128xf32>
    %454 = arith.addf %452, %453 : vector<24x128xf32>
    %455 = arith.mulf %454, %441 : vector<24x128xf32>
    %cst_164 = arith.constant 0.000000e+00 : f32
    %cst_165 = arith.constant 6.000000e+00 : f32
    %456 = vector.broadcast %cst_164 : f32 to vector<24x128xf32>
    %457 = arith.maximumf %456, %430 : vector<24x128xf32>
    %458 = vector.broadcast %cst_165 : f32 to vector<24x128xf32>
    %459 = arith.minimumf %458, %457 : vector<24x128xf32>
    %cst_166 = arith.constant 0.000000e+00 : f32
    %460 = vector.broadcast %cst_166 : f32 to vector<24x128xf32>
    %461 = arith.cmpf ogt, %430, %460 : vector<24x128xf32>
    %462 = arith.mulf %459, %459 : vector<24x128xf32>
    %463 = math.exp %462 : vector<24x128xf32>
    %cst_167 = arith.constant 2.000000e+00 : f32
    %464 = vector.broadcast %cst_167 : f32 to vector<24x128xf32>
    %465 = arith.mulf %464, %463 : vector<24x128xf32>
    %466 = arith.subf %465, %455 : vector<24x128xf32>
    %467 = arith.select %461, %466, %455 : vector<24x128xi1>, vector<24x128xf32>
    %cst_168 = arith.constant 0.000000e+00 : f32
    %468 = vector.broadcast %cst_168 : f32 to vector<24x128xf32>
    %469 = arith.subf %468, %430 : vector<24x128xf32>
    %cst_169 = arith.constant 3.000000e+00 : f32
    %470 = vector.broadcast %cst_169 : f32 to vector<24x128xf32>
    %471 = arith.maximumf %469, %470 : vector<24x128xf32>
    %472 = tpu.reciprocal %471 {approx = true} : vector<24x128xf32> -> vector<24x128xf32>
    %473 = arith.mulf %472, %472 : vector<24x128xf32>
    %cst_170 = arith.constant 0.564189613 : f32
    %474 = vector.broadcast %cst_170 : f32 to vector<24x128xf32>
    %475 = arith.mulf %474, %472 : vector<24x128xf32>
    %cst_171 = arith.constant 5.000000e-01 : f32
    %476 = vector.broadcast %cst_171 : f32 to vector<24x128xf32>
    %477 = arith.mulf %476, %473 : vector<24x128xf32>
    %cst_172 = arith.constant 1.000000e+00 : f32
    %478 = vector.broadcast %cst_172 : f32 to vector<24x128xf32>
    %479 = arith.subf %478, %477 : vector<24x128xf32>
    %cst_173 = arith.constant 7.500000e-01 : f32
    %480 = vector.broadcast %cst_173 : f32 to vector<24x128xf32>
    %481 = arith.mulf %480, %473 : vector<24x128xf32>
    %482 = arith.mulf %481, %473 : vector<24x128xf32>
    %483 = arith.addf %479, %482 : vector<24x128xf32>
    %cst_174 = arith.constant 1.875000e+00 : f32
    %484 = vector.broadcast %cst_174 : f32 to vector<24x128xf32>
    %485 = arith.mulf %484, %473 : vector<24x128xf32>
    %486 = arith.mulf %485, %473 : vector<24x128xf32>
    %487 = arith.mulf %486, %473 : vector<24x128xf32>
    %488 = arith.subf %483, %487 : vector<24x128xf32>
    %489 = arith.mulf %475, %488 : vector<24x128xf32>
    %cst_175 = arith.constant -3.000000e+00 : f32
    %490 = vector.broadcast %cst_175 : f32 to vector<24x128xf32>
    %491 = arith.cmpf ole, %430, %490 : vector<24x128xf32>
    %492 = arith.select %491, %489, %467 : vector<24x128xi1>, vector<24x128xf32>
    %cst_176 = arith.constant 0.886226952 : f32
    %493 = vector.broadcast %cst_176 : f32 to vector<24x128xf32>
    %494 = arith.mulf %493, %492 : vector<24x128xf32>
    %495 = arith.mulf %435, %494 : vector<24x128xf32>
    %496 = arith.mulf %495, %495 : vector<24x128xf32>
    %cst_177 = arith.constant 0.0733464807 : f32
    %497 = vector.broadcast %cst_177 : f32 to vector<24x128xf32>
    %498 = arith.mulf %497, %496 : vector<24x128xf32>
    %499 = arith.addf %427, %498 : vector<24x128xf32>
    %cst_178 = arith.constant -0.740124166 : f32
    %500 = vector.broadcast %cst_178 : f32 to vector<24x128xf32>
    %501 = arith.mulf %134, %500 : vector<24x128xf32>
    %502 = arith.addf %131, %501 : vector<24x128xf32>
    %cst_179 = arith.constant -5.000000e-01 : f32
    %503 = vector.broadcast %cst_179 : f32 to vector<24x128xf32>
    %504 = arith.mulf %503, %502 : vector<24x128xf32>
    %505 = arith.mulf %504, %502 : vector<24x128xf32>
    %506 = math.exp %505 : vector<24x128xf32>
    %507 = arith.mulf %138, %506 : vector<24x128xf32>
    %508 = math.absf %502 : vector<24x128xf32>
    %cst_180 = arith.constant 0.327591091 : f32
    %509 = vector.broadcast %cst_180 : f32 to vector<24x128xf32>
    %510 = arith.mulf %509, %508 : vector<24x128xf32>
    %cst_181 = arith.constant 1.000000e+00 : f32
    %511 = vector.broadcast %cst_181 : f32 to vector<24x128xf32>
    %512 = arith.addf %511, %510 : vector<24x128xf32>
    %513 = tpu.reciprocal %512 {approx = true} : vector<24x128xf32> -> vector<24x128xf32>
    %cst_182 = arith.constant 1.06140542 : f32
    %514 = vector.broadcast %cst_182 : f32 to vector<24x128xf32>
    %515 = arith.mulf %514, %513 : vector<24x128xf32>
    %cst_183 = arith.constant 1.45315206 : f32
    %516 = vector.broadcast %cst_183 : f32 to vector<24x128xf32>
    %517 = arith.subf %515, %516 : vector<24x128xf32>
    %518 = arith.mulf %517, %513 : vector<24x128xf32>
    %cst_184 = arith.constant 1.42141378 : f32
    %519 = vector.broadcast %cst_184 : f32 to vector<24x128xf32>
    %520 = arith.addf %518, %519 : vector<24x128xf32>
    %521 = arith.mulf %520, %513 : vector<24x128xf32>
    %cst_185 = arith.constant 0.284496725 : f32
    %522 = vector.broadcast %cst_185 : f32 to vector<24x128xf32>
    %523 = arith.subf %521, %522 : vector<24x128xf32>
    %524 = arith.mulf %523, %513 : vector<24x128xf32>
    %cst_186 = arith.constant 0.254829586 : f32
    %525 = vector.broadcast %cst_186 : f32 to vector<24x128xf32>
    %526 = arith.addf %524, %525 : vector<24x128xf32>
    %527 = arith.mulf %526, %513 : vector<24x128xf32>
    %cst_187 = arith.constant 0.000000e+00 : f32
    %cst_188 = arith.constant 6.000000e+00 : f32
    %528 = vector.broadcast %cst_187 : f32 to vector<24x128xf32>
    %529 = arith.maximumf %528, %502 : vector<24x128xf32>
    %530 = vector.broadcast %cst_188 : f32 to vector<24x128xf32>
    %531 = arith.minimumf %530, %529 : vector<24x128xf32>
    %cst_189 = arith.constant 0.000000e+00 : f32
    %532 = vector.broadcast %cst_189 : f32 to vector<24x128xf32>
    %533 = arith.cmpf ogt, %502, %532 : vector<24x128xf32>
    %534 = arith.mulf %531, %531 : vector<24x128xf32>
    %535 = math.exp %534 : vector<24x128xf32>
    %cst_190 = arith.constant 2.000000e+00 : f32
    %536 = vector.broadcast %cst_190 : f32 to vector<24x128xf32>
    %537 = arith.mulf %536, %535 : vector<24x128xf32>
    %538 = arith.subf %537, %527 : vector<24x128xf32>
    %539 = arith.select %533, %538, %527 : vector<24x128xi1>, vector<24x128xf32>
    %cst_191 = arith.constant 0.000000e+00 : f32
    %540 = vector.broadcast %cst_191 : f32 to vector<24x128xf32>
    %541 = arith.subf %540, %502 : vector<24x128xf32>
    %cst_192 = arith.constant 3.000000e+00 : f32
    %542 = vector.broadcast %cst_192 : f32 to vector<24x128xf32>
    %543 = arith.maximumf %541, %542 : vector<24x128xf32>
    %544 = tpu.reciprocal %543 {approx = true} : vector<24x128xf32> -> vector<24x128xf32>
    %545 = arith.mulf %544, %544 : vector<24x128xf32>
    %cst_193 = arith.constant 0.564189613 : f32
    %546 = vector.broadcast %cst_193 : f32 to vector<24x128xf32>
    %547 = arith.mulf %546, %544 : vector<24x128xf32>
    %cst_194 = arith.constant 5.000000e-01 : f32
    %548 = vector.broadcast %cst_194 : f32 to vector<24x128xf32>
    %549 = arith.mulf %548, %545 : vector<24x128xf32>
    %cst_195 = arith.constant 1.000000e+00 : f32
    %550 = vector.broadcast %cst_195 : f32 to vector<24x128xf32>
    %551 = arith.subf %550, %549 : vector<24x128xf32>
    %cst_196 = arith.constant 7.500000e-01 : f32
    %552 = vector.broadcast %cst_196 : f32 to vector<24x128xf32>
    %553 = arith.mulf %552, %545 : vector<24x128xf32>
    %554 = arith.mulf %553, %545 : vector<24x128xf32>
    %555 = arith.addf %551, %554 : vector<24x128xf32>
    %cst_197 = arith.constant 1.875000e+00 : f32
    %556 = vector.broadcast %cst_197 : f32 to vector<24x128xf32>
    %557 = arith.mulf %556, %545 : vector<24x128xf32>
    %558 = arith.mulf %557, %545 : vector<24x128xf32>
    %559 = arith.mulf %558, %545 : vector<24x128xf32>
    %560 = arith.subf %555, %559 : vector<24x128xf32>
    %561 = arith.mulf %547, %560 : vector<24x128xf32>
    %cst_198 = arith.constant -3.000000e+00 : f32
    %562 = vector.broadcast %cst_198 : f32 to vector<24x128xf32>
    %563 = arith.cmpf ole, %502, %562 : vector<24x128xf32>
    %564 = arith.select %563, %561, %539 : vector<24x128xi1>, vector<24x128xf32>
    %cst_199 = arith.constant 0.886226952 : f32
    %565 = vector.broadcast %cst_199 : f32 to vector<24x128xf32>
    %566 = arith.mulf %565, %564 : vector<24x128xf32>
    %567 = arith.mulf %507, %566 : vector<24x128xf32>
    %568 = arith.mulf %567, %567 : vector<24x128xf32>
    %cst_200 = arith.constant 0.086190164 : f32
    %569 = vector.broadcast %cst_200 : f32 to vector<24x128xf32>
    %570 = arith.mulf %569, %568 : vector<24x128xf32>
    %571 = arith.addf %499, %570 : vector<24x128xf32>
    %cst_201 = arith.constant -0.64809364 : f32
    %572 = vector.broadcast %cst_201 : f32 to vector<24x128xf32>
    %573 = arith.mulf %134, %572 : vector<24x128xf32>
    %574 = arith.addf %131, %573 : vector<24x128xf32>
    %cst_202 = arith.constant -5.000000e-01 : f32
    %575 = vector.broadcast %cst_202 : f32 to vector<24x128xf32>
    %576 = arith.mulf %575, %574 : vector<24x128xf32>
    %577 = arith.mulf %576, %574 : vector<24x128xf32>
    %578 = math.exp %577 : vector<24x128xf32>
    %579 = arith.mulf %138, %578 : vector<24x128xf32>
    %580 = math.absf %574 : vector<24x128xf32>
    %cst_203 = arith.constant 0.327591091 : f32
    %581 = vector.broadcast %cst_203 : f32 to vector<24x128xf32>
    %582 = arith.mulf %581, %580 : vector<24x128xf32>
    %cst_204 = arith.constant 1.000000e+00 : f32
    %583 = vector.broadcast %cst_204 : f32 to vector<24x128xf32>
    %584 = arith.addf %583, %582 : vector<24x128xf32>
    %585 = tpu.reciprocal %584 {approx = true} : vector<24x128xf32> -> vector<24x128xf32>
    %cst_205 = arith.constant 1.06140542 : f32
    %586 = vector.broadcast %cst_205 : f32 to vector<24x128xf32>
    %587 = arith.mulf %586, %585 : vector<24x128xf32>
    %cst_206 = arith.constant 1.45315206 : f32
    %588 = vector.broadcast %cst_206 : f32 to vector<24x128xf32>
    %589 = arith.subf %587, %588 : vector<24x128xf32>
    %590 = arith.mulf %589, %585 : vector<24x128xf32>
    %cst_207 = arith.constant 1.42141378 : f32
    %591 = vector.broadcast %cst_207 : f32 to vector<24x128xf32>
    %592 = arith.addf %590, %591 : vector<24x128xf32>
    %593 = arith.mulf %592, %585 : vector<24x128xf32>
    %cst_208 = arith.constant 0.284496725 : f32
    %594 = vector.broadcast %cst_208 : f32 to vector<24x128xf32>
    %595 = arith.subf %593, %594 : vector<24x128xf32>
    %596 = arith.mulf %595, %585 : vector<24x128xf32>
    %cst_209 = arith.constant 0.254829586 : f32
    %597 = vector.broadcast %cst_209 : f32 to vector<24x128xf32>
    %598 = arith.addf %596, %597 : vector<24x128xf32>
    %599 = arith.mulf %598, %585 : vector<24x128xf32>
    %cst_210 = arith.constant 0.000000e+00 : f32
    %cst_211 = arith.constant 6.000000e+00 : f32
    %600 = vector.broadcast %cst_210 : f32 to vector<24x128xf32>
    %601 = arith.maximumf %600, %574 : vector<24x128xf32>
    %602 = vector.broadcast %cst_211 : f32 to vector<24x128xf32>
    %603 = arith.minimumf %602, %601 : vector<24x128xf32>
    %cst_212 = arith.constant 0.000000e+00 : f32
    %604 = vector.broadcast %cst_212 : f32 to vector<24x128xf32>
    %605 = arith.cmpf ogt, %574, %604 : vector<24x128xf32>
    %606 = arith.mulf %603, %603 : vector<24x128xf32>
    %607 = math.exp %606 : vector<24x128xf32>
    %cst_213 = arith.constant 2.000000e+00 : f32
    %608 = vector.broadcast %cst_213 : f32 to vector<24x128xf32>
    %609 = arith.mulf %608, %607 : vector<24x128xf32>
    %610 = arith.subf %609, %599 : vector<24x128xf32>
    %611 = arith.select %605, %610, %599 : vector<24x128xi1>, vector<24x128xf32>
    %cst_214 = arith.constant 0.000000e+00 : f32
    %612 = vector.broadcast %cst_214 : f32 to vector<24x128xf32>
    %613 = arith.subf %612, %574 : vector<24x128xf32>
    %cst_215 = arith.constant 3.000000e+00 : f32
    %614 = vector.broadcast %cst_215 : f32 to vector<24x128xf32>
    %615 = arith.maximumf %613, %614 : vector<24x128xf32>
    %616 = tpu.reciprocal %615 {approx = true} : vector<24x128xf32> -> vector<24x128xf32>
    %617 = arith.mulf %616, %616 : vector<24x128xf32>
    %cst_216 = arith.constant 0.564189613 : f32
    %618 = vector.broadcast %cst_216 : f32 to vector<24x128xf32>
    %619 = arith.mulf %618, %616 : vector<24x128xf32>
    %cst_217 = arith.constant 5.000000e-01 : f32
    %620 = vector.broadcast %cst_217 : f32 to vector<24x128xf32>
    %621 = arith.mulf %620, %617 : vector<24x128xf32>
    %cst_218 = arith.constant 1.000000e+00 : f32
    %622 = vector.broadcast %cst_218 : f32 to vector<24x128xf32>
    %623 = arith.subf %622, %621 : vector<24x128xf32>
    %cst_219 = arith.constant 7.500000e-01 : f32
    %624 = vector.broadcast %cst_219 : f32 to vector<24x128xf32>
    %625 = arith.mulf %624, %617 : vector<24x128xf32>
    %626 = arith.mulf %625, %617 : vector<24x128xf32>
    %627 = arith.addf %623, %626 : vector<24x128xf32>
    %cst_220 = arith.constant 1.875000e+00 : f32
    %628 = vector.broadcast %cst_220 : f32 to vector<24x128xf32>
    %629 = arith.mulf %628, %617 : vector<24x128xf32>
    %630 = arith.mulf %629, %617 : vector<24x128xf32>
    %631 = arith.mulf %630, %617 : vector<24x128xf32>
    %632 = arith.subf %627, %631 : vector<24x128xf32>
    %633 = arith.mulf %619, %632 : vector<24x128xf32>
    %cst_221 = arith.constant -3.000000e+00 : f32
    %634 = vector.broadcast %cst_221 : f32 to vector<24x128xf32>
    %635 = arith.cmpf ole, %574, %634 : vector<24x128xf32>
    %636 = arith.select %635, %633, %611 : vector<24x128xi1>, vector<24x128xf32>
    %cst_222 = arith.constant 0.886226952 : f32
    %637 = vector.broadcast %cst_222 : f32 to vector<24x128xf32>
    %638 = arith.mulf %637, %636 : vector<24x128xf32>
    %639 = arith.mulf %579, %638 : vector<24x128xf32>
    %640 = arith.mulf %639, %639 : vector<24x128xf32>
    %cst_223 = arith.constant 0.0976186543 : f32
    %641 = vector.broadcast %cst_223 : f32 to vector<24x128xf32>
    %642 = arith.mulf %641, %640 : vector<24x128xf32>
    %643 = arith.addf %571, %642 : vector<24x128xf32>
    %cst_224 = arith.constant -0.545421481 : f32
    %644 = vector.broadcast %cst_224 : f32 to vector<24x128xf32>
    %645 = arith.mulf %134, %644 : vector<24x128xf32>
    %646 = arith.addf %131, %645 : vector<24x128xf32>
    %cst_225 = arith.constant -5.000000e-01 : f32
    %647 = vector.broadcast %cst_225 : f32 to vector<24x128xf32>
    %648 = arith.mulf %647, %646 : vector<24x128xf32>
    %649 = arith.mulf %648, %646 : vector<24x128xf32>
    %650 = math.exp %649 : vector<24x128xf32>
    %651 = arith.mulf %138, %650 : vector<24x128xf32>
    %652 = math.absf %646 : vector<24x128xf32>
    %cst_226 = arith.constant 0.327591091 : f32
    %653 = vector.broadcast %cst_226 : f32 to vector<24x128xf32>
    %654 = arith.mulf %653, %652 : vector<24x128xf32>
    %cst_227 = arith.constant 1.000000e+00 : f32
    %655 = vector.broadcast %cst_227 : f32 to vector<24x128xf32>
    %656 = arith.addf %655, %654 : vector<24x128xf32>
    %657 = tpu.reciprocal %656 {approx = true} : vector<24x128xf32> -> vector<24x128xf32>
    %cst_228 = arith.constant 1.06140542 : f32
    %658 = vector.broadcast %cst_228 : f32 to vector<24x128xf32>
    %659 = arith.mulf %658, %657 : vector<24x128xf32>
    %cst_229 = arith.constant 1.45315206 : f32
    %660 = vector.broadcast %cst_229 : f32 to vector<24x128xf32>
    %661 = arith.subf %659, %660 : vector<24x128xf32>
    %662 = arith.mulf %661, %657 : vector<24x128xf32>
    %cst_230 = arith.constant 1.42141378 : f32
    %663 = vector.broadcast %cst_230 : f32 to vector<24x128xf32>
    %664 = arith.addf %662, %663 : vector<24x128xf32>
    %665 = arith.mulf %664, %657 : vector<24x128xf32>
    %cst_231 = arith.constant 0.284496725 : f32
    %666 = vector.broadcast %cst_231 : f32 to vector<24x128xf32>
    %667 = arith.subf %665, %666 : vector<24x128xf32>
    %668 = arith.mulf %667, %657 : vector<24x128xf32>
    %cst_232 = arith.constant 0.254829586 : f32
    %669 = vector.broadcast %cst_232 : f32 to vector<24x128xf32>
    %670 = arith.addf %668, %669 : vector<24x128xf32>
    %671 = arith.mulf %670, %657 : vector<24x128xf32>
    %cst_233 = arith.constant 0.000000e+00 : f32
    %cst_234 = arith.constant 6.000000e+00 : f32
    %672 = vector.broadcast %cst_233 : f32 to vector<24x128xf32>
    %673 = arith.maximumf %672, %646 : vector<24x128xf32>
    %674 = vector.broadcast %cst_234 : f32 to vector<24x128xf32>
    %675 = arith.minimumf %674, %673 : vector<24x128xf32>
    %cst_235 = arith.constant 0.000000e+00 : f32
    %676 = vector.broadcast %cst_235 : f32 to vector<24x128xf32>
    %677 = arith.cmpf ogt, %646, %676 : vector<24x128xf32>
    %678 = arith.mulf %675, %675 : vector<24x128xf32>
    %679 = math.exp %678 : vector<24x128xf32>
    %cst_236 = arith.constant 2.000000e+00 : f32
    %680 = vector.broadcast %cst_236 : f32 to vector<24x128xf32>
    %681 = arith.mulf %680, %679 : vector<24x128xf32>
    %682 = arith.subf %681, %671 : vector<24x128xf32>
    %683 = arith.select %677, %682, %671 : vector<24x128xi1>, vector<24x128xf32>
    %cst_237 = arith.constant 0.000000e+00 : f32
    %684 = vector.broadcast %cst_237 : f32 to vector<24x128xf32>
    %685 = arith.subf %684, %646 : vector<24x128xf32>
    %cst_238 = arith.constant 3.000000e+00 : f32
    %686 = vector.broadcast %cst_238 : f32 to vector<24x128xf32>
    %687 = arith.maximumf %685, %686 : vector<24x128xf32>
    %688 = tpu.reciprocal %687 {approx = true} : vector<24x128xf32> -> vector<24x128xf32>
    %689 = arith.mulf %688, %688 : vector<24x128xf32>
    %cst_239 = arith.constant 0.564189613 : f32
    %690 = vector.broadcast %cst_239 : f32 to vector<24x128xf32>
    %691 = arith.mulf %690, %688 : vector<24x128xf32>
    %cst_240 = arith.constant 5.000000e-01 : f32
    %692 = vector.broadcast %cst_240 : f32 to vector<24x128xf32>
    %693 = arith.mulf %692, %689 : vector<24x128xf32>
    %cst_241 = arith.constant 1.000000e+00 : f32
    %694 = vector.broadcast %cst_241 : f32 to vector<24x128xf32>
    %695 = arith.subf %694, %693 : vector<24x128xf32>
    %cst_242 = arith.constant 7.500000e-01 : f32
    %696 = vector.broadcast %cst_242 : f32 to vector<24x128xf32>
    %697 = arith.mulf %696, %689 : vector<24x128xf32>
    %698 = arith.mulf %697, %689 : vector<24x128xf32>
    %699 = arith.addf %695, %698 : vector<24x128xf32>
    %cst_243 = arith.constant 1.875000e+00 : f32
    %700 = vector.broadcast %cst_243 : f32 to vector<24x128xf32>
    %701 = arith.mulf %700, %689 : vector<24x128xf32>
    %702 = arith.mulf %701, %689 : vector<24x128xf32>
    %703 = arith.mulf %702, %689 : vector<24x128xf32>
    %704 = arith.subf %699, %703 : vector<24x128xf32>
    %705 = arith.mulf %691, %704 : vector<24x128xf32>
    %cst_244 = arith.constant -3.000000e+00 : f32
    %706 = vector.broadcast %cst_244 : f32 to vector<24x128xf32>
    %707 = arith.cmpf ole, %646, %706 : vector<24x128xf32>
    %708 = arith.select %707, %705, %683 : vector<24x128xi1>, vector<24x128xf32>
    %cst_245 = arith.constant 0.886226952 : f32
    %709 = vector.broadcast %cst_245 : f32 to vector<24x128xf32>
    %710 = arith.mulf %709, %708 : vector<24x128xf32>
    %711 = arith.mulf %651, %710 : vector<24x128xf32>
    %712 = arith.mulf %711, %711 : vector<24x128xf32>
    %cst_246 = arith.constant 0.107444271 : f32
    %713 = vector.broadcast %cst_246 : f32 to vector<24x128xf32>
    %714 = arith.mulf %713, %712 : vector<24x128xf32>
    %715 = arith.addf %643, %714 : vector<24x128xf32>
    %cst_247 = arith.constant -0.433793515 : f32
    %716 = vector.broadcast %cst_247 : f32 to vector<24x128xf32>
    %717 = arith.mulf %134, %716 : vector<24x128xf32>
    %718 = arith.addf %131, %717 : vector<24x128xf32>
    %cst_248 = arith.constant -5.000000e-01 : f32
    %719 = vector.broadcast %cst_248 : f32 to vector<24x128xf32>
    %720 = arith.mulf %719, %718 : vector<24x128xf32>
    %721 = arith.mulf %720, %718 : vector<24x128xf32>
    %722 = math.exp %721 : vector<24x128xf32>
    %723 = arith.mulf %138, %722 : vector<24x128xf32>
    %724 = math.absf %718 : vector<24x128xf32>
    %cst_249 = arith.constant 0.327591091 : f32
    %725 = vector.broadcast %cst_249 : f32 to vector<24x128xf32>
    %726 = arith.mulf %725, %724 : vector<24x128xf32>
    %cst_250 = arith.constant 1.000000e+00 : f32
    %727 = vector.broadcast %cst_250 : f32 to vector<24x128xf32>
    %728 = arith.addf %727, %726 : vector<24x128xf32>
    %729 = tpu.reciprocal %728 {approx = true} : vector<24x128xf32> -> vector<24x128xf32>
    %cst_251 = arith.constant 1.06140542 : f32
    %730 = vector.broadcast %cst_251 : f32 to vector<24x128xf32>
    %731 = arith.mulf %730, %729 : vector<24x128xf32>
    %cst_252 = arith.constant 1.45315206 : f32
    %732 = vector.broadcast %cst_252 : f32 to vector<24x128xf32>
    %733 = arith.subf %731, %732 : vector<24x128xf32>
    %734 = arith.mulf %733, %729 : vector<24x128xf32>
    %cst_253 = arith.constant 1.42141378 : f32
    %735 = vector.broadcast %cst_253 : f32 to vector<24x128xf32>
    %736 = arith.addf %734, %735 : vector<24x128xf32>
    %737 = arith.mulf %736, %729 : vector<24x128xf32>
    %cst_254 = arith.constant 0.284496725 : f32
    %738 = vector.broadcast %cst_254 : f32 to vector<24x128xf32>
    %739 = arith.subf %737, %738 : vector<24x128xf32>
    %740 = arith.mulf %739, %729 : vector<24x128xf32>
    %cst_255 = arith.constant 0.254829586 : f32
    %741 = vector.broadcast %cst_255 : f32 to vector<24x128xf32>
    %742 = arith.addf %740, %741 : vector<24x128xf32>
    %743 = arith.mulf %742, %729 : vector<24x128xf32>
    %cst_256 = arith.constant 0.000000e+00 : f32
    %cst_257 = arith.constant 6.000000e+00 : f32
    %744 = vector.broadcast %cst_256 : f32 to vector<24x128xf32>
    %745 = arith.maximumf %744, %718 : vector<24x128xf32>
    %746 = vector.broadcast %cst_257 : f32 to vector<24x128xf32>
    %747 = arith.minimumf %746, %745 : vector<24x128xf32>
    %cst_258 = arith.constant 0.000000e+00 : f32
    %748 = vector.broadcast %cst_258 : f32 to vector<24x128xf32>
    %749 = arith.cmpf ogt, %718, %748 : vector<24x128xf32>
    %750 = arith.mulf %747, %747 : vector<24x128xf32>
    %751 = math.exp %750 : vector<24x128xf32>
    %cst_259 = arith.constant 2.000000e+00 : f32
    %752 = vector.broadcast %cst_259 : f32 to vector<24x128xf32>
    %753 = arith.mulf %752, %751 : vector<24x128xf32>
    %754 = arith.subf %753, %743 : vector<24x128xf32>
    %755 = arith.select %749, %754, %743 : vector<24x128xi1>, vector<24x128xf32>
    %cst_260 = arith.constant 0.000000e+00 : f32
    %756 = vector.broadcast %cst_260 : f32 to vector<24x128xf32>
    %757 = arith.subf %756, %718 : vector<24x128xf32>
    %cst_261 = arith.constant 3.000000e+00 : f32
    %758 = vector.broadcast %cst_261 : f32 to vector<24x128xf32>
    %759 = arith.maximumf %757, %758 : vector<24x128xf32>
    %760 = tpu.reciprocal %759 {approx = true} : vector<24x128xf32> -> vector<24x128xf32>
    %761 = arith.mulf %760, %760 : vector<24x128xf32>
    %cst_262 = arith.constant 0.564189613 : f32
    %762 = vector.broadcast %cst_262 : f32 to vector<24x128xf32>
    %763 = arith.mulf %762, %760 : vector<24x128xf32>
    %cst_263 = arith.constant 5.000000e-01 : f32
    %764 = vector.broadcast %cst_263 : f32 to vector<24x128xf32>
    %765 = arith.mulf %764, %761 : vector<24x128xf32>
    %cst_264 = arith.constant 1.000000e+00 : f32
    %766 = vector.broadcast %cst_264 : f32 to vector<24x128xf32>
    %767 = arith.subf %766, %765 : vector<24x128xf32>
    %cst_265 = arith.constant 7.500000e-01 : f32
    %768 = vector.broadcast %cst_265 : f32 to vector<24x128xf32>
    %769 = arith.mulf %768, %761 : vector<24x128xf32>
    %770 = arith.mulf %769, %761 : vector<24x128xf32>
    %771 = arith.addf %767, %770 : vector<24x128xf32>
    %cst_266 = arith.constant 1.875000e+00 : f32
    %772 = vector.broadcast %cst_266 : f32 to vector<24x128xf32>
    %773 = arith.mulf %772, %761 : vector<24x128xf32>
    %774 = arith.mulf %773, %761 : vector<24x128xf32>
    %775 = arith.mulf %774, %761 : vector<24x128xf32>
    %776 = arith.subf %771, %775 : vector<24x128xf32>
    %777 = arith.mulf %763, %776 : vector<24x128xf32>
    %cst_267 = arith.constant -3.000000e+00 : f32
    %778 = vector.broadcast %cst_267 : f32 to vector<24x128xf32>
    %779 = arith.cmpf ole, %718, %778 : vector<24x128xf32>
    %780 = arith.select %779, %777, %755 : vector<24x128xi1>, vector<24x128xf32>
    %cst_268 = arith.constant 0.886226952 : f32
    %781 = vector.broadcast %cst_268 : f32 to vector<24x128xf32>
    %782 = arith.mulf %781, %780 : vector<24x128xf32>
    %783 = arith.mulf %723, %782 : vector<24x128xf32>
    %784 = arith.mulf %783, %783 : vector<24x128xf32>
    %cst_269 = arith.constant 0.115505666 : f32
    %785 = vector.broadcast %cst_269 : f32 to vector<24x128xf32>
    %786 = arith.mulf %785, %784 : vector<24x128xf32>
    %787 = arith.addf %715, %786 : vector<24x128xf32>
    %cst_270 = arith.constant -0.315042675 : f32
    %788 = vector.broadcast %cst_270 : f32 to vector<24x128xf32>
    %789 = arith.mulf %134, %788 : vector<24x128xf32>
    %790 = arith.addf %131, %789 : vector<24x128xf32>
    %cst_271 = arith.constant -5.000000e-01 : f32
    %791 = vector.broadcast %cst_271 : f32 to vector<24x128xf32>
    %792 = arith.mulf %791, %790 : vector<24x128xf32>
    %793 = arith.mulf %792, %790 : vector<24x128xf32>
    %794 = math.exp %793 : vector<24x128xf32>
    %795 = arith.mulf %138, %794 : vector<24x128xf32>
    %796 = math.absf %790 : vector<24x128xf32>
    %cst_272 = arith.constant 0.327591091 : f32
    %797 = vector.broadcast %cst_272 : f32 to vector<24x128xf32>
    %798 = arith.mulf %797, %796 : vector<24x128xf32>
    %cst_273 = arith.constant 1.000000e+00 : f32
    %799 = vector.broadcast %cst_273 : f32 to vector<24x128xf32>
    %800 = arith.addf %799, %798 : vector<24x128xf32>
    %801 = tpu.reciprocal %800 {approx = true} : vector<24x128xf32> -> vector<24x128xf32>
    %cst_274 = arith.constant 1.06140542 : f32
    %802 = vector.broadcast %cst_274 : f32 to vector<24x128xf32>
    %803 = arith.mulf %802, %801 : vector<24x128xf32>
    %cst_275 = arith.constant 1.45315206 : f32
    %804 = vector.broadcast %cst_275 : f32 to vector<24x128xf32>
    %805 = arith.subf %803, %804 : vector<24x128xf32>
    %806 = arith.mulf %805, %801 : vector<24x128xf32>
    %cst_276 = arith.constant 1.42141378 : f32
    %807 = vector.broadcast %cst_276 : f32 to vector<24x128xf32>
    %808 = arith.addf %806, %807 : vector<24x128xf32>
    %809 = arith.mulf %808, %801 : vector<24x128xf32>
    %cst_277 = arith.constant 0.284496725 : f32
    %810 = vector.broadcast %cst_277 : f32 to vector<24x128xf32>
    %811 = arith.subf %809, %810 : vector<24x128xf32>
    %812 = arith.mulf %811, %801 : vector<24x128xf32>
    %cst_278 = arith.constant 0.254829586 : f32
    %813 = vector.broadcast %cst_278 : f32 to vector<24x128xf32>
    %814 = arith.addf %812, %813 : vector<24x128xf32>
    %815 = arith.mulf %814, %801 : vector<24x128xf32>
    %cst_279 = arith.constant 0.000000e+00 : f32
    %cst_280 = arith.constant 6.000000e+00 : f32
    %816 = vector.broadcast %cst_279 : f32 to vector<24x128xf32>
    %817 = arith.maximumf %816, %790 : vector<24x128xf32>
    %818 = vector.broadcast %cst_280 : f32 to vector<24x128xf32>
    %819 = arith.minimumf %818, %817 : vector<24x128xf32>
    %cst_281 = arith.constant 0.000000e+00 : f32
    %820 = vector.broadcast %cst_281 : f32 to vector<24x128xf32>
    %821 = arith.cmpf ogt, %790, %820 : vector<24x128xf32>
    %822 = arith.mulf %819, %819 : vector<24x128xf32>
    %823 = math.exp %822 : vector<24x128xf32>
    %cst_282 = arith.constant 2.000000e+00 : f32
    %824 = vector.broadcast %cst_282 : f32 to vector<24x128xf32>
    %825 = arith.mulf %824, %823 : vector<24x128xf32>
    %826 = arith.subf %825, %815 : vector<24x128xf32>
    %827 = arith.select %821, %826, %815 : vector<24x128xi1>, vector<24x128xf32>
    %cst_283 = arith.constant 0.000000e+00 : f32
    %828 = vector.broadcast %cst_283 : f32 to vector<24x128xf32>
    %829 = arith.subf %828, %790 : vector<24x128xf32>
    %cst_284 = arith.constant 3.000000e+00 : f32
    %830 = vector.broadcast %cst_284 : f32 to vector<24x128xf32>
    %831 = arith.maximumf %829, %830 : vector<24x128xf32>
    %832 = tpu.reciprocal %831 {approx = true} : vector<24x128xf32> -> vector<24x128xf32>
    %833 = arith.mulf %832, %832 : vector<24x128xf32>
    %cst_285 = arith.constant 0.564189613 : f32
    %834 = vector.broadcast %cst_285 : f32 to vector<24x128xf32>
    %835 = arith.mulf %834, %832 : vector<24x128xf32>
    %cst_286 = arith.constant 5.000000e-01 : f32
    %836 = vector.broadcast %cst_286 : f32 to vector<24x128xf32>
    %837 = arith.mulf %836, %833 : vector<24x128xf32>
    %cst_287 = arith.constant 1.000000e+00 : f32
    %838 = vector.broadcast %cst_287 : f32 to vector<24x128xf32>
    %839 = arith.subf %838, %837 : vector<24x128xf32>
    %cst_288 = arith.constant 7.500000e-01 : f32
    %840 = vector.broadcast %cst_288 : f32 to vector<24x128xf32>
    %841 = arith.mulf %840, %833 : vector<24x128xf32>
    %842 = arith.mulf %841, %833 : vector<24x128xf32>
    %843 = arith.addf %839, %842 : vector<24x128xf32>
    %cst_289 = arith.constant 1.875000e+00 : f32
    %844 = vector.broadcast %cst_289 : f32 to vector<24x128xf32>
    %845 = arith.mulf %844, %833 : vector<24x128xf32>
    %846 = arith.mulf %845, %833 : vector<24x128xf32>
    %847 = arith.mulf %846, %833 : vector<24x128xf32>
    %848 = arith.subf %843, %847 : vector<24x128xf32>
    %849 = arith.mulf %835, %848 : vector<24x128xf32>
    %cst_290 = arith.constant -3.000000e+00 : f32
    %850 = vector.broadcast %cst_290 : f32 to vector<24x128xf32>
    %851 = arith.cmpf ole, %790, %850 : vector<24x128xf32>
    %852 = arith.select %851, %849, %827 : vector<24x128xi1>, vector<24x128xf32>
    %cst_291 = arith.constant 0.886226952 : f32
    %853 = vector.broadcast %cst_291 : f32 to vector<24x128xf32>
    %854 = arith.mulf %853, %852 : vector<24x128xf32>
    %855 = arith.mulf %795, %854 : vector<24x128xf32>
    %856 = arith.mulf %855, %855 : vector<24x128xf32>
    %cst_292 = arith.constant 0.12167047 : f32
    %857 = vector.broadcast %cst_292 : f32 to vector<24x128xf32>
    %858 = arith.mulf %857, %856 : vector<24x128xf32>
    %859 = arith.addf %787, %858 : vector<24x128xf32>
    %cst_293 = arith.constant -0.191118866 : f32
    %860 = vector.broadcast %cst_293 : f32 to vector<24x128xf32>
    %861 = arith.mulf %134, %860 : vector<24x128xf32>
    %862 = arith.addf %131, %861 : vector<24x128xf32>
    %cst_294 = arith.constant -5.000000e-01 : f32
    %863 = vector.broadcast %cst_294 : f32 to vector<24x128xf32>
    %864 = arith.mulf %863, %862 : vector<24x128xf32>
    %865 = arith.mulf %864, %862 : vector<24x128xf32>
    %866 = math.exp %865 : vector<24x128xf32>
    %867 = arith.mulf %138, %866 : vector<24x128xf32>
    %868 = math.absf %862 : vector<24x128xf32>
    %cst_295 = arith.constant 0.327591091 : f32
    %869 = vector.broadcast %cst_295 : f32 to vector<24x128xf32>
    %870 = arith.mulf %869, %868 : vector<24x128xf32>
    %cst_296 = arith.constant 1.000000e+00 : f32
    %871 = vector.broadcast %cst_296 : f32 to vector<24x128xf32>
    %872 = arith.addf %871, %870 : vector<24x128xf32>
    %873 = tpu.reciprocal %872 {approx = true} : vector<24x128xf32> -> vector<24x128xf32>
    %cst_297 = arith.constant 1.06140542 : f32
    %874 = vector.broadcast %cst_297 : f32 to vector<24x128xf32>
    %875 = arith.mulf %874, %873 : vector<24x128xf32>
    %cst_298 = arith.constant 1.45315206 : f32
    %876 = vector.broadcast %cst_298 : f32 to vector<24x128xf32>
    %877 = arith.subf %875, %876 : vector<24x128xf32>
    %878 = arith.mulf %877, %873 : vector<24x128xf32>
    %cst_299 = arith.constant 1.42141378 : f32
    %879 = vector.broadcast %cst_299 : f32 to vector<24x128xf32>
    %880 = arith.addf %878, %879 : vector<24x128xf32>
    %881 = arith.mulf %880, %873 : vector<24x128xf32>
    %cst_300 = arith.constant 0.284496725 : f32
    %882 = vector.broadcast %cst_300 : f32 to vector<24x128xf32>
    %883 = arith.subf %881, %882 : vector<24x128xf32>
    %884 = arith.mulf %883, %873 : vector<24x128xf32>
    %cst_301 = arith.constant 0.254829586 : f32
    %885 = vector.broadcast %cst_301 : f32 to vector<24x128xf32>
    %886 = arith.addf %884, %885 : vector<24x128xf32>
    %887 = arith.mulf %886, %873 : vector<24x128xf32>
    %cst_302 = arith.constant 0.000000e+00 : f32
    %cst_303 = arith.constant 6.000000e+00 : f32
    %888 = vector.broadcast %cst_302 : f32 to vector<24x128xf32>
    %889 = arith.maximumf %888, %862 : vector<24x128xf32>
    %890 = vector.broadcast %cst_303 : f32 to vector<24x128xf32>
    %891 = arith.minimumf %890, %889 : vector<24x128xf32>
    %cst_304 = arith.constant 0.000000e+00 : f32
    %892 = vector.broadcast %cst_304 : f32 to vector<24x128xf32>
    %893 = arith.cmpf ogt, %862, %892 : vector<24x128xf32>
    %894 = arith.mulf %891, %891 : vector<24x128xf32>
    %895 = math.exp %894 : vector<24x128xf32>
    %cst_305 = arith.constant 2.000000e+00 : f32
    %896 = vector.broadcast %cst_305 : f32 to vector<24x128xf32>
    %897 = arith.mulf %896, %895 : vector<24x128xf32>
    %898 = arith.subf %897, %887 : vector<24x128xf32>
    %899 = arith.select %893, %898, %887 : vector<24x128xi1>, vector<24x128xf32>
    %cst_306 = arith.constant 0.000000e+00 : f32
    %900 = vector.broadcast %cst_306 : f32 to vector<24x128xf32>
    %901 = arith.subf %900, %862 : vector<24x128xf32>
    %cst_307 = arith.constant 3.000000e+00 : f32
    %902 = vector.broadcast %cst_307 : f32 to vector<24x128xf32>
    %903 = arith.maximumf %901, %902 : vector<24x128xf32>
    %904 = tpu.reciprocal %903 {approx = true} : vector<24x128xf32> -> vector<24x128xf32>
    %905 = arith.mulf %904, %904 : vector<24x128xf32>
    %cst_308 = arith.constant 0.564189613 : f32
    %906 = vector.broadcast %cst_308 : f32 to vector<24x128xf32>
    %907 = arith.mulf %906, %904 : vector<24x128xf32>
    %cst_309 = arith.constant 5.000000e-01 : f32
    %908 = vector.broadcast %cst_309 : f32 to vector<24x128xf32>
    %909 = arith.mulf %908, %905 : vector<24x128xf32>
    %cst_310 = arith.constant 1.000000e+00 : f32
    %910 = vector.broadcast %cst_310 : f32 to vector<24x128xf32>
    %911 = arith.subf %910, %909 : vector<24x128xf32>
    %cst_311 = arith.constant 7.500000e-01 : f32
    %912 = vector.broadcast %cst_311 : f32 to vector<24x128xf32>
    %913 = arith.mulf %912, %905 : vector<24x128xf32>
    %914 = arith.mulf %913, %905 : vector<24x128xf32>
    %915 = arith.addf %911, %914 : vector<24x128xf32>
    %cst_312 = arith.constant 1.875000e+00 : f32
    %916 = vector.broadcast %cst_312 : f32 to vector<24x128xf32>
    %917 = arith.mulf %916, %905 : vector<24x128xf32>
    %918 = arith.mulf %917, %905 : vector<24x128xf32>
    %919 = arith.mulf %918, %905 : vector<24x128xf32>
    %920 = arith.subf %915, %919 : vector<24x128xf32>
    %921 = arith.mulf %907, %920 : vector<24x128xf32>
    %cst_313 = arith.constant -3.000000e+00 : f32
    %922 = vector.broadcast %cst_313 : f32 to vector<24x128xf32>
    %923 = arith.cmpf ole, %862, %922 : vector<24x128xf32>
    %924 = arith.select %923, %921, %899 : vector<24x128xi1>, vector<24x128xf32>
    %cst_314 = arith.constant 0.886226952 : f32
    %925 = vector.broadcast %cst_314 : f32 to vector<24x128xf32>
    %926 = arith.mulf %925, %924 : vector<24x128xf32>
    %927 = arith.mulf %867, %926 : vector<24x128xf32>
    %928 = arith.mulf %927, %927 : vector<24x128xf32>
    %cst_315 = arith.constant 0.12583746 : f32
    %929 = vector.broadcast %cst_315 : f32 to vector<24x128xf32>
    %930 = arith.mulf %929, %928 : vector<24x128xf32>
    %931 = arith.addf %859, %930 : vector<24x128xf32>
    %cst_316 = arith.constant -0.0640568957 : f32
    %932 = vector.broadcast %cst_316 : f32 to vector<24x128xf32>
    %933 = arith.mulf %134, %932 : vector<24x128xf32>
    %934 = arith.addf %131, %933 : vector<24x128xf32>
    %cst_317 = arith.constant -5.000000e-01 : f32
    %935 = vector.broadcast %cst_317 : f32 to vector<24x128xf32>
    %936 = arith.mulf %935, %934 : vector<24x128xf32>
    %937 = arith.mulf %936, %934 : vector<24x128xf32>
    %938 = math.exp %937 : vector<24x128xf32>
    %939 = arith.mulf %138, %938 : vector<24x128xf32>
    %940 = math.absf %934 : vector<24x128xf32>
    %cst_318 = arith.constant 0.327591091 : f32
    %941 = vector.broadcast %cst_318 : f32 to vector<24x128xf32>
    %942 = arith.mulf %941, %940 : vector<24x128xf32>
    %cst_319 = arith.constant 1.000000e+00 : f32
    %943 = vector.broadcast %cst_319 : f32 to vector<24x128xf32>
    %944 = arith.addf %943, %942 : vector<24x128xf32>
    %945 = tpu.reciprocal %944 {approx = true} : vector<24x128xf32> -> vector<24x128xf32>
    %cst_320 = arith.constant 1.06140542 : f32
    %946 = vector.broadcast %cst_320 : f32 to vector<24x128xf32>
    %947 = arith.mulf %946, %945 : vector<24x128xf32>
    %cst_321 = arith.constant 1.45315206 : f32
    %948 = vector.broadcast %cst_321 : f32 to vector<24x128xf32>
    %949 = arith.subf %947, %948 : vector<24x128xf32>
    %950 = arith.mulf %949, %945 : vector<24x128xf32>
    %cst_322 = arith.constant 1.42141378 : f32
    %951 = vector.broadcast %cst_322 : f32 to vector<24x128xf32>
    %952 = arith.addf %950, %951 : vector<24x128xf32>
    %953 = arith.mulf %952, %945 : vector<24x128xf32>
    %cst_323 = arith.constant 0.284496725 : f32
    %954 = vector.broadcast %cst_323 : f32 to vector<24x128xf32>
    %955 = arith.subf %953, %954 : vector<24x128xf32>
    %956 = arith.mulf %955, %945 : vector<24x128xf32>
    %cst_324 = arith.constant 0.254829586 : f32
    %957 = vector.broadcast %cst_324 : f32 to vector<24x128xf32>
    %958 = arith.addf %956, %957 : vector<24x128xf32>
    %959 = arith.mulf %958, %945 : vector<24x128xf32>
    %cst_325 = arith.constant 0.000000e+00 : f32
    %cst_326 = arith.constant 6.000000e+00 : f32
    %960 = vector.broadcast %cst_325 : f32 to vector<24x128xf32>
    %961 = arith.maximumf %960, %934 : vector<24x128xf32>
    %962 = vector.broadcast %cst_326 : f32 to vector<24x128xf32>
    %963 = arith.minimumf %962, %961 : vector<24x128xf32>
    %cst_327 = arith.constant 0.000000e+00 : f32
    %964 = vector.broadcast %cst_327 : f32 to vector<24x128xf32>
    %965 = arith.cmpf ogt, %934, %964 : vector<24x128xf32>
    %966 = arith.mulf %963, %963 : vector<24x128xf32>
    %967 = math.exp %966 : vector<24x128xf32>
    %cst_328 = arith.constant 2.000000e+00 : f32
    %968 = vector.broadcast %cst_328 : f32 to vector<24x128xf32>
    %969 = arith.mulf %968, %967 : vector<24x128xf32>
    %970 = arith.subf %969, %959 : vector<24x128xf32>
    %971 = arith.select %965, %970, %959 : vector<24x128xi1>, vector<24x128xf32>
    %cst_329 = arith.constant 0.000000e+00 : f32
    %972 = vector.broadcast %cst_329 : f32 to vector<24x128xf32>
    %973 = arith.subf %972, %934 : vector<24x128xf32>
    %cst_330 = arith.constant 3.000000e+00 : f32
    %974 = vector.broadcast %cst_330 : f32 to vector<24x128xf32>
    %975 = arith.maximumf %973, %974 : vector<24x128xf32>
    %976 = tpu.reciprocal %975 {approx = true} : vector<24x128xf32> -> vector<24x128xf32>
    %977 = arith.mulf %976, %976 : vector<24x128xf32>
    %cst_331 = arith.constant 0.564189613 : f32
    %978 = vector.broadcast %cst_331 : f32 to vector<24x128xf32>
    %979 = arith.mulf %978, %976 : vector<24x128xf32>
    %cst_332 = arith.constant 5.000000e-01 : f32
    %980 = vector.broadcast %cst_332 : f32 to vector<24x128xf32>
    %981 = arith.mulf %980, %977 : vector<24x128xf32>
    %cst_333 = arith.constant 1.000000e+00 : f32
    %982 = vector.broadcast %cst_333 : f32 to vector<24x128xf32>
    %983 = arith.subf %982, %981 : vector<24x128xf32>
    %cst_334 = arith.constant 7.500000e-01 : f32
    %984 = vector.broadcast %cst_334 : f32 to vector<24x128xf32>
    %985 = arith.mulf %984, %977 : vector<24x128xf32>
    %986 = arith.mulf %985, %977 : vector<24x128xf32>
    %987 = arith.addf %983, %986 : vector<24x128xf32>
    %cst_335 = arith.constant 1.875000e+00 : f32
    %988 = vector.broadcast %cst_335 : f32 to vector<24x128xf32>
    %989 = arith.mulf %988, %977 : vector<24x128xf32>
    %990 = arith.mulf %989, %977 : vector<24x128xf32>
    %991 = arith.mulf %990, %977 : vector<24x128xf32>
    %992 = arith.subf %987, %991 : vector<24x128xf32>
    %993 = arith.mulf %979, %992 : vector<24x128xf32>
    %cst_336 = arith.constant -3.000000e+00 : f32
    %994 = vector.broadcast %cst_336 : f32 to vector<24x128xf32>
    %995 = arith.cmpf ole, %934, %994 : vector<24x128xf32>
    %996 = arith.select %995, %993, %971 : vector<24x128xi1>, vector<24x128xf32>
    %cst_337 = arith.constant 0.886226952 : f32
    %997 = vector.broadcast %cst_337 : f32 to vector<24x128xf32>
    %998 = arith.mulf %997, %996 : vector<24x128xf32>
    %999 = arith.mulf %939, %998 : vector<24x128xf32>
    %1000 = arith.mulf %999, %999 : vector<24x128xf32>
    %cst_338 = arith.constant 0.127938196 : f32
    %1001 = vector.broadcast %cst_338 : f32 to vector<24x128xf32>
    %1002 = arith.mulf %1001, %1000 : vector<24x128xf32>
    %1003 = arith.addf %931, %1002 : vector<24x128xf32>
    %cst_339 = arith.constant 0.0640568957 : f32
    %1004 = vector.broadcast %cst_339 : f32 to vector<24x128xf32>
    %1005 = arith.mulf %134, %1004 : vector<24x128xf32>
    %1006 = arith.addf %131, %1005 : vector<24x128xf32>
    %cst_340 = arith.constant -5.000000e-01 : f32
    %1007 = vector.broadcast %cst_340 : f32 to vector<24x128xf32>
    %1008 = arith.mulf %1007, %1006 : vector<24x128xf32>
    %1009 = arith.mulf %1008, %1006 : vector<24x128xf32>
    %1010 = math.exp %1009 : vector<24x128xf32>
    %1011 = arith.mulf %138, %1010 : vector<24x128xf32>
    %1012 = math.absf %1006 : vector<24x128xf32>
    %cst_341 = arith.constant 0.327591091 : f32
    %1013 = vector.broadcast %cst_341 : f32 to vector<24x128xf32>
    %1014 = arith.mulf %1013, %1012 : vector<24x128xf32>
    %cst_342 = arith.constant 1.000000e+00 : f32
    %1015 = vector.broadcast %cst_342 : f32 to vector<24x128xf32>
    %1016 = arith.addf %1015, %1014 : vector<24x128xf32>
    %1017 = tpu.reciprocal %1016 {approx = true} : vector<24x128xf32> -> vector<24x128xf32>
    %cst_343 = arith.constant 1.06140542 : f32
    %1018 = vector.broadcast %cst_343 : f32 to vector<24x128xf32>
    %1019 = arith.mulf %1018, %1017 : vector<24x128xf32>
    %cst_344 = arith.constant 1.45315206 : f32
    %1020 = vector.broadcast %cst_344 : f32 to vector<24x128xf32>
    %1021 = arith.subf %1019, %1020 : vector<24x128xf32>
    %1022 = arith.mulf %1021, %1017 : vector<24x128xf32>
    %cst_345 = arith.constant 1.42141378 : f32
    %1023 = vector.broadcast %cst_345 : f32 to vector<24x128xf32>
    %1024 = arith.addf %1022, %1023 : vector<24x128xf32>
    %1025 = arith.mulf %1024, %1017 : vector<24x128xf32>
    %cst_346 = arith.constant 0.284496725 : f32
    %1026 = vector.broadcast %cst_346 : f32 to vector<24x128xf32>
    %1027 = arith.subf %1025, %1026 : vector<24x128xf32>
    %1028 = arith.mulf %1027, %1017 : vector<24x128xf32>
    %cst_347 = arith.constant 0.254829586 : f32
    %1029 = vector.broadcast %cst_347 : f32 to vector<24x128xf32>
    %1030 = arith.addf %1028, %1029 : vector<24x128xf32>
    %1031 = arith.mulf %1030, %1017 : vector<24x128xf32>
    %cst_348 = arith.constant 0.000000e+00 : f32
    %cst_349 = arith.constant 6.000000e+00 : f32
    %1032 = vector.broadcast %cst_348 : f32 to vector<24x128xf32>
    %1033 = arith.maximumf %1032, %1006 : vector<24x128xf32>
    %1034 = vector.broadcast %cst_349 : f32 to vector<24x128xf32>
    %1035 = arith.minimumf %1034, %1033 : vector<24x128xf32>
    %cst_350 = arith.constant 0.000000e+00 : f32
    %1036 = vector.broadcast %cst_350 : f32 to vector<24x128xf32>
    %1037 = arith.cmpf ogt, %1006, %1036 : vector<24x128xf32>
    %1038 = arith.mulf %1035, %1035 : vector<24x128xf32>
    %1039 = math.exp %1038 : vector<24x128xf32>
    %cst_351 = arith.constant 2.000000e+00 : f32
    %1040 = vector.broadcast %cst_351 : f32 to vector<24x128xf32>
    %1041 = arith.mulf %1040, %1039 : vector<24x128xf32>
    %1042 = arith.subf %1041, %1031 : vector<24x128xf32>
    %1043 = arith.select %1037, %1042, %1031 : vector<24x128xi1>, vector<24x128xf32>
    %cst_352 = arith.constant 0.000000e+00 : f32
    %1044 = vector.broadcast %cst_352 : f32 to vector<24x128xf32>
    %1045 = arith.subf %1044, %1006 : vector<24x128xf32>
    %cst_353 = arith.constant 3.000000e+00 : f32
    %1046 = vector.broadcast %cst_353 : f32 to vector<24x128xf32>
    %1047 = arith.maximumf %1045, %1046 : vector<24x128xf32>
    %1048 = tpu.reciprocal %1047 {approx = true} : vector<24x128xf32> -> vector<24x128xf32>
    %1049 = arith.mulf %1048, %1048 : vector<24x128xf32>
    %cst_354 = arith.constant 0.564189613 : f32
    %1050 = vector.broadcast %cst_354 : f32 to vector<24x128xf32>
    %1051 = arith.mulf %1050, %1048 : vector<24x128xf32>
    %cst_355 = arith.constant 5.000000e-01 : f32
    %1052 = vector.broadcast %cst_355 : f32 to vector<24x128xf32>
    %1053 = arith.mulf %1052, %1049 : vector<24x128xf32>
    %cst_356 = arith.constant 1.000000e+00 : f32
    %1054 = vector.broadcast %cst_356 : f32 to vector<24x128xf32>
    %1055 = arith.subf %1054, %1053 : vector<24x128xf32>
    %cst_357 = arith.constant 7.500000e-01 : f32
    %1056 = vector.broadcast %cst_357 : f32 to vector<24x128xf32>
    %1057 = arith.mulf %1056, %1049 : vector<24x128xf32>
    %1058 = arith.mulf %1057, %1049 : vector<24x128xf32>
    %1059 = arith.addf %1055, %1058 : vector<24x128xf32>
    %cst_358 = arith.constant 1.875000e+00 : f32
    %1060 = vector.broadcast %cst_358 : f32 to vector<24x128xf32>
    %1061 = arith.mulf %1060, %1049 : vector<24x128xf32>
    %1062 = arith.mulf %1061, %1049 : vector<24x128xf32>
    %1063 = arith.mulf %1062, %1049 : vector<24x128xf32>
    %1064 = arith.subf %1059, %1063 : vector<24x128xf32>
    %1065 = arith.mulf %1051, %1064 : vector<24x128xf32>
    %cst_359 = arith.constant -3.000000e+00 : f32
    %1066 = vector.broadcast %cst_359 : f32 to vector<24x128xf32>
    %1067 = arith.cmpf ole, %1006, %1066 : vector<24x128xf32>
    %1068 = arith.select %1067, %1065, %1043 : vector<24x128xi1>, vector<24x128xf32>
    %cst_360 = arith.constant 0.886226952 : f32
    %1069 = vector.broadcast %cst_360 : f32 to vector<24x128xf32>
    %1070 = arith.mulf %1069, %1068 : vector<24x128xf32>
    %1071 = arith.mulf %1011, %1070 : vector<24x128xf32>
    %1072 = arith.mulf %1071, %1071 : vector<24x128xf32>
    %cst_361 = arith.constant 0.127938196 : f32
    %1073 = vector.broadcast %cst_361 : f32 to vector<24x128xf32>
    %1074 = arith.mulf %1073, %1072 : vector<24x128xf32>
    %1075 = arith.addf %1003, %1074 : vector<24x128xf32>
    %cst_362 = arith.constant 0.191118866 : f32
    %1076 = vector.broadcast %cst_362 : f32 to vector<24x128xf32>
    %1077 = arith.mulf %134, %1076 : vector<24x128xf32>
    %1078 = arith.addf %131, %1077 : vector<24x128xf32>
    %cst_363 = arith.constant -5.000000e-01 : f32
    %1079 = vector.broadcast %cst_363 : f32 to vector<24x128xf32>
    %1080 = arith.mulf %1079, %1078 : vector<24x128xf32>
    %1081 = arith.mulf %1080, %1078 : vector<24x128xf32>
    %1082 = math.exp %1081 : vector<24x128xf32>
    %1083 = arith.mulf %138, %1082 : vector<24x128xf32>
    %1084 = math.absf %1078 : vector<24x128xf32>
    %cst_364 = arith.constant 0.327591091 : f32
    %1085 = vector.broadcast %cst_364 : f32 to vector<24x128xf32>
    %1086 = arith.mulf %1085, %1084 : vector<24x128xf32>
    %cst_365 = arith.constant 1.000000e+00 : f32
    %1087 = vector.broadcast %cst_365 : f32 to vector<24x128xf32>
    %1088 = arith.addf %1087, %1086 : vector<24x128xf32>
    %1089 = tpu.reciprocal %1088 {approx = true} : vector<24x128xf32> -> vector<24x128xf32>
    %cst_366 = arith.constant 1.06140542 : f32
    %1090 = vector.broadcast %cst_366 : f32 to vector<24x128xf32>
    %1091 = arith.mulf %1090, %1089 : vector<24x128xf32>
    %cst_367 = arith.constant 1.45315206 : f32
    %1092 = vector.broadcast %cst_367 : f32 to vector<24x128xf32>
    %1093 = arith.subf %1091, %1092 : vector<24x128xf32>
    %1094 = arith.mulf %1093, %1089 : vector<24x128xf32>
    %cst_368 = arith.constant 1.42141378 : f32
    %1095 = vector.broadcast %cst_368 : f32 to vector<24x128xf32>
    %1096 = arith.addf %1094, %1095 : vector<24x128xf32>
    %1097 = arith.mulf %1096, %1089 : vector<24x128xf32>
    %cst_369 = arith.constant 0.284496725 : f32
    %1098 = vector.broadcast %cst_369 : f32 to vector<24x128xf32>
    %1099 = arith.subf %1097, %1098 : vector<24x128xf32>
    %1100 = arith.mulf %1099, %1089 : vector<24x128xf32>
    %cst_370 = arith.constant 0.254829586 : f32
    %1101 = vector.broadcast %cst_370 : f32 to vector<24x128xf32>
    %1102 = arith.addf %1100, %1101 : vector<24x128xf32>
    %1103 = arith.mulf %1102, %1089 : vector<24x128xf32>
    %cst_371 = arith.constant 0.000000e+00 : f32
    %cst_372 = arith.constant 6.000000e+00 : f32
    %1104 = vector.broadcast %cst_371 : f32 to vector<24x128xf32>
    %1105 = arith.maximumf %1104, %1078 : vector<24x128xf32>
    %1106 = vector.broadcast %cst_372 : f32 to vector<24x128xf32>
    %1107 = arith.minimumf %1106, %1105 : vector<24x128xf32>
    %cst_373 = arith.constant 0.000000e+00 : f32
    %1108 = vector.broadcast %cst_373 : f32 to vector<24x128xf32>
    %1109 = arith.cmpf ogt, %1078, %1108 : vector<24x128xf32>
    %1110 = arith.mulf %1107, %1107 : vector<24x128xf32>
    %1111 = math.exp %1110 : vector<24x128xf32>
    %cst_374 = arith.constant 2.000000e+00 : f32
    %1112 = vector.broadcast %cst_374 : f32 to vector<24x128xf32>
    %1113 = arith.mulf %1112, %1111 : vector<24x128xf32>
    %1114 = arith.subf %1113, %1103 : vector<24x128xf32>
    %1115 = arith.select %1109, %1114, %1103 : vector<24x128xi1>, vector<24x128xf32>
    %cst_375 = arith.constant 0.000000e+00 : f32
    %1116 = vector.broadcast %cst_375 : f32 to vector<24x128xf32>
    %1117 = arith.subf %1116, %1078 : vector<24x128xf32>
    %cst_376 = arith.constant 3.000000e+00 : f32
    %1118 = vector.broadcast %cst_376 : f32 to vector<24x128xf32>
    %1119 = arith.maximumf %1117, %1118 : vector<24x128xf32>
    %1120 = tpu.reciprocal %1119 {approx = true} : vector<24x128xf32> -> vector<24x128xf32>
    %1121 = arith.mulf %1120, %1120 : vector<24x128xf32>
    %cst_377 = arith.constant 0.564189613 : f32
    %1122 = vector.broadcast %cst_377 : f32 to vector<24x128xf32>
    %1123 = arith.mulf %1122, %1120 : vector<24x128xf32>
    %cst_378 = arith.constant 5.000000e-01 : f32
    %1124 = vector.broadcast %cst_378 : f32 to vector<24x128xf32>
    %1125 = arith.mulf %1124, %1121 : vector<24x128xf32>
    %cst_379 = arith.constant 1.000000e+00 : f32
    %1126 = vector.broadcast %cst_379 : f32 to vector<24x128xf32>
    %1127 = arith.subf %1126, %1125 : vector<24x128xf32>
    %cst_380 = arith.constant 7.500000e-01 : f32
    %1128 = vector.broadcast %cst_380 : f32 to vector<24x128xf32>
    %1129 = arith.mulf %1128, %1121 : vector<24x128xf32>
    %1130 = arith.mulf %1129, %1121 : vector<24x128xf32>
    %1131 = arith.addf %1127, %1130 : vector<24x128xf32>
    %cst_381 = arith.constant 1.875000e+00 : f32
    %1132 = vector.broadcast %cst_381 : f32 to vector<24x128xf32>
    %1133 = arith.mulf %1132, %1121 : vector<24x128xf32>
    %1134 = arith.mulf %1133, %1121 : vector<24x128xf32>
    %1135 = arith.mulf %1134, %1121 : vector<24x128xf32>
    %1136 = arith.subf %1131, %1135 : vector<24x128xf32>
    %1137 = arith.mulf %1123, %1136 : vector<24x128xf32>
    %cst_382 = arith.constant -3.000000e+00 : f32
    %1138 = vector.broadcast %cst_382 : f32 to vector<24x128xf32>
    %1139 = arith.cmpf ole, %1078, %1138 : vector<24x128xf32>
    %1140 = arith.select %1139, %1137, %1115 : vector<24x128xi1>, vector<24x128xf32>
    %cst_383 = arith.constant 0.886226952 : f32
    %1141 = vector.broadcast %cst_383 : f32 to vector<24x128xf32>
    %1142 = arith.mulf %1141, %1140 : vector<24x128xf32>
    %1143 = arith.mulf %1083, %1142 : vector<24x128xf32>
    %1144 = arith.mulf %1143, %1143 : vector<24x128xf32>
    %cst_384 = arith.constant 0.12583746 : f32
    %1145 = vector.broadcast %cst_384 : f32 to vector<24x128xf32>
    %1146 = arith.mulf %1145, %1144 : vector<24x128xf32>
    %1147 = arith.addf %1075, %1146 : vector<24x128xf32>
    %cst_385 = arith.constant 0.315042675 : f32
    %1148 = vector.broadcast %cst_385 : f32 to vector<24x128xf32>
    %1149 = arith.mulf %134, %1148 : vector<24x128xf32>
    %1150 = arith.addf %131, %1149 : vector<24x128xf32>
    %cst_386 = arith.constant -5.000000e-01 : f32
    %1151 = vector.broadcast %cst_386 : f32 to vector<24x128xf32>
    %1152 = arith.mulf %1151, %1150 : vector<24x128xf32>
    %1153 = arith.mulf %1152, %1150 : vector<24x128xf32>
    %1154 = math.exp %1153 : vector<24x128xf32>
    %1155 = arith.mulf %138, %1154 : vector<24x128xf32>
    %1156 = math.absf %1150 : vector<24x128xf32>
    %cst_387 = arith.constant 0.327591091 : f32
    %1157 = vector.broadcast %cst_387 : f32 to vector<24x128xf32>
    %1158 = arith.mulf %1157, %1156 : vector<24x128xf32>
    %cst_388 = arith.constant 1.000000e+00 : f32
    %1159 = vector.broadcast %cst_388 : f32 to vector<24x128xf32>
    %1160 = arith.addf %1159, %1158 : vector<24x128xf32>
    %1161 = tpu.reciprocal %1160 {approx = true} : vector<24x128xf32> -> vector<24x128xf32>
    %cst_389 = arith.constant 1.06140542 : f32
    %1162 = vector.broadcast %cst_389 : f32 to vector<24x128xf32>
    %1163 = arith.mulf %1162, %1161 : vector<24x128xf32>
    %cst_390 = arith.constant 1.45315206 : f32
    %1164 = vector.broadcast %cst_390 : f32 to vector<24x128xf32>
    %1165 = arith.subf %1163, %1164 : vector<24x128xf32>
    %1166 = arith.mulf %1165, %1161 : vector<24x128xf32>
    %cst_391 = arith.constant 1.42141378 : f32
    %1167 = vector.broadcast %cst_391 : f32 to vector<24x128xf32>
    %1168 = arith.addf %1166, %1167 : vector<24x128xf32>
    %1169 = arith.mulf %1168, %1161 : vector<24x128xf32>
    %cst_392 = arith.constant 0.284496725 : f32
    %1170 = vector.broadcast %cst_392 : f32 to vector<24x128xf32>
    %1171 = arith.subf %1169, %1170 : vector<24x128xf32>
    %1172 = arith.mulf %1171, %1161 : vector<24x128xf32>
    %cst_393 = arith.constant 0.254829586 : f32
    %1173 = vector.broadcast %cst_393 : f32 to vector<24x128xf32>
    %1174 = arith.addf %1172, %1173 : vector<24x128xf32>
    %1175 = arith.mulf %1174, %1161 : vector<24x128xf32>
    %cst_394 = arith.constant 0.000000e+00 : f32
    %cst_395 = arith.constant 6.000000e+00 : f32
    %1176 = vector.broadcast %cst_394 : f32 to vector<24x128xf32>
    %1177 = arith.maximumf %1176, %1150 : vector<24x128xf32>
    %1178 = vector.broadcast %cst_395 : f32 to vector<24x128xf32>
    %1179 = arith.minimumf %1178, %1177 : vector<24x128xf32>
    %cst_396 = arith.constant 0.000000e+00 : f32
    %1180 = vector.broadcast %cst_396 : f32 to vector<24x128xf32>
    %1181 = arith.cmpf ogt, %1150, %1180 : vector<24x128xf32>
    %1182 = arith.mulf %1179, %1179 : vector<24x128xf32>
    %1183 = math.exp %1182 : vector<24x128xf32>
    %cst_397 = arith.constant 2.000000e+00 : f32
    %1184 = vector.broadcast %cst_397 : f32 to vector<24x128xf32>
    %1185 = arith.mulf %1184, %1183 : vector<24x128xf32>
    %1186 = arith.subf %1185, %1175 : vector<24x128xf32>
    %1187 = arith.select %1181, %1186, %1175 : vector<24x128xi1>, vector<24x128xf32>
    %cst_398 = arith.constant 0.000000e+00 : f32
    %1188 = vector.broadcast %cst_398 : f32 to vector<24x128xf32>
    %1189 = arith.subf %1188, %1150 : vector<24x128xf32>
    %cst_399 = arith.constant 3.000000e+00 : f32
    %1190 = vector.broadcast %cst_399 : f32 to vector<24x128xf32>
    %1191 = arith.maximumf %1189, %1190 : vector<24x128xf32>
    %1192 = tpu.reciprocal %1191 {approx = true} : vector<24x128xf32> -> vector<24x128xf32>
    %1193 = arith.mulf %1192, %1192 : vector<24x128xf32>
    %cst_400 = arith.constant 0.564189613 : f32
    %1194 = vector.broadcast %cst_400 : f32 to vector<24x128xf32>
    %1195 = arith.mulf %1194, %1192 : vector<24x128xf32>
    %cst_401 = arith.constant 5.000000e-01 : f32
    %1196 = vector.broadcast %cst_401 : f32 to vector<24x128xf32>
    %1197 = arith.mulf %1196, %1193 : vector<24x128xf32>
    %cst_402 = arith.constant 1.000000e+00 : f32
    %1198 = vector.broadcast %cst_402 : f32 to vector<24x128xf32>
    %1199 = arith.subf %1198, %1197 : vector<24x128xf32>
    %cst_403 = arith.constant 7.500000e-01 : f32
    %1200 = vector.broadcast %cst_403 : f32 to vector<24x128xf32>
    %1201 = arith.mulf %1200, %1193 : vector<24x128xf32>
    %1202 = arith.mulf %1201, %1193 : vector<24x128xf32>
    %1203 = arith.addf %1199, %1202 : vector<24x128xf32>
    %cst_404 = arith.constant 1.875000e+00 : f32
    %1204 = vector.broadcast %cst_404 : f32 to vector<24x128xf32>
    %1205 = arith.mulf %1204, %1193 : vector<24x128xf32>
    %1206 = arith.mulf %1205, %1193 : vector<24x128xf32>
    %1207 = arith.mulf %1206, %1193 : vector<24x128xf32>
    %1208 = arith.subf %1203, %1207 : vector<24x128xf32>
    %1209 = arith.mulf %1195, %1208 : vector<24x128xf32>
    %cst_405 = arith.constant -3.000000e+00 : f32
    %1210 = vector.broadcast %cst_405 : f32 to vector<24x128xf32>
    %1211 = arith.cmpf ole, %1150, %1210 : vector<24x128xf32>
    %1212 = arith.select %1211, %1209, %1187 : vector<24x128xi1>, vector<24x128xf32>
    %cst_406 = arith.constant 0.886226952 : f32
    %1213 = vector.broadcast %cst_406 : f32 to vector<24x128xf32>
    %1214 = arith.mulf %1213, %1212 : vector<24x128xf32>
    %1215 = arith.mulf %1155, %1214 : vector<24x128xf32>
    %1216 = arith.mulf %1215, %1215 : vector<24x128xf32>
    %cst_407 = arith.constant 0.12167047 : f32
    %1217 = vector.broadcast %cst_407 : f32 to vector<24x128xf32>
    %1218 = arith.mulf %1217, %1216 : vector<24x128xf32>
    %1219 = arith.addf %1147, %1218 : vector<24x128xf32>
    %cst_408 = arith.constant 0.433793515 : f32
    %1220 = vector.broadcast %cst_408 : f32 to vector<24x128xf32>
    %1221 = arith.mulf %134, %1220 : vector<24x128xf32>
    %1222 = arith.addf %131, %1221 : vector<24x128xf32>
    %cst_409 = arith.constant -5.000000e-01 : f32
    %1223 = vector.broadcast %cst_409 : f32 to vector<24x128xf32>
    %1224 = arith.mulf %1223, %1222 : vector<24x128xf32>
    %1225 = arith.mulf %1224, %1222 : vector<24x128xf32>
    %1226 = math.exp %1225 : vector<24x128xf32>
    %1227 = arith.mulf %138, %1226 : vector<24x128xf32>
    %1228 = math.absf %1222 : vector<24x128xf32>
    %cst_410 = arith.constant 0.327591091 : f32
    %1229 = vector.broadcast %cst_410 : f32 to vector<24x128xf32>
    %1230 = arith.mulf %1229, %1228 : vector<24x128xf32>
    %cst_411 = arith.constant 1.000000e+00 : f32
    %1231 = vector.broadcast %cst_411 : f32 to vector<24x128xf32>
    %1232 = arith.addf %1231, %1230 : vector<24x128xf32>
    %1233 = tpu.reciprocal %1232 {approx = true} : vector<24x128xf32> -> vector<24x128xf32>
    %cst_412 = arith.constant 1.06140542 : f32
    %1234 = vector.broadcast %cst_412 : f32 to vector<24x128xf32>
    %1235 = arith.mulf %1234, %1233 : vector<24x128xf32>
    %cst_413 = arith.constant 1.45315206 : f32
    %1236 = vector.broadcast %cst_413 : f32 to vector<24x128xf32>
    %1237 = arith.subf %1235, %1236 : vector<24x128xf32>
    %1238 = arith.mulf %1237, %1233 : vector<24x128xf32>
    %cst_414 = arith.constant 1.42141378 : f32
    %1239 = vector.broadcast %cst_414 : f32 to vector<24x128xf32>
    %1240 = arith.addf %1238, %1239 : vector<24x128xf32>
    %1241 = arith.mulf %1240, %1233 : vector<24x128xf32>
    %cst_415 = arith.constant 0.284496725 : f32
    %1242 = vector.broadcast %cst_415 : f32 to vector<24x128xf32>
    %1243 = arith.subf %1241, %1242 : vector<24x128xf32>
    %1244 = arith.mulf %1243, %1233 : vector<24x128xf32>
    %cst_416 = arith.constant 0.254829586 : f32
    %1245 = vector.broadcast %cst_416 : f32 to vector<24x128xf32>
    %1246 = arith.addf %1244, %1245 : vector<24x128xf32>
    %1247 = arith.mulf %1246, %1233 : vector<24x128xf32>
    %cst_417 = arith.constant 0.000000e+00 : f32
    %cst_418 = arith.constant 6.000000e+00 : f32
    %1248 = vector.broadcast %cst_417 : f32 to vector<24x128xf32>
    %1249 = arith.maximumf %1248, %1222 : vector<24x128xf32>
    %1250 = vector.broadcast %cst_418 : f32 to vector<24x128xf32>
    %1251 = arith.minimumf %1250, %1249 : vector<24x128xf32>
    %cst_419 = arith.constant 0.000000e+00 : f32
    %1252 = vector.broadcast %cst_419 : f32 to vector<24x128xf32>
    %1253 = arith.cmpf ogt, %1222, %1252 : vector<24x128xf32>
    %1254 = arith.mulf %1251, %1251 : vector<24x128xf32>
    %1255 = math.exp %1254 : vector<24x128xf32>
    %cst_420 = arith.constant 2.000000e+00 : f32
    %1256 = vector.broadcast %cst_420 : f32 to vector<24x128xf32>
    %1257 = arith.mulf %1256, %1255 : vector<24x128xf32>
    %1258 = arith.subf %1257, %1247 : vector<24x128xf32>
    %1259 = arith.select %1253, %1258, %1247 : vector<24x128xi1>, vector<24x128xf32>
    %cst_421 = arith.constant 0.000000e+00 : f32
    %1260 = vector.broadcast %cst_421 : f32 to vector<24x128xf32>
    %1261 = arith.subf %1260, %1222 : vector<24x128xf32>
    %cst_422 = arith.constant 3.000000e+00 : f32
    %1262 = vector.broadcast %cst_422 : f32 to vector<24x128xf32>
    %1263 = arith.maximumf %1261, %1262 : vector<24x128xf32>
    %1264 = tpu.reciprocal %1263 {approx = true} : vector<24x128xf32> -> vector<24x128xf32>
    %1265 = arith.mulf %1264, %1264 : vector<24x128xf32>
    %cst_423 = arith.constant 0.564189613 : f32
    %1266 = vector.broadcast %cst_423 : f32 to vector<24x128xf32>
    %1267 = arith.mulf %1266, %1264 : vector<24x128xf32>
    %cst_424 = arith.constant 5.000000e-01 : f32
    %1268 = vector.broadcast %cst_424 : f32 to vector<24x128xf32>
    %1269 = arith.mulf %1268, %1265 : vector<24x128xf32>
    %cst_425 = arith.constant 1.000000e+00 : f32
    %1270 = vector.broadcast %cst_425 : f32 to vector<24x128xf32>
    %1271 = arith.subf %1270, %1269 : vector<24x128xf32>
    %cst_426 = arith.constant 7.500000e-01 : f32
    %1272 = vector.broadcast %cst_426 : f32 to vector<24x128xf32>
    %1273 = arith.mulf %1272, %1265 : vector<24x128xf32>
    %1274 = arith.mulf %1273, %1265 : vector<24x128xf32>
    %1275 = arith.addf %1271, %1274 : vector<24x128xf32>
    %cst_427 = arith.constant 1.875000e+00 : f32
    %1276 = vector.broadcast %cst_427 : f32 to vector<24x128xf32>
    %1277 = arith.mulf %1276, %1265 : vector<24x128xf32>
    %1278 = arith.mulf %1277, %1265 : vector<24x128xf32>
    %1279 = arith.mulf %1278, %1265 : vector<24x128xf32>
    %1280 = arith.subf %1275, %1279 : vector<24x128xf32>
    %1281 = arith.mulf %1267, %1280 : vector<24x128xf32>
    %cst_428 = arith.constant -3.000000e+00 : f32
    %1282 = vector.broadcast %cst_428 : f32 to vector<24x128xf32>
    %1283 = arith.cmpf ole, %1222, %1282 : vector<24x128xf32>
    %1284 = arith.select %1283, %1281, %1259 : vector<24x128xi1>, vector<24x128xf32>
    %cst_429 = arith.constant 0.886226952 : f32
    %1285 = vector.broadcast %cst_429 : f32 to vector<24x128xf32>
    %1286 = arith.mulf %1285, %1284 : vector<24x128xf32>
    %1287 = arith.mulf %1227, %1286 : vector<24x128xf32>
    %1288 = arith.mulf %1287, %1287 : vector<24x128xf32>
    %cst_430 = arith.constant 0.115505666 : f32
    %1289 = vector.broadcast %cst_430 : f32 to vector<24x128xf32>
    %1290 = arith.mulf %1289, %1288 : vector<24x128xf32>
    %1291 = arith.addf %1219, %1290 : vector<24x128xf32>
    %cst_431 = arith.constant 0.545421481 : f32
    %1292 = vector.broadcast %cst_431 : f32 to vector<24x128xf32>
    %1293 = arith.mulf %134, %1292 : vector<24x128xf32>
    %1294 = arith.addf %131, %1293 : vector<24x128xf32>
    %cst_432 = arith.constant -5.000000e-01 : f32
    %1295 = vector.broadcast %cst_432 : f32 to vector<24x128xf32>
    %1296 = arith.mulf %1295, %1294 : vector<24x128xf32>
    %1297 = arith.mulf %1296, %1294 : vector<24x128xf32>
    %1298 = math.exp %1297 : vector<24x128xf32>
    %1299 = arith.mulf %138, %1298 : vector<24x128xf32>
    %1300 = math.absf %1294 : vector<24x128xf32>
    %cst_433 = arith.constant 0.327591091 : f32
    %1301 = vector.broadcast %cst_433 : f32 to vector<24x128xf32>
    %1302 = arith.mulf %1301, %1300 : vector<24x128xf32>
    %cst_434 = arith.constant 1.000000e+00 : f32
    %1303 = vector.broadcast %cst_434 : f32 to vector<24x128xf32>
    %1304 = arith.addf %1303, %1302 : vector<24x128xf32>
    %1305 = tpu.reciprocal %1304 {approx = true} : vector<24x128xf32> -> vector<24x128xf32>
    %cst_435 = arith.constant 1.06140542 : f32
    %1306 = vector.broadcast %cst_435 : f32 to vector<24x128xf32>
    %1307 = arith.mulf %1306, %1305 : vector<24x128xf32>
    %cst_436 = arith.constant 1.45315206 : f32
    %1308 = vector.broadcast %cst_436 : f32 to vector<24x128xf32>
    %1309 = arith.subf %1307, %1308 : vector<24x128xf32>
    %1310 = arith.mulf %1309, %1305 : vector<24x128xf32>
    %cst_437 = arith.constant 1.42141378 : f32
    %1311 = vector.broadcast %cst_437 : f32 to vector<24x128xf32>
    %1312 = arith.addf %1310, %1311 : vector<24x128xf32>
    %1313 = arith.mulf %1312, %1305 : vector<24x128xf32>
    %cst_438 = arith.constant 0.284496725 : f32
    %1314 = vector.broadcast %cst_438 : f32 to vector<24x128xf32>
    %1315 = arith.subf %1313, %1314 : vector<24x128xf32>
    %1316 = arith.mulf %1315, %1305 : vector<24x128xf32>
    %cst_439 = arith.constant 0.254829586 : f32
    %1317 = vector.broadcast %cst_439 : f32 to vector<24x128xf32>
    %1318 = arith.addf %1316, %1317 : vector<24x128xf32>
    %1319 = arith.mulf %1318, %1305 : vector<24x128xf32>
    %cst_440 = arith.constant 0.000000e+00 : f32
    %cst_441 = arith.constant 6.000000e+00 : f32
    %1320 = vector.broadcast %cst_440 : f32 to vector<24x128xf32>
    %1321 = arith.maximumf %1320, %1294 : vector<24x128xf32>
    %1322 = vector.broadcast %cst_441 : f32 to vector<24x128xf32>
    %1323 = arith.minimumf %1322, %1321 : vector<24x128xf32>
    %cst_442 = arith.constant 0.000000e+00 : f32
    %1324 = vector.broadcast %cst_442 : f32 to vector<24x128xf32>
    %1325 = arith.cmpf ogt, %1294, %1324 : vector<24x128xf32>
    %1326 = arith.mulf %1323, %1323 : vector<24x128xf32>
    %1327 = math.exp %1326 : vector<24x128xf32>
    %cst_443 = arith.constant 2.000000e+00 : f32
    %1328 = vector.broadcast %cst_443 : f32 to vector<24x128xf32>
    %1329 = arith.mulf %1328, %1327 : vector<24x128xf32>
    %1330 = arith.subf %1329, %1319 : vector<24x128xf32>
    %1331 = arith.select %1325, %1330, %1319 : vector<24x128xi1>, vector<24x128xf32>
    %cst_444 = arith.constant 0.000000e+00 : f32
    %1332 = vector.broadcast %cst_444 : f32 to vector<24x128xf32>
    %1333 = arith.subf %1332, %1294 : vector<24x128xf32>
    %cst_445 = arith.constant 3.000000e+00 : f32
    %1334 = vector.broadcast %cst_445 : f32 to vector<24x128xf32>
    %1335 = arith.maximumf %1333, %1334 : vector<24x128xf32>
    %1336 = tpu.reciprocal %1335 {approx = true} : vector<24x128xf32> -> vector<24x128xf32>
    %1337 = arith.mulf %1336, %1336 : vector<24x128xf32>
    %cst_446 = arith.constant 0.564189613 : f32
    %1338 = vector.broadcast %cst_446 : f32 to vector<24x128xf32>
    %1339 = arith.mulf %1338, %1336 : vector<24x128xf32>
    %cst_447 = arith.constant 5.000000e-01 : f32
    %1340 = vector.broadcast %cst_447 : f32 to vector<24x128xf32>
    %1341 = arith.mulf %1340, %1337 : vector<24x128xf32>
    %cst_448 = arith.constant 1.000000e+00 : f32
    %1342 = vector.broadcast %cst_448 : f32 to vector<24x128xf32>
    %1343 = arith.subf %1342, %1341 : vector<24x128xf32>
    %cst_449 = arith.constant 7.500000e-01 : f32
    %1344 = vector.broadcast %cst_449 : f32 to vector<24x128xf32>
    %1345 = arith.mulf %1344, %1337 : vector<24x128xf32>
    %1346 = arith.mulf %1345, %1337 : vector<24x128xf32>
    %1347 = arith.addf %1343, %1346 : vector<24x128xf32>
    %cst_450 = arith.constant 1.875000e+00 : f32
    %1348 = vector.broadcast %cst_450 : f32 to vector<24x128xf32>
    %1349 = arith.mulf %1348, %1337 : vector<24x128xf32>
    %1350 = arith.mulf %1349, %1337 : vector<24x128xf32>
    %1351 = arith.mulf %1350, %1337 : vector<24x128xf32>
    %1352 = arith.subf %1347, %1351 : vector<24x128xf32>
    %1353 = arith.mulf %1339, %1352 : vector<24x128xf32>
    %cst_451 = arith.constant -3.000000e+00 : f32
    %1354 = vector.broadcast %cst_451 : f32 to vector<24x128xf32>
    %1355 = arith.cmpf ole, %1294, %1354 : vector<24x128xf32>
    %1356 = arith.select %1355, %1353, %1331 : vector<24x128xi1>, vector<24x128xf32>
    %cst_452 = arith.constant 0.886226952 : f32
    %1357 = vector.broadcast %cst_452 : f32 to vector<24x128xf32>
    %1358 = arith.mulf %1357, %1356 : vector<24x128xf32>
    %1359 = arith.mulf %1299, %1358 : vector<24x128xf32>
    %1360 = arith.mulf %1359, %1359 : vector<24x128xf32>
    %cst_453 = arith.constant 0.107444271 : f32
    %1361 = vector.broadcast %cst_453 : f32 to vector<24x128xf32>
    %1362 = arith.mulf %1361, %1360 : vector<24x128xf32>
    %1363 = arith.addf %1291, %1362 : vector<24x128xf32>
    %cst_454 = arith.constant 0.64809364 : f32
    %1364 = vector.broadcast %cst_454 : f32 to vector<24x128xf32>
    %1365 = arith.mulf %134, %1364 : vector<24x128xf32>
    %1366 = arith.addf %131, %1365 : vector<24x128xf32>
    %cst_455 = arith.constant -5.000000e-01 : f32
    %1367 = vector.broadcast %cst_455 : f32 to vector<24x128xf32>
    %1368 = arith.mulf %1367, %1366 : vector<24x128xf32>
    %1369 = arith.mulf %1368, %1366 : vector<24x128xf32>
    %1370 = math.exp %1369 : vector<24x128xf32>
    %1371 = arith.mulf %138, %1370 : vector<24x128xf32>
    %1372 = math.absf %1366 : vector<24x128xf32>
    %cst_456 = arith.constant 0.327591091 : f32
    %1373 = vector.broadcast %cst_456 : f32 to vector<24x128xf32>
    %1374 = arith.mulf %1373, %1372 : vector<24x128xf32>
    %cst_457 = arith.constant 1.000000e+00 : f32
    %1375 = vector.broadcast %cst_457 : f32 to vector<24x128xf32>
    %1376 = arith.addf %1375, %1374 : vector<24x128xf32>
    %1377 = tpu.reciprocal %1376 {approx = true} : vector<24x128xf32> -> vector<24x128xf32>
    %cst_458 = arith.constant 1.06140542 : f32
    %1378 = vector.broadcast %cst_458 : f32 to vector<24x128xf32>
    %1379 = arith.mulf %1378, %1377 : vector<24x128xf32>
    %cst_459 = arith.constant 1.45315206 : f32
    %1380 = vector.broadcast %cst_459 : f32 to vector<24x128xf32>
    %1381 = arith.subf %1379, %1380 : vector<24x128xf32>
    %1382 = arith.mulf %1381, %1377 : vector<24x128xf32>
    %cst_460 = arith.constant 1.42141378 : f32
    %1383 = vector.broadcast %cst_460 : f32 to vector<24x128xf32>
    %1384 = arith.addf %1382, %1383 : vector<24x128xf32>
    %1385 = arith.mulf %1384, %1377 : vector<24x128xf32>
    %cst_461 = arith.constant 0.284496725 : f32
    %1386 = vector.broadcast %cst_461 : f32 to vector<24x128xf32>
    %1387 = arith.subf %1385, %1386 : vector<24x128xf32>
    %1388 = arith.mulf %1387, %1377 : vector<24x128xf32>
    %cst_462 = arith.constant 0.254829586 : f32
    %1389 = vector.broadcast %cst_462 : f32 to vector<24x128xf32>
    %1390 = arith.addf %1388, %1389 : vector<24x128xf32>
    %1391 = arith.mulf %1390, %1377 : vector<24x128xf32>
    %cst_463 = arith.constant 0.000000e+00 : f32
    %cst_464 = arith.constant 6.000000e+00 : f32
    %1392 = vector.broadcast %cst_463 : f32 to vector<24x128xf32>
    %1393 = arith.maximumf %1392, %1366 : vector<24x128xf32>
    %1394 = vector.broadcast %cst_464 : f32 to vector<24x128xf32>
    %1395 = arith.minimumf %1394, %1393 : vector<24x128xf32>
    %cst_465 = arith.constant 0.000000e+00 : f32
    %1396 = vector.broadcast %cst_465 : f32 to vector<24x128xf32>
    %1397 = arith.cmpf ogt, %1366, %1396 : vector<24x128xf32>
    %1398 = arith.mulf %1395, %1395 : vector<24x128xf32>
    %1399 = math.exp %1398 : vector<24x128xf32>
    %cst_466 = arith.constant 2.000000e+00 : f32
    %1400 = vector.broadcast %cst_466 : f32 to vector<24x128xf32>
    %1401 = arith.mulf %1400, %1399 : vector<24x128xf32>
    %1402 = arith.subf %1401, %1391 : vector<24x128xf32>
    %1403 = arith.select %1397, %1402, %1391 : vector<24x128xi1>, vector<24x128xf32>
    %cst_467 = arith.constant 0.000000e+00 : f32
    %1404 = vector.broadcast %cst_467 : f32 to vector<24x128xf32>
    %1405 = arith.subf %1404, %1366 : vector<24x128xf32>
    %cst_468 = arith.constant 3.000000e+00 : f32
    %1406 = vector.broadcast %cst_468 : f32 to vector<24x128xf32>
    %1407 = arith.maximumf %1405, %1406 : vector<24x128xf32>
    %1408 = tpu.reciprocal %1407 {approx = true} : vector<24x128xf32> -> vector<24x128xf32>
    %1409 = arith.mulf %1408, %1408 : vector<24x128xf32>
    %cst_469 = arith.constant 0.564189613 : f32
    %1410 = vector.broadcast %cst_469 : f32 to vector<24x128xf32>
    %1411 = arith.mulf %1410, %1408 : vector<24x128xf32>
    %cst_470 = arith.constant 5.000000e-01 : f32
    %1412 = vector.broadcast %cst_470 : f32 to vector<24x128xf32>
    %1413 = arith.mulf %1412, %1409 : vector<24x128xf32>
    %cst_471 = arith.constant 1.000000e+00 : f32
    %1414 = vector.broadcast %cst_471 : f32 to vector<24x128xf32>
    %1415 = arith.subf %1414, %1413 : vector<24x128xf32>
    %cst_472 = arith.constant 7.500000e-01 : f32
    %1416 = vector.broadcast %cst_472 : f32 to vector<24x128xf32>
    %1417 = arith.mulf %1416, %1409 : vector<24x128xf32>
    %1418 = arith.mulf %1417, %1409 : vector<24x128xf32>
    %1419 = arith.addf %1415, %1418 : vector<24x128xf32>
    %cst_473 = arith.constant 1.875000e+00 : f32
    %1420 = vector.broadcast %cst_473 : f32 to vector<24x128xf32>
    %1421 = arith.mulf %1420, %1409 : vector<24x128xf32>
    %1422 = arith.mulf %1421, %1409 : vector<24x128xf32>
    %1423 = arith.mulf %1422, %1409 : vector<24x128xf32>
    %1424 = arith.subf %1419, %1423 : vector<24x128xf32>
    %1425 = arith.mulf %1411, %1424 : vector<24x128xf32>
    %cst_474 = arith.constant -3.000000e+00 : f32
    %1426 = vector.broadcast %cst_474 : f32 to vector<24x128xf32>
    %1427 = arith.cmpf ole, %1366, %1426 : vector<24x128xf32>
    %1428 = arith.select %1427, %1425, %1403 : vector<24x128xi1>, vector<24x128xf32>
    %cst_475 = arith.constant 0.886226952 : f32
    %1429 = vector.broadcast %cst_475 : f32 to vector<24x128xf32>
    %1430 = arith.mulf %1429, %1428 : vector<24x128xf32>
    %1431 = arith.mulf %1371, %1430 : vector<24x128xf32>
    %1432 = arith.mulf %1431, %1431 : vector<24x128xf32>
    %cst_476 = arith.constant 0.0976186543 : f32
    %1433 = vector.broadcast %cst_476 : f32 to vector<24x128xf32>
    %1434 = arith.mulf %1433, %1432 : vector<24x128xf32>
    %1435 = arith.addf %1363, %1434 : vector<24x128xf32>
    %cst_477 = arith.constant 0.740124166 : f32
    %1436 = vector.broadcast %cst_477 : f32 to vector<24x128xf32>
    %1437 = arith.mulf %134, %1436 : vector<24x128xf32>
    %1438 = arith.addf %131, %1437 : vector<24x128xf32>
    %cst_478 = arith.constant -5.000000e-01 : f32
    %1439 = vector.broadcast %cst_478 : f32 to vector<24x128xf32>
    %1440 = arith.mulf %1439, %1438 : vector<24x128xf32>
    %1441 = arith.mulf %1440, %1438 : vector<24x128xf32>
    %1442 = math.exp %1441 : vector<24x128xf32>
    %1443 = arith.mulf %138, %1442 : vector<24x128xf32>
    %1444 = math.absf %1438 : vector<24x128xf32>
    %cst_479 = arith.constant 0.327591091 : f32
    %1445 = vector.broadcast %cst_479 : f32 to vector<24x128xf32>
    %1446 = arith.mulf %1445, %1444 : vector<24x128xf32>
    %cst_480 = arith.constant 1.000000e+00 : f32
    %1447 = vector.broadcast %cst_480 : f32 to vector<24x128xf32>
    %1448 = arith.addf %1447, %1446 : vector<24x128xf32>
    %1449 = tpu.reciprocal %1448 {approx = true} : vector<24x128xf32> -> vector<24x128xf32>
    %cst_481 = arith.constant 1.06140542 : f32
    %1450 = vector.broadcast %cst_481 : f32 to vector<24x128xf32>
    %1451 = arith.mulf %1450, %1449 : vector<24x128xf32>
    %cst_482 = arith.constant 1.45315206 : f32
    %1452 = vector.broadcast %cst_482 : f32 to vector<24x128xf32>
    %1453 = arith.subf %1451, %1452 : vector<24x128xf32>
    %1454 = arith.mulf %1453, %1449 : vector<24x128xf32>
    %cst_483 = arith.constant 1.42141378 : f32
    %1455 = vector.broadcast %cst_483 : f32 to vector<24x128xf32>
    %1456 = arith.addf %1454, %1455 : vector<24x128xf32>
    %1457 = arith.mulf %1456, %1449 : vector<24x128xf32>
    %cst_484 = arith.constant 0.284496725 : f32
    %1458 = vector.broadcast %cst_484 : f32 to vector<24x128xf32>
    %1459 = arith.subf %1457, %1458 : vector<24x128xf32>
    %1460 = arith.mulf %1459, %1449 : vector<24x128xf32>
    %cst_485 = arith.constant 0.254829586 : f32
    %1461 = vector.broadcast %cst_485 : f32 to vector<24x128xf32>
    %1462 = arith.addf %1460, %1461 : vector<24x128xf32>
    %1463 = arith.mulf %1462, %1449 : vector<24x128xf32>
    %cst_486 = arith.constant 0.000000e+00 : f32
    %cst_487 = arith.constant 6.000000e+00 : f32
    %1464 = vector.broadcast %cst_486 : f32 to vector<24x128xf32>
    %1465 = arith.maximumf %1464, %1438 : vector<24x128xf32>
    %1466 = vector.broadcast %cst_487 : f32 to vector<24x128xf32>
    %1467 = arith.minimumf %1466, %1465 : vector<24x128xf32>
    %cst_488 = arith.constant 0.000000e+00 : f32
    %1468 = vector.broadcast %cst_488 : f32 to vector<24x128xf32>
    %1469 = arith.cmpf ogt, %1438, %1468 : vector<24x128xf32>
    %1470 = arith.mulf %1467, %1467 : vector<24x128xf32>
    %1471 = math.exp %1470 : vector<24x128xf32>
    %cst_489 = arith.constant 2.000000e+00 : f32
    %1472 = vector.broadcast %cst_489 : f32 to vector<24x128xf32>
    %1473 = arith.mulf %1472, %1471 : vector<24x128xf32>
    %1474 = arith.subf %1473, %1463 : vector<24x128xf32>
    %1475 = arith.select %1469, %1474, %1463 : vector<24x128xi1>, vector<24x128xf32>
    %cst_490 = arith.constant 0.000000e+00 : f32
    %1476 = vector.broadcast %cst_490 : f32 to vector<24x128xf32>
    %1477 = arith.subf %1476, %1438 : vector<24x128xf32>
    %cst_491 = arith.constant 3.000000e+00 : f32
    %1478 = vector.broadcast %cst_491 : f32 to vector<24x128xf32>
    %1479 = arith.maximumf %1477, %1478 : vector<24x128xf32>
    %1480 = tpu.reciprocal %1479 {approx = true} : vector<24x128xf32> -> vector<24x128xf32>
    %1481 = arith.mulf %1480, %1480 : vector<24x128xf32>
    %cst_492 = arith.constant 0.564189613 : f32
    %1482 = vector.broadcast %cst_492 : f32 to vector<24x128xf32>
    %1483 = arith.mulf %1482, %1480 : vector<24x128xf32>
    %cst_493 = arith.constant 5.000000e-01 : f32
    %1484 = vector.broadcast %cst_493 : f32 to vector<24x128xf32>
    %1485 = arith.mulf %1484, %1481 : vector<24x128xf32>
    %cst_494 = arith.constant 1.000000e+00 : f32
    %1486 = vector.broadcast %cst_494 : f32 to vector<24x128xf32>
    %1487 = arith.subf %1486, %1485 : vector<24x128xf32>
    %cst_495 = arith.constant 7.500000e-01 : f32
    %1488 = vector.broadcast %cst_495 : f32 to vector<24x128xf32>
    %1489 = arith.mulf %1488, %1481 : vector<24x128xf32>
    %1490 = arith.mulf %1489, %1481 : vector<24x128xf32>
    %1491 = arith.addf %1487, %1490 : vector<24x128xf32>
    %cst_496 = arith.constant 1.875000e+00 : f32
    %1492 = vector.broadcast %cst_496 : f32 to vector<24x128xf32>
    %1493 = arith.mulf %1492, %1481 : vector<24x128xf32>
    %1494 = arith.mulf %1493, %1481 : vector<24x128xf32>
    %1495 = arith.mulf %1494, %1481 : vector<24x128xf32>
    %1496 = arith.subf %1491, %1495 : vector<24x128xf32>
    %1497 = arith.mulf %1483, %1496 : vector<24x128xf32>
    %cst_497 = arith.constant -3.000000e+00 : f32
    %1498 = vector.broadcast %cst_497 : f32 to vector<24x128xf32>
    %1499 = arith.cmpf ole, %1438, %1498 : vector<24x128xf32>
    %1500 = arith.select %1499, %1497, %1475 : vector<24x128xi1>, vector<24x128xf32>
    %cst_498 = arith.constant 0.886226952 : f32
    %1501 = vector.broadcast %cst_498 : f32 to vector<24x128xf32>
    %1502 = arith.mulf %1501, %1500 : vector<24x128xf32>
    %1503 = arith.mulf %1443, %1502 : vector<24x128xf32>
    %1504 = arith.mulf %1503, %1503 : vector<24x128xf32>
    %cst_499 = arith.constant 0.086190164 : f32
    %1505 = vector.broadcast %cst_499 : f32 to vector<24x128xf32>
    %1506 = arith.mulf %1505, %1504 : vector<24x128xf32>
    %1507 = arith.addf %1435, %1506 : vector<24x128xf32>
    %cst_500 = arith.constant 0.820001959 : f32
    %1508 = vector.broadcast %cst_500 : f32 to vector<24x128xf32>
    %1509 = arith.mulf %134, %1508 : vector<24x128xf32>
    %1510 = arith.addf %131, %1509 : vector<24x128xf32>
    %cst_501 = arith.constant -5.000000e-01 : f32
    %1511 = vector.broadcast %cst_501 : f32 to vector<24x128xf32>
    %1512 = arith.mulf %1511, %1510 : vector<24x128xf32>
    %1513 = arith.mulf %1512, %1510 : vector<24x128xf32>
    %1514 = math.exp %1513 : vector<24x128xf32>
    %1515 = arith.mulf %138, %1514 : vector<24x128xf32>
    %1516 = math.absf %1510 : vector<24x128xf32>
    %cst_502 = arith.constant 0.327591091 : f32
    %1517 = vector.broadcast %cst_502 : f32 to vector<24x128xf32>
    %1518 = arith.mulf %1517, %1516 : vector<24x128xf32>
    %cst_503 = arith.constant 1.000000e+00 : f32
    %1519 = vector.broadcast %cst_503 : f32 to vector<24x128xf32>
    %1520 = arith.addf %1519, %1518 : vector<24x128xf32>
    %1521 = tpu.reciprocal %1520 {approx = true} : vector<24x128xf32> -> vector<24x128xf32>
    %cst_504 = arith.constant 1.06140542 : f32
    %1522 = vector.broadcast %cst_504 : f32 to vector<24x128xf32>
    %1523 = arith.mulf %1522, %1521 : vector<24x128xf32>
    %cst_505 = arith.constant 1.45315206 : f32
    %1524 = vector.broadcast %cst_505 : f32 to vector<24x128xf32>
    %1525 = arith.subf %1523, %1524 : vector<24x128xf32>
    %1526 = arith.mulf %1525, %1521 : vector<24x128xf32>
    %cst_506 = arith.constant 1.42141378 : f32
    %1527 = vector.broadcast %cst_506 : f32 to vector<24x128xf32>
    %1528 = arith.addf %1526, %1527 : vector<24x128xf32>
    %1529 = arith.mulf %1528, %1521 : vector<24x128xf32>
    %cst_507 = arith.constant 0.284496725 : f32
    %1530 = vector.broadcast %cst_507 : f32 to vector<24x128xf32>
    %1531 = arith.subf %1529, %1530 : vector<24x128xf32>
    %1532 = arith.mulf %1531, %1521 : vector<24x128xf32>
    %cst_508 = arith.constant 0.254829586 : f32
    %1533 = vector.broadcast %cst_508 : f32 to vector<24x128xf32>
    %1534 = arith.addf %1532, %1533 : vector<24x128xf32>
    %1535 = arith.mulf %1534, %1521 : vector<24x128xf32>
    %cst_509 = arith.constant 0.000000e+00 : f32
    %cst_510 = arith.constant 6.000000e+00 : f32
    %1536 = vector.broadcast %cst_509 : f32 to vector<24x128xf32>
    %1537 = arith.maximumf %1536, %1510 : vector<24x128xf32>
    %1538 = vector.broadcast %cst_510 : f32 to vector<24x128xf32>
    %1539 = arith.minimumf %1538, %1537 : vector<24x128xf32>
    %cst_511 = arith.constant 0.000000e+00 : f32
    %1540 = vector.broadcast %cst_511 : f32 to vector<24x128xf32>
    %1541 = arith.cmpf ogt, %1510, %1540 : vector<24x128xf32>
    %1542 = arith.mulf %1539, %1539 : vector<24x128xf32>
    %1543 = math.exp %1542 : vector<24x128xf32>
    %cst_512 = arith.constant 2.000000e+00 : f32
    %1544 = vector.broadcast %cst_512 : f32 to vector<24x128xf32>
    %1545 = arith.mulf %1544, %1543 : vector<24x128xf32>
    %1546 = arith.subf %1545, %1535 : vector<24x128xf32>
    %1547 = arith.select %1541, %1546, %1535 : vector<24x128xi1>, vector<24x128xf32>
    %cst_513 = arith.constant 0.000000e+00 : f32
    %1548 = vector.broadcast %cst_513 : f32 to vector<24x128xf32>
    %1549 = arith.subf %1548, %1510 : vector<24x128xf32>
    %cst_514 = arith.constant 3.000000e+00 : f32
    %1550 = vector.broadcast %cst_514 : f32 to vector<24x128xf32>
    %1551 = arith.maximumf %1549, %1550 : vector<24x128xf32>
    %1552 = tpu.reciprocal %1551 {approx = true} : vector<24x128xf32> -> vector<24x128xf32>
    %1553 = arith.mulf %1552, %1552 : vector<24x128xf32>
    %cst_515 = arith.constant 0.564189613 : f32
    %1554 = vector.broadcast %cst_515 : f32 to vector<24x128xf32>
    %1555 = arith.mulf %1554, %1552 : vector<24x128xf32>
    %cst_516 = arith.constant 5.000000e-01 : f32
    %1556 = vector.broadcast %cst_516 : f32 to vector<24x128xf32>
    %1557 = arith.mulf %1556, %1553 : vector<24x128xf32>
    %cst_517 = arith.constant 1.000000e+00 : f32
    %1558 = vector.broadcast %cst_517 : f32 to vector<24x128xf32>
    %1559 = arith.subf %1558, %1557 : vector<24x128xf32>
    %cst_518 = arith.constant 7.500000e-01 : f32
    %1560 = vector.broadcast %cst_518 : f32 to vector<24x128xf32>
    %1561 = arith.mulf %1560, %1553 : vector<24x128xf32>
    %1562 = arith.mulf %1561, %1553 : vector<24x128xf32>
    %1563 = arith.addf %1559, %1562 : vector<24x128xf32>
    %cst_519 = arith.constant 1.875000e+00 : f32
    %1564 = vector.broadcast %cst_519 : f32 to vector<24x128xf32>
    %1565 = arith.mulf %1564, %1553 : vector<24x128xf32>
    %1566 = arith.mulf %1565, %1553 : vector<24x128xf32>
    %1567 = arith.mulf %1566, %1553 : vector<24x128xf32>
    %1568 = arith.subf %1563, %1567 : vector<24x128xf32>
    %1569 = arith.mulf %1555, %1568 : vector<24x128xf32>
    %cst_520 = arith.constant -3.000000e+00 : f32
    %1570 = vector.broadcast %cst_520 : f32 to vector<24x128xf32>
    %1571 = arith.cmpf ole, %1510, %1570 : vector<24x128xf32>
    %1572 = arith.select %1571, %1569, %1547 : vector<24x128xi1>, vector<24x128xf32>
    %cst_521 = arith.constant 0.886226952 : f32
    %1573 = vector.broadcast %cst_521 : f32 to vector<24x128xf32>
    %1574 = arith.mulf %1573, %1572 : vector<24x128xf32>
    %1575 = arith.mulf %1515, %1574 : vector<24x128xf32>
    %1576 = arith.mulf %1575, %1575 : vector<24x128xf32>
    %cst_522 = arith.constant 0.0733464807 : f32
    %1577 = vector.broadcast %cst_522 : f32 to vector<24x128xf32>
    %1578 = arith.mulf %1577, %1576 : vector<24x128xf32>
    %1579 = arith.addf %1507, %1578 : vector<24x128xf32>
    %cst_523 = arith.constant 0.886415541 : f32
    %1580 = vector.broadcast %cst_523 : f32 to vector<24x128xf32>
    %1581 = arith.mulf %134, %1580 : vector<24x128xf32>
    %1582 = arith.addf %131, %1581 : vector<24x128xf32>
    %cst_524 = arith.constant -5.000000e-01 : f32
    %1583 = vector.broadcast %cst_524 : f32 to vector<24x128xf32>
    %1584 = arith.mulf %1583, %1582 : vector<24x128xf32>
    %1585 = arith.mulf %1584, %1582 : vector<24x128xf32>
    %1586 = math.exp %1585 : vector<24x128xf32>
    %1587 = arith.mulf %138, %1586 : vector<24x128xf32>
    %1588 = math.absf %1582 : vector<24x128xf32>
    %cst_525 = arith.constant 0.327591091 : f32
    %1589 = vector.broadcast %cst_525 : f32 to vector<24x128xf32>
    %1590 = arith.mulf %1589, %1588 : vector<24x128xf32>
    %cst_526 = arith.constant 1.000000e+00 : f32
    %1591 = vector.broadcast %cst_526 : f32 to vector<24x128xf32>
    %1592 = arith.addf %1591, %1590 : vector<24x128xf32>
    %1593 = tpu.reciprocal %1592 {approx = true} : vector<24x128xf32> -> vector<24x128xf32>
    %cst_527 = arith.constant 1.06140542 : f32
    %1594 = vector.broadcast %cst_527 : f32 to vector<24x128xf32>
    %1595 = arith.mulf %1594, %1593 : vector<24x128xf32>
    %cst_528 = arith.constant 1.45315206 : f32
    %1596 = vector.broadcast %cst_528 : f32 to vector<24x128xf32>
    %1597 = arith.subf %1595, %1596 : vector<24x128xf32>
    %1598 = arith.mulf %1597, %1593 : vector<24x128xf32>
    %cst_529 = arith.constant 1.42141378 : f32
    %1599 = vector.broadcast %cst_529 : f32 to vector<24x128xf32>
    %1600 = arith.addf %1598, %1599 : vector<24x128xf32>
    %1601 = arith.mulf %1600, %1593 : vector<24x128xf32>
    %cst_530 = arith.constant 0.284496725 : f32
    %1602 = vector.broadcast %cst_530 : f32 to vector<24x128xf32>
    %1603 = arith.subf %1601, %1602 : vector<24x128xf32>
    %1604 = arith.mulf %1603, %1593 : vector<24x128xf32>
    %cst_531 = arith.constant 0.254829586 : f32
    %1605 = vector.broadcast %cst_531 : f32 to vector<24x128xf32>
    %1606 = arith.addf %1604, %1605 : vector<24x128xf32>
    %1607 = arith.mulf %1606, %1593 : vector<24x128xf32>
    %cst_532 = arith.constant 0.000000e+00 : f32
    %cst_533 = arith.constant 6.000000e+00 : f32
    %1608 = vector.broadcast %cst_532 : f32 to vector<24x128xf32>
    %1609 = arith.maximumf %1608, %1582 : vector<24x128xf32>
    %1610 = vector.broadcast %cst_533 : f32 to vector<24x128xf32>
    %1611 = arith.minimumf %1610, %1609 : vector<24x128xf32>
    %cst_534 = arith.constant 0.000000e+00 : f32
    %1612 = vector.broadcast %cst_534 : f32 to vector<24x128xf32>
    %1613 = arith.cmpf ogt, %1582, %1612 : vector<24x128xf32>
    %1614 = arith.mulf %1611, %1611 : vector<24x128xf32>
    %1615 = math.exp %1614 : vector<24x128xf32>
    %cst_535 = arith.constant 2.000000e+00 : f32
    %1616 = vector.broadcast %cst_535 : f32 to vector<24x128xf32>
    %1617 = arith.mulf %1616, %1615 : vector<24x128xf32>
    %1618 = arith.subf %1617, %1607 : vector<24x128xf32>
    %1619 = arith.select %1613, %1618, %1607 : vector<24x128xi1>, vector<24x128xf32>
    %cst_536 = arith.constant 0.000000e+00 : f32
    %1620 = vector.broadcast %cst_536 : f32 to vector<24x128xf32>
    %1621 = arith.subf %1620, %1582 : vector<24x128xf32>
    %cst_537 = arith.constant 3.000000e+00 : f32
    %1622 = vector.broadcast %cst_537 : f32 to vector<24x128xf32>
    %1623 = arith.maximumf %1621, %1622 : vector<24x128xf32>
    %1624 = tpu.reciprocal %1623 {approx = true} : vector<24x128xf32> -> vector<24x128xf32>
    %1625 = arith.mulf %1624, %1624 : vector<24x128xf32>
    %cst_538 = arith.constant 0.564189613 : f32
    %1626 = vector.broadcast %cst_538 : f32 to vector<24x128xf32>
    %1627 = arith.mulf %1626, %1624 : vector<24x128xf32>
    %cst_539 = arith.constant 5.000000e-01 : f32
    %1628 = vector.broadcast %cst_539 : f32 to vector<24x128xf32>
    %1629 = arith.mulf %1628, %1625 : vector<24x128xf32>
    %cst_540 = arith.constant 1.000000e+00 : f32
    %1630 = vector.broadcast %cst_540 : f32 to vector<24x128xf32>
    %1631 = arith.subf %1630, %1629 : vector<24x128xf32>
    %cst_541 = arith.constant 7.500000e-01 : f32
    %1632 = vector.broadcast %cst_541 : f32 to vector<24x128xf32>
    %1633 = arith.mulf %1632, %1625 : vector<24x128xf32>
    %1634 = arith.mulf %1633, %1625 : vector<24x128xf32>
    %1635 = arith.addf %1631, %1634 : vector<24x128xf32>
    %cst_542 = arith.constant 1.875000e+00 : f32
    %1636 = vector.broadcast %cst_542 : f32 to vector<24x128xf32>
    %1637 = arith.mulf %1636, %1625 : vector<24x128xf32>
    %1638 = arith.mulf %1637, %1625 : vector<24x128xf32>
    %1639 = arith.mulf %1638, %1625 : vector<24x128xf32>
    %1640 = arith.subf %1635, %1639 : vector<24x128xf32>
    %1641 = arith.mulf %1627, %1640 : vector<24x128xf32>
    %cst_543 = arith.constant -3.000000e+00 : f32
    %1642 = vector.broadcast %cst_543 : f32 to vector<24x128xf32>
    %1643 = arith.cmpf ole, %1582, %1642 : vector<24x128xf32>
    %1644 = arith.select %1643, %1641, %1619 : vector<24x128xi1>, vector<24x128xf32>
    %cst_544 = arith.constant 0.886226952 : f32
    %1645 = vector.broadcast %cst_544 : f32 to vector<24x128xf32>
    %1646 = arith.mulf %1645, %1644 : vector<24x128xf32>
    %1647 = arith.mulf %1587, %1646 : vector<24x128xf32>
    %1648 = arith.mulf %1647, %1647 : vector<24x128xf32>
    %cst_545 = arith.constant 0.0592985861 : f32
    %1649 = vector.broadcast %cst_545 : f32 to vector<24x128xf32>
    %1650 = arith.mulf %1649, %1648 : vector<24x128xf32>
    %1651 = arith.addf %1579, %1650 : vector<24x128xf32>
    %cst_546 = arith.constant 0.938274562 : f32
    %1652 = vector.broadcast %cst_546 : f32 to vector<24x128xf32>
    %1653 = arith.mulf %134, %1652 : vector<24x128xf32>
    %1654 = arith.addf %131, %1653 : vector<24x128xf32>
    %cst_547 = arith.constant -5.000000e-01 : f32
    %1655 = vector.broadcast %cst_547 : f32 to vector<24x128xf32>
    %1656 = arith.mulf %1655, %1654 : vector<24x128xf32>
    %1657 = arith.mulf %1656, %1654 : vector<24x128xf32>
    %1658 = math.exp %1657 : vector<24x128xf32>
    %1659 = arith.mulf %138, %1658 : vector<24x128xf32>
    %1660 = math.absf %1654 : vector<24x128xf32>
    %cst_548 = arith.constant 0.327591091 : f32
    %1661 = vector.broadcast %cst_548 : f32 to vector<24x128xf32>
    %1662 = arith.mulf %1661, %1660 : vector<24x128xf32>
    %cst_549 = arith.constant 1.000000e+00 : f32
    %1663 = vector.broadcast %cst_549 : f32 to vector<24x128xf32>
    %1664 = arith.addf %1663, %1662 : vector<24x128xf32>
    %1665 = tpu.reciprocal %1664 {approx = true} : vector<24x128xf32> -> vector<24x128xf32>
    %cst_550 = arith.constant 1.06140542 : f32
    %1666 = vector.broadcast %cst_550 : f32 to vector<24x128xf32>
    %1667 = arith.mulf %1666, %1665 : vector<24x128xf32>
    %cst_551 = arith.constant 1.45315206 : f32
    %1668 = vector.broadcast %cst_551 : f32 to vector<24x128xf32>
    %1669 = arith.subf %1667, %1668 : vector<24x128xf32>
    %1670 = arith.mulf %1669, %1665 : vector<24x128xf32>
    %cst_552 = arith.constant 1.42141378 : f32
    %1671 = vector.broadcast %cst_552 : f32 to vector<24x128xf32>
    %1672 = arith.addf %1670, %1671 : vector<24x128xf32>
    %1673 = arith.mulf %1672, %1665 : vector<24x128xf32>
    %cst_553 = arith.constant 0.284496725 : f32
    %1674 = vector.broadcast %cst_553 : f32 to vector<24x128xf32>
    %1675 = arith.subf %1673, %1674 : vector<24x128xf32>
    %1676 = arith.mulf %1675, %1665 : vector<24x128xf32>
    %cst_554 = arith.constant 0.254829586 : f32
    %1677 = vector.broadcast %cst_554 : f32 to vector<24x128xf32>
    %1678 = arith.addf %1676, %1677 : vector<24x128xf32>
    %1679 = arith.mulf %1678, %1665 : vector<24x128xf32>
    %cst_555 = arith.constant 0.000000e+00 : f32
    %cst_556 = arith.constant 6.000000e+00 : f32
    %1680 = vector.broadcast %cst_555 : f32 to vector<24x128xf32>
    %1681 = arith.maximumf %1680, %1654 : vector<24x128xf32>
    %1682 = vector.broadcast %cst_556 : f32 to vector<24x128xf32>
    %1683 = arith.minimumf %1682, %1681 : vector<24x128xf32>
    %cst_557 = arith.constant 0.000000e+00 : f32
    %1684 = vector.broadcast %cst_557 : f32 to vector<24x128xf32>
    %1685 = arith.cmpf ogt, %1654, %1684 : vector<24x128xf32>
    %1686 = arith.mulf %1683, %1683 : vector<24x128xf32>
    %1687 = math.exp %1686 : vector<24x128xf32>
    %cst_558 = arith.constant 2.000000e+00 : f32
    %1688 = vector.broadcast %cst_558 : f32 to vector<24x128xf32>
    %1689 = arith.mulf %1688, %1687 : vector<24x128xf32>
    %1690 = arith.subf %1689, %1679 : vector<24x128xf32>
    %1691 = arith.select %1685, %1690, %1679 : vector<24x128xi1>, vector<24x128xf32>
    %cst_559 = arith.constant 0.000000e+00 : f32
    %1692 = vector.broadcast %cst_559 : f32 to vector<24x128xf32>
    %1693 = arith.subf %1692, %1654 : vector<24x128xf32>
    %cst_560 = arith.constant 3.000000e+00 : f32
    %1694 = vector.broadcast %cst_560 : f32 to vector<24x128xf32>
    %1695 = arith.maximumf %1693, %1694 : vector<24x128xf32>
    %1696 = tpu.reciprocal %1695 {approx = true} : vector<24x128xf32> -> vector<24x128xf32>
    %1697 = arith.mulf %1696, %1696 : vector<24x128xf32>
    %cst_561 = arith.constant 0.564189613 : f32
    %1698 = vector.broadcast %cst_561 : f32 to vector<24x128xf32>
    %1699 = arith.mulf %1698, %1696 : vector<24x128xf32>
    %cst_562 = arith.constant 5.000000e-01 : f32
    %1700 = vector.broadcast %cst_562 : f32 to vector<24x128xf32>
    %1701 = arith.mulf %1700, %1697 : vector<24x128xf32>
    %cst_563 = arith.constant 1.000000e+00 : f32
    %1702 = vector.broadcast %cst_563 : f32 to vector<24x128xf32>
    %1703 = arith.subf %1702, %1701 : vector<24x128xf32>
    %cst_564 = arith.constant 7.500000e-01 : f32
    %1704 = vector.broadcast %cst_564 : f32 to vector<24x128xf32>
    %1705 = arith.mulf %1704, %1697 : vector<24x128xf32>
    %1706 = arith.mulf %1705, %1697 : vector<24x128xf32>
    %1707 = arith.addf %1703, %1706 : vector<24x128xf32>
    %cst_565 = arith.constant 1.875000e+00 : f32
    %1708 = vector.broadcast %cst_565 : f32 to vector<24x128xf32>
    %1709 = arith.mulf %1708, %1697 : vector<24x128xf32>
    %1710 = arith.mulf %1709, %1697 : vector<24x128xf32>
    %1711 = arith.mulf %1710, %1697 : vector<24x128xf32>
    %1712 = arith.subf %1707, %1711 : vector<24x128xf32>
    %1713 = arith.mulf %1699, %1712 : vector<24x128xf32>
    %cst_566 = arith.constant -3.000000e+00 : f32
    %1714 = vector.broadcast %cst_566 : f32 to vector<24x128xf32>
    %1715 = arith.cmpf ole, %1654, %1714 : vector<24x128xf32>
    %1716 = arith.select %1715, %1713, %1691 : vector<24x128xi1>, vector<24x128xf32>
    %cst_567 = arith.constant 0.886226952 : f32
    %1717 = vector.broadcast %cst_567 : f32 to vector<24x128xf32>
    %1718 = arith.mulf %1717, %1716 : vector<24x128xf32>
    %1719 = arith.mulf %1659, %1718 : vector<24x128xf32>
    %1720 = arith.mulf %1719, %1719 : vector<24x128xf32>
    %cst_568 = arith.constant 0.044277437 : f32
    %1721 = vector.broadcast %cst_568 : f32 to vector<24x128xf32>
    %1722 = arith.mulf %1721, %1720 : vector<24x128xf32>
    %1723 = arith.addf %1651, %1722 : vector<24x128xf32>
    %cst_569 = arith.constant 0.974728584 : f32
    %1724 = vector.broadcast %cst_569 : f32 to vector<24x128xf32>
    %1725 = arith.mulf %134, %1724 : vector<24x128xf32>
    %1726 = arith.addf %131, %1725 : vector<24x128xf32>
    %cst_570 = arith.constant -5.000000e-01 : f32
    %1727 = vector.broadcast %cst_570 : f32 to vector<24x128xf32>
    %1728 = arith.mulf %1727, %1726 : vector<24x128xf32>
    %1729 = arith.mulf %1728, %1726 : vector<24x128xf32>
    %1730 = math.exp %1729 : vector<24x128xf32>
    %1731 = arith.mulf %138, %1730 : vector<24x128xf32>
    %1732 = math.absf %1726 : vector<24x128xf32>
    %cst_571 = arith.constant 0.327591091 : f32
    %1733 = vector.broadcast %cst_571 : f32 to vector<24x128xf32>
    %1734 = arith.mulf %1733, %1732 : vector<24x128xf32>
    %cst_572 = arith.constant 1.000000e+00 : f32
    %1735 = vector.broadcast %cst_572 : f32 to vector<24x128xf32>
    %1736 = arith.addf %1735, %1734 : vector<24x128xf32>
    %1737 = tpu.reciprocal %1736 {approx = true} : vector<24x128xf32> -> vector<24x128xf32>
    %cst_573 = arith.constant 1.06140542 : f32
    %1738 = vector.broadcast %cst_573 : f32 to vector<24x128xf32>
    %1739 = arith.mulf %1738, %1737 : vector<24x128xf32>
    %cst_574 = arith.constant 1.45315206 : f32
    %1740 = vector.broadcast %cst_574 : f32 to vector<24x128xf32>
    %1741 = arith.subf %1739, %1740 : vector<24x128xf32>
    %1742 = arith.mulf %1741, %1737 : vector<24x128xf32>
    %cst_575 = arith.constant 1.42141378 : f32
    %1743 = vector.broadcast %cst_575 : f32 to vector<24x128xf32>
    %1744 = arith.addf %1742, %1743 : vector<24x128xf32>
    %1745 = arith.mulf %1744, %1737 : vector<24x128xf32>
    %cst_576 = arith.constant 0.284496725 : f32
    %1746 = vector.broadcast %cst_576 : f32 to vector<24x128xf32>
    %1747 = arith.subf %1745, %1746 : vector<24x128xf32>
    %1748 = arith.mulf %1747, %1737 : vector<24x128xf32>
    %cst_577 = arith.constant 0.254829586 : f32
    %1749 = vector.broadcast %cst_577 : f32 to vector<24x128xf32>
    %1750 = arith.addf %1748, %1749 : vector<24x128xf32>
    %1751 = arith.mulf %1750, %1737 : vector<24x128xf32>
    %cst_578 = arith.constant 0.000000e+00 : f32
    %cst_579 = arith.constant 6.000000e+00 : f32
    %1752 = vector.broadcast %cst_578 : f32 to vector<24x128xf32>
    %1753 = arith.maximumf %1752, %1726 : vector<24x128xf32>
    %1754 = vector.broadcast %cst_579 : f32 to vector<24x128xf32>
    %1755 = arith.minimumf %1754, %1753 : vector<24x128xf32>
    %cst_580 = arith.constant 0.000000e+00 : f32
    %1756 = vector.broadcast %cst_580 : f32 to vector<24x128xf32>
    %1757 = arith.cmpf ogt, %1726, %1756 : vector<24x128xf32>
    %1758 = arith.mulf %1755, %1755 : vector<24x128xf32>
    %1759 = math.exp %1758 : vector<24x128xf32>
    %cst_581 = arith.constant 2.000000e+00 : f32
    %1760 = vector.broadcast %cst_581 : f32 to vector<24x128xf32>
    %1761 = arith.mulf %1760, %1759 : vector<24x128xf32>
    %1762 = arith.subf %1761, %1751 : vector<24x128xf32>
    %1763 = arith.select %1757, %1762, %1751 : vector<24x128xi1>, vector<24x128xf32>
    %cst_582 = arith.constant 0.000000e+00 : f32
    %1764 = vector.broadcast %cst_582 : f32 to vector<24x128xf32>
    %1765 = arith.subf %1764, %1726 : vector<24x128xf32>
    %cst_583 = arith.constant 3.000000e+00 : f32
    %1766 = vector.broadcast %cst_583 : f32 to vector<24x128xf32>
    %1767 = arith.maximumf %1765, %1766 : vector<24x128xf32>
    %1768 = tpu.reciprocal %1767 {approx = true} : vector<24x128xf32> -> vector<24x128xf32>
    %1769 = arith.mulf %1768, %1768 : vector<24x128xf32>
    %cst_584 = arith.constant 0.564189613 : f32
    %1770 = vector.broadcast %cst_584 : f32 to vector<24x128xf32>
    %1771 = arith.mulf %1770, %1768 : vector<24x128xf32>
    %cst_585 = arith.constant 5.000000e-01 : f32
    %1772 = vector.broadcast %cst_585 : f32 to vector<24x128xf32>
    %1773 = arith.mulf %1772, %1769 : vector<24x128xf32>
    %cst_586 = arith.constant 1.000000e+00 : f32
    %1774 = vector.broadcast %cst_586 : f32 to vector<24x128xf32>
    %1775 = arith.subf %1774, %1773 : vector<24x128xf32>
    %cst_587 = arith.constant 7.500000e-01 : f32
    %1776 = vector.broadcast %cst_587 : f32 to vector<24x128xf32>
    %1777 = arith.mulf %1776, %1769 : vector<24x128xf32>
    %1778 = arith.mulf %1777, %1769 : vector<24x128xf32>
    %1779 = arith.addf %1775, %1778 : vector<24x128xf32>
    %cst_588 = arith.constant 1.875000e+00 : f32
    %1780 = vector.broadcast %cst_588 : f32 to vector<24x128xf32>
    %1781 = arith.mulf %1780, %1769 : vector<24x128xf32>
    %1782 = arith.mulf %1781, %1769 : vector<24x128xf32>
    %1783 = arith.mulf %1782, %1769 : vector<24x128xf32>
    %1784 = arith.subf %1779, %1783 : vector<24x128xf32>
    %1785 = arith.mulf %1771, %1784 : vector<24x128xf32>
    %cst_589 = arith.constant -3.000000e+00 : f32
    %1786 = vector.broadcast %cst_589 : f32 to vector<24x128xf32>
    %1787 = arith.cmpf ole, %1726, %1786 : vector<24x128xf32>
    %1788 = arith.select %1787, %1785, %1763 : vector<24x128xi1>, vector<24x128xf32>
    %cst_590 = arith.constant 0.886226952 : f32
    %1789 = vector.broadcast %cst_590 : f32 to vector<24x128xf32>
    %1790 = arith.mulf %1789, %1788 : vector<24x128xf32>
    %1791 = arith.mulf %1731, %1790 : vector<24x128xf32>
    %1792 = arith.mulf %1791, %1791 : vector<24x128xf32>
    %cst_591 = arith.constant 0.0285313893 : f32
    %1793 = vector.broadcast %cst_591 : f32 to vector<24x128xf32>
    %1794 = arith.mulf %1793, %1792 : vector<24x128xf32>
    %1795 = arith.addf %1723, %1794 : vector<24x128xf32>
    %cst_592 = arith.constant 0.995187222 : f32
    %1796 = vector.broadcast %cst_592 : f32 to vector<24x128xf32>
    %1797 = arith.mulf %134, %1796 : vector<24x128xf32>
    %1798 = arith.addf %131, %1797 : vector<24x128xf32>
    %cst_593 = arith.constant -5.000000e-01 : f32
    %1799 = vector.broadcast %cst_593 : f32 to vector<24x128xf32>
    %1800 = arith.mulf %1799, %1798 : vector<24x128xf32>
    %1801 = arith.mulf %1800, %1798 : vector<24x128xf32>
    %1802 = math.exp %1801 : vector<24x128xf32>
    %1803 = arith.mulf %138, %1802 : vector<24x128xf32>
    %1804 = math.absf %1798 : vector<24x128xf32>
    %cst_594 = arith.constant 0.327591091 : f32
    %1805 = vector.broadcast %cst_594 : f32 to vector<24x128xf32>
    %1806 = arith.mulf %1805, %1804 : vector<24x128xf32>
    %cst_595 = arith.constant 1.000000e+00 : f32
    %1807 = vector.broadcast %cst_595 : f32 to vector<24x128xf32>
    %1808 = arith.addf %1807, %1806 : vector<24x128xf32>
    %1809 = tpu.reciprocal %1808 {approx = true} : vector<24x128xf32> -> vector<24x128xf32>
    %cst_596 = arith.constant 1.06140542 : f32
    %1810 = vector.broadcast %cst_596 : f32 to vector<24x128xf32>
    %1811 = arith.mulf %1810, %1809 : vector<24x128xf32>
    %cst_597 = arith.constant 1.45315206 : f32
    %1812 = vector.broadcast %cst_597 : f32 to vector<24x128xf32>
    %1813 = arith.subf %1811, %1812 : vector<24x128xf32>
    %1814 = arith.mulf %1813, %1809 : vector<24x128xf32>
    %cst_598 = arith.constant 1.42141378 : f32
    %1815 = vector.broadcast %cst_598 : f32 to vector<24x128xf32>
    %1816 = arith.addf %1814, %1815 : vector<24x128xf32>
    %1817 = arith.mulf %1816, %1809 : vector<24x128xf32>
    %cst_599 = arith.constant 0.284496725 : f32
    %1818 = vector.broadcast %cst_599 : f32 to vector<24x128xf32>
    %1819 = arith.subf %1817, %1818 : vector<24x128xf32>
    %1820 = arith.mulf %1819, %1809 : vector<24x128xf32>
    %cst_600 = arith.constant 0.254829586 : f32
    %1821 = vector.broadcast %cst_600 : f32 to vector<24x128xf32>
    %1822 = arith.addf %1820, %1821 : vector<24x128xf32>
    %1823 = arith.mulf %1822, %1809 : vector<24x128xf32>
    %cst_601 = arith.constant 0.000000e+00 : f32
    %cst_602 = arith.constant 6.000000e+00 : f32
    %1824 = vector.broadcast %cst_601 : f32 to vector<24x128xf32>
    %1825 = arith.maximumf %1824, %1798 : vector<24x128xf32>
    %1826 = vector.broadcast %cst_602 : f32 to vector<24x128xf32>
    %1827 = arith.minimumf %1826, %1825 : vector<24x128xf32>
    %cst_603 = arith.constant 0.000000e+00 : f32
    %1828 = vector.broadcast %cst_603 : f32 to vector<24x128xf32>
    %1829 = arith.cmpf ogt, %1798, %1828 : vector<24x128xf32>
    %1830 = arith.mulf %1827, %1827 : vector<24x128xf32>
    %1831 = math.exp %1830 : vector<24x128xf32>
    %cst_604 = arith.constant 2.000000e+00 : f32
    %1832 = vector.broadcast %cst_604 : f32 to vector<24x128xf32>
    %1833 = arith.mulf %1832, %1831 : vector<24x128xf32>
    %1834 = arith.subf %1833, %1823 : vector<24x128xf32>
    %1835 = arith.select %1829, %1834, %1823 : vector<24x128xi1>, vector<24x128xf32>
    %cst_605 = arith.constant 0.000000e+00 : f32
    %1836 = vector.broadcast %cst_605 : f32 to vector<24x128xf32>
    %1837 = arith.subf %1836, %1798 : vector<24x128xf32>
    %cst_606 = arith.constant 3.000000e+00 : f32
    %1838 = vector.broadcast %cst_606 : f32 to vector<24x128xf32>
    %1839 = arith.maximumf %1837, %1838 : vector<24x128xf32>
    %1840 = tpu.reciprocal %1839 {approx = true} : vector<24x128xf32> -> vector<24x128xf32>
    %1841 = arith.mulf %1840, %1840 : vector<24x128xf32>
    %cst_607 = arith.constant 0.564189613 : f32
    %1842 = vector.broadcast %cst_607 : f32 to vector<24x128xf32>
    %1843 = arith.mulf %1842, %1840 : vector<24x128xf32>
    %cst_608 = arith.constant 5.000000e-01 : f32
    %1844 = vector.broadcast %cst_608 : f32 to vector<24x128xf32>
    %1845 = arith.mulf %1844, %1841 : vector<24x128xf32>
    %cst_609 = arith.constant 1.000000e+00 : f32
    %1846 = vector.broadcast %cst_609 : f32 to vector<24x128xf32>
    %1847 = arith.subf %1846, %1845 : vector<24x128xf32>
    %cst_610 = arith.constant 7.500000e-01 : f32
    %1848 = vector.broadcast %cst_610 : f32 to vector<24x128xf32>
    %1849 = arith.mulf %1848, %1841 : vector<24x128xf32>
    %1850 = arith.mulf %1849, %1841 : vector<24x128xf32>
    %1851 = arith.addf %1847, %1850 : vector<24x128xf32>
    %cst_611 = arith.constant 1.875000e+00 : f32
    %1852 = vector.broadcast %cst_611 : f32 to vector<24x128xf32>
    %1853 = arith.mulf %1852, %1841 : vector<24x128xf32>
    %1854 = arith.mulf %1853, %1841 : vector<24x128xf32>
    %1855 = arith.mulf %1854, %1841 : vector<24x128xf32>
    %1856 = arith.subf %1851, %1855 : vector<24x128xf32>
    %1857 = arith.mulf %1843, %1856 : vector<24x128xf32>
    %cst_612 = arith.constant -3.000000e+00 : f32
    %1858 = vector.broadcast %cst_612 : f32 to vector<24x128xf32>
    %1859 = arith.cmpf ole, %1798, %1858 : vector<24x128xf32>
    %1860 = arith.select %1859, %1857, %1835 : vector<24x128xi1>, vector<24x128xf32>
    %cst_613 = arith.constant 0.886226952 : f32
    %1861 = vector.broadcast %cst_613 : f32 to vector<24x128xf32>
    %1862 = arith.mulf %1861, %1860 : vector<24x128xf32>
    %1863 = arith.mulf %1803, %1862 : vector<24x128xf32>
    %1864 = arith.mulf %1863, %1863 : vector<24x128xf32>
    %cst_614 = arith.constant 0.0123412302 : f32
    %1865 = vector.broadcast %cst_614 : f32 to vector<24x128xf32>
    %1866 = arith.mulf %1865, %1864 : vector<24x128xf32>
    %1867 = arith.addf %1795, %1866 : vector<24x128xf32>
    %1868 = arith.mulf %134, %1867 : vector<24x128xf32>
    %1869 = vector.broadcast %48 : vector<24x1xf32> to vector<24x128xf32>
    %1870 = arith.mulf %1869, %1868 : vector<24x128xf32>
    %cst_615 = arith.constant dense<0.000000e+00> : vector<128xf32>
    %1871 = vector.multi_reduction <add>, %1870, %cst_615 [0] : vector<24x128xf32> to vector<128xf32>
    %1872 = vector.shape_cast %1871 : vector<128xf32> to vector<1x128xf32>
    %1873 = arith.mulf %46, %1872 : vector<1x128xf32>
    %cst_616 = arith.constant 3.200000e+03 : f32
    %1874 = vector.broadcast %cst_616 : f32 to vector<1x128xf32>
    %1875 = arith.mulf %1874, %1873 : vector<1x128xf32>
    %1876 = arith.mulf %122, %122 : vector<1x128xf32>
    %1877 = arith.mulf %1876, %122 : vector<1x128xf32>
    %1878 = arith.mulf %1877, %1875 : vector<1x128xf32>
    %cst_617 = arith.constant 0.000000e+00 : f32
    %1879 = vector.broadcast %cst_617 : f32 to vector<1x128xf32>
    %1880 = arith.maximumf %1878, %1879 : vector<1x128xf32>
    %1881 = arith.mulf %122, %122 : vector<1x128xf32>
    %cst_618 = arith.constant 178.885437 : f32
    %1882 = vector.broadcast %cst_618 : f32 to vector<1x128xf32>
    %1883 = arith.mulf %1881, %1882 : vector<1x128xf32>
    %1884 = math.absf %33 : vector<1x128xf32>
    %cst_619 = arith.constant 0.327591091 : f32
    %1885 = vector.broadcast %cst_619 : f32 to vector<1x128xf32>
    %1886 = arith.mulf %1885, %1884 : vector<1x128xf32>
    %cst_620 = arith.constant 1.000000e+00 : f32
    %1887 = vector.broadcast %cst_620 : f32 to vector<1x128xf32>
    %1888 = arith.addf %1887, %1886 : vector<1x128xf32>
    %1889 = tpu.reciprocal %1888 {approx = true} : vector<1x128xf32> -> vector<1x128xf32>
    %cst_621 = arith.constant 1.06140542 : f32
    %1890 = vector.broadcast %cst_621 : f32 to vector<1x128xf32>
    %1891 = arith.mulf %1890, %1889 : vector<1x128xf32>
    %cst_622 = arith.constant 1.45315206 : f32
    %1892 = vector.broadcast %cst_622 : f32 to vector<1x128xf32>
    %1893 = arith.subf %1891, %1892 : vector<1x128xf32>
    %1894 = arith.mulf %1893, %1889 : vector<1x128xf32>
    %cst_623 = arith.constant 1.42141378 : f32
    %1895 = vector.broadcast %cst_623 : f32 to vector<1x128xf32>
    %1896 = arith.addf %1894, %1895 : vector<1x128xf32>
    %1897 = arith.mulf %1896, %1889 : vector<1x128xf32>
    %cst_624 = arith.constant 0.284496725 : f32
    %1898 = vector.broadcast %cst_624 : f32 to vector<1x128xf32>
    %1899 = arith.subf %1897, %1898 : vector<1x128xf32>
    %1900 = arith.mulf %1899, %1889 : vector<1x128xf32>
    %cst_625 = arith.constant 0.254829586 : f32
    %1901 = vector.broadcast %cst_625 : f32 to vector<1x128xf32>
    %1902 = arith.addf %1900, %1901 : vector<1x128xf32>
    %1903 = arith.mulf %1902, %1889 : vector<1x128xf32>
    %cst_626 = arith.constant 0.000000e+00 : f32
    %cst_627 = arith.constant 6.000000e+00 : f32
    %1904 = vector.broadcast %cst_626 : f32 to vector<1x128xf32>
    %1905 = arith.maximumf %1904, %33 : vector<1x128xf32>
    %1906 = vector.broadcast %cst_627 : f32 to vector<1x128xf32>
    %1907 = arith.minimumf %1906, %1905 : vector<1x128xf32>
    %cst_628 = arith.constant 0.000000e+00 : f32
    %1908 = vector.broadcast %cst_628 : f32 to vector<1x128xf32>
    %1909 = arith.cmpf ogt, %33, %1908 : vector<1x128xf32>
    %1910 = arith.mulf %1907, %1907 : vector<1x128xf32>
    %1911 = math.exp %1910 : vector<1x128xf32>
    %cst_629 = arith.constant 2.000000e+00 : f32
    %1912 = vector.broadcast %cst_629 : f32 to vector<1x128xf32>
    %1913 = arith.mulf %1912, %1911 : vector<1x128xf32>
    %1914 = arith.subf %1913, %1903 : vector<1x128xf32>
    %1915 = arith.select %1909, %1914, %1903 : vector<1x128xi1>, vector<1x128xf32>
    %cst_630 = arith.constant 0.000000e+00 : f32
    %1916 = vector.broadcast %cst_630 : f32 to vector<1x128xf32>
    %1917 = arith.subf %1916, %33 : vector<1x128xf32>
    %cst_631 = arith.constant 3.000000e+00 : f32
    %1918 = vector.broadcast %cst_631 : f32 to vector<1x128xf32>
    %1919 = arith.maximumf %1917, %1918 : vector<1x128xf32>
    %1920 = tpu.reciprocal %1919 {approx = true} : vector<1x128xf32> -> vector<1x128xf32>
    %1921 = arith.mulf %1920, %1920 : vector<1x128xf32>
    %cst_632 = arith.constant 0.564189613 : f32
    %1922 = vector.broadcast %cst_632 : f32 to vector<1x128xf32>
    %1923 = arith.mulf %1922, %1920 : vector<1x128xf32>
    %cst_633 = arith.constant 5.000000e-01 : f32
    %1924 = vector.broadcast %cst_633 : f32 to vector<1x128xf32>
    %1925 = arith.mulf %1924, %1921 : vector<1x128xf32>
    %cst_634 = arith.constant 1.000000e+00 : f32
    %1926 = vector.broadcast %cst_634 : f32 to vector<1x128xf32>
    %1927 = arith.subf %1926, %1925 : vector<1x128xf32>
    %cst_635 = arith.constant 7.500000e-01 : f32
    %1928 = vector.broadcast %cst_635 : f32 to vector<1x128xf32>
    %1929 = arith.mulf %1928, %1921 : vector<1x128xf32>
    %1930 = arith.mulf %1929, %1921 : vector<1x128xf32>
    %1931 = arith.addf %1927, %1930 : vector<1x128xf32>
    %cst_636 = arith.constant 1.875000e+00 : f32
    %1932 = vector.broadcast %cst_636 : f32 to vector<1x128xf32>
    %1933 = arith.mulf %1932, %1921 : vector<1x128xf32>
    %1934 = arith.mulf %1933, %1921 : vector<1x128xf32>
    %1935 = arith.mulf %1934, %1921 : vector<1x128xf32>
    %1936 = arith.subf %1931, %1935 : vector<1x128xf32>
    %1937 = arith.mulf %1923, %1936 : vector<1x128xf32>
    %cst_637 = arith.constant -3.000000e+00 : f32
    %1938 = vector.broadcast %cst_637 : f32 to vector<1x128xf32>
    %1939 = arith.cmpf ole, %33, %1938 : vector<1x128xf32>
    %1940 = arith.select %1939, %1937, %1915 : vector<1x128xi1>, vector<1x128xf32>
    %cst_638 = arith.constant 0.886226952 : f32
    %1941 = vector.broadcast %cst_638 : f32 to vector<1x128xf32>
    %1942 = arith.mulf %1941, %1940 : vector<1x128xf32>
    %1943 = math.absf %40 : vector<1x128xf32>
    %cst_639 = arith.constant 0.327591091 : f32
    %1944 = vector.broadcast %cst_639 : f32 to vector<1x128xf32>
    %1945 = arith.mulf %1944, %1943 : vector<1x128xf32>
    %cst_640 = arith.constant 1.000000e+00 : f32
    %1946 = vector.broadcast %cst_640 : f32 to vector<1x128xf32>
    %1947 = arith.addf %1946, %1945 : vector<1x128xf32>
    %1948 = tpu.reciprocal %1947 {approx = true} : vector<1x128xf32> -> vector<1x128xf32>
    %cst_641 = arith.constant 1.06140542 : f32
    %1949 = vector.broadcast %cst_641 : f32 to vector<1x128xf32>
    %1950 = arith.mulf %1949, %1948 : vector<1x128xf32>
    %cst_642 = arith.constant 1.45315206 : f32
    %1951 = vector.broadcast %cst_642 : f32 to vector<1x128xf32>
    %1952 = arith.subf %1950, %1951 : vector<1x128xf32>
    %1953 = arith.mulf %1952, %1948 : vector<1x128xf32>
    %cst_643 = arith.constant 1.42141378 : f32
    %1954 = vector.broadcast %cst_643 : f32 to vector<1x128xf32>
    %1955 = arith.addf %1953, %1954 : vector<1x128xf32>
    %1956 = arith.mulf %1955, %1948 : vector<1x128xf32>
    %cst_644 = arith.constant 0.284496725 : f32
    %1957 = vector.broadcast %cst_644 : f32 to vector<1x128xf32>
    %1958 = arith.subf %1956, %1957 : vector<1x128xf32>
    %1959 = arith.mulf %1958, %1948 : vector<1x128xf32>
    %cst_645 = arith.constant 0.254829586 : f32
    %1960 = vector.broadcast %cst_645 : f32 to vector<1x128xf32>
    %1961 = arith.addf %1959, %1960 : vector<1x128xf32>
    %1962 = arith.mulf %1961, %1948 : vector<1x128xf32>
    %cst_646 = arith.constant 0.000000e+00 : f32
    %cst_647 = arith.constant 6.000000e+00 : f32
    %1963 = vector.broadcast %cst_646 : f32 to vector<1x128xf32>
    %1964 = arith.maximumf %1963, %40 : vector<1x128xf32>
    %1965 = vector.broadcast %cst_647 : f32 to vector<1x128xf32>
    %1966 = arith.minimumf %1965, %1964 : vector<1x128xf32>
    %cst_648 = arith.constant 0.000000e+00 : f32
    %1967 = vector.broadcast %cst_648 : f32 to vector<1x128xf32>
    %1968 = arith.cmpf ogt, %40, %1967 : vector<1x128xf32>
    %1969 = arith.mulf %1966, %1966 : vector<1x128xf32>
    %1970 = math.exp %1969 : vector<1x128xf32>
    %cst_649 = arith.constant 2.000000e+00 : f32
    %1971 = vector.broadcast %cst_649 : f32 to vector<1x128xf32>
    %1972 = arith.mulf %1971, %1970 : vector<1x128xf32>
    %1973 = arith.subf %1972, %1962 : vector<1x128xf32>
    %1974 = arith.select %1968, %1973, %1962 : vector<1x128xi1>, vector<1x128xf32>
    %cst_650 = arith.constant 0.000000e+00 : f32
    %1975 = vector.broadcast %cst_650 : f32 to vector<1x128xf32>
    %1976 = arith.subf %1975, %40 : vector<1x128xf32>
    %cst_651 = arith.constant 3.000000e+00 : f32
    %1977 = vector.broadcast %cst_651 : f32 to vector<1x128xf32>
    %1978 = arith.maximumf %1976, %1977 : vector<1x128xf32>
    %1979 = tpu.reciprocal %1978 {approx = true} : vector<1x128xf32> -> vector<1x128xf32>
    %1980 = arith.mulf %1979, %1979 : vector<1x128xf32>
    %cst_652 = arith.constant 0.564189613 : f32
    %1981 = vector.broadcast %cst_652 : f32 to vector<1x128xf32>
    %1982 = arith.mulf %1981, %1979 : vector<1x128xf32>
    %cst_653 = arith.constant 5.000000e-01 : f32
    %1983 = vector.broadcast %cst_653 : f32 to vector<1x128xf32>
    %1984 = arith.mulf %1983, %1980 : vector<1x128xf32>
    %cst_654 = arith.constant 1.000000e+00 : f32
    %1985 = vector.broadcast %cst_654 : f32 to vector<1x128xf32>
    %1986 = arith.subf %1985, %1984 : vector<1x128xf32>
    %cst_655 = arith.constant 7.500000e-01 : f32
    %1987 = vector.broadcast %cst_655 : f32 to vector<1x128xf32>
    %1988 = arith.mulf %1987, %1980 : vector<1x128xf32>
    %1989 = arith.mulf %1988, %1980 : vector<1x128xf32>
    %1990 = arith.addf %1986, %1989 : vector<1x128xf32>
    %cst_656 = arith.constant 1.875000e+00 : f32
    %1991 = vector.broadcast %cst_656 : f32 to vector<1x128xf32>
    %1992 = arith.mulf %1991, %1980 : vector<1x128xf32>
    %1993 = arith.mulf %1992, %1980 : vector<1x128xf32>
    %1994 = arith.mulf %1993, %1980 : vector<1x128xf32>
    %1995 = arith.subf %1990, %1994 : vector<1x128xf32>
    %1996 = arith.mulf %1982, %1995 : vector<1x128xf32>
    %cst_657 = arith.constant -3.000000e+00 : f32
    %1997 = vector.broadcast %cst_657 : f32 to vector<1x128xf32>
    %1998 = arith.cmpf ole, %40, %1997 : vector<1x128xf32>
    %1999 = arith.select %1998, %1996, %1974 : vector<1x128xi1>, vector<1x128xf32>
    %cst_658 = arith.constant 0.886226952 : f32
    %2000 = vector.broadcast %cst_658 : f32 to vector<1x128xf32>
    %2001 = arith.mulf %2000, %1999 : vector<1x128xf32>
    %2002 = arith.subf %1942, %2001 : vector<1x128xf32>
    %2003 = arith.mulf %1883, %2002 : vector<1x128xf32>
    %2004 = arith.mulf %2003, %24 : vector<1x128xf32>
    %2005 = vector.broadcast %2004 : vector<1x128xf32> to vector<32x128xf32>
    %2006 = arith.mulf %18, %2005 : vector<32x128xf32>
    %c0_659 = arith.constant 0 : index
    %c0_660 = arith.constant 0 : index
    %2007 = vector.load %arg9[%c0_659, %c0_660] : memref<128x128xf32, #tpu.memory_space<vmem>>, vector<128x128xf32>
    %cst_661 = arith.constant dense<0.000000e+00> : vector<32x128xf32>
    %2008 = tpu.matmul %2006, %2007, %cst_661 {dimension_numbers = #tpu.dot_dimension_numbers<[1], [0], [0], [1], [0, 0, 1, 1], [], []>} : vector<32x128xf32>, vector<128x128xf32>, vector<32x128xf32> -> vector<32x128xf32>
    %2009 = vector.broadcast %2004 : vector<1x128xf32> to vector<32x128xf32>
    %2010 = arith.mulf %2008, %2009 : vector<32x128xf32>
    %2011 = arith.mulf %2010, %17 : vector<32x128xf32>
    %cst_662 = arith.constant 1.000000e+00 : f32
    %2012 = vector.broadcast %cst_662 : f32 to vector<32x128xf32>
    %2013 = arith.subf %2012, %18 : vector<32x128xf32>
    %2014 = arith.mulf %2011, %2013 : vector<32x128xf32>
    %2015 = vector.broadcast %1880 : vector<1x128xf32> to vector<32x128xf32>
    %2016 = arith.mulf %18, %2015 : vector<32x128xf32>
    %2017 = arith.addf %2014, %2016 : vector<32x128xf32>
    %c0_663 = arith.constant 0 : index
    %c0_664 = arith.constant 0 : index
    %c0_665 = arith.constant 0 : index
    %2018 = vector.load %arg12[%c0_663, %c0_664, %c0_665] : memref<1x1x128xf32, #tpu.memory_space<vmem>>, vector<1x1x128xf32>
    %2019 = vector.shape_cast %2018 : vector<1x1x128xf32> to vector<1x128xf32>
    %2020 = vector.shape_cast %122 : vector<1x128xf32> to vector<1x1x128xf32>
    tpu.vector_store %arg12[%c0_663, %c0_664, %c0_665], %2020 {strides = array<i32>} : memref<1x1x128xf32, #tpu.memory_space<vmem>>, vector<1x1x128xf32>,
    %c0_666 = arith.constant 0 : index
    %c0_667 = arith.constant 0 : index
    %c0_668 = arith.constant 0 : index
    %2021 = vector.load %arg13[%c0_666, %c0_667, %c0_668] : memref<1x32x128xf32, #tpu.memory_space<vmem>>, vector<1x32x128xf32>
    %2022 = vector.shape_cast %2021 : vector<1x32x128xf32> to vector<32x128xf32>
    %2023 = vector.shape_cast %2017 : vector<32x128xf32> to vector<1x32x128xf32>
    tpu.vector_store %arg13[%c0_666, %c0_667, %c0_668], %2023 {strides = array<i32>} : memref<1x32x128xf32, #tpu.memory_space<vmem>>, vector<1x32x128xf32>,
    return
  }
  func.func @transform_0(%arg0: i32) -> (i32, i32, i32) {
    %c0_i32 = arith.constant 0 : i32
    %c0_i32_0 = arith.constant 0 : i32
    %c0_i32_1 = arith.constant 0 : i32
    return %arg0, %c0_i32, %c0_i32_0 : i32, i32, i32
  }
  func.func @transform_1(%arg0: i32) -> (i32, i32, i32) {
    %c0_i32 = arith.constant 0 : i32
    %c0_i32_0 = arith.constant 0 : i32
    %c0_i32_1 = arith.constant 0 : i32
    return %arg0, %c0_i32, %c0_i32_0 : i32, i32, i32
  }
  func.func @transform_2(%arg0: i32) -> (i32, i32) {
    %c0_i32 = arith.constant 0 : i32
    %c0_i32_0 = arith.constant 0 : i32
    %c0_i32_1 = arith.constant 0 : i32
    return %c0_i32, %c0_i32_0 : i32, i32
  }
  func.func @transform_3(%arg0: i32) -> (i32, i32) {
    %c0_i32 = arith.constant 0 : i32
    %c0_i32_0 = arith.constant 0 : i32
    %c0_i32_1 = arith.constant 0 : i32
    return %c0_i32, %c0_i32_0 : i32, i32
  }
  func.func @transform_4(%arg0: i32) -> (i32, i32) {
    %c0_i32 = arith.constant 0 : i32
    %c0_i32_0 = arith.constant 0 : i32
    %c0_i32_1 = arith.constant 0 : i32
    return %c0_i32, %c0_i32_0 : i32, i32
  }
  func.func @transform_5(%arg0: i32) -> (i32, i32) {
    %c0_i32 = arith.constant 0 : i32
    %c0_i32_0 = arith.constant 0 : i32
    %c0_i32_1 = arith.constant 0 : i32
    return %c0_i32, %c0_i32_0 : i32, i32
  }
  func.func @transform_6(%arg0: i32) -> (i32, i32) {
    %c0_i32 = arith.constant 0 : i32
    %c0_i32_0 = arith.constant 0 : i32
    %c0_i32_1 = arith.constant 0 : i32
    return %c0_i32, %c0_i32_0 : i32, i32
  }
  func.func @transform_7(%arg0: i32) -> (i32, i32) {
    %c0_i32 = arith.constant 0 : i32
    %c0_i32_0 = arith.constant 0 : i32
    %c0_i32_1 = arith.constant 0 : i32
    return %c0_i32, %c0_i32_0 : i32, i32
  }
  func.func @transform_8(%arg0: i32) -> (i32, i32) {
    %c0_i32 = arith.constant 0 : i32
    %c0_i32_0 = arith.constant 0 : i32
    %c0_i32_1 = arith.constant 0 : i32
    return %c0_i32, %c0_i32_0 : i32, i32
  }
  func.func @transform_9(%arg0: i32) -> (i32, i32) {
    %c0_i32 = arith.constant 0 : i32
    %c0_i32_0 = arith.constant 0 : i32
    %c0_i32_1 = arith.constant 0 : i32
    return %c0_i32, %c0_i32_0 : i32, i32
  }
  func.func @transform_10(%arg0: i32) -> (i32, i32) {
    %c0_i32 = arith.constant 0 : i32
    %c0_i32_0 = arith.constant 0 : i32
    %c0_i32_1 = arith.constant 0 : i32
    return %c0_i32, %c0_i32_0 : i32, i32
  }
  func.func @transform_11(%arg0: i32) -> (i32, i32, i32) {
    %c0_i32 = arith.constant 0 : i32
    %c0_i32_0 = arith.constant 0 : i32
    %c0_i32_1 = arith.constant 0 : i32
    return %arg0, %c0_i32, %c0_i32_0 : i32, i32, i32
  }
  func.func @transform_12(%arg0: i32) -> (i32, i32, i32) {
    %c0_i32 = arith.constant 0 : i32
    %c0_i32_0 = arith.constant 0 : i32
    %c0_i32_1 = arith.constant 0 : i32
    return %arg0, %c0_i32, %c0_i32_0 : i32, i32, i32
  }
}

</mosaic_0001>

<bundles_post_ra>
// kernel: mul.21
= control target key start
LH: loop header
LB: loop body
LE: loop exit
PB: predicated region body
PF: predicated region fallthrough
CT: control target
= control target key end

     0   :  { %s364_s0 = inlined_call_operand.vmem [shape: f32[128,128], index: 0, kind: input, shape index: {}]   ;;  %s365_s1 = inlined_call_operand.vmem [shape: f32[128,128], index: 1, kind: input, shape index: {}]   ;;  %s366_s2 = inlined_call_operand.vmem [shape: f32[128,128], index: 2, kind: output, shape index: {}]  }
   0x1   :  { %v3_v0 = vld [vmem:[%s364_s0] sm:$0xff]  ;;  %v160_v2 = vld [vmem:[%s364_s0 + $0x8] sm:$0xff]  ;;  %v163_v5 = vld [vmem:[%s364_s0 + $0x10] sm:$0xff] }
   0x2   :  { %v4_v1 = vld [vmem:[%s365_s1] sm:$0xff]  ;;  %v161_v4 = vld [vmem:[%s365_s1 + $0x8] sm:$0xff]  ;;  %v164_v6 = vld [vmem:[%s365_s1 + $0x10] sm:$0xff] }
   0x3   :  { %v7_v3 = vmul.f32 %v4_v1, %v3_v0  ;;  %v16_v7 = vmul.f32 %v161_v4, %v160_v2  ;;  %v26_v8 = vmul.f32 %v164_v6, %v163_v5  ;;  %v166_v9 = vld [vmem:[%s364_s0 + $0x18] sm:$0xff]  ;;  %v169_v11 = vld [vmem:[%s364_s0 + $0x20] sm:$0xff]  ;;  %v172_v14 = vld [vmem:[%s364_s0 + $0x28] sm:$0xff] }
   0x4   :  { %v167_v10 = vld [vmem:[%s365_s1 + $0x18] sm:$0xff]  ;;  %v170_v13 = vld [vmem:[%s365_s1 + $0x20] sm:$0xff]  ;;  %v173_v15 = vld [vmem:[%s365_s1 + $0x28] sm:$0xff] }
   0x5   :  { %9 = vst [vmem:[%s366_s2] sm:$0xff] %v7_v3  ;;  %v36_v12 = vmul.f32 %v167_v10, %v166_v9  ;;  %162 = vst [vmem:[%s366_s2 + $0x8] sm:$0xff] %v16_v7  ;;  %v46_v16 = vmul.f32 %v170_v13, %v169_v11  ;;  %v56_v17 = vmul.f32 %v173_v15, %v172_v14  ;;  %v175_v18 = vld [vmem:[%s364_s0 + $0x30] sm:$0xff]  ;;  %v178_v20 = vld [vmem:[%s364_s0 + $0x38] sm:$0xff] }
   0x6   :  { %165 = vst [vmem:[%s366_s2 + $0x10] sm:$0xff] %v26_v8  ;;  %v176_v19 = vld [vmem:[%s365_s1 + $0x30] sm:$0xff]  ;;  %v179_v22 = vld [vmem:[%s365_s1 + $0x38] sm:$0xff]  ;;  %v181_v23 = vld [vmem:[%s364_s0 + $0x40] sm:$0xff] }
   0x7   :  { %168 = vst [vmem:[%s366_s2 + $0x18] sm:$0xff] %v36_v12  ;;  %v66_v21 = vmul.f32 %v176_v19, %v175_v18  ;;  %v182_v24 = vld [vmem:[%s365_s1 + $0x40] sm:$0xff]  ;;  %171 = vst [vmem:[%s366_s2 + $0x20] sm:$0xff] %v46_v16  ;;  %v76_v25 = vmul.f32 %v179_v22, %v178_v20  ;;  %v184_v27 = vld [vmem:[%s364_s0 + $0x48] sm:$0xff] }
   0x8   :  { %174 = vst [vmem:[%s366_s2 + $0x28] sm:$0xff] %v56_v17  ;;  %v86_v26 = vmul.f32 %v182_v24, %v181_v23  ;;  %v185_v28 = vld [vmem:[%s365_s1 + $0x48] sm:$0xff]  ;;  %v187_v29 = vld [vmem:[%s364_s0 + $0x50] sm:$0xff]  ;;  %v190_v32 = vld [vmem:[%s364_s0 + $0x58] sm:$0xff] }
   0x9   :  { %177 = vst [vmem:[%s366_s2 + $0x30] sm:$0xff] %v66_v21  ;;  %v96_v30 = vmul.f32 %v185_v28, %v184_v27  ;;  %v188_v31 = vld [vmem:[%s365_s1 + $0x50] sm:$0xff]  ;;  %v191_v33 = vld [vmem:[%s365_s1 + $0x58] sm:$0xff]  ;;  %180 = vst [vmem:[%s366_s2 + $0x38] sm:$0xff] %v76_v25 }
   0xa   :  { %183 = vst [vmem:[%s366_s2 + $0x40] sm:$0xff] %v86_v26  ;;  %v106_v34 = vmul.f32 %v188_v31, %v187_v29  ;;  %v116_v35 = vmul.f32 %v191_v33, %v190_v32  ;;  %v193_v36 = vld [vmem:[%s364_s0 + $0x60] sm:$0xff]  ;;  %v196_v38 = vld [vmem:[%s364_s0 + $0x68] sm:$0xff]  ;;  %v199_v41 = vld [vmem:[%s364_s0 + $0x70] sm:$0xff] }
   0xb   :  { %v194_v37 = vld [vmem:[%s365_s1 + $0x60] sm:$0xff]  ;;  %186 = vst [vmem:[%s366_s2 + $0x48] sm:$0xff] %v96_v30  ;;  %v197_v40 = vld [vmem:[%s365_s1 + $0x68] sm:$0xff]  ;;  %v200_v42 = vld [vmem:[%s365_s1 + $0x70] sm:$0xff] }
   0xc   :  { %v126_v39 = vmul.f32 %v194_v37, %v193_v36  ;;  %189 = vst [vmem:[%s366_s2 + $0x50] sm:$0xff] %v106_v34  ;;  %192 = vst [vmem:[%s366_s2 + $0x58] sm:$0xff] %v116_v35  ;;  %v136_v43 = vmul.f32 %v197_v40, %v196_v38  ;;  %v146_v44 = vmul.f32 %v200_v42, %v199_v41  ;;  %v202_v45 = vld [vmem:[%s364_s0 + $0x78] sm:$0xff] }
   0xd   :  { %v203_v46 = vld [vmem:[%s365_s1 + $0x78] sm:$0xff] }
   0xe   :  { %195 = vst [vmem:[%s366_s2 + $0x60] sm:$0xff] %v126_v39  ;;  %v156_v47 = vmul.f32 %v203_v46, %v202_v45  ;;  %198 = vst [vmem:[%s366_s2 + $0x68] sm:$0xff] %v136_v43 }
   0xf   :  { %201 = vst [vmem:[%s366_s2 + $0x70] sm:$0xff] %v146_v44 }
  0x10   :  { %204 = vst [vmem:[%s366_s2 + $0x78] sm:$0xff] %v156_v47 }

// kernel: tile.19
= control target key start
LH: loop header
LB: loop body
LE: loop exit
PB: predicated region body
PF: predicated region fallthrough
CT: control target
= control target key end

     0   :  { %vm162_vm0 = vcmask 1047556   ;;  %s398_s10 = smov 96   ;;  %vm164_vm1 = vcmask 261120   ;;  %s400_s21 = smov 32   ;;  %vm201_vm2 = vcmask 1048320   ;;  %vm244_vm3 = vcmask 785920   ;;  %s579_s0 = inlined_call_operand.vmem [shape: f32[32,4,32], index: 0, kind: input, shape index: {}]   ;;  %s580_s1 = inlined_call_operand.vmem [shape: f32[32,128], index: 1, kind: output, shape index: {}]  }
   0x1   :  { %v376_v0 = vld [vmem:[%s579_s0 + $0x1c] sm:$0xf]  ;;  %v377_v1 = vld [vmem:[%s579_s0 + $0x18] sm:$0xf]  ;;  %v378_v2 = vld [vmem:[%s579_s0 + $0x14] sm:$0xf] }
   0x2   :  { %128 = vst [vmem:[#allocation0 + $0x38] sm:$0xf] %v376_v0  ;;  %133 = vst [vmem:[#allocation0 + $0x30] sm:$0xf] %v377_v1  ;;  %v379_v3 = vld [vmem:[%s579_s0 + $0x10] sm:$0xf] }
   0x3   :  { %138 = vst [vmem:[#allocation0 + $0x28] sm:$0xf] %v378_v2  ;;  %v380_v4 = vld [vmem:[%s579_s0 + $0xc] sm:$0xf]  ;;  %v381_v5 = vld [vmem:[%s579_s0 + $0x8] sm:$0xf] }
   0x4   :  { %143 = vst [vmem:[#allocation0 + $0x20] sm:$0xf] %v379_v3  ;;  %148 = vst [vmem:[#allocation0 + $0x18] sm:$0xf] %v380_v4  ;;  %v382_v6 = vld [vmem:[%s579_s0 + $0x4] sm:$0xf] }
   0x5   :  { %153 = vst [vmem:[#allocation0 + $0x10] sm:$0xf] %v381_v5  ;;  %v158_v7 = vld [vmem:[%s579_s0] sm:$0xf]  ;;  %157 = vst [vmem:[#allocation0 + $0x8] sm:$0xf] %v382_v6 }
   0x6   :  { %159 = vst [vmem:[#allocation0] sm:$0xf] %v158_v7  ;;  %v360_v8 = vld [vmem:[%s579_s0 + $0x5c] sm:$0xf]  ;;  %v361_v9 = vld [vmem:[%s579_s0 + $0x58] sm:$0xf] }
   0x7   :  { %v362_v10 = vld [vmem:[%s579_s0 + $0x54] sm:$0xf]  ;;  %48 = vst [vmem:[#allocation0 + $0xb8] sm:$0xf] %v360_v8  ;;  %53 = vst [vmem:[#allocation0 + $0xb0] sm:$0xf] %v361_v9 }
   0x8   :  { %58 = vst [vmem:[#allocation0 + $0xa8] sm:$0xf] %v362_v10  ;;  %v363_v11 = vld [vmem:[%s579_s0 + $0x50] sm:$0xf]  ;;  %v364_v12 = vld [vmem:[%s579_s0 + $0x4c] sm:$0xf] }
   0x9   :  { %v365_v13 = vld [vmem:[%s579_s0 + $0x48] sm:$0xf]  ;;  %63 = vst [vmem:[#allocation0 + $0xa0] sm:$0xf] %v363_v11  ;;  %68 = vst [vmem:[#allocation0 + $0x98] sm:$0xf] %v364_v12 }
   0xa   :  { %73 = vst [vmem:[#allocation0 + $0x90] sm:$0xf] %v365_v13  ;;  %v366_v14 = vld [vmem:[%s579_s0 + $0x44] sm:$0xf]  ;;  %v367_v15 = vld [vmem:[%s579_s0 + $0x40] sm:$0xf] }
   0xb   :  { %v368_v16 = vld [vmem:[%s579_s0 + $0x3c] sm:$0xf]  ;;  %78 = vst [vmem:[#allocation0 + $0x88] sm:$0xf] %v366_v14  ;;  %83 = vst [vmem:[#allocation0 + $0x80] sm:$0xf] %v367_v15 }
   0xc   :  { %88 = vst [vmem:[#allocation0 + $0x78] sm:$0xf] %v368_v16  ;;  %v369_v17 = vld [vmem:[%s579_s0 + $0x38] sm:$0xf]  ;;  %v370_v18 = vld [vmem:[%s579_s0 + $0x34] sm:$0xf] }
   0xd   :  { %v371_v19 = vld [vmem:[%s579_s0 + $0x30] sm:$0xf]  ;;  %93 = vst [vmem:[#allocation0 + $0x70] sm:$0xf] %v369_v17  ;;  %98 = vst [vmem:[#allocation0 + $0x68] sm:$0xf] %v370_v18 }
   0xe   :  { %103 = vst [vmem:[#allocation0 + $0x60] sm:$0xf] %v371_v19  ;;  %v372_v20 = vld [vmem:[%s579_s0 + $0x2c] sm:$0xf]  ;;  %v373_v21 = vld [vmem:[%s579_s0 + $0x28] sm:$0xf] }
   0xf   :  { %v374_v22 = vld [vmem:[%s579_s0 + $0x24] sm:$0xf]  ;;  %108 = vst [vmem:[#allocation0 + $0x58] sm:$0xf] %v372_v20  ;;  %113 = vst [vmem:[#allocation0 + $0x50] sm:$0xf] %v373_v21 }
  0x10   :  { %118 = vst [vmem:[#allocation0 + $0x48] sm:$0xf] %v374_v22  ;;  %v375_v23 = vld [vmem:[%s579_s0 + $0x20] sm:$0xf]  ;;  %v352_v24 = vld [vmem:[%s579_s0 + $0x7c] sm:$0xf] }
  0x11   :  { %v353_v25 = vld [vmem:[%s579_s0 + $0x78] sm:$0xf]  ;;  %123 = vst [vmem:[#allocation0 + $0x40] sm:$0xf] %v375_v23  ;;  %8 = vst [vmem:[#allocation0 + $0xf8] sm:$0xf] %v352_v24 }
  0x12   :  { %v196_v26 = vld [vmem:[#allocation0 + $0x3] ss:$8 sm:$0xf0]   ;;  %13 = vst [vmem:[#allocation0 + $0xf0] sm:$0xf] %v353_v25  ;;  %vm287_vm4 = vcmask 523520  }
  0x13   :  { %v354_v27 = vld [vmem:[%s579_s0 + $0x74] sm:$0xf]  ;;  %v194_v28 = vld [vmem:[#allocation0 + $0x3] ss:$8 sm:$0xf]  }
  0x14   :  { %18 = vst [vmem:[#allocation0 + $0xe8] sm:$0xf] %v354_v27  ;;  %v355_v29 = vld [vmem:[%s579_s0 + $0x70] sm:$0xf]  ;;  %v198_v30 = vsel %vm162_vm0, %v196_v26, %v194_v28  ;;  %v356_v31 = vld [vmem:[%s579_s0 + $0x6c] sm:$0xf] }
  0x15   :  { %23 = vst [vmem:[#allocation0 + $0xe0] sm:$0xf] %v355_v29  ;;  %v357_v32 = vld [vmem:[%s579_s0 + $0x68] sm:$0xf]  ;;  %v358_v33 = vld [vmem:[%s579_s0 + $0x64] sm:$0xf]  ;;  %199 = vrot.lane.b32.xlu0 %v198_v30, %s398_s10 }
  0x16   :  { %v217_v34 = vld [vmem:[#allocation0 + $0x83] ss:$8 sm:$0xf0]   ;;  %28 = vst [vmem:[#allocation0 + $0xd8] sm:$0xf] %v356_v31 }
  0x17   :  { %33 = vst [vmem:[#allocation0 + $0xd0] sm:$0xf] %v357_v32  ;;  %38 = vst [vmem:[#allocation0 + $0xc8] sm:$0xf] %v358_v33  ;;  %v359_v35 = vld [vmem:[%s579_s0 + $0x60] sm:$0xf] }
  0x18   :  { %v215_v36 = vld [vmem:[#allocation0 + $0x83] ss:$8 sm:$0xf]   ;;  %43 = vst [vmem:[#allocation0 + $0xc0] sm:$0xf] %v359_v35  ;;  %s399_s0 = smov 64  }
  0x19   :  { %v219_v37 = vsel %vm162_vm0, %v217_v34, %v215_v36  ;;  %v206_v38 = vld [vmem:[#allocation0 + $0x43] ss:$8 sm:$0xf0]   ;;  %v237_v39 = vld [vmem:[#allocation0 + $0x2] ss:$8 sm:$0xf]  }
  0x1a   :  { %220 = vrot.lane.b32.xlu1 %v219_v37, %s398_s10  ;;  %v204_v40 = vld [vmem:[#allocation0 + $0x43] ss:$8 sm:$0xf]   ;;  %v239_v41 = vld [vmem:[#allocation0 + $0x2] ss:$8 sm:$0xf0]  }
  0x1b   :  { %v208_v42 = vsel %vm162_vm0, %v206_v38, %v204_v40  ;;  %v249_v44 = vld [vmem:[#allocation0 + $0x42] ss:$8 sm:$0xf0]   ;;  %v241_v45 = vsel %vm162_vm0, %v239_v41, %v237_v39  ;;  %v280_v52 = vld [vmem:[#allocation0 + $0x1] ss:$8 sm:$0xf]  }
  0x1c   :  { %209 = vrot.lane.b32.xlu0 %v208_v42, %s398_s10  ;;  %v228_v43 = vld [vmem:[#allocation0 + $0xc3] ss:$8 sm:$0xf0]   ;;  %v247_v46 = vld [vmem:[#allocation0 + $0x42] ss:$8 sm:$0xf]  }
  0x1d   :  { %v258_v47 = vld [vmem:[#allocation0 + $0x82] ss:$8 sm:$0xf]   ;;  %v251_v53 = vsel %vm162_vm0, %v249_v44, %v247_v46  ;;  %v282_v55 = vld [vmem:[#allocation0 + $0x1] ss:$8 sm:$0xf0]  }
  0x1e   :  { %v260_v49 = vld [vmem:[#allocation0 + $0x82] ss:$8 sm:$0xf0]   ;;  %v160_v56 = vld [vmem:[#allocation0] ss:$8 sm:$0xf]   ;;  %v284_v4 = vsel %vm162_vm0, %v282_v55, %v280_v52 }
  0x1f   :  { %v226_v48 = vld [vmem:[#allocation0 + $0xc3] ss:$8 sm:$0xf]   ;;  %v271_v51 = vld [vmem:[#allocation0 + $0xc2] ss:$8 sm:$0xf0]   ;;  %v262_v54 = vsel %vm162_vm0, %v260_v49, %v258_v47 }
  0x20   :  { %v230_v50 = vsel %vm162_vm0, %v228_v43, %v226_v48  ;;  %242 = vrot.lane.b32.xlu0 %v241_v45, %s399_s0  ;;  %v269_v57 = vld [vmem:[#allocation0 + $0xc2] ss:$8 sm:$0xf]   ;;  %v161_v58 = vld [vmem:[#allocation0] ss:$8 sm:$0xf0]  }
  0x21   :  { %231 = vrot.lane.b32.xlu1 %v230_v50, %s398_s10  ;;  %v163_v59 = vsel %vm162_vm0, %v161_v58, %v160_v56  ;;  %v176_v60 = vld [vmem:[#allocation0 + $0x80] ss:$8 sm:$0xf]   ;;  %v290_v62 = vld [vmem:[#allocation0 + $0x41] ss:$8 sm:$0xf]   ;;  %v273_v3 = vsel %vm162_vm0, %v271_v51, %v269_v57 }
  0x22   :  { %v178_v61 = vld [vmem:[#allocation0 + $0x80] ss:$8 sm:$0xf0]   ;;  %v292_v63 = vld [vmem:[#allocation0 + $0x41] ss:$8 sm:$0xf0]  }
  0x23   :  { %165 = vst.msk [vmem:[%s580_s1] sm:$0xff] %vm164_vm1, %v163_v59   ;;  %v180_v0 = vsel %vm162_vm0, %v178_v61, %v176_v60  ;;  %v167_v1 = vld [vmem:[#allocation0 + $0x40] ss:$8 sm:$0xf]   ;;  %v294_v11 = vsel %vm162_vm0, %v292_v63, %v290_v62 }
  0x24   :  { %263 = vrot.lane.b32.xlu0 %v262_v54, %s399_s0  ;;  %v169_v2 = vld [vmem:[#allocation0 + $0x40] ss:$8 sm:$0xf0]   ;;  %384 = vst.msk [vmem:[%s580_s1 + $0x10] sm:$0xff] %vm164_vm1, %v180_v0  }
  0x25   :  { %252 = vrot.lane.b32.xlu1 %v251_v53, %s399_s0  ;;  %v171_v5 = vsel %vm162_vm0, %v169_v2, %v167_v1  ;;  %v185_v6 = vld [vmem:[#allocation0 + $0xc0] ss:$8 sm:$0xf]   ;;  %v301_v8 = vld [vmem:[#allocation0 + $0x81] ss:$8 sm:$0xf]  }
  0x26   :  { %v187_v7 = vld [vmem:[#allocation0 + $0xc0] ss:$8 sm:$0xf0]   ;;  %v303_v9 = vld [vmem:[#allocation0 + $0x81] ss:$8 sm:$0xf0]  }
  0x27   :  { %383 = vst.msk [vmem:[%s580_s1 + $0x8] sm:$0xff] %vm164_vm1, %v171_v5   ;;  %v189_v10 = vsel %vm162_vm0, %v187_v7, %v185_v6  ;;  %v305_v12 = vsel %vm162_vm0, %v303_v9, %v301_v8  ;;  %v312_v13 = vld [vmem:[#allocation0 + $0xc1] ss:$8 sm:$0xf]  }
  0x28   :  { %385 = vst.msk [vmem:[%s580_s1 + $0x18] sm:$0xff] %vm164_vm1, %v189_v10   ;;  %285 = vrot.lane.b32.xlu0 %v284_v4, %s400_s21  ;;  %v314_v14 = vld [vmem:[#allocation0 + $0xc1] ss:$8 sm:$0xf0]  }
  0x29   :  { %274 = vrot.lane.b32.xlu1 %v273_v3, %s399_s0  ;;  %v316_v15 = vsel %vm162_vm0, %v314_v14, %v312_v13 }
  0x2c   :  { %306 = vrot.lane.b32.xlu0 %v305_v12, %s400_s21 }
  0x2d   :  { %295 = vrot.lane.b32.xlu1 %v294_v11, %s400_s21 }
  0x31   :  { %317 = vrot.lane.b32.xlu1 %v316_v15, %s400_s21 }
  0x87   :  { %v200_v16 = vpop.permute.xlu0 %199  }
  0x88   :  { %202 = vst.msk [vmem:[%s580_s1] sm:$0xff] %vm201_vm2, %v200_v16  }
  0x8c   :  { %v221_v17 = vpop.permute.xlu1 %220  }
  0x8d   :  { %387 = vst.msk [vmem:[%s580_s1 + $0x10] sm:$0xff] %vm201_vm2, %v221_v17  }
  0x8e   :  { %v210_v18 = vpop.permute.xlu0 %209  }
  0x8f   :  { %386 = vst.msk [vmem:[%s580_s1 + $0x8] sm:$0xff] %vm201_vm2, %v210_v18  }
  0x92   :  { %v243_v20 = vpop.permute.xlu0 %242  }
  0x93   :  { %v232_v19 = vpop.permute.xlu1 %231   ;;  %245 = vst.msk [vmem:[%s580_s1] sm:$0xff] %vm244_vm3, %v243_v20  }
  0x94   :  { %388 = vst.msk [vmem:[%s580_s1 + $0x18] sm:$0xff] %vm201_vm2, %v232_v19  }
  0x96   :  { %v264_v22 = vpop.permute.xlu0 %263  }
  0x97   :  { %v253_v21 = vpop.permute.xlu1 %252   ;;  %390 = vst.msk [vmem:[%s580_s1 + $0x10] sm:$0xff] %vm244_vm3, %v264_v22  }
  0x98   :  { %389 = vst.msk [vmem:[%s580_s1 + $0x8] sm:$0xff] %vm244_vm3, %v253_v21  }
  0x9a   :  { %v286_v24 = vpop.permute.xlu0 %285  }
  0x9b   :  { %v275_v23 = vpop.permute.xlu1 %274   ;;  %288 = vst.msk [vmem:[%s580_s1] sm:$0xff] %vm287_vm4, %v286_v24  }
  0x9c   :  { %391 = vst.msk [vmem:[%s580_s1 + $0x18] sm:$0xff] %vm244_vm3, %v275_v23  }
  0x9e   :  { %v307_v26 = vpop.permute.xlu0 %306  }
  0x9f   :  { %v296_v25 = vpop.permute.xlu1 %295   ;;  %393 = vst.msk [vmem:[%s580_s1 + $0x10] sm:$0xff] %vm287_vm4, %v307_v26  }
  0xa0   :  { %392 = vst.msk [vmem:[%s580_s1 + $0x8] sm:$0xff] %vm287_vm4, %v296_v25  }
  0xa3   :  { %v318_v27 = vpop.permute.xlu1 %317  }
  0xa4   :  { %394 = vst.msk [vmem:[%s580_s1 + $0x18] sm:$0xff] %vm287_vm4, %v318_v27  }

// kernel: tile.23
= control target key start
LH: loop header
LB: loop body
LE: loop exit
PB: predicated region body
PF: predicated region fallthrough
CT: control target
= control target key end

     0   :  { %s22_s0 = inlined_call_operand.vmem [shape: f32[32], index: 0, kind: input, shape index: {}]   ;;  %s23_s1 = inlined_call_operand.vmem [shape: f32[4,32], index: 1, kind: output, shape index: {}]  }
   0x1   :  { %v4_v0 = vld [vmem:[%s22_s0] ss:$0 sm:$0xff] }
   0x2   :  { %5 = vst [vmem:[%s23_s1] sm:$0xf] %v4_v0 }

// kernel: tile.24
= control target key start
LH: loop header
LB: loop body
LE: loop exit
PB: predicated region body
PF: predicated region fallthrough
CT: control target
= control target key end

     0   :  { %vm7_vm0 = vcmask 261120   ;;  %s37_s8 = smov 32   ;;  %s38_s9 = smov 64   ;;  %vm13_vm1 = vcmask 1048320   ;;  %vm19_vm2 = vcmask 785920   ;;  %vm25_vm3 = vcmask 523520   ;;  %s55_s0 = inlined_call_operand.vmem [shape: f32[4,32], index: 0, kind: input, shape index: {}]   ;;  %s56_s1 = inlined_call_operand.vmem [shape: f32[1,128], index: 1, kind: output, shape index: {}]  }
   0x1   :  { %v4_v0 = vld [vmem:[%s55_s0] sm:$0xf]  ;;  %s36_s0 = smov 96  }
   0x2   :  { %5 = vst [vmem:[#allocation1] sm:$0xf] %v4_v0 }
   0x9   :  { %v10_v1 = vld [vmem:[#allocation1 + $0x3] sm:$0x1]   ;;  %v22_v2 = vld [vmem:[#allocation1 + $0x1] sm:$0x1]   ;;  %v6_v3 = vld [vmem:[#allocation1] sm:$0x1]  }
   0xa   :  { %11 = vrot.lane.b32.xlu0 %v10_v1, %s36_s0  ;;  %23 = vrot.lane.b32.xlu1 %v22_v2, %s37_s8  ;;  %v16_v4 = vld [vmem:[#allocation1 + $0x2] sm:$0x1]   ;;  %8 = vst.msk [vmem:[#allocation0] sm:$0x1] %vm7_vm0, %v6_v3  }
   0xe   :  { %17 = vrot.lane.b32.xlu0 %v16_v4, %s38_s9 }
  0x7c   :  { %v12_v5 = vpop.permute.xlu0 %11   ;;  %v24_v6 = vpop.permute.xlu1 %23  }
  0x7d   :  { %14 = vst.msk [vmem:[#allocation0] sm:$0x1] %vm13_vm1, %v12_v5  }
  0x80   :  { %v18_v7 = vpop.permute.xlu0 %17  }
  0x81   :  { %20 = vst.msk [vmem:[#allocation0] sm:$0x1] %vm19_vm2, %v18_v7  }
  0x82   :  { %26 = vst.msk [vmem:[#allocation0] sm:$0x1] %vm25_vm3, %v24_v6  }
  0x89   :  { %v30_v8 = vld [vmem:[#allocation0] sm:$0x1] }
  0x8a   :  { %32 = vst [vmem:[%s56_s1] sm:$0x1] %v30_v8 }

// kernel: ensemble_linear_duo_forward.1
= control target key start
LH: loop header
LB: loop body
LE: loop exit
PB: predicated region body
PF: predicated region fallthrough
CT: control target
= control target key end

     0   :  { %s6209_s21 = smov 0   ;;  %s9632_s0 = inlined_call_operand.vmem [shape: f32[2,1,128], index: 0, kind: input, shape index: {}]   ;;  %s9633_s1 = inlined_call_operand.vmem [shape: f32[2,32,128], index: 1, kind: input, shape index: {}]   ;;  %s9634_s2 = inlined_call_operand.vmem [shape: f32[32,32], index: 2, kind: input, shape index: {}]   ;;  %s9635_s3 = inlined_call_operand.vmem [shape: f32[128,128], index: 3, kind: input, shape index: {}]   ;;  %s9636_s4 = inlined_call_operand.vmem [shape: f32[32,1], index: 4, kind: input, shape index: {}]   ;;  %s9637_s5 = inlined_call_operand.vmem [shape: f32[1,128], index: 5, kind: input, shape index: {}]   ;;  %s9638_s6 = inlined_call_operand.vmem [shape: f32[1,128], index: 6, kind: input, shape index: {}]   ;;  %s9639_s7 = inlined_call_operand.vmem [shape: f32[32,128], index: 7, kind: input, shape index: {}]   ;;  %s9640_s8 = inlined_call_operand.vmem [shape: f32[128,128], index: 8, kind: input, shape index: {}]   ;;  %s9641_s9 = inlined_call_operand.vmem [shape: f32[24,1], index: 9, kind: input, shape index: {}]   ;;  %s9642_s10 = inlined_call_operand.vmem [shape: f32[24,1], index: 10, kind: input, shape index: {}]   ;;  %s9643_s11 = inlined_call_operand.vmem [shape: f32[2,1,128], index: 11, kind: output, shape index: {0}]   ;;  %s9644_s12 = inlined_call_operand.vmem [shape: f32[2,32,128], index: 12, kind: output, shape index: {1}]  }
   0x1 LB: > { %s5035_s22 = sadd.s32 4294967295, %s6138_s21   ;;  %p5039_p0 = scmp.ge.s32.totalorder %s6138_s21, 1  ;;  %s6138_s21 = sphi %s6209_s21, %s23_s21  }
   0x2   : > { %p373_p1 = scmp.lt.s32.totalorder %s6138_s21, 3 }
   0x4   : > { %p374_p2 = pnand %p5039_p0, %p373_p1 }
   0x6   : > { %377 = sbr.rel (%p374_p2) target bundleno = 1576 (0x628), region = 64 }
   0xd   : > { %v442_v0 = vld [vmem:[%s9635_s3] sm:$0xff]  ;;  %v443_v1 = vld [vmem:[%s9635_s3 + $0x8] sm:$0xff]  ;;  %v444_v2 = vld [vmem:[%s9635_s3 + $0x10] sm:$0xff]  ;;  %p421_p3 = scmp.lt.s32.totalorder %s5035_s22, 1  ;;  %v6140_v5 = vmov 0.0|0.0   ;;  %vm6141_vm0 = vmmov 0   ;;  %v744_v54 = vlaneseq }
   0xe   : > { %v5397_v3 = vpack.c.bf16 %v443_v1, %v442_v0  ;;  %v445_v4 = vld [vmem:[%s9635_s3 + $0x18] sm:$0xff]  ;;  %5396 = vmatprep.subr.bf16.mxu0 %v6140_v5  ;;  %v446_v7 = vld [vmem:[%s9635_s3 + $0x20] sm:$0xff]  ;;  %v447_v8 = vld [vmem:[%s9635_s3 + $0x28] sm:$0xff]  ;;  %v6142_v29 = vmov 0.0   ;;  %vm617_vm1 = vcmask 261120   ;;  %v6143_v34 = vmov 0  }
   0xf   : > { %v5400_v6 = vpack.c.bf16 %v445_v4, %v444_v2  ;;  %s9826_s22 = smov (!%p421_p3, %s5035_s22), 1  ;;  %v5403_v9 = vpack.c.bf16 %v447_v8, %v446_v7  ;;  %v448_v10 = vld [vmem:[%s9635_s3 + $0x30] sm:$0xff]  ;;  %v449_v11 = vld [vmem:[%s9635_s3 + $0x38] sm:$0xff]  ;;  %v450_v14 = vld [vmem:[%s9635_s3 + $0x40] sm:$0xff]  ;;  %5303 = vmatprep.mubr.msk.f32.mxu0 %vm6141_vm0, %v6142_v29  ;;  %5504 = vset.pattern.permute.xlu0 %v6143_v34  ;;  %v745_v55 = vshrl.u32 %v744_v54, 7 }
  0x10   : > { %5421 = vmatprep.subr.bf16.mxu1 %v5397_v3  ;;  %5398 = vmatpush3.bf16.msra.mxu0 %v5397_v3  ;;  %s5204_s17 = sshll.u32 %s9826_s22, 5  ;;  %v5406_v13 = vpack.c.bf16 %v449_v11, %v448_v10  ;;  %v451_v15 = vld [vmem:[%s9635_s3 + $0x48] sm:$0xff]  ;;  %v452_v17 = vld [vmem:[%s9635_s3 + $0x50] sm:$0xff]  ;;  %v453_v18 = vld [vmem:[%s9635_s3 + $0x58] sm:$0xff]  ;;  %s423_s13 = scalar_lea.vmem %s9632_s0, %s9826_s22 }
  0x11   : > { %5423 = vmatpush3.bf16.msra.mxu1 %v5397_v3  ;;  %5399 = vmatprep.subr.bf16.mxu0 %v6140_v5  ;;  %s6243_s20 = scalar_lea.vmem %s9633_s1, %s5204_s17  ;;  %v5409_v16 = vpack.c.bf16 %v451_v15, %v450_v14  ;;  %v5412_v19 = vpack.c.bf16 %v453_v18, %v452_v17  ;;  %v454_v20 = vld [vmem:[%s9635_s3 + $0x60] sm:$0xff]  ;;  %v455_v21 = vld [vmem:[%s9635_s3 + $0x68] sm:$0xff]  ;;  %v456_v23 = vld [vmem:[%s9635_s3 + $0x70] sm:$0xff]  ;;  %v6331_v56 = vsub.s32 0, %v745_v55  ;;  %s436_s27 = scalar_lea.vmem %s9644_s12, %s5204_s17 }
  0x12   : > { %5425 = vmatprep.subr.bf16.mxu1 %v5400_v6  ;;  %v438_v12 = vld [vmem:[%s6243_s20] sm:$0xff]  ;;  %v5415_v22 = vpack.c.bf16 %v455_v21, %v454_v20  ;;  %v457_v24 = vld [vmem:[%s9635_s3 + $0x78] sm:$0xff]  ;;  %v439_v26 = vld [vmem:[%s6243_s20 + $0x8] sm:$0xff]  ;;  %5505 = vset.pattern.permute.xlu1 %v6143_v34 }
  0x13   : > { %5338 = vmatprep.mubr.f32.mxu1 %v438_v12  ;;  %v5418_v25 = vpack.c.bf16 %v457_v24, %v456_v23  ;;  %v440_v27 = vld [vmem:[%s6243_s20 + $0x10] sm:$0xff]  ;;  %v441_v28 = vld [vmem:[%s6243_s20 + $0x18] sm:$0xff]  ;;  %v437_v30 = vld [vmem:[%s423_s13] sm:$0x1]  ;;  %9709 = vst [vmem:[#allocation2_spill] sm:$0xff] %v6331_v56  ;;  %s431_s13 = scalar_lea.vmem %s9643_s11, %s9826_s22 }
  0x14   : > { %5401 = vmatpush3.bf16.msra.mxu0 %v5400_v6  ;;  %v613_v31 = vld [vmem:[%s9634_s2] sm:$0xff]  ;;  %v721_v33 = vld [vmem:[%s9636_s4 + $0x10] sm:$0xff]  ;;  %v720_v35 = vld [vmem:[%s9636_s4 + $0x8] sm:$0xff] }
  0x15   : > { %5427 = vmatpush3.bf16.msra.mxu1 %v5400_v6  ;;  %5402 = vmatprep.subr.bf16.mxu0 %v6140_v5  ;;  %v719_v32 = vld [vmem:[%s9636_s4] sm:$0xff]  ;;  %v722_v36 = vld [vmem:[%s9636_s4 + $0x18] sm:$0xff]  ;;  %v790_v38 = vld [vmem:[%s9641_s9 + $0x8] sm:$0xff] }
  0x16   : > { %5429 = vmatprep.subr.bf16.mxu1 %v5403_v9  ;;  %725 = vperm.xlu0 %5504, %v719_v32   ;;  %v789_v37 = vld [vmem:[%s9641_s9] sm:$0xff]  ;;  %v791_v39 = vld [vmem:[%s9641_s9 + $0x10] sm:$0xff]  ;;  %v793_v41 = vld [vmem:[%s9642_s10 + $0x8] sm:$0xff] }
  0x17   : > { %735 = vperm.xlu1 %5505, %v721_v33   ;;  %v792_v40 = vld [vmem:[%s9642_s10] sm:$0xff]  ;;  %v794_v42 = vld [vmem:[%s9642_s10 + $0x10] sm:$0xff]  ;;  %v614_v49 = vld [vmem:[%s9634_s2 + $0x8] sm:$0xff] }
  0x18   : > { %5404 = vmatpush3.bf16.msra.mxu0 %v5403_v9  ;;  %v615_v50 = vld [vmem:[%s9634_s2 + $0x10] sm:$0xff]  ;;  %v616_v51 = vld [vmem:[%s9634_s2 + $0x18] sm:$0xff]  ;;  %v715_v58 = vld [vmem:[%s9637_s5] sm:$0x1] }
  0x19   : > { %5431 = vmatpush3.bf16.msra.mxu1 %v5403_v9  ;;  %5405 = vmatprep.subr.bf16.mxu0 %v6140_v5  ;;  %v747_v59 = vrot.slane %v715_v58, %v6331_v56  ;;  %v6342_v3 = vld [vmem:[%s9639_s7 + $0x8] sm:$0xff]  ;;  %v4812_v24 = vld [vmem:[%s9640_s8] sm:$0xff]  ;;  %v4826_v54 = vld [vmem:[%s9640_s8 + $0x70] sm:$0xff] }
  0x1a   : > { %5433 = vmatprep.subr.bf16.mxu1 %v5406_v13  ;;  %730 = vperm.xlu0 %5504, %v720_v35   ;;  %v4817_v32 = vld [vmem:[%s9640_s8 + $0x28] sm:$0xff]  ;;  %v4827_v55 = vld [vmem:[%s9640_s8 + $0x78] sm:$0xff] }
  0x1b   : > { %740 = vperm.xlu1 %5505, %v722_v36   ;;  %v4818_v36 = vld [vmem:[%s9640_s8 + $0x30] sm:$0xff] }
  0x1c   : > { %5407 = vmatpush3.bf16.msra.mxu0 %v5406_v13 }
  0x1d   : > { %5435 = vmatpush3.bf16.msra.mxu1 %v5406_v13  ;;  %5408 = vmatprep.subr.bf16.mxu0 %v6140_v5  ;;  %v6358_v13 = vld [vmem:[%s9639_s7 + $0x10] sm:$0xff] }
  0x1e   : > { %5437 = vmatprep.subr.bf16.mxu1 %v5409_v16  ;;  %801 = vperm.xlu0 %5504, %v789_v37   ;;  %v4819_v37 = vld [vmem:[%s9640_s8 + $0x38] sm:$0xff] }
  0x1f   : > { %806 = vperm.xlu1 %5505, %v790_v38  }
  0x20   : > { %5410 = vmatpush3.bf16.msra.mxu0 %v5409_v16 }
  0x21   : > { %5439 = vmatpush3.bf16.msra.mxu1 %v5409_v16  ;;  %5411 = vmatprep.subr.bf16.mxu0 %v6140_v5  ;;  %v6367_v16 = vld [vmem:[%s9639_s7 + $0x18] sm:$0xff] }
  0x22   : > { %5441 = vmatprep.subr.bf16.mxu1 %v5412_v19  ;;  %811 = vperm.xlu0 %5504, %v791_v39   ;;  %v5472_v39 = vpack.c.bf16 %v4819_v37, %v4818_v36 }
  0x23   : > { %946 = vperm.xlu1 %5505, %v792_v40  }
  0x24   : > { %5413 = vmatpush3.bf16.msra.mxu0 %v5412_v19 }
  0x25   : > { %5443 = vmatpush3.bf16.msra.mxu1 %v5412_v19  ;;  %5414 = vmatprep.subr.bf16.mxu0 %v6140_v5 }
  0x26   : > { %5445 = vmatprep.subr.bf16.mxu1 %v5415_v22  ;;  %951 = vperm.xlu0 %5504, %v793_v41   ;;  %v4820_v41 = vld [vmem:[%s9640_s8 + $0x40] sm:$0xff] }
  0x27   : > { %956 = vperm.xlu1 %5505, %v794_v42   ;;  %v4821_v42 = vld [vmem:[%s9640_s8 + $0x48] sm:$0xff] }
  0x28   : > { %5416 = vmatpush3.bf16.msra.mxu0 %v5415_v22 }
  0x29   : > { %5447 = vmatpush3.bf16.msra.mxu1 %v5415_v22  ;;  %5417 = vmatprep.subr.bf16.mxu0 %v6140_v5  ;;  %v6347_v5 = vld [vmem:[%s9639_s7] sm:$0xff] }
  0x2a   : > { %5449 = vmatprep.subr.bf16.mxu1 %v5418_v25 }
  0x2c   : > { %5419 = vmatpush3.bf16.msra.mxu0 %v5418_v25 }
  0x2d   : > { %5451 = vmatpush3.bf16.msra.mxu1 %v5418_v25  ;;  %v4813_v25 = vld [vmem:[%s9640_s8 + $0x8] sm:$0xff] }
  0x2f   : > { %5304 = vmatmul.mubr.f32.vlgmr.msra.gmra.mrb[0].mxu0 %v437_v30 }
  0x30   : > { %5339 = vmatmul.mubr.f32.vlgmr.msra.gmra.mrb[0].mxu1 %v439_v26  ;;  %5352 = vmatprep.mubr.msk.f32.mxu0 %vm617_vm1, %v613_v31  ;;  %v4814_v26 = vld [vmem:[%s9640_s8 + $0x10] sm:$0xff]  ;;  %v4816_v31 = vld [vmem:[%s9640_s8 + $0x20] sm:$0xff] }
  0x31   : > { %5341 = vmatprep.mubr.f32.mxu1 %v440_v27  ;;  %v5460_v27 = vpack.c.bf16 %v4813_v25, %v4812_v24  ;;  %v5468_v34 = vpack.c.bf16 %v4817_v32, %v4816_v31 }
  0x33   : > { %5461 = vmatprep.subr.bf16.mxu1 %v5460_v27 }
  0x34   : > { %5342 = vmatmul.mubr.f32.gmra.mrb[2].mxu1 %v441_v28  ;;  %v4815_v28 = vld [vmem:[%s9640_s8 + $0x18] sm:$0xff] }
  0x35   : > { %v5464_v30 = vpack.c.bf16 %v4815_v28, %v4814_v26  ;;  %5463 = vmatpush3.bf16.msra.mxu1 %v5460_v27 }
  0x37   : > { %5465 = vmatprep.subr.bf16.mxu1 %v5464_v30 }
  0x39   : > { %5467 = vmatpush3.bf16.msra.mxu1 %v5464_v30 }
  0x3a   : > { %5469 = vmatprep.subr.bf16.mxu1 %v5468_v34 }
  0x3d   : > { %5471 = vmatpush3.bf16.msra.mxu1 %v5468_v34 }
  0x3e   : > { %5473 = vmatprep.subr.bf16.mxu1 %v5472_v39 }
  0x41   : > { %5475 = vmatpush3.bf16.msra.mxu1 %v5472_v39 }
  0x95   : > { %v726_v57 = vpop.permute.xlu0 %725 }
  0x96   : > { %v736_v60 = vpop.permute.xlu1 %735  ;;  %v749_v63 = vmul.f32 %v747_v59, %v726_v57 }
  0x97   : > { %v751_v8 = vmul.f32 %v747_v59, %v736_v60 }
  0x99   : > { %v731_v61 = vpop.permute.xlu0 %730 }
  0x9a   : > { %v750_v62 = vmul.f32 %v747_v59, %v731_v61  ;;  %v741_v1 = vpop.permute.xlu1 %740 }
  0x9b   : > { %v752_v6 = vmul.f32 %v747_v59, %v741_v1 }
 0x102   : > { %v6329_v52 = vpop.f32.mrb[0].mxu0 }
 0x103   : > { %v5340_v43 = vpop.f32.mrb[0].mxu1  ;;  %v5305_v53 = vpop.f32.mrb[1].mxu0 }
 0x104   : > { %v594_v44 = vpop.f32.mrb[1].mxu1 }
 0x105   : > { %v5452_v45 = vpack.c.bf16 %v5340_v43, %v594_v44  ;;  %v5476_v43 = vpack.c.bf16 %v4821_v42, %v4820_v41  ;;  %v4822_v44 = vld [vmem:[%s9640_s8 + $0x50] sm:$0xff] }
 0x107   : > { %v5343_v46 = vpop.f32.mrb[2].mxu1  ;;  %5453 = vmatprep.subr.bf16.mxu0 %v5452_v45  ;;  %5477 = vmatprep.subr.bf16.mxu1 %v5476_v43 }
 0x108   : > { %v604_v47 = vpop.f32.mrb[3].mxu1  ;;  %5455 = vmatpush3.bf16.msra.mxu0 %v5452_v45  ;;  %v4823_v45 = vld [vmem:[%s9640_s8 + $0x58] sm:$0xff]  ;;  %5479 = vmatpush3.bf16.msra.mxu1 %v5476_v43 }
 0x109   : > { %v5456_v48 = vpack.c.bf16 %v5343_v46, %v604_v47  ;;  %v716_v46 = vmul.f32 %v715_v58, %v6329_v52  ;;  %v717_v47 = vld [vmem:[%s9638_s6] sm:$0x1] }
 0x10b   : > { %5457 = vmatprep.subr.bf16.mxu0 %v5456_v48 }
 0x10c   : > { %5459 = vmatpush3.bf16.msra.mxu0 %v5456_v48  ;;  %v5480_v48 = vpack.c.bf16 %v4823_v45, %v4822_v44 }
 0x10e   : > { %5481 = vmatprep.subr.bf16.mxu1 %v5480_v48 }
 0x10f   : > { %5353 = vmatmul.mubr.msk.f32.vlgmr.msra.gmra.mrb[2].mxu0 %vm617_vm1, %v614_v49  ;;  %v4824_v49 = vld [vmem:[%s9640_s8 + $0x60] sm:$0xff]  ;;  %5483 = vmatpush3.bf16.msra.mxu1 %v5480_v48 }
 0x110   : > { %5355 = vmatprep.mubr.msk.f32.mxu0 %vm617_vm1, %v615_v50  ;;  %v4825_v50 = vld [vmem:[%s9640_s8 + $0x68] sm:$0xff] }
 0x111   : > { %v5484_v53 = vpack.c.bf16 %v4825_v50, %v4824_v49 }
 0x113   : > { %5356 = vmatmul.mubr.msk.f32.gmra.mrb[4].mxu0 %vm617_vm1, %v616_v51  ;;  %v718_v51 = vadd.f32 %v717_v47, %v716_v46  ;;  %5485 = vmatprep.subr.bf16.mxu1 %v5484_v53 }
 0x114   : > { %5487 = vmatpush3.bf16.msra.mxu1 %v5484_v53 }
 0x115   : > { %v777_v57 = vsub.f32 1.0, %v718_v51  ;;  %v781_v58 = vsub.f32 0.0, %v718_v51 }
 0x1e2   : > { %v5354_v0 = vpop.f32.mrb[2].mxu0 }
 0x1e3   : > { %v6337_v2 = vmul.f32 %v5354_v0, %v750_v62  ;;  %v696_v4 = vpop.f32.mrb[3].mxu0  ;;  %v5488_v62 = vpack.c.bf16 %v4827_v55, %v4826_v54 }
 0x1e4   : > { %v6349_v7 = vmul.f32 %v749_v63, %v696_v4 }
 0x1e5   : > { %9710 = vst [vmem:[#allocation3_spill] sm:$0xff] %v6337_v2  ;;  %v762_v9 = vmul.f32 %v6342_v3, %v6337_v2  ;;  %5489 = vmatprep.subr.bf16.mxu1 %v5488_v62 }
 0x1e6   : > { %9711 = vst [vmem:[#allocation4_spill] sm:$0xff] %v6349_v7  ;;  %v761_v10 = vmul.f32 %v6347_v5, %v6349_v7  ;;  %v5357_v11 = vpop.f32.mrb[4].mxu0  ;;  %5491 = vmatpush3.bf16.msra.mxu1 %v5488_v62 }
 0x1e7   : > { %v706_v12 = vpop.f32.mrb[5].mxu0  ;;  %v6360_v14 = vmul.f32 %v5357_v11, %v752_v6  ;;  %v802_v6 = vpop.permute.xlu0 %801 }
 0x1e8   : > { %v6362_v15 = vmul.f32 %v751_v8, %v706_v12  ;;  %v765_v17 = vadd.f32 %v762_v9, %v761_v10 }
 0x1e9   : > { %9712 = vst [vmem:[#allocation5_spill] sm:$0xff] %v6360_v14  ;;  %v764_v19 = vmul.f32 %v6367_v16, %v6360_v14 }
 0x1ea   : > { %9713 = vst [vmem:[#allocation6_spill] sm:$0xff] %v6362_v15  ;;  %v763_v18 = vmul.f32 %v6358_v13, %v6362_v15 }
 0x1ec   : > { %v766_v20 = vadd.f32 %v765_v17, %v763_v18  ;;  %v807_v18 = vpop.permute.xlu1 %806 }
 0x1ee   : > { %v767_v21 = vadd.f32 %v766_v20, %v764_v19  ;;  %v812_v19 = vpop.permute.xlu0 %811 }
 0x1f0   : > { %v768_v22 = vrot.slane %v767_v21, 4 }
 0x1f2   : > { %v769_v23 = vadd.f32 %v768_v22, %v767_v21 }
 0x1f4   : > { %v770_v29 = vrot.slane %v769_v23, 2 }
 0x1f6   : > { %v771_v33 = vadd.f32 %v770_v29, %v769_v23 }
 0x1f8   : > { %v772_v35 = vrot.slane %v771_v33, 1 }
 0x1fa   : > { %v773_v38 = vadd.f32 %v772_v35, %v771_v33 }
 0x1fc   : > { %v774_v40 = vmax.f32 %v773_v38, 1e-06 }
 0x1fe   : > { %5506 = vrsqrt.f32 %v774_v40 }
 0x208   : > { %v6419_v52 = vpop.eup %5506 }
 0x209   : > { %v776_v59 = vmul.f32 4.472136, %v6419_v52 }
 0x20b   : > { %v778_v60 = vmul.f32 %v777_v57, %v776_v59  ;;  %v782_v61 = vmul.f32 %v781_v58, %v776_v59 }
 0x20d   : > { %v779_v63 = vmax.f32 %v778_v60, -12.0  ;;  %v783_v0 = vmax.f32 %v782_v61, -12.0 }
 0x20f   : > { %v6428_v1 = vmin.f32 %v779_v63, 6.0  ;;  %v6430_v4 = vmin.f32 %v783_v0, 6.0 }
 0x211   : > { %v785_v8 = vadd.f32 %v6430_v4, %v6428_v1  ;;  %v787_v9 = vsub.f32 %v6428_v1, %v6430_v4  ;;  %v4721_v10 = vand.u32 2147483647, %v6428_v1  ;;  %v4734_v43 = vmax.f32 %v6428_v1, 0.0 }
 0x212   : > { %v4761_v53 = vand.u32 2147483647, %v6430_v4  ;;  %v4743_v58 = vsub.f32 0.0, %v6428_v1  ;;  %vm4736_vm14 = vcmp.gt.f32.partialorder %v6428_v1, 0.0  ;;  %vm4758_vm15 = vcmp.le.f32.partialorder %v6428_v1, -3.0 }
 0x213   : > { %v786_v11 = vmul.f32 0.5, %v785_v8  ;;  %v6437_v12 = vmul.f32 0.5, %v787_v9  ;;  %v4722_v20 = vmul.f32 0.3275911, %v4721_v10  ;;  %v4735_v55 = vmin.f32 %v4734_v43, 6.0 }
 0x214   : > { %v4762_v61 = vmul.f32 0.3275911, %v4761_v53  ;;  %v4774_v10 = vmax.f32 %v6430_v4, 0.0  ;;  %vm4776_vm0 = vcmp.gt.f32.partialorder %v6430_v4, 0.0  ;;  %vm4798_vm1 = vcmp.le.f32.partialorder %v6430_v4, -3.0 }
 0x215   : > { %9714 = vst [vmem:[#allocation7_spill] sm:$0xff] %v6437_v12  ;;  %v798_v17 = vrot.slane %v6437_v12, %v6331_v56  ;;  %v820_v24 = vrot.slane %v786_v11, %v6331_v56  ;;  %v4723_v28 = vadd.f32 1.0, %v4722_v20  ;;  %v4737_v62 = vmul.f32 %v4735_v55, %v4735_v55 }
 0x217   : > { %v814_v21 = vmul.f32 %v802_v6, %v798_v17  ;;  %v815_v22 = vmul.f32 %v807_v18, %v798_v17  ;;  %v816_v23 = vmul.f32 %v812_v19, %v798_v17  ;;  %5508 = vrcp.f32 %v4723_v28 }
 0x218   : > { %v4744_v6 = vmax.f32 %v4743_v58, 3.0  ;;  %v4763_v17 = vadd.f32 1.0, %v4762_v61  ;;  %v4738_v20 = vmul.f32 1.442695, %v4737_v62 }
 0x219   : > { %v6442_v25 = vadd.f32 %v820_v24, %v814_v21  ;;  %v6444_v26 = vadd.f32 %v820_v24, %v815_v22  ;;  %v6446_v27 = vadd.f32 %v820_v24, %v816_v23 }
 0x21b   : > { %v824_v29 = vand.u32 2147483647, %v6442_v25  ;;  %v825_v30 = vand.u32 2147483647, %v6444_v26  ;;  %v826_v31 = vand.u32 2147483647, %v6446_v27  ;;  %v974_v0 = vmul.f32 %v6442_v25, %v6442_v25 }
 0x21c   : > { %v863_v32 = vmax.f32 %v6442_v25, 0.0  ;;  %v864_v33 = vmax.f32 %v6444_v26, 0.0  ;;  %v865_v34 = vmax.f32 %v6446_v27, 0.0  ;;  %v890_v46 = vsub.f32 0.0, %v6442_v25 }
 0x21d   : > { %v827_v35 = vmul.f32 0.3275911, %v824_v29  ;;  %v828_v36 = vmul.f32 0.3275911, %v825_v30  ;;  %v829_v37 = vmul.f32 0.3275911, %v826_v31  ;;  %v975_v9 = vmul.f32 %v6444_v26, %v6444_v26 }
 0x21e   : > { %v866_v38 = vmin.f32 %v863_v32, 6.0  ;;  %v867_v39 = vmin.f32 %v864_v33, 6.0  ;;  %v868_v47 = vmin.f32 %v865_v34, 6.0  ;;  %v891_v48 = vsub.f32 0.0, %v6444_v26 }
 0x21f   : > { %v830_v40 = vadd.f32 1.0, %v827_v35  ;;  %v831_v41 = vadd.f32 1.0, %v828_v36  ;;  %v832_v42 = vadd.f32 1.0, %v829_v37  ;;  %v892_v49 = vsub.f32 0.0, %v6446_v27 }
 0x220   : > { %v872_v44 = vmul.f32 %v866_v38, %v866_v38  ;;  %v873_v45 = vmul.f32 %v867_v39, %v867_v39  ;;  %v893_v54 = vmax.f32 %v890_v46, 3.0  ;;  %v894_v57 = vmax.f32 %v891_v48, 3.0 }
 0x221   : > { %5510 = vrcp.f32 %v830_v40  ;;  %v874_v59 = vmul.f32 %v868_v47, %v868_v47  ;;  %v895_v60 = vmax.f32 %v892_v49, 3.0  ;;  %v6460_v63 = vpop.eup %5508  ;;  %v976_v11 = vmul.f32 %v6446_v27, %v6446_v27 }
 0x222   : > { %5512 = vrcp.f32 %v831_v41  ;;  %v875_v50 = vmul.f32 1.442695, %v872_v44  ;;  %v877_v51 = vmul.f32 1.442695, %v873_v45  ;;  %v4725_v19 = vmul.f32 1.0614054, %v6460_v63 }
 0x223   : > { %5514 = vrcp.f32 %v832_v42  ;;  %v879_v8 = vmul.f32 1.442695, %v874_v59  ;;  %v6475_v23 = vadd.f32 36.0, %v974_v0  ;;  %v6480_v29 = vadd.f32 36.0, %v975_v9 }
 0x224   : > { %5516 = vpow2.f32 %v875_v50  ;;  %v4775_v30 = vmin.f32 %v4774_v10, 6.0  ;;  %v6483_v33 = vadd.f32 36.0, %v976_v11  ;;  %v5198_v36 = vadd.f32 -1.4531521, %v4725_v19 }
 0x225   : > { %5518 = vpow2.f32 %v877_v51  ;;  %vm869_vm2 = vcmp.gt.f32.partialorder %v6442_v25, 0.0  ;;  %vm870_vm3 = vcmp.gt.f32.partialorder %v6444_v26, 0.0  ;;  %vm871_vm4 = vcmp.gt.f32.partialorder %v6446_v27, 0.0 }
 0x226   : > { %5520 = vrcp.f32 %v893_v54  ;;  %v6491_v42 = vmul.f32 %v4775_v30, %v4775_v30  ;;  %v4727_v53 = vmul.f32 %v6460_v63, %v5198_v36  ;;  %vm935_vm5 = vcmp.le.f32.partialorder %v6442_v25, -3.0 }
 0x227   : > { %5522 = vrcp.f32 %v894_v57  ;;  %vm936_vm6 = vcmp.le.f32.partialorder %v6444_v26, -3.0  ;;  %vm937_vm7 = vcmp.le.f32.partialorder %v6446_v27, -3.0  ;;  %vm982_vm8 = vcmp.eq.f32.partialorder %v6475_v23, inf }
 0x228   : > { %5524 = vrcp.f32 %v895_v60  ;;  %v4728_v14 = vadd.f32 1.4214138, %v4727_v53  ;;  %vm984_vm9 = vcmp.eq.f32.partialorder %v6475_v23, 0.0  ;;  %vm989_vm10 = vcmp.eq.f32.partialorder %v6480_v29, inf }
 0x229   : > { %5526 = vrcp.f32 %v4744_v6  ;;  %vm991_vm11 = vcmp.eq.f32.partialorder %v6480_v29, 0.0  ;;  %vm996_vm12 = vcmp.eq.f32.partialorder %v6483_v33, inf  ;;  %vm998_vm13 = vcmp.eq.f32.partialorder %v6483_v33, 0.0 }
 0x22a   : > { %5528 = vpow2.f32 %v879_v8 }
 0x22b   : > { %v6469_v18 = vpop.eup %5510  ;;  %5530 = vrcp.f32 %v4763_v17 }
 0x22c   : > { %v6472_v21 = vpop.eup %5512  ;;  %v836_v22 = vmul.f32 1.0614054, %v6469_v18  ;;  %5532 = vpow2.f32 %v4738_v20 }
 0x22d   : > { %v6477_v24 = vpop.eup %5514  ;;  %v837_v28 = vmul.f32 1.0614054, %v6472_v21  ;;  %5534 = vrsqrt.f32 %v6475_v23 }
 0x22e   : > { %v838_v31 = vmul.f32 1.0614054, %v6477_v24  ;;  %v5048_v32 = vadd.f32 -1.4531521, %v836_v22  ;;  %v5517_v34 = vpop.eup %5516  ;;  %5536 = vrsqrt.f32 %v6480_v29 }
 0x22f   : > { %v5049_v35 = vadd.f32 -1.4531521, %v837_v28  ;;  %v5519_v37 = vpop.eup %5518  ;;  %5538 = vrsqrt.f32 %v6483_v33  ;;  %v6502_v50 = vmul.f32 2.0, %v5517_v34 }
 0x230   : > { %v5050_v38 = vadd.f32 -1.4531521, %v838_v31  ;;  %v842_v39 = vmul.f32 %v6469_v18, %v5048_v32  ;;  %v6487_v40 = vpop.eup %5520  ;;  %v6508_v57 = vmul.f32 2.0, %v5519_v37 }
 0x231   : > { %v843_v41 = vmul.f32 %v6472_v21, %v5049_v35  ;;  %v6494_v44 = vpop.eup %5522  ;;  %v899_v47 = vmul.f32 %v6487_v40, %v6487_v40 }
 0x232   : > { %v844_v45 = vmul.f32 %v6477_v24, %v5050_v38  ;;  %v845_v46 = vadd.f32 1.4214138, %v842_v39  ;;  %v6500_v48 = vpop.eup %5524  ;;  %v900_v51 = vmul.f32 %v6494_v44, %v6494_v44 }
 0x233   : > { %v846_v49 = vadd.f32 1.4214138, %v843_v41  ;;  %v901_v58 = vmul.f32 %v6500_v48, %v6500_v48  ;;  %v905_v60 = vmul.f32 0.5, %v899_v47  ;;  %v911_v62 = vmul.f32 0.75, %v899_v47  ;;  %v6513_v0 = vpop.eup %5526 }
 0x234   : > { %v847_v54 = vadd.f32 1.4214138, %v844_v45  ;;  %v848_v55 = vmul.f32 %v6469_v18, %v845_v46  ;;  %v906_v61 = vmul.f32 0.5, %v900_v51  ;;  %v912_v10 = vmul.f32 0.75, %v900_v51  ;;  %v5529_v11 = vpop.eup %5528 }
 0x235   : > { %v849_v59 = vmul.f32 %v6472_v21, %v846_v49  ;;  %v907_v9 = vmul.f32 0.5, %v901_v58  ;;  %v908_v19 = vsub.f32 1.0, %v905_v60  ;;  %v913_v22 = vmul.f32 0.75, %v901_v58  ;;  %v6516_v28 = vpop.eup %5530 }
 0x236   : > { %v850_v6 = vmul.f32 %v6477_v24, %v847_v54  ;;  %v5051_v8 = vadd.f32 -0.28449672, %v848_v55  ;;  %v909_v20 = vsub.f32 1.0, %v906_v61  ;;  %v914_v34 = vmul.f32 %v911_v62, %v899_v47  ;;  %v6521_v35 = vpop.eup %5532 }
 0x237   : > { %v5052_v17 = vadd.f32 -0.28449672, %v849_v59  ;;  %v910_v32 = vsub.f32 1.0, %v907_v9  ;;  %v915_v37 = vmul.f32 %v912_v10, %v900_v51  ;;  %v916_v38 = vmul.f32 %v913_v22, %v901_v58  ;;  %v5535_v41 = vpop.eup %5534 }
 0x238   : > { %v5053_v30 = vadd.f32 -0.28449672, %v850_v6  ;;  %v854_v31 = vmul.f32 %v6469_v18, %v5051_v8  ;;  %v920_v39 = vmul.f32 1.875, %v899_v47  ;;  %v883_v49 = vmul.f32 2.0, %v5529_v11  ;;  %v5537_v55 = vpop.eup %5536 }
 0x239   : > { %v855_v36 = vmul.f32 %v6472_v21, %v5052_v17  ;;  %v921_v54 = vmul.f32 1.875, %v900_v51  ;;  %v917_v60 = vadd.f32 %v914_v34, %v908_v19  ;;  %v918_v61 = vadd.f32 %v915_v37, %v909_v20  ;;  %v5539_v6 = vpop.eup %5538 }
 0x23a   : > { %v856_v45 = vmul.f32 %v6477_v24, %v5053_v30  ;;  %v857_v46 = vadd.f32 0.2548296, %v854_v31  ;;  %v922_v62 = vmul.f32 1.875, %v901_v58  ;;  %v923_v17 = vmul.f32 %v920_v39, %v899_v47 }
 0x23b   : > { %v858_v59 = vadd.f32 0.2548296, %v855_v36  ;;  %v924_v43 = vmul.f32 %v921_v54, %v900_v51  ;;  %v919_v22 = vadd.f32 %v916_v38, %v910_v32  ;;  %v902_v20 = vmul.f32 0.5641896, %v6487_v40  ;;  %v6542_v40 = vpop.permute.xlu1 %946 }
 0x23c   : > { %v859_v8 = vadd.f32 0.2548296, %v856_v45  ;;  %v860_v9 = vmul.f32 %v6469_v18, %v857_v46  ;;  %v925_v15 = vmul.f32 %v922_v62, %v901_v58  ;;  %v926_v31 = vmul.f32 %v923_v17, %v899_v47  ;;  %9715 = vst [vmem:[#allocation8_spill] sm:$0xff] %v6542_v40 }
 0x23d   : > { %v861_v10 = vmul.f32 %v6472_v21, %v858_v59  ;;  %v927_v36 = vmul.f32 %v924_v43, %v900_v51  ;;  %v6534_v18 = vmul.f32 %v6513_v0, %v6513_v0  ;;  %v903_v21 = vmul.f32 0.5641896, %v6494_v44 }
 0x23e   : > { %v862_v30 = vmul.f32 %v6477_v24, %v859_v8  ;;  %v884_v11 = vsub.f32 %v6502_v50, %v860_v9  ;;  %v928_v34 = vmul.f32 %v925_v15, %v901_v58  ;;  %v929_v32 = vsub.f32 %v917_v60, %v926_v31 }
 0x23f   : > { %v885_v19 = vsub.f32 %v6508_v57, %v861_v10  ;;  %v930_v53 = vsub.f32 %v918_v61, %v927_v36  ;;  %v904_v47 = vmul.f32 0.5641896, %v6500_v48  ;;  %v4729_v44 = vmul.f32 %v6460_v63, %v4728_v14  ;;  %v6554_v14 = vpop.permute.xlu0 %951 }
 0x240   : > { %v886_v37 = vsub.f32 %v883_v49, %v862_v30  ;;  %v887_v24 = vsel %vm869_vm2, %v884_v11, %v860_v9  ;;  %v931_v50 = vsub.f32 %v919_v22, %v928_v34  ;;  %v932_v51 = vmul.f32 %v929_v32, %v902_v20  ;;  %9717 = vst [vmem:[#allocation9_spill] sm:$0xff] %v6554_v14  ;;  %v6563_v22 = vpop.permute.xlu1 %956 }
 0x241   : > { %v888_v43 = vsel %vm870_vm3, %v885_v19, %v861_v10  ;;  %v933_v57 = vmul.f32 %v930_v53, %v903_v21  ;;  %v9716_v38 = vsub.f32 0.0, %v6430_v4  ;;  %v4778_v46 = vmul.f32 1.442695, %v6491_v42  ;;  %9718 = vst [vmem:[#allocation10_spill] sm:$0xff] %v6563_v22 }
 0x242   : > { %v889_v15 = vsel %vm871_vm4, %v886_v37, %v862_v30  ;;  %v934_v58 = vmul.f32 %v931_v50, %v904_v47  ;;  %v938_v48 = vsel %vm935_vm5, %v932_v51, %v887_v24  ;;  %v985_v61 = vand.u32 2147483648, %v6475_v23 }
 0x243   : > { %v4784_v39 = vmax.f32 %v9716_v38, 3.0  ;;  %v939_v45 = vsel %vm936_vm6, %v933_v57, %v888_v43  ;;  %v941_v54 = vmul.f32 0.88622695, %v938_v48  ;;  %v5199_v62 = vadd.f32 -0.28449672, %v4729_v44 }
 0x244   : > { %v940_v49 = vsel %vm937_vm7, %v934_v58, %v889_v15  ;;  %v942_v59 = vmul.f32 0.88622695, %v939_v45  ;;  %v4748_v8 = vmul.f32 0.5, %v6534_v18  ;;  %v981_v42 = vmul.f32 %v5535_v41, %v6475_v23 }
 0x245   : > { %v943_v60 = vmul.f32 0.88622695, %v940_v49  ;;  %v959_v9 = vmul.f32 %v6542_v40, %v941_v54  ;;  %v988_v10 = vmul.f32 %v5537_v55, %v6480_v29  ;;  %v992_v30 = vand.u32 2147483648, %v6480_v29 }
 0x246   : > { %v960_v17 = vmul.f32 %v6554_v14, %v942_v59  ;;  %v995_v36 = vmul.f32 %v5539_v6, %v6483_v33  ;;  %v999_v19 = vand.u32 2147483648, %v6483_v33  ;;  %v4731_v41 = vmul.f32 %v6460_v63, %v5199_v62 }
 0x247   : > { %v961_v11 = vmul.f32 %v6563_v22, %v943_v60  ;;  %v4749_v55 = vsub.f32 1.0, %v4748_v8  ;;  %v4750_v20 = vmul.f32 0.75, %v6534_v18  ;;  %v4753_v34 = vmul.f32 1.875, %v6534_v18 }
 0x248   : > { %v962_v31 = vadd.f32 %v960_v17, %v959_v9  ;;  %v983_v21 = vsel %vm982_vm8, %v6475_v23, %v981_v42  ;;  %v990_v32 = vsel %vm989_vm10, %v6480_v29, %v988_v10  ;;  %v4765_v53 = vmul.f32 1.0614054, %v6516_v28 }
 0x249   : > { %v4732_v24 = vadd.f32 0.2548296, %v4731_v41  ;;  %v4751_v6 = vmul.f32 %v4750_v20, %v6534_v18  ;;  %v4754_v43 = vmul.f32 %v4753_v34, %v6534_v18  ;;  %5540 = vrcp.f32 %v4784_v39 }
 0x24a   : > { %v963_v37 = vadd.f32 %v962_v31, %v961_v11  ;;  %v4740_v50 = vmul.f32 2.0, %v6521_v35  ;;  %v5200_v15 = vadd.f32 -1.4531521, %v4765_v53  ;;  %5542 = vpow2.f32 %v4778_v46 }
 0x24b   : > { %v997_v51 = vsel %vm996_vm12, %v6483_v33, %v995_v36  ;;  %v4733_v57 = vmul.f32 %v6460_v63, %v4732_v24  ;;  %v4752_v44 = vadd.f32 %v4751_v6, %v4749_v55  ;;  %v4755_v58 = vmul.f32 %v4754_v43, %v6534_v18 }
 0x24c   : > { %v964_v47 = vrot.slane %v963_v37, 4  ;;  %v986_v48 = vsel %vm984_vm9, %v985_v61, %v983_v21  ;;  %v993_v39 = vsel %vm991_vm11, %v992_v30, %v990_v32  ;;  %v4767_v35 = vmul.f32 %v6516_v28, %v5200_v15 }
 0x24d   : > { %v4741_v45 = vsub.f32 %v4740_v50, %v4733_v57  ;;  %v4747_v46 = vmul.f32 0.5641896, %v6513_v0  ;;  %v4756_v49 = vsub.f32 %v4752_v44, %v4755_v58  ;;  %v1000_v63 = vsel %vm998_vm13, %v999_v19, %v997_v51 }
 0x24e   : > { %v965_v38 = vadd.f32 %v964_v47, %v963_v37  ;;  %v4768_v18 = vadd.f32 1.4214138, %v4767_v35  ;;  %v1001_v59 = vsub.f32 0.0, %v986_v48  ;;  %v1002_v60 = vsub.f32 0.0, %v993_v39 }
 0x24f   : > { %v4742_v23 = vsel %vm4736_vm14, %v4741_v45, %v4733_v57  ;;  %v4757_v61 = vmul.f32 %v4756_v49, %v4747_v46  ;;  %v1003_v8 = vsub.f32 0.0, %v1000_v63 }
 0x250   : > { %v966_v54 = vrot.slane %v965_v38, 2  ;;  %v4769_v29 = vmul.f32 %v6516_v28, %v4768_v18  ;;  %v1010_v42 = vsub.f32 %v6442_v25, %v1001_v59  ;;  %v1011_v10 = vsub.f32 %v6444_v26, %v1002_v60 }
 0x251   : > { %v4759_v33 = vsel %vm4758_vm15, %v4757_v61, %v4742_v23  ;;  %v1012_v19 = vsub.f32 %v6446_v27, %v1003_v8  ;;  %v1004_v47 = vadd.f32 %v1001_v59, %v6442_v25  ;;  %v1005_v51 = vadd.f32 %v1002_v60, %v6444_v26 }
 0x252   : > { %v967_v62 = vadd.f32 %v966_v54, %v965_v38  ;;  %v5201_v17 = vadd.f32 -0.28449672, %v4769_v29  ;;  %v6603_v34 = vmul.f32 0.5, %v1010_v42  ;;  %v6605_v37 = vmul.f32 0.5, %v1011_v10 }
 0x253   : > { %v5541_v0 = vpop.eup %5540  ;;  %v6610_v58 = vmul.f32 0.5, %v1012_v19  ;;  %v1006_v35 = vadd.f32 %v1003_v8, %v6446_v27  ;;  %v6616_v45 = vmul.f32 0.5, %v1004_v47  ;;  %v6618_v54 = vmul.f32 0.5, %v1005_v51 }
 0x254   : > { %v968_v9 = vrot.slane %v967_v62, 1  ;;  %v5543_v30 = vpop.eup %5542  ;;  %v4771_v31 = vmul.f32 %v6516_v28, %v5201_v17  ;;  %v4786_v36 = vmul.f32 %v5541_v0, %v5541_v0  ;;  %9719 = vst [vmem:[#allocation11_spill] sm:$0xff] %v6603_v34  ;;  %9720 = vst [vmem:[#allocation12_spill] sm:$0xff] %v6605_v37  ;;  %v1028_v48 = vmul.f32 -0.9951872, %v6603_v34 }
 0x255   : > { %v4780_v21 = vmul.f32 2.0, %v5543_v30  ;;  %v4787_v46 = vmul.f32 0.5641896, %v5541_v0  ;;  %9721 = vst [vmem:[#allocation13_spill] sm:$0xff] %v6618_v54  ;;  %v1030_v18 = vmul.f32 -0.9951872, %v6610_v58 }
 0x256   : > { %v969_v11 = vadd.f32 %v968_v9, %v967_v62  ;;  %v4772_v41 = vadd.f32 0.2548296, %v4771_v31  ;;  %v4788_v55 = vmul.f32 0.5, %v4786_v36  ;;  %v4790_v20 = vmul.f32 0.75, %v4786_v36 }
 0x257   : > { %v4793_v32 = vmul.f32 1.875, %v4786_v36  ;;  %v6622_v59 = vadd.f32 %v1028_v48, %v6616_v45  ;;  %v4760_v60 = vmul.f32 0.88622695, %v4759_v33  ;;  %v6628_v61 = vmul.f32 0.5, %v1006_v35 }
 0x258   : > { %v970_v1 = vmul.f32 %v969_v11, %v6437_v12  ;;  %v4773_v24 = vmul.f32 %v6516_v28, %v4772_v41  ;;  %v4789_v6 = vsub.f32 1.0, %v4788_v55  ;;  %v4791_v43 = vmul.f32 %v4790_v20, %v4786_v36 }
 0x259   : > { %v4794_v50 = vmul.f32 %v4793_v32, %v4786_v36  ;;  %v1029_v28 = vmul.f32 -0.9951872, %v6605_v37  ;;  %9722 = vst [vmem:[#allocation14_spill] sm:$0xff] %v6628_v61  ;;  %v6631_v8 = vadd.f32 %v1030_v18, %v6628_v61  ;;  %v1049_v9 = vand.u32 2147483647, %v6622_v59 }
 0x25a   : > { %v971_v53 = vmul.f32 40.0, %v970_v1  ;;  %v4781_v57 = vsub.f32 %v4780_v21, %v4773_v24  ;;  %v4792_v44 = vadd.f32 %v4791_v43, %v4789_v6  ;;  %v1115_v51 = vsub.f32 0.0, %v6622_v59 }
 0x25b   : > { %v4795_v38 = vmul.f32 %v4794_v50, %v4786_v36  ;;  %v6626_v23 = vadd.f32 %v1029_v28, %v6618_v54  ;;  %v1051_v42 = vand.u32 2147483647, %v6631_v8  ;;  %v1052_v10 = vmul.f32 0.3275911, %v1049_v9 }
 0x25c   : > { %v972_v15 = vadd.f32 5.0, %v971_v53  ;;  %v4782_v39 = vsel %vm4776_vm0, %v4781_v57, %v4773_v24  ;;  %v1034_v24 = vmul.f32 -0.5, %v6622_v59  ;;  %v1018_v57 = vmul.f32 0.5, %v6446_v27 }
 0x25d   : > { %v4796_v49 = vsub.f32 %v4792_v44, %v4795_v38  ;;  %v1050_v33 = vand.u32 2147483647, %v6626_v23  ;;  %v1054_v36 = vmul.f32 0.3275911, %v1051_v42  ;;  %v1055_v19 = vadd.f32 1.0, %v1052_v10 }
 0x25e   : > { %5544 = vrcp.f32 %v972_v15  ;;  %v1016_v15 = vmul.f32 0.5, %v6442_v25  ;;  %v1116_v28 = vsub.f32 0.0, %v6626_v23  ;;  %v1090_v9 = vmax.f32 %v6631_v8, 0.0 }
 0x25f   : > { %v4797_v63 = vmul.f32 %v4796_v49, %v4787_v46  ;;  %v1053_v30 = vmul.f32 0.3275911, %v1050_v33  ;;  %v1057_v20 = vadd.f32 1.0, %v1054_v36  ;;  %5546 = vrcp.f32 %v1055_v19 }
 0x260   : > { %v1117_v49 = vsub.f32 0.0, %v6631_v8  ;;  %v1119_v10 = vmax.f32 %v1116_v28, 3.0  ;;  %vm1094_vm2 = vcmp.gt.f32.partialorder %v6622_v59, 0.0  ;;  %vm1095_vm3 = vcmp.gt.f32.partialorder %v6626_v23, 0.0 }
 0x261   : > { %v4799_v62 = vsel %vm4798_vm1, %v4797_v63, %v4782_v39  ;;  %v1056_v1 = vadd.f32 1.0, %v1053_v30  ;;  %v1088_v39 = vmax.f32 %v6622_v59, 0.0  ;;  %v1019_v63 = vmul.f32 %v1016_v15, %v6442_v25 }
 0x262   : > { %v4800_v29 = vmul.f32 0.88622695, %v4799_v62  ;;  %vm1096_vm4 = vcmp.gt.f32.partialorder %v6631_v8, 0.0  ;;  %vm1160_vm5 = vcmp.le.f32.partialorder %v6622_v59, -3.0  ;;  %vm1161_vm6 = vcmp.le.f32.partialorder %v6626_v23, -3.0 }
 0x263   : > { %5548 = vrcp.f32 %v1056_v1  ;;  %v1091_v42 = vmin.f32 %v1088_v39, 6.0  ;;  %v1022_v25 = vmul.f32 1.442695, %v1019_v63  ;;  %v1093_v1 = vmin.f32 %v1090_v9, 6.0 }
 0x264   : > { %v4801_v17 = vsub.f32 %v4760_v60, %v4800_v29  ;;  %5550 = vrcp.f32 %v1057_v20  ;;  %v1118_v60 = vmax.f32 %v1115_v51, 3.0  ;;  %v1089_v29 = vmax.f32 %v6626_v23, 0.0 }
 0x265   : > { %v1097_v20 = vmul.f32 %v1091_v42, %v1091_v42  ;;  %vm1162_vm7 = vcmp.le.f32.partialorder %v6631_v8, -3.0 }
 0x266   : > { %v1092_v19 = vmin.f32 %v1089_v29, 6.0 }
 0x267   : > { %v1100_v15 = vmul.f32 1.442695, %v1097_v20 }
 0x268   : > { %v6639_v4 = vpop.eup %5544 }
 0x269   : > { %9723 = vst [vmem:[#allocation15_spill] sm:$0xff] %v6639_v4  ;;  %v6643_v0 = vmul.f32 %v6639_v4, %v6639_v4  ;;  %4941 = vst [vmem:[%s431_s13] sm:$0x1] %v6639_v4  ;;  %v6661_v6 = vpop.eup %5546 }
 0x26b   : > { %9724 = vst [vmem:[#allocation16_spill] sm:$0xff] %v6643_v0  ;;  %v4720_v11 = vmul.f32 178.88544, %v6643_v0 }
 0x26d   : > { %v4802_v31 = vmul.f32 %v4801_v17, %v4720_v11  ;;  %v6663_v43 = vpop.eup %5548  ;;  %v1021_v17 = vmul.f32 %v1018_v57, %v6446_v27 }
 0x26e   : > { %v6667_v47 = vpop.eup %5550  ;;  %v1062_v50 = vmul.f32 1.0614054, %v6663_v43 }
 0x26f   : > { %v4803_v41 = vmul.f32 %v6419_v52, %v4802_v31  ;;  %v1063_v48 = vmul.f32 1.0614054, %v6667_v47  ;;  %v1120_v31 = vmax.f32 %v1117_v49, 3.0  ;;  %v1026_v51 = vmul.f32 1.442695, %v1021_v17 }
 0x270   : > { %v5055_v46 = vadd.f32 -1.4531521, %v1062_v50  ;;  %v1099_v50 = vmul.f32 %v1093_v1, %v1093_v1 }
 0x271   : > { %v6650_v55 = vrot.slane %v4803_v41, %v6331_v56  ;;  %v5056_v33 = vadd.f32 -1.4531521, %v1063_v48  ;;  %v1181_v41 = vmul.f32 -0.9747286, %v6603_v34 }
 0x272   : > { %v1068_v11 = vmul.f32 %v6663_v43, %v5055_v46 }
 0x273   : > { %9725 = vst [vmem:[#allocation17_spill] sm:$0xff] %v6650_v55  ;;  %v4808_v21 = vmul.f32 %v6650_v55, %v6347_v5  ;;  %v4809_v32 = vmul.f32 %v6650_v55, %v6342_v3  ;;  %v4810_v53 = vmul.f32 %v6650_v55, %v6358_v13  ;;  %v4811_v52 = vmul.f32 %v6650_v55, %v6367_v16 }
 0x274   : > { %v1035_v5 = vmul.f32 -0.5, %v6626_v23  ;;  %v1037_v3 = vmul.f32 %v1034_v24, %v6622_v59  ;;  %v1061_v13 = vmul.f32 1.0614054, %v6661_v6  ;;  %v1017_v16 = vmul.f32 0.5, %v6444_v26 }
 0x275   : > { %5390 = vmatprep.mubr.f32.mxu1 %v4808_v21  ;;  %v1069_v27 = vmul.f32 %v6667_v47, %v5056_v33  ;;  %v1182_v21 = vmul.f32 -0.9747286, %v6605_v37 }
 0x276   : > { %5391 = vmatmul.mubr.f32.vlgmr.msra.gmra.mrb[4].mxu1 %v4809_v32  ;;  %v1038_v44 = vmul.f32 %v1035_v5, %v6626_v23  ;;  %v1040_v38 = vmul.f32 1.442695, %v1037_v3  ;;  %v5054_v35 = vadd.f32 -1.4531521, %v1061_v13  ;;  %v1020_v18 = vmul.f32 %v1017_v16, %v6444_v26 }
 0x277   : > { %5393 = vmatprep.mubr.f32.mxu1 %v4810_v53  ;;  %v1036_v26 = vmul.f32 -0.5, %v6631_v8  ;;  %v1071_v53 = vadd.f32 1.4214138, %v1068_v11  ;;  %v1098_v5 = vmul.f32 %v1092_v19, %v1092_v19  ;;  %v6694_v3 = vadd.f32 %v1181_v41, %v6616_v45 }
 0x278   : > { %v1042_v62 = vmul.f32 1.442695, %v1038_v44  ;;  %5552 = vpow2.f32 %v1040_v38  ;;  %v1067_v30 = vmul.f32 %v6661_v6, %v5054_v35  ;;  %v1024_v36 = vmul.f32 1.442695, %v1020_v18 }
 0x279   : > { %5554 = vrcp.f32 %v1118_v60  ;;  %v1039_v24 = vmul.f32 %v1036_v26, %v6631_v8  ;;  %v1072_v13 = vadd.f32 1.4214138, %v1069_v27  ;;  %v6697_v16 = vadd.f32 %v1182_v21, %v6618_v54 }
 0x27a   : > { %5394 = vmatmul.mubr.f32.gmra.mrb[6].mxu1 %v4811_v52  ;;  %5556 = vpow2.f32 %v1042_v62  ;;  %v1070_v32 = vadd.f32 1.4214138, %v1067_v30  ;;  %v1183_v52 = vmul.f32 -0.9747286, %v6610_v58  ;;  %v1074_v44 = vmul.f32 %v6663_v43, %v1071_v53 }
 0x27b   : > { %5558 = vrcp.f32 %v1119_v10  ;;  %v1044_v48 = vmul.f32 1.442695, %v1039_v24  ;;  %v1102_v28 = vmul.f32 1.442695, %v1098_v5  ;;  %v1187_v35 = vmul.f32 -0.5, %v6694_v3 }
 0x27c   : > { %5560 = vrcp.f32 %v1120_v31  ;;  %v1073_v57 = vmul.f32 %v6661_v6, %v1070_v32  ;;  %v6702_v38 = vadd.f32 %v1183_v52, %v6628_v61  ;;  %v1202_v46 = vand.u32 2147483647, %v6694_v3 }
 0x27d   : > { %5562 = vpow2.f32 %v1022_v25  ;;  %v1075_v63 = vmul.f32 %v6667_v47, %v1072_v13  ;;  %v1104_v18 = vmul.f32 1.442695, %v1099_v50  ;;  %v1203_v60 = vand.u32 2147483647, %v6697_v16 }
 0x27e   : > { %5564 = vpow2.f32 %v1024_v36  ;;  %v5057_v29 = vadd.f32 -0.28449672, %v1073_v57  ;;  %v5058_v9 = vadd.f32 -0.28449672, %v1074_v44  ;;  %v1204_v17 = vand.u32 2147483647, %v6702_v38 }
 0x27f   : > { %5566 = vpow2.f32 %v1100_v15  ;;  %v1190_v30 = vmul.f32 %v1187_v35, %v6694_v3  ;;  %v1205_v11 = vmul.f32 0.3275911, %v1202_v46  ;;  %v5059_v25 = vadd.f32 -0.28449672, %v1075_v63 }
 0x280   : > { %5568 = vpow2.f32 %v1026_v51  ;;  %v1206_v36 = vmul.f32 0.3275911, %v1203_v60  ;;  %v1079_v19 = vmul.f32 %v6661_v6, %v5057_v29  ;;  %v1080_v1 = vmul.f32 %v6663_v43, %v5058_v9 }
 0x281   : > { %5570 = vpow2.f32 %v1044_v48  ;;  %v1188_v41 = vmul.f32 -0.5, %v6697_v16  ;;  %v1207_v27 = vmul.f32 0.3275911, %v1204_v17  ;;  %v1189_v24 = vmul.f32 -0.5, %v6702_v38 }
 0x282   : > { %v5553_v39 = vpop.eup %5552  ;;  %5572 = vpow2.f32 %v1102_v28  ;;  %v1193_v5 = vmul.f32 1.442695, %v1190_v30  ;;  %v1208_v13 = vadd.f32 1.0, %v1205_v11  ;;  %v1081_v50 = vmul.f32 %v6667_v47, %v5059_v25 }
 0x283   : > { %v6706_v49 = vpop.eup %5554  ;;  %5574 = vpow2.f32 %v1104_v18  ;;  %v1209_v57 = vadd.f32 1.0, %v1206_v36  ;;  %v1082_v44 = vadd.f32 0.2548296, %v1079_v19  ;;  %v1083_v48 = vadd.f32 0.2548296, %v1080_v1 }
 0x284   : > { %v5557_v62 = vpop.eup %5556  ;;  %v1124_v10 = vmul.f32 %v6706_v49, %v6706_v49  ;;  %v1210_v28 = vadd.f32 1.0, %v1207_v27  ;;  %5576 = vrcp.f32 %v1208_v13  ;;  %v1084_v11 = vadd.f32 0.2548296, %v1081_v50 }
 0x285   : > { %v6711_v33 = vpop.eup %5558  ;;  %5578 = vrcp.f32 %v1209_v57  ;;  %v1085_v1 = vmul.f32 %v6661_v6, %v1082_v44  ;;  %v1192_v27 = vmul.f32 %v1189_v24, %v6702_v38  ;;  %v1086_v7 = vmul.f32 %v6663_v43, %v1083_v48 }
 0x286   : > { %v6713_v42 = vpop.eup %5560  ;;  %v1125_v32 = vmul.f32 %v6711_v33, %v6711_v33  ;;  %v1130_v52 = vmul.f32 0.5, %v1124_v10  ;;  %v1136_v15 = vmul.f32 0.75, %v1124_v10  ;;  %v1145_v51 = vmul.f32 1.875, %v1124_v10 }
 0x287   : > { %v6718_v31 = vpop.eup %5562  ;;  %v1126_v53 = vmul.f32 %v6713_v42, %v6713_v42  ;;  %5580 = vrcp.f32 %v1210_v28  ;;  %v1241_v6 = vmax.f32 %v6694_v3, 0.0  ;;  %v1087_v24 = vmul.f32 %v6667_v47, %v1084_v11 }
 0x288   : > { %9726 = vst [vmem:[#allocation18_spill] sm:$0xff] %v6718_v31  ;;  %v6720_v26 = vpop.eup %5564  ;;  %v6726_v20 = vmul.f32 %v6718_v31, %v5553_v39  ;;  %v1191_v39 = vmul.f32 %v1188_v41, %v6697_v16  ;;  %v1131_v46 = vmul.f32 0.5, %v1125_v32  ;;  %v1137_v18 = vmul.f32 0.75, %v1125_v32 }
 0x289   : > { %9727 = vst [vmem:[#allocation19_spill] sm:$0xff] %v6720_v26  ;;  %v6729_v21 = vmul.f32 %v6720_v26, %v5557_v62  ;;  %v5567_v35 = vpop.eup %5566  ;;  %v1132_v63 = vmul.f32 0.5, %v1126_v53  ;;  %v1146_v60 = vmul.f32 1.875, %v1125_v32  ;;  %v1133_v29 = vsub.f32 1.0, %v1130_v52 }
 0x28a   : > { %v6738_v62 = vpop.eup %5568  ;;  %v1138_v9 = vmul.f32 0.75, %v1126_v53  ;;  %v1147_v17 = vmul.f32 1.875, %v1126_v53  ;;  %v1139_v25 = vmul.f32 %v1136_v15, %v1124_v10  ;;  %v1148_v36 = vmul.f32 %v1145_v51, %v1124_v10 }
 0x28b   : > { %9728 = vst [vmem:[#allocation20_spill] sm:$0xff] %v6738_v62  ;;  %v6740_v30 = vpop.eup %5570  ;;  %v1106_v41 = vmul.f32 2.0, %v5567_v35  ;;  %v1134_v52 = vsub.f32 1.0, %v1131_v46  ;;  %v1140_v13 = vmul.f32 %v1137_v18, %v1125_v32  ;;  %v1149_v50 = vmul.f32 %v1146_v60, %v1125_v32 }
 0x28c   : > { %v5573_v19 = vpop.eup %5572  ;;  %v1135_v15 = vsub.f32 1.0, %v1132_v63  ;;  %v1141_v51 = vmul.f32 %v1138_v9, %v1126_v53  ;;  %v1150_v57 = vmul.f32 %v1147_v17, %v1126_v53  ;;  %v1142_v44 = vadd.f32 %v1139_v25, %v1133_v29 }
 0x28d   : > { %v5575_v56 = vpop.eup %5574  ;;  %v1151_v28 = vmul.f32 %v1148_v36, %v1124_v10  ;;  %v1242_v43 = vmax.f32 %v6697_v16, 0.0  ;;  %v1107_v48 = vmul.f32 2.0, %v5573_v19  ;;  %5582 = vpow2.f32 %v1193_v5 }
 0x28e   : > { %v1108_v35 = vmul.f32 2.0, %v5575_v56  ;;  %v1195_v2 = vmul.f32 1.442695, %v1191_v39  ;;  %v1109_v46 = vsub.f32 %v1106_v41, %v1085_v1  ;;  %v1143_v18 = vadd.f32 %v1140_v13, %v1134_v52  ;;  %v6754_v56 = vpop.eup %5576 }
 0x28f   : > { %v1152_v60 = vmul.f32 %v1149_v50, %v1125_v32  ;;  %v1243_v63 = vmax.f32 %v6702_v38, 0.0  ;;  %v1110_v9 = vsub.f32 %v1107_v48, %v1086_v7  ;;  %v1144_v17 = vadd.f32 %v1141_v51, %v1135_v15  ;;  %v6759_v36 = vpop.eup %5578 }
 0x290   : > { %v1153_v4 = vmul.f32 %v1150_v57, %v1126_v53  ;;  %v1244_v47 = vmin.f32 %v1241_v6, 6.0  ;;  %v1111_v10 = vsub.f32 %v1108_v35, %v1087_v24  ;;  %v1154_v29 = vsub.f32 %v1142_v44, %v1151_v28 }
 0x291   : > { %v1197_v11 = vmul.f32 1.442695, %v1192_v27  ;;  %v1245_v25 = vmin.f32 %v1242_v43, 6.0  ;;  %v1127_v5 = vmul.f32 0.5641896, %v6706_v49  ;;  %5584 = vpow2.f32 %v1195_v2  ;;  %v6764_v52 = vpop.eup %5580 }
 0x292   : > { %v1128_v32 = vmul.f32 0.5641896, %v6711_v33  ;;  %v1334_v39 = vmul.f32 -0.93827456, %v6603_v34  ;;  %v1129_v53 = vmul.f32 0.5641896, %v6713_v42  ;;  %v1155_v19 = vsub.f32 %v1143_v18, %v1152_v60 }
 0x293   : > { %v1246_v41 = vmin.f32 %v1243_v63, 6.0  ;;  %v1335_v27 = vmul.f32 -0.93827456, %v6605_v37  ;;  %v1112_v49 = vsel %vm1094_vm2, %v1109_v46, %v1085_v1  ;;  %v1113_v2 = vsel %vm1095_vm3, %v1110_v9, %v1086_v7 }
 0x294   : > { %v1156_v33 = vsub.f32 %v1144_v17, %v1153_v4  ;;  %v1250_v13 = vmul.f32 %v1244_v47, %v1244_v47  ;;  %v1114_v50 = vsel %vm1096_vm4, %v1111_v10, %v1087_v24  ;;  %v1157_v42 = vmul.f32 %v1154_v29, %v1127_v5 }
 0x295   : > { %v1214_v15 = vmul.f32 1.0614054, %v6754_v56  ;;  %v1251_v51 = vmul.f32 %v1245_v25, %v1245_v25  ;;  %v1215_v57 = vmul.f32 1.0614054, %v6759_v36  ;;  %v1268_v6 = vsub.f32 0.0, %v6694_v3 }
 0x296   : > { %v1336_v44 = vmul.f32 -0.93827456, %v6610_v58  ;;  %v6777_v1 = vadd.f32 %v1334_v39, %v6616_v45  ;;  %v1158_v28 = vmul.f32 %v1155_v19, %v1128_v32  ;;  %v1216_v7 = vmul.f32 1.0614054, %v6764_v52 }
 0x297   : > { %v1252_v4 = vmul.f32 %v1246_v41, %v1246_v41  ;;  %v6781_v43 = vadd.f32 %v1335_v27, %v6618_v54  ;;  %v6783_v24 = vpop.eup %5582  ;;  %v1159_v48 = vmul.f32 %v1156_v33, %v1129_v53  ;;  %v1163_v35 = vsel %vm1160_vm5, %v1157_v42, %v1112_v49 }
 0x298   : > { %v1253_v46 = vmul.f32 1.442695, %v1250_v13  ;;  %v1269_v18 = vsub.f32 0.0, %v6697_v16  ;;  %v1164_v60 = vsel %vm1161_vm6, %v1158_v28, %v1113_v2  ;;  %v5060_v63 = vadd.f32 -1.4531521, %v1214_v15 }
 0x299   : > { %v1255_v9 = vmul.f32 1.442695, %v1251_v51  ;;  %v1270_v17 = vsub.f32 0.0, %v6702_v38  ;;  %v5061_v47 = vadd.f32 -1.4531521, %v1215_v57  ;;  %v1271_v10 = vmax.f32 %v1268_v6, 3.0 }
 0x29a   : > { %v6792_v29 = vadd.f32 %v1336_v44, %v6628_v61  ;;  %v1355_v25 = vand.u32 2147483647, %v6777_v1  ;;  %5586 = vpow2.f32 %v1197_v11  ;;  %v5062_v59 = vadd.f32 -1.4531521, %v1216_v7 }
 0x29b   : > { %v1257_v5 = vmul.f32 1.442695, %v1252_v4  ;;  %v1356_v32 = vand.u32 2147483647, %v6781_v43  ;;  %v5585_v39 = vpop.eup %5584  ;;  %v1165_v23 = vsel %vm1162_vm7, %v1159_v48, %v1114_v50  ;;  %v1166_v53 = vmul.f32 0.88622695, %v1163_v35 }
 0x29c   : > { %5588 = vpow2.f32 %v1253_v46  ;;  %v1272_v19 = vmax.f32 %v1269_v18, 3.0  ;;  %v1167_v41 = vmul.f32 0.88622695, %v1164_v60  ;;  %v1220_v27 = vmul.f32 %v6754_v56, %v5060_v63 }
 0x29d   : > { %5590 = vpow2.f32 %v1255_v9  ;;  %v1273_v49 = vmax.f32 %v1270_v17, 3.0  ;;  %v1221_v2 = vmul.f32 %v6759_v36, %v5061_v47  ;;  %v1357_v11 = vand.u32 2147483647, %v6792_v29 }
 0x29e   : > { %5592 = vrcp.f32 %v1271_v10  ;;  %v1358_v33 = vmul.f32 0.3275911, %v1355_v25  ;;  %v1168_v13 = vmul.f32 0.88622695, %v1165_v23  ;;  %v1222_v42 = vmul.f32 %v6764_v52, %v5062_v59 }
 0x29f   : > { %5594 = vpow2.f32 %v1257_v5  ;;  %v1359_v8 = vmul.f32 0.3275911, %v1356_v32  ;;  %v1048_v50 = vmul.f32 %v6740_v30, %v6738_v62  ;;  %v1169_v15 = vmul.f32 %v1166_v53, %v6726_v20 }
 0x2a0   : > { %5596 = vrcp.f32 %v1272_v19  ;;  %v1170_v51 = vmul.f32 %v1167_v41, %v6729_v21  ;;  %v1223_v57 = vadd.f32 1.4214138, %v1220_v27  ;;  %v1224_v6 = vadd.f32 1.4214138, %v1221_v2 }
 0x2a1   : > { %5598 = vrcp.f32 %v1273_v49  ;;  %v1360_v44 = vmul.f32 0.3275911, %v1357_v11  ;;  %v1361_v28 = vadd.f32 1.0, %v1358_v33  ;;  %v1171_v7 = vmul.f32 %v1168_v13, %v1048_v50 }
 0x2a2   : > { %v1225_v4 = vadd.f32 1.4214138, %v1222_v42  ;;  %v1340_v48 = vmul.f32 -0.5, %v6777_v1  ;;  %v1362_v35 = vadd.f32 1.0, %v1359_v8  ;;  %v1341_v46 = vmul.f32 -0.5, %v6781_v43 }
 0x2a3   : > { %v1172_v60 = vmul.f32 %v1169_v15, %v1169_v15  ;;  %v1173_v30 = vmul.f32 %v1170_v51, %v1170_v51  ;;  %v1226_v63 = vmul.f32 %v6754_v56, %v1223_v57  ;;  %v1227_v21 = vmul.f32 %v6759_v36, %v1224_v6 }
 0x2a4   : > { %v5587_v18 = vpop.eup %5586  ;;  %v1342_v9 = vmul.f32 -0.5, %v6792_v29  ;;  %v1363_v17 = vadd.f32 1.0, %v1360_v44  ;;  %5600 = vrcp.f32 %v1361_v28  ;;  %v1174_v10 = vmul.f32 %v1171_v7, %v1171_v7 }
 0x2a5   : > { %v1228_v25 = vmul.f32 %v6764_v52, %v1225_v4  ;;  %v1343_v59 = vmul.f32 %v1340_v48, %v6777_v1  ;;  %5602 = vrcp.f32 %v1362_v35  ;;  %v1344_v32 = vmul.f32 %v1341_v46, %v6781_v43 }
 0x2a6   : > { %v5589_v20 = vpop.eup %5588  ;;  %v6814_v53 = vmul.f32 0.01234123, %v1172_v60  ;;  %v6818_v19 = vmul.f32 %v6783_v24, %v6718_v31  ;;  %v6821_v41 = vmul.f32 %v5585_v39, %v6720_v26  ;;  %v5063_v27 = vadd.f32 -0.28449672, %v1226_v63 }
 0x2a7   : > { %v5591_v47 = vpop.eup %5590  ;;  %v6823_v2 = vmul.f32 0.01234123, %v1173_v30  ;;  %v5064_v11 = vadd.f32 -0.28449672, %v1227_v21  ;;  %v1345_v33 = vmul.f32 %v1342_v9, %v6792_v29  ;;  %5604 = vrcp.f32 %v1363_v17 }
 0x2a8   : > { %v5593_v5 = vpop.eup %5592  ;;  %9729 = vst [vmem:[#allocation21_spill] sm:$0xff] %v6814_v53  ;;  %v6828_v42 = vmul.f32 0.01234123, %v1174_v10  ;;  %v5065_v8 = vadd.f32 -0.28449672, %v1228_v25  ;;  %v6831_v24 = vmul.f32 %v5587_v18, %v6738_v62  ;;  %v1232_v6 = vmul.f32 %v6754_v56, %v5063_v27 }
 0x2a9   : > { %v5595_v23 = vpop.eup %5594  ;;  %9730 = vst [vmem:[#allocation22_spill] sm:$0xff] %v6823_v2  ;;  %v1277_v50 = vmul.f32 %v5593_v5, %v5593_v5  ;;  %v1346_v15 = vmul.f32 1.442695, %v1343_v59  ;;  %v1348_v39 = vmul.f32 1.442695, %v1344_v32  ;;  %v6840_v44 = vmul.f32 2.0, %v5589_v20 }
 0x2aa   : > { %v5597_v49 = vpop.eup %5596  ;;  %9731 = vst [vmem:[#allocation23_spill] sm:$0xff] %v6828_v42  ;;  %v6834_v51 = vmul.f32 -0.88641554, %v6603_v34  ;;  %v6837_v57 = vmul.f32 -0.88641554, %v6605_v37  ;;  %v6842_v28 = vmul.f32 2.0, %v5591_v47  ;;  %v1233_v4 = vmul.f32 %v6759_v36, %v5064_v11 }
 0x2ab   : > { %v6826_v13 = vpop.eup %5598  ;;  %v1278_v7 = vmul.f32 %v5597_v49, %v5597_v49  ;;  %v6845_v48 = vmul.f32 2.0, %v5595_v23  ;;  %v6849_v46 = vmul.f32 1.442695, %v1345_v33  ;;  %v1234_v18 = vmul.f32 %v6764_v52, %v5065_v8 }
 0x2ac   : > { %v1279_v35 = vmul.f32 %v6826_v13, %v6826_v13  ;;  %v1283_v60 = vmul.f32 0.5, %v1277_v50  ;;  %v1289_v30 = vmul.f32 0.75, %v1277_v50  ;;  %5606 = vpow2.f32 %v1346_v15 }
 0x2ad   : > { %v6854_v20 = vmul.f32 0.5641896, %v5593_v5  ;;  %v6856_v21 = vmul.f32 0.5641896, %v5597_v49  ;;  %v1298_v9 = vmul.f32 1.875, %v1277_v50  ;;  %5608 = vpow2.f32 %v1348_v39 }
 0x2ae   : > { %v6852_v63 = vpop.eup %5600  ;;  %v1235_v47 = vadd.f32 0.2548296, %v1232_v6  ;;  %v1284_v10 = vmul.f32 0.5, %v1278_v7  ;;  %v1290_v25 = vmul.f32 0.75, %v1278_v7  ;;  %v1299_v59 = vmul.f32 1.875, %v1278_v7 }
 0x2af   : > { %v6858_v17 = vpop.eup %5602  ;;  %v1236_v32 = vadd.f32 0.2548296, %v1233_v4  ;;  %v1285_v23 = vmul.f32 0.5, %v1279_v35  ;;  %v1291_v27 = vmul.f32 0.75, %v1279_v35  ;;  %v1300_v11 = vmul.f32 1.875, %v1279_v35 }
 0x2b0   : > { %v1237_v33 = vadd.f32 0.2548296, %v1234_v18  ;;  %v1286_v8 = vsub.f32 1.0, %v1283_v60  ;;  %v1292_v15 = vmul.f32 %v1289_v30, %v1277_v50  ;;  %v1421_v5 = vsub.f32 0.0, %v6777_v1 }
 0x2b1   : > { %v6861_v0 = vpop.eup %5604  ;;  %v1301_v49 = vmul.f32 %v1298_v9, %v1277_v50  ;;  %v1367_v39 = vmul.f32 1.0614054, %v6852_v63  ;;  %v1368_v12 = vmul.f32 1.0614054, %v6858_v17  ;;  %v1422_v6 = vsub.f32 0.0, %v6781_v43 }
 0x2b2   : > { %v1238_v55 = vmul.f32 %v6754_v56, %v1235_v47  ;;  %vm1247_vm8 = vcmp.gt.f32.partialorder %v6694_v3, 0.0  ;;  %v1287_v4 = vsub.f32 1.0, %v1284_v10  ;;  %v1293_v22 = vmul.f32 %v1290_v25, %v1278_v7 }
 0x2b3   : > { %v1302_v18 = vmul.f32 %v1299_v59, %v1278_v7  ;;  %v1239_v60 = vmul.f32 %v6759_v36, %v1236_v32  ;;  %v1288_v30 = vsub.f32 1.0, %v1285_v23  ;;  %v1294_v14 = vmul.f32 %v1291_v27, %v1279_v35 }
 0x2b4   : > { %v1303_v40 = vmul.f32 %v1300_v11, %v1279_v35  ;;  %v1295_v42 = vadd.f32 %v1292_v15, %v1286_v8  ;;  %v1369_v9 = vmul.f32 1.0614054, %v6861_v0  ;;  %v1423_v2 = vsub.f32 0.0, %v6792_v29 }
 0x2b5   : > { %v1424_v53 = vmax.f32 %v1421_v5, 3.0  ;;  %vm1248_vm9 = vcmp.gt.f32.partialorder %v6697_v16, 0.0  ;;  %v1304_v62 = vmul.f32 %v1301_v49, %v1277_v50  ;;  %v5066_v56 = vadd.f32 -1.4531521, %v1367_v39 }
 0x2b6   : > { %v5067_v47 = vadd.f32 -1.4531521, %v1368_v12  ;;  %v1425_v37 = vmax.f32 %v1422_v6, 3.0  ;;  %v6872_v10 = vpop.eup %5606  ;;  %v1240_v25 = vmul.f32 %v6764_v52, %v1237_v33  ;;  %v1296_v36 = vadd.f32 %v1293_v22, %v1287_v4 }
 0x2b7   : > { %v1305_v59 = vmul.f32 %v1302_v18, %v1278_v7  ;;  %vm1313_vm10 = vcmp.le.f32.partialorder %v6694_v3, -3.0  ;;  %v1394_v32 = vmax.f32 %v6777_v1, 0.0  ;;  %v6877_v23 = vpop.eup %5608  ;;  %vm1249_vm11 = vcmp.gt.f32.partialorder %v6702_v38, 0.0 }
 0x2b8   : > { %v1262_v27 = vsub.f32 %v6840_v44, %v1238_v55  ;;  %v1297_v50 = vadd.f32 %v1294_v14, %v1288_v30  ;;  %v1306_v11 = vmul.f32 %v1303_v40, %v1279_v35  ;;  %v1395_v12 = vmax.f32 %v6781_v43, 0.0 }
 0x2b9   : > { %vm1314_vm12 = vcmp.le.f32.partialorder %v6697_v16, -3.0  ;;  %v5068_v8 = vadd.f32 -1.4531521, %v1369_v9  ;;  %v1396_v22 = vmax.f32 %v6792_v29, 0.0  ;;  %v1426_v52 = vmax.f32 %v1423_v2, 3.0 }
 0x2ba   : > { %5610 = vrcp.f32 %v1424_v53  ;;  %v1307_v7 = vsub.f32 %v1295_v42, %v1304_v62  ;;  %v1373_v33 = vmul.f32 %v6852_v63, %v5066_v56  ;;  %v1374_v15 = vmul.f32 %v6858_v17, %v5067_v47 }
 0x2bb   : > { %5612 = vrcp.f32 %v1425_v37  ;;  %v1263_v5 = vsub.f32 %v6842_v28, %v1239_v60  ;;  %v1264_v14 = vsub.f32 %v6845_v48, %v1240_v25  ;;  %v1308_v40 = vsub.f32 %v1296_v36, %v1305_v59 }
 0x2bc   : > { %v1397_v44 = vmin.f32 %v1394_v32, 6.0  ;;  %v1265_v35 = vsel %vm1247_vm8, %v1262_v27, %v1238_v55  ;;  %v1398_v49 = vmin.f32 %v1395_v12, 6.0  ;;  %v1489_v39 = vmul.f32 -0.88641554, %v6610_v58 }
 0x2bd   : > { %v6893_v62 = vadd.f32 %v6834_v51, %v6616_v45  ;;  %v1375_v53 = vmul.f32 %v6861_v0, %v5068_v8  ;;  %v1399_v2 = vmin.f32 %v1396_v22, 6.0  ;;  %5614 = vrcp.f32 %v1426_v52 }
 0x2be   : > { %v6898_v37 = vadd.f32 %v6837_v57, %v6618_v54  ;;  %v1309_v42 = vsub.f32 %v1297_v50, %v1306_v11  ;;  %v1310_v28 = vmul.f32 %v1307_v7, %v6854_v20  ;;  %v1376_v48 = vadd.f32 1.4214138, %v1373_v33 }
 0x2bf   : > { %v1377_v55 = vadd.f32 1.4214138, %v1374_v15  ;;  %v1266_v6 = vsel %vm1248_vm9, %v1263_v5, %v1239_v60  ;;  %v1282_v4 = vmul.f32 0.5641896, %v6826_v13  ;;  %v1311_v51 = vmul.f32 %v1308_v40, %v6856_v21 }
 0x2c0   : > { %v1403_v18 = vmul.f32 %v1397_v44, %v1397_v44  ;;  %v1316_v30 = vsel %vm1313_vm10, %v1310_v28, %v1265_v35  ;;  %v1404_v9 = vmul.f32 %v1398_v49, %v1398_v49  ;;  %v6908_v57 = vadd.f32 %v1489_v39, %v6628_v61 }
 0x2c1   : > { %v1508_v56 = vand.u32 2147483647, %v6893_v62  ;;  %v1267_v20 = vsel %vm1249_vm11, %v1264_v14, %v1240_v25  ;;  %v1378_v47 = vadd.f32 1.4214138, %v1375_v53  ;;  %v1405_v36 = vmul.f32 %v1399_v2, %v1399_v2 }
 0x2c2   : > { %v1509_v60 = vand.u32 2147483647, %v6898_v37  ;;  %v1312_v13 = vmul.f32 %v1309_v42, %v1282_v4  ;;  %v1317_v21 = vsel %vm1314_vm12, %v1311_v51, %v1266_v6  ;;  %v1379_v3 = vmul.f32 %v6852_v63, %v1376_v48 }
 0x2c3   : > { %v1380_v59 = vmul.f32 %v6858_v17, %v1377_v55  ;;  %vm1315_vm13 = vcmp.le.f32.partialorder %v6702_v38, -3.0  ;;  %v1319_v27 = vmul.f32 0.88622695, %v1316_v30  ;;  %5616 = vpow2.f32 %v6849_v46 }
 0x2c4   : > { %v6918_v32 = vpop.eup %5610  ;;  %v1406_v25 = vmul.f32 1.442695, %v1403_v18  ;;  %v1318_v11 = vsel %vm1315_vm13, %v1312_v13, %v1267_v20  ;;  %v1408_v12 = vmul.f32 1.442695, %v1404_v9  ;;  %v1510_v8 = vand.u32 2147483647, %v6908_v57 }
 0x2c5   : > { %v6922_v50 = vpop.eup %5612  ;;  %v1511_v16 = vmul.f32 0.3275911, %v1508_v56  ;;  %v1320_v22 = vmul.f32 0.88622695, %v1317_v21  ;;  %v1381_v52 = vmul.f32 %v6861_v0, %v1378_v47  ;;  %v1410_v7 = vmul.f32 1.442695, %v1405_v36 }
 0x2c6   : > { %v1512_v33 = vmul.f32 0.3275911, %v1509_v60  ;;  %v6928_v15 = vmul.f32 %v6872_v10, %v6718_v31  ;;  %v5069_v38 = vadd.f32 -0.28449672, %v1379_v3  ;;  %v5070_v5 = vadd.f32 -0.28449672, %v1380_v59 }
 0x2c7   : > { %v1430_v46 = vmul.f32 %v6918_v32, %v6918_v32  ;;  %v6932_v14 = vpop.eup %5614  ;;  %v1321_v40 = vmul.f32 0.88622695, %v1318_v11  ;;  %v6936_v44 = vmul.f32 %v6877_v23, %v6720_v26  ;;  %5618 = vpow2.f32 %v1406_v25 }
 0x2c8   : > { %v1431_v35 = vmul.f32 %v6922_v50, %v6922_v50  ;;  %v1322_v49 = vmul.f32 %v1319_v27, %v6818_v19  ;;  %5620 = vpow2.f32 %v1408_v12  ;;  %v1513_v10 = vmul.f32 0.3275911, %v1510_v8 }
 0x2c9   : > { %v1514_v39 = vadd.f32 1.0, %v1511_v16  ;;  %v1323_v53 = vmul.f32 %v1320_v22, %v6821_v41  ;;  %v5071_v2 = vadd.f32 -0.28449672, %v1381_v52  ;;  %5622 = vpow2.f32 %v1410_v7  ;;  %v9732_v7 = vld [vmem:[#allocation12_spill] sm:$0xff] }
 0x2ca   : > { %v1515_v42 = vadd.f32 1.0, %v1512_v33  ;;  %v1385_v28 = vmul.f32 %v6852_v63, %v5069_v38  ;;  %v1386_v48 = vmul.f32 %v6858_v17, %v5070_v5  ;;  %v6946_v23 = vmul.f32 %v6932_v14, %v6932_v14 }
 0x2cb   : > { %v1436_v55 = vmul.f32 0.5, %v1430_v46  ;;  %v1324_v6 = vmul.f32 %v1321_v40, %v6831_v24  ;;  %v1437_v19 = vmul.f32 0.5, %v1431_v35  ;;  %v1442_v4 = vmul.f32 0.75, %v1430_v46 }
 0x2cc   : > { %v1443_v51 = vmul.f32 0.75, %v1431_v35  ;;  %v1451_v18 = vmul.f32 1.875, %v1430_v46  ;;  %v1452_v30 = vmul.f32 1.875, %v1431_v35  ;;  %v1516_v41 = vadd.f32 1.0, %v1513_v10 }
 0x2cd   : > { %5624 = vrcp.f32 %v1514_v39  ;;  %v6949_v9 = vpop.eup %5616  ;;  %v6951_v56 = vmul.f32 %v1322_v49, %v1322_v49  ;;  %v1387_v20 = vmul.f32 %v6861_v0, %v5071_v2  ;;  %v1493_v47 = vmul.f32 -0.5, %v6893_v62 }
 0x2ce   : > { %5626 = vrcp.f32 %v1515_v42  ;;  %v1388_v36 = vadd.f32 0.2548296, %v1385_v28  ;;  %v1389_v60 = vadd.f32 0.2548296, %v1386_v48  ;;  %v1438_v24 = vmul.f32 0.5, %v6946_v23 }
 0x2cf   : > { %v1439_v13 = vsub.f32 1.0, %v1436_v55  ;;  %v1440_v21 = vsub.f32 1.0, %v1437_v19  ;;  %v1444_v3 = vmul.f32 0.75, %v6946_v23  ;;  %v1445_v59 = vmul.f32 %v1442_v4, %v1430_v46 }
 0x2d0   : > { %v1446_v27 = vmul.f32 %v1443_v51, %v1431_v35  ;;  %v1453_v25 = vmul.f32 1.875, %v6946_v23  ;;  %v1454_v11 = vmul.f32 %v1451_v18, %v1430_v46  ;;  %v1455_v12 = vmul.f32 %v1452_v30, %v1431_v35 }
 0x2d1   : > { %5628 = vrcp.f32 %v1516_v41  ;;  %v5619_v8 = vpop.eup %5618  ;;  %v6958_v16 = vmul.f32 %v1323_v53, %v1323_v53  ;;  %v6960_v22 = vmul.f32 %v1324_v6, %v1324_v6  ;;  %v6963_v52 = vmul.f32 -0.82000196, %v6603_v34 }
 0x2d2   : > { %v6966_v33 = vmul.f32 -0.82000196, %v9732_v7  ;;  %v5621_v38 = vpop.eup %5620  ;;  %v1390_v5 = vadd.f32 0.2548296, %v1387_v20  ;;  %v1391_v40 = vmul.f32 %v6852_v63, %v1388_v36  ;;  %vm1400_vm14 = vcmp.gt.f32.partialorder %v6777_v1, 0.0 }
 0x2d3   : > { %vm1401_vm15 = vcmp.gt.f32.partialorder %v6781_v43, 0.0  ;;  %v1496_v49 = vmul.f32 %v1493_v47, %v6893_v62  ;;  %v1547_v10 = vmax.f32 %v6893_v62, 0.0  ;;  %v5623_v39 = vpop.eup %5622  ;;  %v1392_v53 = vmul.f32 %v6858_v17, %v1389_v60 }
 0x2d4   : > { %v1441_v2 = vsub.f32 1.0, %v1438_v24  ;;  %v1447_v42 = vmul.f32 %v1444_v3, %v6946_v23  ;;  %v1448_v28 = vadd.f32 %v1445_v59, %v1439_v13  ;;  %v1449_v48 = vadd.f32 %v1446_v27, %v1440_v21 }
 0x2d5   : > { %v1456_v55 = vmul.f32 %v1453_v25, %v6946_v23  ;;  %v1457_v6 = vmul.f32 %v1454_v11, %v1430_v46  ;;  %v1458_v63 = vmul.f32 %v1455_v12, %v1431_v35  ;;  %v1412_v19 = vmul.f32 2.0, %v5619_v8 }
 0x2d6   : > { %v1413_v4 = vmul.f32 2.0, %v5621_v38  ;;  %v1494_v51 = vmul.f32 -0.5, %v6898_v37  ;;  %v1495_v18 = vmul.f32 -0.5, %v6908_v57  ;;  %v1393_v41 = vmul.f32 %v6861_v0, %v1390_v5 }
 0x2d7   : > { %v6978_v30 = vpop.eup %5624  ;;  %vm1402_vm0 = vcmp.gt.f32.partialorder %v6792_v29, 0.0  ;;  %v1414_v17 = vmul.f32 2.0, %v5623_v39  ;;  %v1499_v20 = vmul.f32 1.442695, %v1496_v49  ;;  %v1548_v47 = vmax.f32 %v6898_v37, 0.0 }
 0x2d8   : > { %v6983_v36 = vpop.eup %5626  ;;  %v1415_v46 = vsub.f32 %v1412_v19, %v1391_v40  ;;  %v1416_v35 = vsub.f32 %v1413_v4, %v1392_v53  ;;  %v1433_v60 = vmul.f32 0.5641896, %v6918_v32  ;;  %v1450_v24 = vadd.f32 %v1447_v42, %v1441_v2 }
 0x2d9   : > { %vm1466_vm1 = vcmp.le.f32.partialorder %v6777_v1, -3.0  ;;  %vm1467_vm2 = vcmp.le.f32.partialorder %v6781_v43, -3.0  ;;  %v1459_v13 = vmul.f32 %v1456_v55, %v6946_v23  ;;  %v1460_v0 = vsub.f32 %v1448_v28, %v1457_v6 }
 0x2da   : > { %v1461_v21 = vsub.f32 %v1449_v48, %v1458_v63  ;;  %v1550_v3 = vmin.f32 %v1547_v10, 6.0  ;;  %v1434_v59 = vmul.f32 0.5641896, %v6922_v50  ;;  %v1497_v27 = vmul.f32 %v1494_v51, %v6898_v37 }
 0x2db   : > { %v1520_v25 = vmul.f32 1.0614054, %v6978_v30  ;;  %v1549_v11 = vmax.f32 %v6908_v57, 0.0  ;;  %v6993_v12 = vpop.eup %5628  ;;  %v1417_v32 = vsub.f32 %v1414_v17, %v1393_v41  ;;  %v1435_v8 = vmul.f32 0.5641896, %v6932_v14 }
 0x2dc   : > { %v1521_v38 = vmul.f32 1.0614054, %v6983_v36  ;;  %v1551_v5 = vmin.f32 %v1548_v47, 6.0  ;;  %v1418_v23 = vsel %vm1400_vm14, %v1415_v46, %v1391_v40  ;;  %v1419_v50 = vsel %vm1401_vm15, %v1416_v35, %v1392_v53 }
 0x2dd   : > { %vm1468_vm3 = vcmp.le.f32.partialorder %v6792_v29, -3.0  ;;  %5630 = vpow2.f32 %v1499_v20  ;;  %v1574_v49 = vsub.f32 0.0, %v6893_v62  ;;  %v1462_v10 = vsub.f32 %v1450_v24, %v1459_v13 }
 0x2de   : > { %v1463_v39 = vmul.f32 %v1460_v0, %v1433_v60  ;;  %v1464_v2 = vmul.f32 %v1461_v21, %v1434_v59  ;;  %v1556_v42 = vmul.f32 %v1550_v3, %v1550_v3  ;;  %v1522_v14 = vmul.f32 1.0614054, %v6993_v12 }
 0x2df   : > { %v5072_v28 = vadd.f32 -1.4531521, %v1520_v25  ;;  %v1552_v48 = vmin.f32 %v1549_v11, 6.0  ;;  %v1575_v55 = vsub.f32 0.0, %v6898_v37  ;;  %v5073_v6 = vadd.f32 -1.4531521, %v1521_v38 }
 0x2e0   : > { %v1557_v40 = vmul.f32 %v1551_v5, %v1551_v5  ;;  %v1642_v63 = vmul.f32 -0.82000196, %v6610_v58  ;;  %v7008_v53 = vadd.f32 %v6963_v52, %v6616_v45  ;;  %v1420_v19 = vsel %vm1402_vm0, %v1417_v32, %v1393_v41 }
 0x2e1   : > { %v1576_v4 = vsub.f32 0.0, %v6908_v57  ;;  %v1577_v51 = vmax.f32 %v1574_v49, 3.0  ;;  %v7015_v17 = vadd.f32 %v6966_v33, %v6618_v54  ;;  %v1465_v20 = vmul.f32 %v1462_v10, %v1435_v8 }
 0x2e2   : > { %v1469_v47 = vsel %vm1466_vm1, %v1463_v39, %v1418_v23  ;;  %v1470_v46 = vsel %vm1467_vm2, %v1464_v2, %v1419_v50  ;;  %v1559_v35 = vmul.f32 1.442695, %v1556_v42  ;;  %v5074_v52 = vadd.f32 -1.4531521, %v1522_v14  ;;  %v9733_v2 = vld [vmem:[#allocation20_spill] sm:$0xff] }
 0x2e3   : > { %v1526_v60 = vmul.f32 %v6978_v30, %v5072_v28  ;;  %v1558_v24 = vmul.f32 %v1552_v48, %v1552_v48  ;;  %v1578_v41 = vmax.f32 %v1575_v55, 3.0  ;;  %v1527_v13 = vmul.f32 %v6983_v36, %v5073_v6 }
 0x2e4   : > { %v1561_v0 = vmul.f32 1.442695, %v1557_v40  ;;  %v7024_v21 = vadd.f32 %v1642_v63, %v6628_v61  ;;  %v1661_v33 = vand.u32 2147483647, %v7008_v53  ;;  %v1498_v1 = vmul.f32 %v1495_v18, %v6908_v57 }
 0x2e5   : > { %v1579_v3 = vmax.f32 %v1576_v4, 3.0  ;;  %5632 = vrcp.f32 %v1577_v51  ;;  %v1662_v43 = vand.u32 2147483647, %v7015_v17  ;;  %v1471_v59 = vsel %vm1468_vm3, %v1465_v20, %v1420_v19 }
 0x2e6   : > { %v1472_v25 = vmul.f32 0.88622695, %v1469_v47  ;;  %v1473_v11 = vmul.f32 0.88622695, %v1470_v46  ;;  %5634 = vpow2.f32 %v1559_v35  ;;  %v1528_v8 = vmul.f32 %v6993_v12, %v5074_v52  ;;  %v9734_v35 = vld [vmem:[#allocation21_spill] sm:$0xff] }
 0x2e7   : > { %v5631_v32 = vpop.eup %5630  ;;  %v1529_v38 = vadd.f32 1.4214138, %v1526_v60  ;;  %v1563_v5 = vmul.f32 1.442695, %v1558_v24  ;;  %5636 = vrcp.f32 %v1578_v41  ;;  %v1530_v23 = vadd.f32 1.4214138, %v1527_v13 }
 0x2e8   : > { %5638 = vpow2.f32 %v1561_v0  ;;  %v1663_v18 = vand.u32 2147483647, %v7024_v21  ;;  %v1664_v50 = vmul.f32 0.3275911, %v1661_v33  ;;  %v1328_v49 = vmul.f32 0.02853139, %v6951_v56 }
 0x2e9   : > { %v1501_v10 = vmul.f32 1.442695, %v1497_v27  ;;  %5640 = vrcp.f32 %v1579_v3  ;;  %v1665_v29 = vmul.f32 0.3275911, %v1662_v43  ;;  %v1329_v39 = vmul.f32 0.02853139, %v6958_v16 }
 0x2ea   : > { %v1354_v42 = vmul.f32 %v6949_v9, %v9733_v2  ;;  %v1474_v14 = vmul.f32 0.88622695, %v1471_v59  ;;  %v1503_v28 = vmul.f32 1.442695, %v1498_v1  ;;  %v1475_v48 = vmul.f32 %v1472_v25, %v6928_v15  ;;  %v9735_v41 = vld [vmem:[#allocation22_spill] sm:$0xff]  ;;  %v9736_v0 = vld [vmem:[#allocation23_spill] sm:$0xff] }
 0x2eb   : > { %v1476_v55 = vmul.f32 %v1473_v11, %v6936_v44  ;;  %v1531_v6 = vadd.f32 1.4214138, %v1528_v8  ;;  %v1532_v40 = vmul.f32 %v6978_v30, %v1529_v38  ;;  %v1533_v63 = vmul.f32 %v6983_v36, %v1530_v23 }
 0x2ec   : > { %5642 = vpow2.f32 %v1563_v5  ;;  %v1666_v56 = vmul.f32 0.3275911, %v1663_v18  ;;  %v1667_v27 = vadd.f32 1.0, %v1664_v50  ;;  %v1330_v19 = vmul.f32 0.02853139, %v6960_v22 }
 0x2ed   : > { %5644 = vpow2.f32 %v1501_v10  ;;  %v1646_v16 = vmul.f32 -0.5, %v7008_v53  ;;  %v1668_v9 = vadd.f32 1.0, %v1665_v29  ;;  %v1477_v4 = vmul.f32 %v1474_v14, %v1354_v42 }
 0x2ee   : > { %5646 = vpow2.f32 %v1503_v28  ;;  %v1478_v15 = vmul.f32 %v1475_v48, %v1475_v48  ;;  %v1479_v20 = vmul.f32 %v1476_v55, %v1476_v55  ;;  %v1534_v44 = vmul.f32 %v6993_v12, %v1531_v6 }
 0x2ef   : > { %v5633_v51 = vpop.eup %5632  ;;  %v5075_v47 = vadd.f32 -0.28449672, %v1532_v40  ;;  %v7045_v52 = vadd.f32 %v1328_v49, %v9734_v35  ;;  %v5076_v60 = vadd.f32 -0.28449672, %v1533_v63  ;;  %v1669_v24 = vadd.f32 1.0, %v1666_v56 }
 0x2f0   : > { %v5635_v46 = vpop.eup %5634  ;;  %5648 = vrcp.f32 %v1667_v27  ;;  %v7048_v13 = vadd.f32 %v1329_v39, %v9735_v41  ;;  %v7051_v33 = vadd.f32 %v1330_v19, %v9736_v0  ;;  %v1649_v1 = vmul.f32 %v1646_v16, %v7008_v53 }
 0x2f1   : > { %v5637_v22 = vpop.eup %5636  ;;  %5650 = vrcp.f32 %v1668_v9  ;;  %v7054_v43 = vmul.f32 %v1477_v4, %v1477_v4  ;;  %v7057_v59 = vmul.f32 %v5631_v32, %v6718_v31  ;;  %v1583_v25 = vmul.f32 %v5633_v51, %v5633_v51 }
 0x2f2   : > { %9737 = vst [vmem:[#allocation21_spill] sm:$0xff] %v7051_v33  ;;  %v5639_v3 = vpop.eup %5638  ;;  %v1647_v11 = vmul.f32 -0.5, %v7015_v17  ;;  %v7062_v38 = vmul.f32 0.044277437, %v1478_v15  ;;  %v7064_v5 = vmul.f32 0.044277437, %v1479_v20  ;;  %v1538_v18 = vmul.f32 %v6978_v30, %v5075_v47 }
 0x2f3   : > { %v7060_v8 = vpop.eup %5640  ;;  %v5077_v23 = vadd.f32 -0.28449672, %v1534_v44  ;;  %v1539_v50 = vmul.f32 %v6983_v36, %v5076_v60  ;;  %v1584_v49 = vmul.f32 %v5637_v22, %v5637_v22  ;;  %5652 = vrcp.f32 %v1669_v24 }
 0x2f4   : > { %9738 = vst [vmem:[#allocation22_spill] sm:$0xff] %v7064_v5  ;;  %v7069_v10 = vmul.f32 -0.74012417, %v6603_v34  ;;  %v7071_v32 = vmul.f32 2.0, %v5635_v46  ;;  %v7074_v29 = vmul.f32 -0.5, %v7024_v21  ;;  %v7079_v28 = vmul.f32 2.0, %v5639_v3 }
 0x2f5   : > { %v1652_v39 = vmul.f32 1.442695, %v1649_v1  ;;  %v7077_v42 = vmul.f32 -0.74012417, %v9732_v7  ;;  %v1585_v48 = vmul.f32 %v7060_v8, %v7060_v8  ;;  %v1589_v55 = vmul.f32 0.5, %v1583_v25 }
 0x2f6   : > { %v5643_v14 = vpop.eup %5642  ;;  %v7084_v6 = vmul.f32 %v1647_v11, %v7015_v17  ;;  %v1540_v63 = vmul.f32 %v6993_v12, %v5077_v23  ;;  %v1541_v56 = vadd.f32 0.2548296, %v1538_v18  ;;  %v1595_v27 = vmul.f32 0.75, %v1583_v25 }
 0x2f7   : > { %v7086_v40 = vpop.eup %5644  ;;  %v1604_v19 = vmul.f32 1.875, %v1583_v25  ;;  %v1542_v9 = vadd.f32 0.2548296, %v1539_v50  ;;  %v1590_v4 = vmul.f32 0.5, %v1584_v49  ;;  %v1596_v15 = vmul.f32 0.75, %v1584_v49 }
 0x2f8   : > { %v7089_v16 = vpop.eup %5646  ;;  %v1605_v20 = vmul.f32 1.875, %v1584_v49  ;;  %v7091_v44 = vmul.f32 2.0, %v5643_v14  ;;  %v7093_v47 = vmul.f32 0.5641896, %v5633_v51  ;;  %5654 = vpow2.f32 %v1652_v39 }
 0x2f9   : > { %v1700_v46 = vmax.f32 %v7008_v53, 0.0  ;;  %v1591_v60 = vmul.f32 0.5, %v1585_v48  ;;  %v1592_v24 = vsub.f32 1.0, %v1589_v55  ;;  %v1597_v41 = vmul.f32 0.75, %v1585_v48 }
 0x2fa   : > { %v7096_v35 = vpop.eup %5648  ;;  %v1606_v0 = vmul.f32 1.875, %v1585_v48  ;;  %v1543_v3 = vadd.f32 0.2548296, %v1540_v63  ;;  %v1544_v11 = vmul.f32 %v6978_v30, %v1541_v56  ;;  %vm1553_vm4 = vcmp.gt.f32.partialorder %v6893_v62, 0.0 }
 0x2fb   : > { %v7098_v1 = vpop.eup %5650  ;;  %v1598_v23 = vmul.f32 %v1595_v27, %v1583_v25  ;;  %v1607_v18 = vmul.f32 %v1604_v19, %v1583_v25  ;;  %v1545_v51 = vmul.f32 %v6983_v36, %v1542_v9  ;;  %v1593_v50 = vsub.f32 1.0, %v1590_v4 }
 0x2fc   : > { %v1599_v39 = vmul.f32 %v1596_v15, %v1584_v49  ;;  %v1608_v14 = vmul.f32 %v1605_v20, %v1584_v49  ;;  %vm1554_vm5 = vcmp.gt.f32.partialorder %v6898_v37, 0.0  ;;  %v1587_v7 = vmul.f32 0.5641896, %v5637_v22 }
 0x2fd   : > { %v1673_v55 = vmul.f32 1.0614054, %v7096_v35  ;;  %v1701_v34 = vmax.f32 %v7015_v17, 0.0  ;;  %v1703_v31 = vmin.f32 %v1700_v46, 6.0  ;;  %v7106_v63 = vpop.eup %5652  ;;  %v1594_v30 = vsub.f32 1.0, %v1591_v60 }
 0x2fe   : > { %v1600_v56 = vmul.f32 %v1597_v41, %v1585_v48  ;;  %v1609_v33 = vmul.f32 %v1606_v0, %v1585_v48  ;;  %v1674_v27 = vmul.f32 1.0614054, %v7098_v1  ;;  %v1546_v36 = vmul.f32 %v6993_v12, %v1543_v3 }
 0x2ff   : > { %v1568_v19 = vsub.f32 %v7071_v32, %v1544_v11  ;;  %v1601_v9 = vadd.f32 %v1598_v23, %v1592_v24  ;;  %v1610_v4 = vmul.f32 %v1607_v18, %v1583_v25  ;;  %v1569_v22 = vsub.f32 %v7079_v28, %v1545_v51 }
 0x300   : > { %v1602_v15 = vadd.f32 %v1599_v39, %v1593_v50  ;;  %v1611_v20 = vmul.f32 %v1608_v14, %v1584_v49  ;;  %v1702_v5 = vmax.f32 %v7024_v21, 0.0  ;;  %vm1555_vm6 = vcmp.gt.f32.partialorder %v6908_v57, 0.0 }
 0x301   : > { %vm1619_vm7 = vcmp.le.f32.partialorder %v6893_v62, -3.0  ;;  %v1675_v46 = vmul.f32 1.0614054, %v7106_v63  ;;  %v5078_v60 = vadd.f32 -1.4531521, %v1673_v55  ;;  %v1704_v41 = vmin.f32 %v1701_v34, 6.0 }
 0x302   : > { %v1709_v0 = vmul.f32 %v1703_v31, %v1703_v31  ;;  %v1603_v12 = vadd.f32 %v1600_v56, %v1594_v30  ;;  %v1612_v3 = vmul.f32 %v1609_v33, %v1585_v48  ;;  %vm1620_vm8 = vcmp.le.f32.partialorder %v6898_v37, -3.0  ;;  %v7118_v28 = vpop.eup %5654 }
 0x303   : > { %v5079_v25 = vadd.f32 -1.4531521, %v1674_v27  ;;  %v1727_v32 = vsub.f32 0.0, %v7008_v53  ;;  %v1570_v49 = vsub.f32 %v7091_v44, %v1546_v36  ;;  %v1588_v24 = vmul.f32 0.5641896, %v7060_v8 }
 0x304   : > { %v1613_v23 = vsub.f32 %v1601_v9, %v1610_v4  ;;  %v1728_v18 = vsub.f32 0.0, %v7015_v17  ;;  %v1571_v34 = vsel %vm1553_vm4, %v1568_v19, %v1544_v11  ;;  %v1614_v31 = vsub.f32 %v1602_v15, %v1611_v20 }
 0x305   : > { %v1705_v50 = vmin.f32 %v1702_v5, 6.0  ;;  %v1729_v33 = vsub.f32 0.0, %v7024_v21  ;;  %vm1621_vm9 = vcmp.le.f32.partialorder %v6908_v57, -3.0  ;;  %v5080_v48 = vadd.f32 -1.4531521, %v1675_v46 }
 0x306   : > { %v1679_v39 = vmul.f32 %v7096_v35, %v5078_v60  ;;  %v1710_v14 = vmul.f32 %v1704_v41, %v1704_v41  ;;  %v1712_v55 = vmul.f32 1.442695, %v1709_v0  ;;  %v1572_v8 = vsel %vm1554_vm5, %v1569_v22, %v1545_v51 }
 0x307   : > { %v1615_v44 = vsub.f32 %v1603_v12, %v1612_v3  ;;  %v1680_v30 = vmul.f32 %v7098_v1, %v5079_v25  ;;  %v1730_v56 = vmax.f32 %v1727_v32, 3.0  ;;  %v1616_v11 = vmul.f32 %v1613_v23, %v7093_v47 }
 0x308   : > { %v1731_v27 = vmax.f32 %v1728_v18, 3.0  ;;  %v1795_v5 = vmul.f32 -0.74012417, %v6610_v58  ;;  %v7135_v19 = vadd.f32 %v7069_v10, %v6616_v45  ;;  %v1617_v9 = vmul.f32 %v1614_v31, %v1587_v7 }
 0x309   : > { %v1711_v4 = vmul.f32 %v1705_v50, %v1705_v50  ;;  %v1732_v15 = vmax.f32 %v1729_v33, 3.0  ;;  %v7139_v20 = vadd.f32 %v7077_v42, %v6618_v54  ;;  %v1681_v51 = vmul.f32 %v7106_v63, %v5080_v48 }
 0x30a   : > { %v1682_v22 = vadd.f32 1.4214138, %v1679_v39  ;;  %5656 = vpow2.f32 %v1712_v55  ;;  %v1714_v46 = vmul.f32 1.442695, %v1710_v14  ;;  %v1573_v47 = vsel %vm1555_vm6, %v1570_v49, %v1546_v36 }
 0x30b   : > { %v1622_v60 = vsel %vm1619_vm7, %v1616_v11, %v1571_v34  ;;  %v1683_v10 = vadd.f32 1.4214138, %v1680_v30  ;;  %5658 = vrcp.f32 %v1730_v56  ;;  %v1623_v7 = vsel %vm1620_vm8, %v1617_v9, %v1572_v8  ;;  %v9741_v9 = vld [vmem:[#allocation18_spill] sm:$0xff] }
 0x30c   : > { %5660 = vrcp.f32 %v1731_v27  ;;  %v7149_v42 = vadd.f32 %v1795_v5, %v6628_v61  ;;  %v1814_v41 = vand.u32 2147483647, %v7135_v19  ;;  %v1618_v0 = vmul.f32 %v1615_v44, %v1588_v24  ;;  %v9740_v27 = vld [vmem:[#allocation21_spill] sm:$0xff] }
 0x30d   : > { %v1651_v12 = vmul.f32 %v7074_v29, %v7024_v21  ;;  %5662 = vrcp.f32 %v1732_v15  ;;  %v1815_v36 = vand.u32 2147483647, %v7139_v20  ;;  %v1684_v62 = vadd.f32 1.4214138, %v1681_v51 }
 0x30e   : > { %v1685_v3 = vmul.f32 %v7096_v35, %v1682_v22  ;;  %5664 = vpow2.f32 %v1714_v46  ;;  %v1716_v25 = vmul.f32 1.442695, %v1711_v4  ;;  %v1624_v37 = vsel %vm1621_vm9, %v1618_v0, %v1573_v47  ;;  %v9742_v0 = vld [vmem:[#allocation11_spill] sm:$0xff] }
 0x30f   : > { %v1625_v32 = vmul.f32 0.88622695, %v1622_v60  ;;  %v1626_v49 = vmul.f32 0.88622695, %v1623_v7  ;;  %v1686_v23 = vmul.f32 %v7098_v1, %v1683_v10  ;;  %v1506_v24 = vmul.f32 %v7086_v40, %v6720_v26 }
 0x310   : > { %v1654_v29 = vmul.f32 1.442695, %v7084_v6  ;;  %v1816_v18 = vand.u32 2147483647, %v7149_v42  ;;  %v1817_v34 = vmul.f32 0.3275911, %v1814_v41  ;;  %v1507_v50 = vmul.f32 %v7089_v16, %v9733_v2 }
 0x311   : > { %v1483_v31 = vmul.f32 0.044277437, %v7054_v43  ;;  %v1656_v33 = vmul.f32 1.442695, %v1651_v12  ;;  %v1818_v57 = vmul.f32 0.3275911, %v1815_v36  ;;  %v1687_v39 = vmul.f32 %v7106_v63, %v1684_v62 }
 0x312   : > { %v1627_v48 = vmul.f32 0.88622695, %v1624_v37  ;;  %v5081_v14 = vadd.f32 -0.28449672, %v1685_v3  ;;  %5666 = vpow2.f32 %v1716_v25  ;;  %v7169_v40 = vadd.f32 %v7062_v38, %v7045_v52  ;;  %v9739_v43 = vld [vmem:[#allocation22_spill] sm:$0xff]  ;;  %v9743_v3 = vld [vmem:[#allocation12_spill] sm:$0xff] }
 0x313   : > { %v1628_v6 = vmul.f32 %v1625_v32, %v7057_v59  ;;  %v1629_v55 = vmul.f32 %v1626_v49, %v1506_v24  ;;  %v5082_v8 = vadd.f32 -0.28449672, %v1686_v23  ;;  %v7174_v30 = vadd.f32 %v9739_v43, %v7048_v13 }
 0x314   : > { %v5657_v44 = vpop.eup %5656  ;;  %5668 = vpow2.f32 %v1654_v29  ;;  %v1819_v16 = vmul.f32 0.3275911, %v1816_v18  ;;  %v1820_v56 = vadd.f32 1.0, %v1817_v34  ;;  %v7177_v5 = vadd.f32 %v1483_v31, %v9740_v27 }
 0x315   : > { %v5659_v11 = vpop.eup %5658  ;;  %5670 = vpow2.f32 %v1656_v33  ;;  %v7181_v52 = vmul.f32 %v7118_v28, %v9741_v9  ;;  %v1821_v59 = vadd.f32 1.0, %v1818_v57  ;;  %v7185_v4 = vmul.f32 %v1627_v48, %v1507_v50 }
 0x316   : > { %v7183_v38 = vpop.eup %5660  ;;  %v5083_v15 = vadd.f32 -0.28449672, %v1687_v39  ;;  %v1691_v13 = vmul.f32 %v7096_v35, %v5081_v14  ;;  %v1799_v51 = vmul.f32 -0.5, %v7135_v19  ;;  %v7191_v46 = vmul.f32 %v1628_v6, %v1628_v6 }
 0x317   : > { %v7189_v22 = vpop.eup %5662  ;;  %v7193_v47 = vmul.f32 %v1629_v55, %v1629_v55  ;;  %v1692_v60 = vmul.f32 %v7098_v1, %v5082_v8  ;;  %v1800_v28 = vmul.f32 -0.5, %v7139_v20  ;;  %v1736_v7 = vmul.f32 %v5659_v11, %v5659_v11 }
 0x318   : > { %v5665_v10 = vpop.eup %5664  ;;  %v1822_v41 = vadd.f32 1.0, %v1819_v16  ;;  %5672 = vrcp.f32 %v1820_v56  ;;  %v7198_v12 = vmul.f32 -0.64809364, %v9742_v0  ;;  %v1737_v36 = vmul.f32 %v7183_v38, %v7183_v38 }
 0x319   : > { %v1801_v62 = vmul.f32 -0.5, %v7149_v42  ;;  %5674 = vrcp.f32 %v1821_v59  ;;  %v7204_v25 = vmul.f32 -0.64809364, %v9743_v3  ;;  %v1693_v37 = vmul.f32 %v7106_v63, %v5083_v15 }
 0x31a   : > { %v1694_v32 = vadd.f32 0.2548296, %v1691_v13  ;;  %v7209_v49 = vmul.f32 %v7189_v22, %v7189_v22  ;;  %v1802_v23 = vmul.f32 %v1799_v51, %v7135_v19  ;;  %v1695_v24 = vadd.f32 0.2548296, %v1692_v60 }
 0x31b   : > { %v1718_v29 = vmul.f32 2.0, %v5657_v44  ;;  %v1719_v18 = vmul.f32 2.0, %v5665_v10  ;;  %v1803_v34 = vmul.f32 %v1800_v28, %v7139_v20  ;;  %v1742_v50 = vmul.f32 0.5, %v1736_v7 }
 0x31c   : > { %v5667_v31 = vpop.eup %5666  ;;  %v1748_v33 = vmul.f32 0.75, %v1736_v7  ;;  %v1757_v57 = vmul.f32 1.875, %v1736_v7  ;;  %5676 = vrcp.f32 %v1822_v41  ;;  %vm1706_vm10 = vcmp.gt.f32.partialorder %v7008_v53, 0.0 }
 0x31d   : > { %v1743_v48 = vmul.f32 0.5, %v1737_v36  ;;  %v1749_v39 = vmul.f32 0.75, %v1737_v36  ;;  %v1758_v14 = vmul.f32 1.875, %v1737_v36  ;;  %v7215_v6 = vmul.f32 %v1801_v62, %v7149_v42 }
 0x31e   : > { %v7217_v55 = vpop.eup %5668  ;;  %v1696_v8 = vadd.f32 0.2548296, %v1693_v37  ;;  %v1697_v44 = vmul.f32 %v7096_v35, %v1694_v32  ;;  %vm1707_vm11 = vcmp.gt.f32.partialorder %v7015_v17, 0.0  ;;  %v1744_v43 = vmul.f32 0.5, %v7209_v49 }
 0x31f   : > { %v1750_v16 = vmul.f32 0.75, %v7209_v49  ;;  %v7223_v56 = vpop.eup %5670  ;;  %v1698_v27 = vmul.f32 %v7098_v1, %v1695_v24  ;;  %v7226_v59 = vmul.f32 2.0, %v5667_v31  ;;  %v1805_v15 = vmul.f32 1.442695, %v1802_v23 }
 0x320   : > { %v1807_v13 = vmul.f32 1.442695, %v1803_v34  ;;  %v1745_v51 = vsub.f32 1.0, %v1742_v50  ;;  %v1751_v60 = vmul.f32 %v1748_v33, %v1736_v7  ;;  %v1759_v28 = vmul.f32 1.875, %v7209_v49 }
 0x321   : > { %v1760_v10 = vmul.f32 %v1757_v57, %v1736_v7  ;;  %v1739_v35 = vmul.f32 0.5641896, %v5659_v11  ;;  %v1746_v41 = vsub.f32 1.0, %v1743_v48  ;;  %v1752_v62 = vmul.f32 %v1749_v39, %v1737_v36 }
 0x322   : > { %v1761_v37 = vmul.f32 %v1758_v14, %v1737_v36  ;;  %v7229_v32 = vpop.eup %5672  ;;  %v7232_v3 = vmul.f32 %v7106_v63, %v1696_v8  ;;  %v1721_v0 = vsub.f32 %v1718_v29, %v1697_v44  ;;  %v1747_v1 = vsub.f32 1.0, %v1744_v43 }
 0x323   : > { %v1753_v24 = vmul.f32 %v1750_v16, %v7209_v49  ;;  %v7235_v23 = vpop.eup %5674  ;;  %v1722_v34 = vsub.f32 %v1719_v18, %v1698_v27  ;;  %v1740_v31 = vmul.f32 0.5641896, %v7183_v38  ;;  %5678 = vpow2.f32 %v1805_v15 }
 0x324   : > { %v1853_v11 = vmax.f32 %v7135_v19, 0.0  ;;  %v1754_v50 = vadd.f32 %v1751_v60, %v1745_v51  ;;  %v1762_v33 = vmul.f32 %v1759_v28, %v7209_v49  ;;  %v1763_v57 = vmul.f32 %v1760_v10, %v1736_v7 }
 0x325   : > { %v1854_v48 = vmax.f32 %v7139_v20, 0.0  ;;  %v1741_v63 = vmul.f32 0.5641896, %v7189_v22  ;;  %v1755_v29 = vadd.f32 %v1752_v62, %v1746_v41  ;;  %v1764_v39 = vmul.f32 %v1761_v37, %v1737_v36 }
 0x326   : > { %vm1772_vm12 = vcmp.le.f32.partialorder %v7008_v53, -3.0  ;;  %v1826_v14 = vmul.f32 1.0614054, %v7229_v32  ;;  %v7244_v18 = vpop.eup %5676  ;;  %v1723_v38 = vsub.f32 %v7226_v59, %v7232_v3  ;;  %v1724_v8 = vsel %vm1706_vm10, %v1721_v0, %v1697_v44 }
 0x327   : > { %v1756_v43 = vadd.f32 %v1753_v24, %v1747_v1  ;;  %v1827_v7 = vmul.f32 1.0614054, %v7235_v23  ;;  %vm1708_vm13 = vcmp.gt.f32.partialorder %v7024_v21, 0.0  ;;  %v1725_v22 = vsel %vm1707_vm11, %v1722_v34, %v1698_v27 }
 0x328   : > { %v1855_v36 = vmax.f32 %v7149_v42, 0.0  ;;  %v1856_v16 = vmin.f32 %v1853_v11, 6.0  ;;  %v1880_v15 = vsub.f32 0.0, %v7135_v19  ;;  %v1765_v51 = vmul.f32 %v1762_v33, %v7209_v49 }
 0x329   : > { %v1766_v60 = vsub.f32 %v1754_v50, %v1763_v57  ;;  %vm1773_vm14 = vcmp.le.f32.partialorder %v7015_v17, -3.0  ;;  %v1857_v59 = vmin.f32 %v1854_v48, 6.0  ;;  %v1948_v0 = vmul.f32 -0.64809364, %v6610_v58 }
 0x32a   : > { %v1767_v44 = vsub.f32 %v1755_v29, %v1764_v39  ;;  %v1828_v28 = vmul.f32 1.0614054, %v7244_v18  ;;  %v5084_v10 = vadd.f32 -1.4531521, %v1826_v14  ;;  %v1881_v41 = vsub.f32 0.0, %v7139_v20 }
 0x32b   : > { %vm1774_vm15 = vcmp.le.f32.partialorder %v7024_v21, -3.0  ;;  %5680 = vpow2.f32 %v1807_v13  ;;  %v5085_v27 = vadd.f32 -1.4531521, %v1827_v7  ;;  %v1882_v62 = vsub.f32 0.0, %v7149_v42 }
 0x32c   : > { %v7265_v49 = vadd.f32 %v7198_v12, %v6616_v45  ;;  %v1858_v37 = vmin.f32 %v1855_v36, 6.0  ;;  %v1862_v1 = vmul.f32 %v1856_v16, %v1856_v16  ;;  %v1883_v24 = vmax.f32 %v1880_v15, 3.0 }
 0x32d   : > { %v7269_v34 = vadd.f32 %v7204_v25, %v6618_v54  ;;  %v1768_v11 = vsub.f32 %v1756_v43, %v1765_v51  ;;  %v1769_v50 = vmul.f32 %v1766_v60, %v1739_v35  ;;  %v1863_v33 = vmul.f32 %v1857_v59, %v1857_v59  ;;  %v7274_v13 = vpop.eup %5678 }
 0x32e   : > { %v7272_v57 = vadd.f32 %v1948_v0, %v6628_v61  ;;  %v1770_v48 = vmul.f32 %v1767_v44, %v1740_v31  ;;  %v5086_v29 = vadd.f32 -1.4531521, %v1828_v28  ;;  %v1832_v12 = vmul.f32 %v7229_v32, %v5084_v10 }
 0x32f   : > { %v1884_v39 = vmax.f32 %v1881_v41, 3.0  ;;  %v1775_v14 = vsel %vm1772_vm12, %v1769_v50, %v1724_v8  ;;  %v1833_v7 = vmul.f32 %v7235_v23, %v5085_v27  ;;  %v1885_v25 = vmax.f32 %v1882_v62, 3.0 }
 0x330   : > { %v1967_v43 = vand.u32 2147483647, %v7265_v49  ;;  %v1864_v35 = vmul.f32 %v1858_v37, %v1858_v37  ;;  %v1865_v36 = vmul.f32 1.442695, %v1862_v1  ;;  %5682 = vrcp.f32 %v1883_v24 }
 0x331   : > { %v1968_v16 = vand.u32 2147483647, %v7269_v34  ;;  %v1726_v31 = vsel %vm1708_vm13, %v1723_v38, %v7232_v3  ;;  %v1771_v15 = vmul.f32 %v1768_v11, %v1741_v63  ;;  %v1867_v51 = vmul.f32 1.442695, %v1863_v33 }
 0x332   : > { %v1969_v60 = vand.u32 2147483647, %v7272_v57  ;;  %v1776_v53 = vsel %vm1773_vm14, %v1770_v48, %v1725_v22  ;;  %v1834_v8 = vmul.f32 %v7244_v18, %v5086_v29  ;;  %v1835_v59 = vadd.f32 1.4214138, %v1832_v12 }
 0x333   : > { %5684 = vrcp.f32 %v1884_v39  ;;  %v1778_v0 = vmul.f32 0.88622695, %v1775_v14  ;;  %v1836_v44 = vadd.f32 1.4214138, %v1833_v7  ;;  %v1970_v28 = vmul.f32 0.3275911, %v1967_v43 }
 0x334   : > { %5686 = vrcp.f32 %v1885_v25  ;;  %v1777_v10 = vsel %vm1774_vm15, %v1771_v15, %v1726_v31  ;;  %v1869_v3 = vmul.f32 1.442695, %v1864_v35  ;;  %v1971_v63 = vmul.f32 0.3275911, %v1968_v16 }
 0x335   : > { %5688 = vpow2.f32 %v1865_v36  ;;  %v5681_v38 = vpop.eup %5680  ;;  %v1633_v41 = vmul.f32 %v7185_v4, %v7185_v4  ;;  %v1634_v17 = vmul.f32 0.059298586, %v7191_v46  ;;  %v1972_v22 = vmul.f32 0.3275911, %v1969_v60 }
 0x336   : > { %5690 = vpow2.f32 %v1867_v51  ;;  %v1779_v27 = vmul.f32 0.88622695, %v1776_v53  ;;  %v1809_v62 = vmul.f32 1.442695, %v7215_v6  ;;  %v1837_v37 = vadd.f32 1.4214138, %v1834_v8 }
 0x337   : > { %v1838_v1 = vmul.f32 %v7229_v32, %v1835_v59  ;;  %v1780_v24 = vmul.f32 0.88622695, %v1777_v10  ;;  %v1781_v21 = vmul.f32 %v1778_v0, %v7181_v52  ;;  %v1839_v11 = vmul.f32 %v7235_v23, %v1836_v44 }
 0x338   : > { %v1973_v50 = vadd.f32 1.0, %v1970_v28  ;;  %v1659_v33 = vmul.f32 %v7217_v55, %v6720_v26  ;;  %v1660_v4 = vmul.f32 %v7223_v56, %v9733_v2  ;;  %5692 = vpow2.f32 %v1869_v3 }
 0x339   : > { %v1974_v46 = vadd.f32 1.0, %v1971_v63  ;;  %v1635_v48 = vmul.f32 0.059298586, %v7193_v47  ;;  %v1636_v6 = vmul.f32 0.059298586, %v1633_v41  ;;  %v7304_v29 = vadd.f32 %v1634_v17, %v7169_v40  ;;  %v9745_v63 = vld [vmem:[#allocation11_spill] sm:$0xff] }
 0x33a   : > { %v1975_v12 = vadd.f32 1.0, %v1972_v22  ;;  %v5683_v39 = vpop.eup %5682  ;;  %v1782_v52 = vmul.f32 %v1779_v27, %v1659_v33  ;;  %5694 = vpow2.f32 %v1809_v62  ;;  %v1840_v14 = vmul.f32 %v7244_v18, %v1837_v37 }
 0x33b   : > { %v5087_v7 = vadd.f32 -0.28449672, %v1838_v1  ;;  %v1783_v25 = vmul.f32 %v1780_v24, %v1660_v4  ;;  %v1784_v55 = vmul.f32 %v1781_v21, %v1781_v21  ;;  %v5088_v43 = vadd.f32 -0.28449672, %v1839_v11 }
 0x33c   : > { %5696 = vrcp.f32 %v1973_v50  ;;  %v7308_v35 = vadd.f32 %v1635_v48, %v7174_v30  ;;  %v7311_v47 = vadd.f32 %v1636_v6, %v7177_v5  ;;  %v1952_v40 = vmul.f32 -0.5, %v7265_v49 }
 0x33d   : > { %v5685_v56 = vpop.eup %5684  ;;  %5698 = vrcp.f32 %v1974_v46  ;;  %v7316_v16 = vmul.f32 %v7274_v13, %v9741_v9  ;;  %v7319_v31 = vmul.f32 %v5681_v38, %v6720_v26  ;;  %v1889_v15 = vmul.f32 %v5683_v39, %v5683_v39 }
 0x33e   : > { %9744 = vst [vmem:[#allocation23_spill] sm:$0xff] %v7311_v47  ;;  %v5687_v36 = vpop.eup %5686  ;;  %5700 = vrcp.f32 %v1975_v12  ;;  %v7321_v60 = vmul.f32 %v1782_v52, %v1782_v52  ;;  %v5089_v30 = vadd.f32 -0.28449672, %v1840_v14  ;;  %v1844_v5 = vmul.f32 %v7229_v32, %v5087_v7 }
 0x33f   : > { %v5689_v51 = vpop.eup %5688  ;;  %v1953_v53 = vmul.f32 -0.5, %v7269_v34  ;;  %v7325_v59 = vmul.f32 %v1783_v25, %v1783_v25  ;;  %v7327_v0 = vmul.f32 0.07334648, %v1784_v55  ;;  %v1845_v13 = vmul.f32 %v7235_v23, %v5088_v43 }
 0x340   : > { %v5691_v8 = vpop.eup %5690  ;;  %v1890_v44 = vmul.f32 %v5685_v56, %v5685_v56  ;;  %v1891_v28 = vmul.f32 %v5687_v36, %v5687_v36  ;;  %v7331_v10 = vmul.f32 -0.5, %v7272_v57  ;;  %v1955_v3 = vmul.f32 %v1952_v40, %v7265_v49 }
 0x341   : > { %v7335_v38 = vmul.f32 -0.5454215, %v9745_v63  ;;  %v7337_v41 = vmul.f32 2.0, %v5689_v51  ;;  %v1895_v17 = vmul.f32 0.5, %v1889_v15  ;;  %v1901_v22 = vmul.f32 0.75, %v1889_v15 }
 0x342   : > { %v1910_v27 = vmul.f32 1.875, %v1889_v15  ;;  %v5693_v62 = vpop.eup %5692  ;;  %v1846_v37 = vmul.f32 %v7244_v18, %v5089_v30  ;;  %v1847_v1 = vadd.f32 0.2548296, %v1844_v5  ;;  %v7340_v24 = vmul.f32 2.0, %v5691_v8 }
 0x343   : > { %v1956_v21 = vmul.f32 %v1953_v53, %v7269_v34  ;;  %v1848_v11 = vadd.f32 0.2548296, %v1845_v13  ;;  %v1896_v50 = vmul.f32 0.5, %v1890_v44  ;;  %v1902_v33 = vmul.f32 0.75, %v1890_v44 }
 0x344   : > { %v1911_v4 = vmul.f32 1.875, %v1890_v44  ;;  %v7343_v46 = vpop.eup %5694  ;;  %v1897_v48 = vmul.f32 0.5, %v1891_v28  ;;  %v1903_v6 = vmul.f32 0.75, %v1891_v28  ;;  %v1912_v12 = vmul.f32 1.875, %v1891_v28 }
 0x345   : > { %v1958_v52 = vmul.f32 1.442695, %v1955_v3  ;;  %v7347_v7 = vmul.f32 2.0, %v5693_v62  ;;  %v1898_v25 = vsub.f32 1.0, %v1895_v17  ;;  %v1904_v55 = vmul.f32 %v1901_v22, %v1889_v15 }
 0x346   : > { %v7345_v14 = vpop.eup %5696  ;;  %v1913_v43 = vmul.f32 %v1910_v27, %v1889_v15  ;;  %v1849_v51 = vadd.f32 0.2548296, %v1846_v37  ;;  %v1850_v30 = vmul.f32 %v7229_v32, %v1847_v1  ;;  %v1892_v5 = vmul.f32 0.5641896, %v5683_v39 }
 0x347   : > { %v7349_v40 = vpop.eup %5698  ;;  %v1960_v53 = vmul.f32 1.442695, %v1956_v21  ;;  %v1851_v13 = vmul.f32 %v7235_v23, %v1848_v11  ;;  %vm1859_vm0 = vcmp.gt.f32.partialorder %v7135_v19, 0.0  ;;  %vm1860_vm1 = vcmp.gt.f32.partialorder %v7139_v20, 0.0 }
 0x348   : > { %v7352_v8 = vpop.eup %5700  ;;  %v1899_v3 = vsub.f32 1.0, %v1896_v50  ;;  %v1905_v62 = vmul.f32 %v1902_v33, %v1890_v44  ;;  %v1914_v17 = vmul.f32 %v1911_v4, %v1890_v44  ;;  %v1900_v22 = vsub.f32 1.0, %v1897_v48 }
 0x349   : > { %v1906_v27 = vmul.f32 %v1903_v6, %v1891_v28  ;;  %v1915_v47 = vmul.f32 %v1912_v12, %v1891_v28  ;;  %v1979_v37 = vmul.f32 1.0614054, %v7345_v14  ;;  %v1893_v63 = vmul.f32 0.5641896, %v5685_v56 }
 0x34a   : > { %v1894_v32 = vmul.f32 0.5641896, %v5687_v36  ;;  %v1907_v39 = vadd.f32 %v1904_v55, %v1898_v25  ;;  %v1916_v1 = vmul.f32 %v1913_v43, %v1889_v15  ;;  %v1852_v21 = vmul.f32 %v7244_v18, %v1849_v51 }
 0x34b   : > { %v1980_v23 = vmul.f32 1.0614054, %v7349_v40  ;;  %v1981_v11 = vmul.f32 1.0614054, %v7352_v8  ;;  %v2033_v26 = vsub.f32 0.0, %v7265_v49  ;;  %vm1861_vm2 = vcmp.gt.f32.partialorder %v7149_v42, 0.0 }
 0x34c   : > { %v1874_v50 = vsub.f32 %v7337_v41, %v1850_v30  ;;  %v1908_v33 = vadd.f32 %v1905_v62, %v1899_v3  ;;  %v1917_v4 = vmul.f32 %v1914_v17, %v1890_v44  ;;  %vm1925_vm3 = vcmp.le.f32.partialorder %v7135_v19, -3.0 }
 0x34d   : > { %v2034_v56 = vsub.f32 0.0, %v7269_v34  ;;  %v1875_v36 = vsub.f32 %v7340_v24, %v1851_v13  ;;  %v1909_v15 = vadd.f32 %v1906_v27, %v1900_v22  ;;  %v1918_v18 = vmul.f32 %v1915_v47, %v1891_v28 }
 0x34e   : > { %vm1926_vm4 = vcmp.le.f32.partialorder %v7139_v20, -3.0  ;;  %v5090_v48 = vadd.f32 -1.4531521, %v1979_v37  ;;  %v1919_v6 = vsub.f32 %v1907_v39, %v1916_v1  ;;  %v2006_v12 = vmax.f32 %v7265_v49, 0.0  ;;  %v9746_v1 = vld [vmem:[#allocation12_spill] sm:$0xff] }
 0x34f   : > { %v2007_v25 = vmax.f32 %v7269_v34, 0.0  ;;  %v2035_v41 = vsub.f32 0.0, %v7272_v57  ;;  %5702 = vpow2.f32 %v1958_v52  ;;  %v5091_v44 = vadd.f32 -1.4531521, %v1980_v23 }
 0x350   : > { %v5092_v55 = vadd.f32 -1.4531521, %v1981_v11  ;;  %v2036_v43 = vmax.f32 %v2033_v26, 3.0  ;;  %v1876_v51 = vsub.f32 %v7347_v7, %v1852_v21  ;;  %v1920_v3 = vsub.f32 %v1908_v33, %v1917_v4 }
 0x351   : > { %v2008_v24 = vmax.f32 %v7272_v57, 0.0  ;;  %v2037_v47 = vmax.f32 %v2034_v56, 3.0  ;;  %v1877_v28 = vsel %vm1859_vm0, %v1874_v50, %v1850_v30  ;;  %v1878_v62 = vsel %vm1860_vm1, %v1875_v36, %v1851_v13 }
 0x352   : > { %v1921_v17 = vsub.f32 %v1909_v15, %v1918_v18  ;;  %v1985_v22 = vmul.f32 %v7345_v14, %v5090_v48  ;;  %v1922_v27 = vmul.f32 %v1919_v6, %v1892_v5  ;;  %v2009_v52 = vmin.f32 %v2006_v12, 6.0 }
 0x353   : > { %v2010_v37 = vmin.f32 %v2007_v25, 6.0  ;;  %v2038_v39 = vmax.f32 %v2035_v41, 3.0  ;;  %v1986_v26 = vmul.f32 %v7349_v40, %v5091_v44  ;;  %v1987_v7 = vmul.f32 %v7352_v8, %v5092_v55 }
 0x354   : > { %5704 = vrcp.f32 %v2036_v43  ;;  %v2100_v23 = vmul.f32 -0.5454215, %v9746_v1  ;;  %v1923_v11 = vmul.f32 %v1920_v3, %v1893_v63  ;;  %v2011_v33 = vmin.f32 %v2008_v24, 6.0 }
 0x355   : > { %5706 = vrcp.f32 %v2037_v47  ;;  %v2101_v30 = vmul.f32 -0.5454215, %v6610_v58  ;;  %v1879_v13 = vsel %vm1861_vm2, %v1876_v51, %v1852_v21  ;;  %v1928_v5 = vsel %vm1925_vm3, %v1922_v27, %v1877_v28 }
 0x356   : > { %5708 = vpow2.f32 %v1960_v53  ;;  %v1988_v50 = vadd.f32 1.4214138, %v1985_v22  ;;  %v1929_v4 = vsel %vm1926_vm4, %v1923_v11, %v1878_v62  ;;  %v2015_v56 = vmul.f32 %v2009_v52, %v2009_v52 }
 0x357   : > { %v2016_v36 = vmul.f32 %v2010_v37, %v2010_v37  ;;  %v7390_v63 = vadd.f32 %v7335_v38, %v6616_v45  ;;  %v1989_v15 = vadd.f32 1.4214138, %v1986_v26  ;;  %v1990_v18 = vadd.f32 1.4214138, %v1987_v7 }
 0x358   : > { %5710 = vrcp.f32 %v2038_v39  ;;  %v7393_v48 = vadd.f32 %v2100_v23, %v6618_v54  ;;  %v1788_v19 = vmul.f32 0.07334648, %v7321_v60  ;;  %v1924_v21 = vmul.f32 %v1921_v17, %v1894_v32 }
 0x359   : > { %v2017_v53 = vmul.f32 %v2011_v33, %v2011_v33  ;;  %v7397_v6 = vadd.f32 %v2101_v30, %v6628_v61  ;;  %v5703_v20 = vpop.eup %5702  ;;  %vm1927_vm5 = vcmp.le.f32.partialorder %v7149_v42, -3.0  ;;  %v1931_v12 = vmul.f32 0.88622695, %v1928_v5  ;;  %v9747_v5 = vld [vmem:[#allocation19_spill] sm:$0xff] }
 0x35a   : > { %v1957_v38 = vmul.f32 %v7331_v10, %v7272_v57  ;;  %v1991_v25 = vmul.f32 %v7345_v14, %v1988_v50  ;;  %v1930_v41 = vsel %vm1927_vm5, %v1924_v21, %v1879_v13  ;;  %v1932_v44 = vmul.f32 0.88622695, %v1929_v4 }
 0x35b   : > { %v2018_v55 = vmul.f32 1.442695, %v2015_v56  ;;  %v2120_v43 = vand.u32 2147483647, %v7390_v63  ;;  %v1992_v60 = vmul.f32 %v7349_v40, %v1989_v15  ;;  %v1993_v32 = vmul.f32 %v7352_v8, %v1990_v18 }
 0x35c   : > { %v2020_v51 = vmul.f32 1.442695, %v2016_v36  ;;  %v2121_v3 = vand.u32 2147483647, %v7393_v48  ;;  %v7408_v42 = vmul.f32 0.07334648, %v7325_v59  ;;  %v1813_v10 = vmul.f32 %v7343_v46, %v9733_v2 }
 0x35d   : > { %v2022_v24 = vmul.f32 1.442695, %v2017_v53  ;;  %v2122_v47 = vand.u32 2147483647, %v7397_v6  ;;  %v7417_v62 = vadd.f32 %v7327_v0, %v7304_v29  ;;  %v1933_v17 = vmul.f32 0.88622695, %v1930_v41 }
 0x35e   : > { %v7413_v28 = vpop.eup %5704  ;;  %v1962_v22 = vmul.f32 1.442695, %v1957_v38  ;;  %v5093_v27 = vadd.f32 -0.28449672, %v1991_v25  ;;  %v1934_v59 = vmul.f32 %v1931_v12, %v7316_v16  ;;  %v1935_v37 = vmul.f32 %v1932_v44, %v7319_v31 }
 0x35f   : > { %v7419_v52 = vpop.eup %5706  ;;  %5712 = vpow2.f32 %v2018_v55  ;;  %v2123_v46 = vmul.f32 0.3275911, %v2120_v43  ;;  %v5094_v26 = vadd.f32 -0.28449672, %v1992_v60  ;;  %v5095_v7 = vadd.f32 -0.28449672, %v1993_v32 }
 0x360   : > { %v5709_v39 = vpop.eup %5708  ;;  %5714 = vpow2.f32 %v2020_v51  ;;  %v2124_v23 = vmul.f32 0.3275911, %v2121_v3  ;;  %v7424_v11 = vadd.f32 %v1788_v19, %v7308_v35  ;;  %v7427_v29 = vmul.f32 %v5703_v20, %v9741_v9  ;;  %v9748_v20 = vld [vmem:[#allocation11_spill] sm:$0xff] }
 0x361   : > { %5716 = vpow2.f32 %v2022_v24  ;;  %v2125_v0 = vmul.f32 0.3275911, %v2122_v47  ;;  %v1997_v16 = vmul.f32 %v7345_v14, %v5093_v27  ;;  %v2042_v31 = vmul.f32 %v7413_v28, %v7413_v28 }
 0x362   : > { %v7429_v33 = vpop.eup %5710  ;;  %5718 = vpow2.f32 %v1962_v22  ;;  %v2043_v30 = vmul.f32 %v7419_v52, %v7419_v52  ;;  %v7436_v13 = vmul.f32 %v1933_v17, %v1813_v10  ;;  %v7438_v35 = vmul.f32 %v1934_v59, %v1934_v59 }
 0x363   : > { %v7441_v50 = vmul.f32 %v5709_v39, %v9747_v5  ;;  %v2126_v4 = vadd.f32 1.0, %v2123_v46  ;;  %v7443_v56 = vmul.f32 %v1935_v37, %v1935_v37  ;;  %v1998_v36 = vmul.f32 %v7349_v40, %v5094_v26 }
 0x364   : > { %v1999_v15 = vmul.f32 %v7352_v8, %v5095_v7  ;;  %v2127_v18 = vadd.f32 1.0, %v2124_v23  ;;  %v2044_v19 = vmul.f32 %v7429_v33, %v7429_v33  ;;  %v2105_v21 = vmul.f32 -0.5, %v7390_v63 }
 0x365   : > { %v2128_v53 = vadd.f32 1.0, %v2125_v0  ;;  %v7451_v12 = vmul.f32 -0.43379351, %v9748_v20  ;;  %v2000_v38 = vadd.f32 0.2548296, %v1997_v16  ;;  %v2048_v25 = vmul.f32 0.5, %v2042_v31 }
 0x366   : > { %v2049_v41 = vmul.f32 0.5, %v2043_v30  ;;  %v2054_v44 = vmul.f32 0.75, %v2042_v31  ;;  %v2055_v55 = vmul.f32 0.75, %v2043_v30  ;;  %v2063_v43 = vmul.f32 1.875, %v2042_v31 }
 0x367   : > { %v2064_v60 = vmul.f32 1.875, %v2043_v30  ;;  %5720 = vrcp.f32 %v2126_v4  ;;  %v2001_v32 = vadd.f32 0.2548296, %v1998_v36  ;;  %v2002_v51 = vadd.f32 0.2548296, %v1999_v15 }
 0x368   : > { %v2106_v3 = vmul.f32 -0.5, %v7393_v48  ;;  %5722 = vrcp.f32 %v2127_v18  ;;  %v2050_v24 = vmul.f32 0.5, %v2044_v19  ;;  %v2056_v47 = vmul.f32 0.75, %v2044_v19 }
 0x369   : > { %v5713_v10 = vpop.eup %5712  ;;  %v2065_v17 = vmul.f32 1.875, %v2044_v19  ;;  %5724 = vrcp.f32 %v2128_v53  ;;  %v2003_v27 = vmul.f32 %v7345_v14, %v2000_v38  ;;  %vm2012_vm6 = vcmp.gt.f32.partialorder %v7265_v49, 0.0 }
 0x36a   : > { %v5715_v22 = vpop.eup %5714  ;;  %v2051_v59 = vsub.f32 1.0, %v2048_v25  ;;  %v2052_v37 = vsub.f32 1.0, %v2049_v41  ;;  %v2108_v46 = vmul.f32 %v2105_v21, %v7390_v63  ;;  %vm2013_vm7 = vcmp.gt.f32.partialorder %v7269_v34, 0.0 }
 0x36b   : > { %v5717_v39 = vpop.eup %5716  ;;  %vm2014_vm8 = vcmp.gt.f32.partialorder %v7272_v57, 0.0  ;;  %v2057_v26 = vmul.f32 %v2054_v44, %v2042_v31  ;;  %v2058_v7 = vmul.f32 %v2055_v55, %v2043_v30  ;;  %v2066_v23 = vmul.f32 %v2063_v43, %v2042_v31 }
 0x36c   : > { %v2067_v0 = vmul.f32 %v2064_v60, %v2043_v30  ;;  %v7459_v16 = vpop.eup %5718  ;;  %v2004_v4 = vmul.f32 %v7349_v40, %v2001_v32  ;;  %v2005_v14 = vmul.f32 %v7352_v8, %v2002_v51  ;;  %v2024_v36 = vmul.f32 2.0, %v5713_v10 }
 0x36d   : > { %v2107_v15 = vmul.f32 -0.5, %v7397_v6  ;;  %v2025_v18 = vmul.f32 2.0, %v5715_v22  ;;  %v2053_v21 = vsub.f32 1.0, %v2050_v24  ;;  %v2059_v53 = vmul.f32 %v2056_v47, %v2044_v19 }
 0x36e   : > { %v2068_v38 = vmul.f32 %v2065_v17, %v2044_v19  ;;  %v2026_v25 = vmul.f32 2.0, %v5717_v39  ;;  %v2027_v41 = vsub.f32 %v2024_v36, %v2003_v27  ;;  %v2109_v44 = vmul.f32 %v2106_v3, %v7393_v48 }
 0x36f   : > { %v2111_v55 = vmul.f32 1.442695, %v2108_v46  ;;  %v2060_v43 = vadd.f32 %v2057_v26, %v2051_v59  ;;  %v2061_v60 = vadd.f32 %v2058_v7, %v2052_v37  ;;  %v2069_v20 = vmul.f32 %v2066_v23, %v2042_v31 }
 0x370   : > { %v2070_v5 = vmul.f32 %v2067_v0, %v2043_v30  ;;  %v2028_v9 = vsub.f32 %v2025_v18, %v2004_v4  ;;  %v2029_v40 = vsub.f32 %v2026_v25, %v2005_v14  ;;  %v2110_v8 = vmul.f32 %v2107_v15, %v7397_v6 }
 0x371   : > { %v2159_v32 = vmax.f32 %v7390_v63, 0.0  ;;  %v7467_v51 = vpop.eup %5720  ;;  %v2045_v10 = vmul.f32 0.5641896, %v7413_v28  ;;  %v2046_v24 = vmul.f32 0.5641896, %v7419_v52  ;;  %v2062_v47 = vadd.f32 %v2059_v53, %v2053_v21 }
 0x372   : > { %v2071_v17 = vmul.f32 %v2068_v38, %v2044_v19  ;;  %vm2078_vm9 = vcmp.le.f32.partialorder %v7265_v49, -3.0  ;;  %v7472_v3 = vpop.eup %5722  ;;  %v2047_v31 = vmul.f32 0.5641896, %v7429_v33  ;;  %vm2079_vm10 = vcmp.le.f32.partialorder %v7269_v34, -3.0 }
 0x373   : > { %vm2080_vm11 = vcmp.le.f32.partialorder %v7272_v57, -3.0  ;;  %5726 = vpow2.f32 %v2111_v55  ;;  %v2113_v30 = vmul.f32 1.442695, %v2109_v44  ;;  %v2160_v22 = vmax.f32 %v7393_v48, 0.0  ;;  %v7478_v59 = vpop.eup %5724 }
 0x374   : > { %v2030_v28 = vsel %vm2012_vm6, %v2027_v41, %v2003_v27  ;;  %v2072_v52 = vsub.f32 %v2060_v43, %v2069_v20  ;;  %v2073_v19 = vsub.f32 %v2061_v60, %v2070_v5  ;;  %v2161_v37 = vmax.f32 %v7397_v6, 0.0 }
 0x375   : > { %v2031_v33 = vsel %vm2013_vm7, %v2028_v9, %v2004_v4  ;;  %v2032_v46 = vsel %vm2014_vm8, %v2029_v40, %v2005_v14  ;;  %v2132_v39 = vmul.f32 1.0614054, %v7467_v51  ;;  %v2162_v26 = vmin.f32 %v2159_v32, 6.0 }
 0x376   : > { %v2074_v7 = vsub.f32 %v2062_v47, %v2071_v17  ;;  %v2115_v23 = vmul.f32 1.442695, %v2110_v8  ;;  %v2133_v0 = vmul.f32 1.0614054, %v7472_v3  ;;  %v2253_v36 = vmul.f32 -0.43379351, %v9746_v1 }
 0x377   : > { %5728 = vpow2.f32 %v2113_v30  ;;  %v2134_v5 = vmul.f32 1.0614054, %v7478_v59  ;;  %v2163_v20 = vmin.f32 %v2160_v22, 6.0  ;;  %v2186_v27 = vsub.f32 0.0, %v7390_v63 }
 0x378   : > { %v2075_v15 = vmul.f32 %v2072_v52, %v2045_v10  ;;  %v2076_v9 = vmul.f32 %v2073_v19, %v2046_v24  ;;  %v2164_v4 = vmin.f32 %v2161_v37, 6.0  ;;  %v2187_v14 = vsub.f32 0.0, %v7393_v48 }
 0x379   : > { %v5096_v18 = vadd.f32 -1.4531521, %v2132_v39  ;;  %v2168_v21 = vmul.f32 %v2162_v26, %v2162_v26  ;;  %v2254_v53 = vmul.f32 -0.43379351, %v6610_v58  ;;  %v7496_v38 = vadd.f32 %v7451_v12, %v6616_v45 }
 0x37a   : > { %v2077_v25 = vmul.f32 %v2074_v7, %v2047_v31  ;;  %v5097_v41 = vadd.f32 -1.4531521, %v2133_v0  ;;  %v2188_v44 = vsub.f32 0.0, %v7397_v6  ;;  %v7500_v55 = vadd.f32 %v2253_v36, %v6618_v54 }
 0x37b   : > { %9749 = vst [vmem:[#allocation22_spill] sm:$0xff] %v7496_v38  ;;  %v2081_v43 = vsel %vm2078_vm9, %v2075_v15, %v2030_v28  ;;  %v5098_v60 = vadd.f32 -1.4531521, %v2134_v5  ;;  %v2169_v40 = vmul.f32 %v2163_v20, %v2163_v20  ;;  %v2189_v8 = vmax.f32 %v2186_v27, 3.0  ;;  %v9752_v20 = vld [vmem:[#allocation23_spill] sm:$0xff] }
 0x37c   : > { %9750 = vst [vmem:[#allocation21_spill] sm:$0xff] %v7500_v55  ;;  %v2082_v32 = vsel %vm2079_vm10, %v2076_v9, %v2031_v33  ;;  %v2083_v12 = vsel %vm2080_vm11, %v2077_v25, %v2032_v46  ;;  %v2170_v10 = vmul.f32 %v2164_v4, %v2164_v4  ;;  %v2190_v24 = vmax.f32 %v2187_v14, 3.0 }
 0x37d   : > { %v5727_v47 = vpop.eup %5726  ;;  %v2138_v17 = vmul.f32 %v7467_v51, %v5096_v18  ;;  %v2171_v31 = vmul.f32 1.442695, %v2168_v21  ;;  %v7510_v30 = vadd.f32 %v2254_v53, %v6628_v61  ;;  %v2273_v49 = vand.u32 2147483647, %v7496_v38 }
 0x37e   : > { %5730 = vpow2.f32 %v2115_v23  ;;  %v2139_v22 = vmul.f32 %v7472_v3, %v5097_v41  ;;  %v2191_v28 = vmax.f32 %v2188_v44, 3.0  ;;  %v2274_v34 = vand.u32 2147483647, %v7500_v55 }
 0x37f   : > { %9751 = vst [vmem:[#allocation24_spill] sm:$0xff] %v7510_v30  ;;  %v2084_v52 = vmul.f32 0.88622695, %v2081_v43  ;;  %v2140_v57 = vmul.f32 %v7478_v59, %v5098_v60  ;;  %v2173_v19 = vmul.f32 1.442695, %v2169_v40  ;;  %5732 = vrcp.f32 %v2189_v8 }
 0x380   : > { %v2085_v37 = vmul.f32 0.88622695, %v2082_v32  ;;  %v2086_v33 = vmul.f32 0.88622695, %v2083_v12  ;;  %v2175_v46 = vmul.f32 1.442695, %v2170_v10  ;;  %5734 = vrcp.f32 %v2190_v24 }
 0x381   : > { %v5729_v39 = vpop.eup %5728  ;;  %v2141_v26 = vadd.f32 1.4214138, %v2138_v17  ;;  %5736 = vpow2.f32 %v2171_v31  ;;  %v2275_v7 = vand.u32 2147483647, %v7510_v30  ;;  %v2276_v23 = vmul.f32 0.3275911, %v2273_v49 }
 0x382   : > { %v1966_v0 = vmul.f32 %v7459_v16, %v9733_v2  ;;  %v2142_v36 = vadd.f32 1.4214138, %v2139_v22  ;;  %5738 = vrcp.f32 %v2191_v28  ;;  %v2277_v5 = vmul.f32 0.3275911, %v2274_v34  ;;  %v9753_v17 = vld [vmem:[#allocation18_spill] sm:$0xff] }
 0x383   : > { %v1792_v27 = vadd.f32 %v7408_v42, %v9752_v20  ;;  %v1939_v15 = vmul.f32 %v7436_v13, %v7436_v13  ;;  %v2143_v9 = vadd.f32 1.4214138, %v2140_v57  ;;  %5740 = vpow2.f32 %v2173_v19 }
 0x384   : > { %v1940_v4 = vmul.f32 0.086190164, %v7438_v35  ;;  %v2087_v14 = vmul.f32 %v2084_v52, %v7427_v29  ;;  %v2088_v18 = vmul.f32 %v2085_v37, %v7441_v50  ;;  %v2089_v21 = vmul.f32 %v2086_v33, %v1966_v0 }
 0x385   : > { %v2144_v16 = vmul.f32 %v7467_v51, %v2141_v26  ;;  %5742 = vpow2.f32 %v2175_v46  ;;  %v2278_v53 = vmul.f32 0.3275911, %v2275_v7  ;;  %v2279_v25 = vadd.f32 1.0, %v2276_v23 }
 0x386   : > { %v1941_v41 = vmul.f32 0.086190164, %v7443_v56  ;;  %v2145_v42 = vmul.f32 %v7472_v3, %v2142_v36  ;;  %v2280_v44 = vadd.f32 1.0, %v2277_v5  ;;  %v1942_v13 = vmul.f32 0.086190164, %v1939_v15  ;;  %v9755_v5 = vld [vmem:[#allocation11_spill] sm:$0xff] }
 0x387   : > { %v7530_v43 = vadd.f32 %v1940_v4, %v7417_v62  ;;  %v2146_v35 = vmul.f32 %v7478_v59, %v2143_v9  ;;  %v2090_v60 = vmul.f32 %v2087_v14, %v2087_v14  ;;  %v2091_v40 = vmul.f32 %v2088_v18, %v2088_v18 }
 0x388   : > { %v5731_v29 = vpop.eup %5730  ;;  %v7534_v50 = vadd.f32 %v1941_v41, %v7424_v11  ;;  %v2092_v8 = vmul.f32 %v2089_v21, %v2089_v21  ;;  %v7536_v12 = vadd.f32 %v1942_v13, %v1792_v27  ;;  %v5099_v56 = vadd.f32 -0.28449672, %v2144_v16  ;;  %v9754_v11 = vld [vmem:[#allocation19_spill] sm:$0xff] }
 0x389   : > { %v5733_v32 = vpop.eup %5732  ;;  %v2281_v10 = vadd.f32 1.0, %v2278_v53  ;;  %5744 = vrcp.f32 %v2279_v25  ;;  %v7539_v31 = vmul.f32 %v5727_v47, %v9753_v17  ;;  %v5100_v62 = vadd.f32 -0.28449672, %v2145_v42 }
 0x38a   : > { %v5735_v24 = vpop.eup %5734  ;;  %v2258_v49 = vmul.f32 -0.5, %v7496_v38  ;;  %5746 = vrcp.f32 %v2280_v44  ;;  %v7543_v28 = vmul.f32 %v5729_v39, %v9754_v11  ;;  %v7546_v34 = vmul.f32 %v5731_v29, %v9733_v2 }
 0x38b   : > { %v5737_v22 = vpop.eup %5736  ;;  %v5101_v52 = vadd.f32 -0.28449672, %v2146_v35  ;;  %v2259_v57 = vmul.f32 -0.5, %v7500_v55  ;;  %v7551_v37 = vmul.f32 0.097618654, %v2090_v60  ;;  %v2195_v46 = vmul.f32 %v5733_v32, %v5733_v32 }
 0x38c   : > { %v7549_v19 = vpop.eup %5738  ;;  %v7553_v47 = vmul.f32 0.097618654, %v2091_v40  ;;  %v7555_v33 = vmul.f32 0.097618654, %v2092_v8  ;;  %v2150_v7 = vmul.f32 %v7467_v51, %v5099_v56  ;;  %v2196_v39 = vmul.f32 %v5735_v24, %v5735_v24 }
 0x38d   : > { %v5741_v26 = vpop.eup %5740  ;;  %v2260_v23 = vmul.f32 -0.5, %v7510_v30  ;;  %5748 = vrcp.f32 %v2281_v10  ;;  %v2151_v0 = vmul.f32 %v7472_v3, %v5100_v62  ;;  %v2261_v36 = vmul.f32 %v2258_v49, %v7496_v38 }
 0x38e   : > { %v7562_v20 = vmul.f32 -0.31504267, %v9755_v5  ;;  %v7565_v27 = vmul.f32 -0.31504267, %v9746_v1  ;;  %v2152_v9 = vmul.f32 %v7478_v59, %v5101_v52  ;;  %v7568_v4 = vmul.f32 2.0, %v5737_v22 }
 0x38f   : > { %v5743_v15 = vpop.eup %5742  ;;  %v2197_v14 = vmul.f32 %v7549_v19, %v7549_v19  ;;  %v7573_v18 = vmul.f32 %v2259_v57, %v7500_v55  ;;  %v7575_v21 = vmul.f32 2.0, %v5741_v26  ;;  %v2201_v16 = vmul.f32 0.5, %v2195_v46 }
 0x390   : > { %v2207_v53 = vmul.f32 0.75, %v2195_v46  ;;  %v2216_v25 = vmul.f32 1.875, %v2195_v46  ;;  %v2153_v41 = vadd.f32 0.2548296, %v2150_v7  ;;  %v2202_v42 = vmul.f32 0.5, %v2196_v39 }
 0x391   : > { %v2208_v44 = vmul.f32 0.75, %v2196_v39  ;;  %v7578_v13 = vmul.f32 %v2260_v23, %v7510_v30  ;;  %v2154_v35 = vadd.f32 0.2548296, %v2151_v0  ;;  %v7580_v29 = vmul.f32 2.0, %v5743_v15 }
 0x392   : > { %v2217_v60 = vmul.f32 1.875, %v2196_v39  ;;  %v7582_v40 = vmul.f32 1.442695, %v2261_v36  ;;  %v2155_v56 = vadd.f32 0.2548296, %v2152_v9  ;;  %v2203_v62 = vmul.f32 0.5, %v2197_v14 }
 0x393   : > { %v7584_v8 = vpop.eup %5744  ;;  %v2198_v10 = vmul.f32 0.5641896, %v5733_v32  ;;  %v2209_v49 = vmul.f32 0.75, %v2197_v14  ;;  %v2204_v52 = vsub.f32 1.0, %v2201_v16  ;;  %v2210_v57 = vmul.f32 %v2207_v53, %v2195_v46 }
 0x394   : > { %v7586_v22 = vpop.eup %5746  ;;  %v2218_v26 = vmul.f32 1.875, %v2197_v14  ;;  %v2219_v7 = vmul.f32 %v2216_v25, %v2195_v46  ;;  %v2156_v23 = vmul.f32 %v7467_v51, %v2153_v41  ;;  %v2205_v0 = vsub.f32 1.0, %v2202_v42 }
 0x395   : > { %v2211_v15 = vmul.f32 %v2208_v44, %v2196_v39  ;;  %v2312_v2 = vmax.f32 %v7496_v38, 0.0  ;;  %v2157_v36 = vmul.f32 %v7472_v3, %v2154_v35  ;;  %vm2165_vm12 = vcmp.gt.f32.partialorder %v7390_v63, 0.0 }
 0x396   : > { %v2199_v9 = vmul.f32 0.5641896, %v5735_v24  ;;  %v2220_v32 = vmul.f32 %v2217_v60, %v2196_v39  ;;  %v2285_v11 = vmul.f32 1.0614054, %v7584_v8  ;;  %v2158_v16 = vmul.f32 %v7478_v59, %v2155_v56 }
 0x397   : > { %v7593_v17 = vpop.eup %5748  ;;  %vm2166_vm13 = vcmp.gt.f32.partialorder %v7393_v48, 0.0  ;;  %v2206_v53 = vsub.f32 1.0, %v2203_v62  ;;  %v2212_v51 = vmul.f32 %v2209_v49, %v2197_v14  ;;  %v2286_v25 = vmul.f32 1.0614054, %v7586_v22 }
 0x398   : > { %v2213_v41 = vadd.f32 %v2210_v57, %v2204_v52  ;;  %v2221_v42 = vmul.f32 %v2218_v26, %v2197_v14  ;;  %v2222_v44 = vmul.f32 %v2219_v7, %v2195_v46  ;;  %v2313_v3 = vmax.f32 %v7500_v55, 0.0 }
 0x399   : > { %v2180_v24 = vsub.f32 %v7568_v4, %v2156_v23  ;;  %v2214_v35 = vadd.f32 %v2211_v15, %v2205_v0  ;;  %v2315_v60 = vmin.f32 %v2312_v2, 6.0  ;;  %v2339_v1 = vsub.f32 0.0, %v7496_v38 }
 0x39a   : > { %vm2167_vm14 = vcmp.gt.f32.partialorder %v7397_v6, 0.0  ;;  %v2223_v59 = vmul.f32 %v2220_v32, %v2196_v39  ;;  %v2287_v56 = vmul.f32 1.0614054, %v7593_v17  ;;  %v5102_v62 = vadd.f32 -1.4531521, %v2285_v11 }
 0x39b   : > { %v2340_v49 = vsub.f32 0.0, %v7500_v55  ;;  %v2181_v52 = vsub.f32 %v7575_v21, %v2157_v36  ;;  %vm2231_vm15 = vcmp.le.f32.partialorder %v7390_v63, -3.0  ;;  %vm2232_vm0 = vcmp.le.f32.partialorder %v7393_v48, -3.0 }
 0x39c   : > { %v5103_v46 = vadd.f32 -1.4531521, %v2286_v25  ;;  %v2314_v4 = vmax.f32 %v7510_v30, 0.0  ;;  %v2341_v2 = vsub.f32 0.0, %v7510_v30  ;;  %v2215_v57 = vadd.f32 %v2212_v51, %v2206_v53 }
 0x39d   : > { %v2224_v26 = vmul.f32 %v2221_v42, %v2197_v14  ;;  %v2225_v7 = vsub.f32 %v2213_v41, %v2222_v44  ;;  %v2316_v39 = vmin.f32 %v2313_v3, 6.0  ;;  %v2182_v0 = vsub.f32 %v7580_v29, %v2158_v16 }
 0x39e   : > { %v2200_v11 = vmul.f32 0.5641896, %v7549_v19  ;;  %v2321_v15 = vmul.f32 %v2315_v60, %v2315_v60  ;;  %v2342_v32 = vmax.f32 %v2339_v1, 3.0  ;;  %v2226_v21 = vsub.f32 %v2214_v35, %v2223_v59 }
 0x39f   : > { %v5104_v55 = vadd.f32 -1.4531521, %v2287_v56  ;;  %v2291_v38 = vmul.f32 %v7584_v8, %v5102_v62  ;;  %v2343_v5 = vmax.f32 %v2340_v49, 3.0  ;;  %v2183_v25 = vsel %vm2165_vm12, %v2180_v24, %v2156_v23 }
 0x3a0   : > { %v2292_v30 = vmul.f32 %v7586_v22, %v5103_v46  ;;  %v2317_v53 = vmin.f32 %v2314_v4, 6.0  ;;  %v2344_v14 = vmax.f32 %v2341_v2, 3.0  ;;  %v2184_v51 = vsel %vm2166_vm13, %v2181_v52, %v2157_v36 }
 0x3a1   : > { %v2227_v29 = vsub.f32 %v2215_v57, %v2224_v26  ;;  %v2228_v41 = vmul.f32 %v2225_v7, %v2198_v10  ;;  %v2322_v19 = vmul.f32 %v2316_v39, %v2316_v39  ;;  %v2324_v42 = vmul.f32 1.442695, %v2321_v15 }
 0x3a2   : > { %5750 = vrcp.f32 %v2342_v32  ;;  %v2407_v1 = vmul.f32 -0.31504267, %v6610_v58  ;;  %v7620_v44 = vadd.f32 %v7562_v20, %v6616_v45  ;;  %v2229_v3 = vmul.f32 %v2226_v21, %v2199_v9 }
 0x3a3   : > { %v2293_v23 = vmul.f32 %v7593_v17, %v5104_v55  ;;  %v2294_v24 = vadd.f32 1.4214138, %v2291_v38  ;;  %5752 = vrcp.f32 %v2343_v5  ;;  %v2185_v35 = vsel %vm2167_vm14, %v2182_v0, %v2158_v16 }
 0x3a4   : > { %v2295_v36 = vadd.f32 1.4214138, %v2292_v30  ;;  %v2323_v60 = vmul.f32 %v2317_v53, %v2317_v53  ;;  %5754 = vrcp.f32 %v2344_v14  ;;  %v2230_v10 = vmul.f32 %v2227_v29, %v2200_v11  ;;  %v9756_v29 = vld [vmem:[#allocation11_spill] sm:$0xff] }
 0x3a5   : > { %v2234_v59 = vsel %vm2231_vm15, %v2228_v41, %v2183_v25  ;;  %v2235_v56 = vsel %vm2232_vm0, %v2229_v3, %v2184_v51  ;;  %v7631_v20 = vadd.f32 %v7565_v27, %v6618_v54  ;;  %5756 = vpow2.f32 %v2324_v42 }
 0x3a6   : > { %v2326_v38 = vmul.f32 1.442695, %v2322_v19  ;;  %v7634_v55 = vadd.f32 %v2407_v1, %v6628_v61  ;;  %v2426_v30 = vand.u32 2147483647, %v7620_v44  ;;  %vm2233_vm1 = vcmp.le.f32.partialorder %v7397_v6, -3.0  ;;  %v9757_v1 = vld [vmem:[#allocation12_spill] sm:$0xff] }
 0x3a7   : > { %v2266_v5 = vmul.f32 1.442695, %v7573_v18  ;;  %v2296_v63 = vadd.f32 1.4214138, %v2293_v23  ;;  %v2297_v9 = vmul.f32 %v7584_v8, %v2294_v24  ;;  %v2236_v48 = vsel %vm2233_vm1, %v2230_v10, %v2185_v35 }
 0x3a8   : > { %v2237_v16 = vmul.f32 0.88622695, %v2234_v59  ;;  %v2298_v62 = vmul.f32 %v7586_v22, %v2295_v36  ;;  %v2328_v27 = vmul.f32 1.442695, %v2323_v60  ;;  %v2238_v49 = vmul.f32 0.88622695, %v2235_v56 }
 0x3a9   : > { %5758 = vpow2.f32 %v7582_v40  ;;  %v2268_v52 = vmul.f32 1.442695, %v7578_v13  ;;  %v2427_v46 = vand.u32 2147483647, %v7631_v20  ;;  %v7646_v6 = vadd.f32 %v7551_v37, %v7530_v43 }
 0x3aa   : > { %5760 = vpow2.f32 %v2326_v38  ;;  %v2428_v18 = vand.u32 2147483647, %v7634_v55  ;;  %v2429_v4 = vmul.f32 0.3275911, %v2426_v30  ;;  %v2239_v2 = vmul.f32 0.88622695, %v2236_v48 }
 0x3ab   : > { %5762 = vpow2.f32 %v2266_v5  ;;  %v2299_v57 = vmul.f32 %v7593_v17, %v2296_v63  ;;  %v5105_v26 = vadd.f32 -0.28449672, %v2297_v9  ;;  %v7654_v13 = vadd.f32 %v7553_v47, %v7534_v50 }
 0x3ac   : > { %v7650_v7 = vpop.eup %5750  ;;  %v2240_v40 = vmul.f32 %v2237_v16, %v7539_v31  ;;  %v5106_v39 = vadd.f32 -0.28449672, %v2298_v62  ;;  %5764 = vpow2.f32 %v2328_v27  ;;  %v7661_v37 = vadd.f32 %v7555_v33, %v7536_v12 }
 0x3ad   : > { %v7657_v43 = vpop.eup %5752  ;;  %v7664_v0 = vmul.f32 %v2238_v49, %v7543_v28  ;;  %5766 = vpow2.f32 %v2268_v52  ;;  %v2430_v11 = vmul.f32 0.3275911, %v2427_v46  ;;  %v2411_v50 = vmul.f32 -0.5, %v7620_v44  ;;  %v9758_v52 = vld [vmem:[#allocation22_spill] sm:$0xff] }
 0x3ae   : > { %v7666_v15 = vpop.eup %5754  ;;  %v2412_v47 = vmul.f32 -0.5, %v7631_v20  ;;  %v2431_v31 = vmul.f32 0.3275911, %v2428_v18  ;;  %v2432_v32 = vadd.f32 1.0, %v2429_v4  ;;  %v7671_v21 = vmul.f32 %v2239_v2, %v7546_v34 }
 0x3af   : > { %v5107_v25 = vadd.f32 -0.28449672, %v2299_v57  ;;  %v2303_v12 = vmul.f32 %v7584_v8, %v5105_v26  ;;  %v2348_v28 = vmul.f32 %v7650_v7, %v7650_v7  ;;  %v5757_v33 = vpop.eup %5756  ;;  %v7676_v53 = vmul.f32 %v2240_v40, %v2240_v40  ;;  %v9759_v40 = vld [vmem:[#allocation21_spill] sm:$0xff] }
 0x3b0   : > { %v2304_v14 = vmul.f32 %v7586_v22, %v5106_v39  ;;  %v7681_v51 = vmul.f32 %v7657_v43, %v7657_v43  ;;  %v7684_v41 = vmul.f32 -0.19111887, %v9756_v29  ;;  %v7688_v34 = vmul.f32 %v7666_v15, %v7666_v15 }
 0x3b1   : > { %v7691_v19 = vmul.f32 -0.5, %v7634_v55  ;;  %v2433_v42 = vadd.f32 1.0, %v2430_v11  ;;  %v7694_v3 = vmul.f32 -0.19111887, %v9757_v1  ;;  %v2414_v23 = vmul.f32 %v2411_v50, %v7620_v44 }
 0x3b2   : > { %v2415_v24 = vmul.f32 %v2412_v47, %v7631_v20  ;;  %v2434_v35 = vadd.f32 1.0, %v2431_v31  ;;  %5768 = vrcp.f32 %v2432_v32  ;;  %v2305_v60 = vmul.f32 %v7593_v17, %v5107_v25 }
 0x3b3   : > { %v7698_v36 = vpop.eup %5758  ;;  %v2306_v10 = vadd.f32 0.2548296, %v2303_v12  ;;  %v2330_v59 = vmul.f32 2.0, %v5757_v33  ;;  %v2354_v56 = vmul.f32 0.5, %v2348_v28  ;;  %v2307_v30 = vadd.f32 0.2548296, %v2304_v14 }
 0x3b4   : > { %v5761_v38 = vpop.eup %5760  ;;  %v2355_v5 = vmul.f32 0.5, %v7681_v51  ;;  %v2360_v63 = vmul.f32 0.75, %v2348_v28  ;;  %v2369_v9 = vmul.f32 1.875, %v2348_v28  ;;  %v2356_v16 = vmul.f32 0.5, %v7688_v34 }
 0x3b5   : > { %v7702_v48 = vpop.eup %5762  ;;  %v2361_v62 = vmul.f32 0.75, %v7681_v51  ;;  %v2362_v27 = vmul.f32 0.75, %v7688_v34  ;;  %5770 = vrcp.f32 %v2433_v42  ;;  %vm2318_vm2 = vcmp.gt.f32.partialorder %v9758_v52, 0.0 }
 0x3b6   : > { %v5765_v49 = vpop.eup %5764  ;;  %v2370_v46 = vmul.f32 1.875, %v7681_v51  ;;  %v2371_v18 = vmul.f32 1.875, %v7688_v34  ;;  %5772 = vrcp.f32 %v2434_v35  ;;  %v2465_v4 = vmax.f32 %v7620_v44, 0.0 }
 0x3b7   : > { %v7711_v2 = vpop.eup %5766  ;;  %v2308_v57 = vadd.f32 0.2548296, %v2305_v60  ;;  %v2309_v26 = vmul.f32 %v7584_v8, %v2306_v10  ;;  %vm2319_vm3 = vcmp.gt.f32.partialorder %v9759_v40, 0.0  ;;  %v2331_v39 = vmul.f32 2.0, %v5761_v38 }
 0x3b8   : > { %v2417_v11 = vmul.f32 1.442695, %v2414_v23  ;;  %v2310_v50 = vmul.f32 %v7586_v22, %v2307_v30  ;;  %v2357_v47 = vsub.f32 1.0, %v2354_v56  ;;  %v2363_v31 = vmul.f32 %v2360_v63, %v2348_v28  ;;  %v9760_v30 = vld [vmem:[#allocation24_spill] sm:$0xff] }
 0x3b9   : > { %v2372_v32 = vmul.f32 %v2369_v9, %v2348_v28  ;;  %v2332_v25 = vmul.f32 2.0, %v5765_v49  ;;  %v2358_v12 = vsub.f32 1.0, %v2355_v5  ;;  %v2359_v33 = vsub.f32 1.0, %v2356_v16 }
 0x3ba   : > { %v2364_v14 = vmul.f32 %v2361_v62, %v7681_v51  ;;  %v2365_v42 = vmul.f32 %v2362_v27, %v7688_v34  ;;  %v2373_v35 = vmul.f32 %v2370_v46, %v7681_v51  ;;  %v2374_v8 = vmul.f32 %v2371_v18, %v7688_v34 }
 0x3bb   : > { %v2468_v60 = vmin.f32 %v2465_v4, 6.0  ;;  %v2311_v10 = vmul.f32 %v7593_v17, %v2308_v57  ;;  %v2333_v23 = vsub.f32 %v2330_v59, %v2309_v26  ;;  %v2351_v22 = vmul.f32 0.5641896, %v7650_v7 }
 0x3bc   : > { %v2419_v56 = vmul.f32 1.442695, %v2415_v24  ;;  %v7722_v38 = vpop.eup %5768  ;;  %vm2320_vm4 = vcmp.gt.f32.partialorder %v9760_v30, 0.0  ;;  %v2334_v5 = vsub.f32 %v2331_v39, %v2310_v50  ;;  %v2366_v63 = vadd.f32 %v2363_v31, %v2357_v47 }
 0x3bd   : > { %v2375_v9 = vmul.f32 %v2372_v32, %v2348_v28  ;;  %v2466_v16 = vmax.f32 %v7631_v20, 0.0  ;;  %v2352_v62 = vmul.f32 0.5641896, %v7657_v43  ;;  %v2367_v27 = vadd.f32 %v2364_v14, %v2358_v12 }
 0x3be   : > { %vm2384_vm5 = vcmp.le.f32.partialorder %v9758_v52, -3.0  ;;  %5774 = vpow2.f32 %v2417_v11  ;;  %v2467_v17 = vmax.f32 %v7634_v55, 0.0  ;;  %v2368_v59 = vadd.f32 %v2365_v42, %v2359_v33 }
 0x3bf   : > { %v2376_v7 = vmul.f32 %v2373_v35, %v7681_v51  ;;  %v2377_v24 = vmul.f32 %v2374_v8, %v7688_v34  ;;  %v2474_v49 = vmul.f32 %v2468_v60, %v2468_v60  ;;  %v7731_v46 = vpop.eup %5770  ;;  %v2335_v18 = vsub.f32 %v2332_v25, %v2311_v10 }
 0x3c0   : > { %v2336_v28 = vsel %vm2318_vm2, %v2333_v23, %v2309_v26  ;;  %v2353_v43 = vmul.f32 0.5641896, %v7666_v15  ;;  %v2438_v4 = vmul.f32 1.0614054, %v7722_v38  ;;  %v7737_v57 = vpop.eup %5772  ;;  %v2337_v39 = vsel %vm2319_vm3, %v2334_v5, %v2310_v50 }
 0x3c1   : > { %v2378_v11 = vsub.f32 %v2366_v63, %v2375_v9  ;;  %v2469_v51 = vmin.f32 %v2466_v16, 6.0  ;;  %v2492_v34 = vsub.f32 0.0, %v7620_v44  ;;  %vm2385_vm6 = vcmp.le.f32.partialorder %v9759_v40, -3.0 }
 0x3c2   : > { %vm2386_vm7 = vcmp.le.f32.partialorder %v9760_v30, -3.0  ;;  %5776 = vpow2.f32 %v2419_v56  ;;  %v2470_v47 = vmin.f32 %v2467_v17, 6.0  ;;  %v2493_v26 = vsub.f32 0.0, %v7631_v20 }
 0x3c3   : > { %v2560_v15 = vmul.f32 -0.19111887, %v6610_v58  ;;  %v2379_v31 = vsub.f32 %v2367_v27, %v2376_v7  ;;  %v2380_v32 = vsub.f32 %v2368_v59, %v2377_v24  ;;  %v2477_v25 = vmul.f32 1.442695, %v2474_v49 }
 0x3c4   : > { %v2494_v12 = vsub.f32 0.0, %v7634_v55  ;;  %v2439_v50 = vmul.f32 1.0614054, %v7731_v46  ;;  %v2440_v33 = vmul.f32 1.0614054, %v7737_v57  ;;  %v7751_v42 = vadd.f32 %v7684_v41, %v6616_v45 }
 0x3c5   : > { %v5108_v14 = vadd.f32 -1.4531521, %v2438_v4  ;;  %v2381_v35 = vmul.f32 %v2378_v11, %v2351_v22  ;;  %v2475_v8 = vmul.f32 %v2469_v51, %v2469_v51  ;;  %v2495_v60 = vmax.f32 %v2492_v34, 3.0 }
 0x3c6   : > { %v7755_v23 = vadd.f32 %v7694_v3, %v6618_v54  ;;  %v2338_v56 = vsel %vm2320_vm4, %v2335_v18, %v2311_v10  ;;  %v2476_v5 = vmul.f32 %v2470_v47, %v2470_v47  ;;  %v2496_v63 = vmax.f32 %v2493_v26, 3.0 }
 0x3c7   : > { %v7760_v9 = vadd.f32 %v2560_v15, %v6628_v61  ;;  %v2382_v16 = vmul.f32 %v2379_v31, %v2352_v62  ;;  %v2387_v41 = vsel %vm2384_vm5, %v2381_v35, %v2336_v28  ;;  %5778 = vpow2.f32 %v2477_v25  ;;  %v9761_v15 = vld [vmem:[#allocation18_spill] sm:$0xff] }
 0x3c8   : > { %v2497_v22 = vmax.f32 %v2494_v12, 3.0  ;;  %v5775_v27 = vpop.eup %5774  ;;  %v5109_v17 = vadd.f32 -1.4531521, %v2439_v50  ;;  %v5110_v59 = vadd.f32 -1.4531521, %v2440_v33  ;;  %v2444_v3 = vmul.f32 %v7722_v38, %v5108_v14 }
 0x3c9   : > { %v2579_v7 = vand.u32 2147483647, %v7751_v42  ;;  %v2383_v24 = vmul.f32 %v2380_v32, %v2353_v43  ;;  %v2479_v10 = vmul.f32 1.442695, %v2475_v8  ;;  %5780 = vrcp.f32 %v2495_v60 }
 0x3ca   : > { %v2580_v49 = vand.u32 2147483647, %v7755_v23  ;;  %v2416_v62 = vmul.f32 %v7691_v19, %v7634_v55  ;;  %v2481_v18 = vmul.f32 1.442695, %v2476_v5  ;;  %5782 = vrcp.f32 %v2496_v63  ;;  %v9763_v5 = vld [vmem:[#allocation20_spill] sm:$0xff] }
 0x3cb   : > { %v2581_v52 = vand.u32 2147483647, %v7760_v9  ;;  %v2388_v28 = vsel %vm2385_vm6, %v2382_v16, %v2337_v39  ;;  %v2389_v4 = vsel %vm2386_vm7, %v2383_v24, %v2338_v56  ;;  %v2390_v11 = vmul.f32 0.88622695, %v2387_v41 }
 0x3cc   : > { %5784 = vrcp.f32 %v2497_v22  ;;  %v5777_v43 = vpop.eup %5776  ;;  %v2445_v51 = vmul.f32 %v7731_v46, %v5109_v17  ;;  %v2446_v34 = vmul.f32 %v7737_v57, %v5110_v59  ;;  %v2447_v47 = vadd.f32 1.4214138, %v2444_v3 }
 0x3cd   : > { %v2582_v26 = vmul.f32 0.3275911, %v2579_v7  ;;  %v2244_v19 = vmul.f32 %v7664_v0, %v7664_v0  ;;  %v2270_v31 = vmul.f32 %v7698_v36, %v9761_v15  ;;  %5786 = vpow2.f32 %v2479_v10  ;;  %v9762_v36 = vld [vmem:[#allocation19_spill] sm:$0xff] }
 0x3ce   : > { %v2583_v40 = vmul.f32 0.3275911, %v2580_v49  ;;  %v2245_v30 = vmul.f32 %v7671_v21, %v7671_v21  ;;  %v2246_v39 = vmul.f32 0.10744427, %v7676_v53  ;;  %5788 = vpow2.f32 %v2481_v18 }
 0x3cf   : > { %v2584_v32 = vmul.f32 0.3275911, %v2581_v52  ;;  %v2391_v25 = vmul.f32 0.88622695, %v2388_v28  ;;  %v2392_v12 = vmul.f32 0.88622695, %v2389_v4  ;;  %v2393_v50 = vmul.f32 %v2390_v11, %v2270_v31 }
 0x3d0   : > { %v2421_v33 = vmul.f32 1.442695, %v2416_v62  ;;  %v2448_v14 = vadd.f32 1.4214138, %v2445_v51  ;;  %v2449_v35 = vadd.f32 1.4214138, %v2446_v34  ;;  %v2450_v0 = vmul.f32 %v7722_v38, %v2447_v47 }
 0x3d1   : > { %v2585_v8 = vadd.f32 1.0, %v2582_v26  ;;  %v5779_v60 = vpop.eup %5778  ;;  %v2271_v56 = vmul.f32 %v7702_v48, %v9762_v36  ;;  %v2272_v21 = vmul.f32 %v7711_v2, %v9763_v5  ;;  %v2564_v53 = vmul.f32 -0.5, %v7751_v42 }
 0x3d2   : > { %v2586_v63 = vadd.f32 1.0, %v2583_v40  ;;  %v2247_v16 = vmul.f32 0.10744427, %v2244_v19  ;;  %v2248_v41 = vmul.f32 0.10744427, %v2245_v30  ;;  %v7790_v22 = vadd.f32 %v2246_v39, %v7646_v6 }
 0x3d3   : > { %v2587_v17 = vadd.f32 1.0, %v2584_v32  ;;  %v5781_v59 = vpop.eup %5780  ;;  %v2394_v3 = vmul.f32 %v2391_v25, %v2271_v56  ;;  %v2395_v7 = vmul.f32 %v2392_v12, %v2272_v21  ;;  %v2396_v24 = vmul.f32 %v2393_v50, %v2393_v50 }
 0x3d4   : > { %5790 = vpow2.f32 %v2421_v33  ;;  %v5783_v10 = vpop.eup %5782  ;;  %v2451_v48 = vmul.f32 %v7731_v46, %v2448_v14  ;;  %v2452_v49 = vmul.f32 %v7737_v57, %v2449_v35  ;;  %v5111_v2 = vadd.f32 -0.28449672, %v2450_v0 }
 0x3d5   : > { %5792 = vrcp.f32 %v2585_v8  ;;  %v7795_v18 = vadd.f32 %v2247_v16, %v7654_v13  ;;  %v7798_v6 = vadd.f32 %v2248_v41, %v7661_v37  ;;  %v2567_v52 = vmul.f32 %v2564_v53, %v7751_v42 }
 0x3d6   : > { %v5785_v62 = vpop.eup %5784  ;;  %5794 = vrcp.f32 %v2586_v63  ;;  %v7802_v28 = vmul.f32 %v5775_v27, %v9761_v15  ;;  %v2501_v4 = vmul.f32 %v5781_v59, %v5781_v59  ;;  %v2565_v11 = vmul.f32 -0.5, %v7755_v23 }
 0x3d7   : > { %9764 = vst [vmem:[#allocation23_spill] sm:$0xff] %v7798_v6  ;;  %5796 = vrcp.f32 %v2587_v17  ;;  %v5787_v51 = vpop.eup %5786  ;;  %v7805_v34 = vmul.f32 %v2394_v3, %v2394_v3  ;;  %v7807_v47 = vmul.f32 %v2395_v7, %v2395_v7  ;;  %v7810_v13 = vmul.f32 %v5777_v43, %v9762_v36 }
 0x3d8   : > { %v2566_v37 = vmul.f32 -0.5, %v7760_v9  ;;  %v5789_v26 = vpop.eup %5788  ;;  %v7813_v19 = vmul.f32 0.115505666, %v2396_v24  ;;  %v5112_v31 = vadd.f32 -0.28449672, %v2451_v48  ;;  %v2456_v40 = vmul.f32 %v7722_v38, %v5111_v2 }
 0x3d9   : > { %9765 = vst [vmem:[#allocation22_spill] sm:$0xff] %v7810_v13  ;;  %v5113_v27 = vadd.f32 -0.28449672, %v2452_v49  ;;  %v2502_v30 = vmul.f32 %v5783_v10, %v5783_v10  ;;  %v7816_v39 = vmul.f32 %v5785_v62, %v5785_v62  ;;  %v2570_v32 = vmul.f32 1.442695, %v2567_v52 }
 0x3da   : > { %v7819_v25 = vmul.f32 -0.064056896, %v9756_v29  ;;  %v7821_v12 = vmul.f32 2.0, %v5779_v60  ;;  %v2507_v43 = vmul.f32 0.5, %v2501_v4  ;;  %v2513_v50 = vmul.f32 0.75, %v2501_v4 }
 0x3db   : > { %v7824_v33 = vmul.f32 %v2565_v11, %v7755_v23  ;;  %v7826_v14 = vmul.f32 2.0, %v5787_v51  ;;  %v7828_v35 = vmul.f32 2.0, %v5789_v26  ;;  %v2522_v0 = vmul.f32 1.875, %v2501_v4 }
 0x3dc   : > { %v7831_v8 = vmul.f32 %v2566_v37, %v7760_v9  ;;  %v2457_v56 = vmul.f32 %v7731_v46, %v5112_v31  ;;  %v2458_v21 = vmul.f32 %v7737_v57, %v5113_v27  ;;  %v2459_v53 = vadd.f32 0.2548296, %v2456_v40 }
 0x3dd   : > { %v7835_v60 = vmul.f32 0.5641896, %v5781_v59  ;;  %v2508_v16 = vmul.f32 0.5, %v2502_v30  ;;  %v2509_v41 = vmul.f32 0.5, %v7816_v39  ;;  %v2514_v17 = vmul.f32 0.75, %v2502_v30 }
 0x3de   : > { %v7837_v63 = vpop.eup %5790  ;;  %5798 = vpow2.f32 %v2570_v32  ;;  %v2510_v7 = vsub.f32 1.0, %v2507_v43  ;;  %v2515_v24 = vmul.f32 0.75, %v7816_v39  ;;  %v2516_v48 = vmul.f32 %v2513_v50, %v2501_v4 }
 0x3df   : > { %v7840_v3 = vpop.eup %5792  ;;  %v2523_v49 = vmul.f32 1.875, %v2502_v30  ;;  %v7845_v52 = vmul.f32 0.5641896, %v5783_v10  ;;  %v7847_v59 = vmul.f32 0.5641896, %v5785_v62  ;;  %v2524_v11 = vmul.f32 1.875, %v7816_v39 }
 0x3e0   : > { %v7843_v2 = vpop.eup %5794  ;;  %v2525_v51 = vmul.f32 %v2522_v0, %v2501_v4  ;;  %v2460_v26 = vadd.f32 0.2548296, %v2457_v56  ;;  %v2461_v31 = vadd.f32 0.2548296, %v2458_v21  ;;  %v2462_v27 = vmul.f32 %v7722_v38, %v2459_v53 }
 0x3e1   : > { %v7850_v37 = vpop.eup %5796  ;;  %v2618_v40 = vmax.f32 %v7751_v42, 0.0  ;;  %vm2471_vm8 = vcmp.gt.f32.partialorder %v7620_v44, 0.0  ;;  %v2511_v32 = vsub.f32 1.0, %v2508_v16  ;;  %v2512_v43 = vsub.f32 1.0, %v2509_v41 }
 0x3e2   : > { %v2517_v50 = vmul.f32 %v2514_v17, %v2502_v30  ;;  %v2591_v10 = vmul.f32 1.0614054, %v7840_v3  ;;  %v2518_v62 = vmul.f32 %v2515_v24, %v7816_v39  ;;  %v2519_v6 = vadd.f32 %v2516_v48, %v2510_v7 }
 0x3e3   : > { %v2526_v36 = vmul.f32 %v2523_v49, %v2502_v30  ;;  %v2592_v0 = vmul.f32 1.0614054, %v7843_v2  ;;  %v2527_v56 = vmul.f32 %v2524_v11, %v7816_v39  ;;  %v2528_v21 = vmul.f32 %v2525_v51, %v2501_v4 }
 0x3e4   : > { %v2593_v38 = vmul.f32 1.0614054, %v7850_v37  ;;  %v2619_v53 = vmax.f32 %v7755_v23, 0.0  ;;  %v2463_v29 = vmul.f32 %v7731_v46, %v2460_v26  ;;  %v2464_v16 = vmul.f32 %v7737_v57, %v2461_v31 }
 0x3e5   : > { %v2620_v41 = vmax.f32 %v7760_v9, 0.0  ;;  %v2621_v17 = vmin.f32 %v2618_v40, 6.0  ;;  %vm2472_vm9 = vcmp.gt.f32.partialorder %v7631_v20, 0.0  ;;  %vm2473_vm10 = vcmp.gt.f32.partialorder %v7634_v55, 0.0 }
 0x3e6   : > { %v2486_v7 = vsub.f32 %v7821_v12, %v2462_v27  ;;  %v2520_v24 = vadd.f32 %v2517_v50, %v2511_v32  ;;  %v5114_v48 = vadd.f32 -1.4531521, %v2591_v10  ;;  %v2645_v4 = vsub.f32 0.0, %v7751_v42 }
 0x3e7   : > { %v2521_v49 = vadd.f32 %v2518_v62, %v2512_v43  ;;  %v2529_v11 = vmul.f32 %v2526_v36, %v2502_v30  ;;  %vm2537_vm11 = vcmp.le.f32.partialorder %v7620_v44, -3.0  ;;  %v5115_v46 = vadd.f32 -1.4531521, %v2592_v0 }
 0x3e8   : > { %v2646_v57 = vsub.f32 0.0, %v7755_v23  ;;  %v7870_v51 = vpop.eup %5798  ;;  %v2530_v26 = vmul.f32 %v2527_v56, %v7816_v39  ;;  %v2531_v31 = vsub.f32 %v2519_v6, %v2528_v21  ;;  %v5116_v40 = vadd.f32 -1.4531521, %v2593_v38 }
 0x3e9   : > { %v2622_v13 = vmin.f32 %v2619_v53, 6.0  ;;  %v2487_v12 = vsub.f32 %v7826_v14, %v2463_v29  ;;  %v2488_v32 = vsub.f32 %v7828_v35, %v2464_v16  ;;  %v2623_v50 = vmin.f32 %v2620_v41, 6.0 }
 0x3ea   : > { %v2627_v10 = vmul.f32 %v2621_v17, %v2621_v17  ;;  %v2597_v36 = vmul.f32 %v7840_v3, %v5114_v48  ;;  %v2647_v30 = vsub.f32 0.0, %v7760_v9  ;;  %v2648_v43 = vmax.f32 %v2645_v4, 3.0 }
 0x3eb   : > { %v2712_v62 = vmul.f32 -0.064056896, %v9757_v1  ;;  %v2489_v0 = vsel %vm2471_vm8, %v2486_v7, %v2462_v27  ;;  %v2532_v39 = vsub.f32 %v2520_v24, %v2529_v11  ;;  %v2598_v6 = vmul.f32 %v7843_v2, %v5115_v46 }
 0x3ec   : > { %v2649_v56 = vmax.f32 %v2646_v57, 3.0  ;;  %v2533_v21 = vsub.f32 %v2521_v49, %v2530_v26  ;;  %v2534_v14 = vmul.f32 %v2531_v31, %v7835_v60  ;;  %v2599_v35 = vmul.f32 %v7850_v37, %v5116_v40 }
 0x3ed   : > { %v2628_v38 = vmul.f32 %v2622_v13, %v2622_v13  ;;  %v2629_v53 = vmul.f32 %v2623_v50, %v2623_v50  ;;  %v2630_v41 = vmul.f32 1.442695, %v2627_v10  ;;  %v2713_v17 = vmul.f32 -0.064056896, %v6610_v58 }
 0x3ee   : > { %v7886_v48 = vadd.f32 %v7819_v25, %v6616_v45  ;;  %v2600_v4 = vadd.f32 1.4214138, %v2597_v36  ;;  %v2650_v27 = vmax.f32 %v2647_v30, 3.0  ;;  %5800 = vrcp.f32 %v2648_v43 }
 0x3ef   : > { %v7889_v7 = vadd.f32 %v2712_v62, %v6618_v54  ;;  %v2490_v60 = vsel %vm2472_vm9, %v2487_v12, %v2463_v29  ;;  %v2491_v13 = vsel %vm2473_vm10, %v2488_v32, %v2464_v16  ;;  %v2601_v24 = vadd.f32 1.4214138, %v2598_v6 }
 0x3f0   : > { %5802 = vrcp.f32 %v2649_v56  ;;  %v2535_v49 = vmul.f32 %v2532_v39, %v7845_v52  ;;  %v2536_v11 = vmul.f32 %v2533_v21, %v7847_v59  ;;  %v2540_v25 = vsel %vm2537_vm11, %v2534_v14, %v2489_v0 }
 0x3f1   : > { %v2602_v46 = vadd.f32 1.4214138, %v2599_v35  ;;  %5804 = vpow2.f32 %v2630_v41  ;;  %v2632_v57 = vmul.f32 1.442695, %v2628_v38  ;;  %v7900_v26 = vadd.f32 %v2713_v17, %v6628_v61 }
 0x3f2   : > { %v2732_v29 = vand.u32 2147483647, %v7886_v48  ;;  %v2603_v31 = vmul.f32 %v7840_v3, %v2600_v4  ;;  %v2634_v16 = vmul.f32 1.442695, %v2629_v53  ;;  %5806 = vrcp.f32 %v2650_v27 }
 0x3f3   : > { %v2733_v40 = vand.u32 2147483647, %v7889_v7  ;;  %v2400_v52 = vmul.f32 0.115505666, %v7805_v34  ;;  %vm2538_vm12 = vcmp.le.f32.partialorder %v7631_v20, -3.0  ;;  %vm2539_vm13 = vcmp.le.f32.partialorder %v7634_v55, -3.0 }
 0x3f4   : > { %v2604_v44 = vmul.f32 %v7843_v2, %v2601_v24  ;;  %v2541_v59 = vsel %vm2538_vm12, %v2535_v49, %v2490_v60  ;;  %v2542_v12 = vsel %vm2539_vm13, %v2536_v11, %v2491_v13  ;;  %v2543_v32 = vmul.f32 0.88622695, %v2540_v25  ;;  %v9767_v25 = vld [vmem:[#allocation11_spill] sm:$0xff] }
 0x3f5   : > { %v2605_v50 = vmul.f32 %v7850_v37, %v2602_v46  ;;  %v2572_v10 = vmul.f32 1.442695, %v7824_v33  ;;  %5808 = vpow2.f32 %v2632_v57  ;;  %v2734_v36 = vand.u32 2147483647, %v7900_v26 }
 0x3f6   : > { %v2735_v30 = vmul.f32 0.3275911, %v2732_v29  ;;  %v2574_v43 = vmul.f32 1.442695, %v7831_v8  ;;  %v5117_v34 = vadd.f32 -0.28449672, %v2603_v31  ;;  %5810 = vpow2.f32 %v2634_v16 }
 0x3f7   : > { %v2736_v20 = vmul.f32 0.3275911, %v2733_v40  ;;  %v2425_v55 = vmul.f32 %v7837_v63, %v9763_v5  ;;  %v2544_v62 = vmul.f32 0.88622695, %v2541_v59  ;;  %v2545_v0 = vmul.f32 0.88622695, %v2542_v12 }
 0x3f8   : > { %v5118_v39 = vadd.f32 -0.28449672, %v2604_v44  ;;  %v7915_v6 = vpop.eup %5800  ;;  %v7918_v56 = vmul.f32 0.115505666, %v7807_v47  ;;  %v7922_v33 = vadd.f32 %v7813_v19, %v7790_v22  ;;  %v2546_v8 = vmul.f32 %v2543_v32, %v7802_v28  ;;  %v9766_v28 = vld [vmem:[#allocation22_spill] sm:$0xff] }
 0x3f9   : > { %v5119_v21 = vadd.f32 -0.28449672, %v2605_v50  ;;  %v7928_v35 = vadd.f32 %v2400_v52, %v7795_v18  ;;  %5812 = vpow2.f32 %v2572_v10  ;;  %v2737_v63 = vmul.f32 0.3275911, %v2734_v36 }
 0x3fa   : > { %v7925_v14 = vpop.eup %5802  ;;  %v2738_v38 = vadd.f32 1.0, %v2735_v30  ;;  %v7932_v53 = vmul.f32 %v7870_v51, %v9761_v15  ;;  %v2609_v47 = vmul.f32 %v7840_v3, %v5117_v34  ;;  %v2717_v22 = vmul.f32 -0.5, %v7886_v48 }
 0x3fb   : > { %v2739_v19 = vadd.f32 1.0, %v2736_v20  ;;  %v5805_v41 = vpop.eup %5804  ;;  %v7937_v17 = vmul.f32 %v2544_v62, %v9766_v28  ;;  %v7939_v4 = vmul.f32 %v2545_v0, %v2425_v55  ;;  %5814 = vpow2.f32 %v2574_v43 }
 0x3fc   : > { %v2610_v18 = vmul.f32 %v7843_v2, %v5118_v39  ;;  %v7942_v27 = vpop.eup %5806  ;;  %v7944_v60 = vmul.f32 %v2546_v8, %v2546_v8  ;;  %v2611_v51 = vmul.f32 %v7850_v37, %v5119_v21  ;;  %v2654_v13 = vmul.f32 %v7915_v6, %v7915_v6 }
 0x3fd   : > { %v2655_v24 = vmul.f32 %v7925_v14, %v7925_v14  ;;  %v2740_v49 = vadd.f32 1.0, %v2737_v63  ;;  %5816 = vrcp.f32 %v2738_v38  ;;  %v2771_v11 = vmax.f32 %v7886_v48, 0.0 }
 0x3fe   : > { %v7953_v46 = vmul.f32 0.064056896, %v9767_v25  ;;  %v2612_v57 = vadd.f32 0.2548296, %v2609_v47  ;;  %v2718_v29 = vmul.f32 -0.5, %v7889_v7  ;;  %v2720_v31 = vmul.f32 %v2717_v22, %v7886_v48 }
 0x3ff   : > { %5818 = vrcp.f32 %v2739_v19  ;;  %v5809_v16 = vpop.eup %5808  ;;  %v2613_v40 = vadd.f32 0.2548296, %v2610_v18  ;;  %v2636_v52 = vmul.f32 2.0, %v5805_v41  ;;  %v2656_v44 = vmul.f32 %v7942_v27, %v7942_v27 }
 0x400   : > { %v2719_v59 = vmul.f32 -0.5, %v7900_v26  ;;  %v5811_v12 = vpop.eup %5810  ;;  %v2614_v32 = vadd.f32 0.2548296, %v2611_v51  ;;  %v2660_v50 = vmul.f32 0.5, %v2654_v13  ;;  %v2661_v10 = vmul.f32 0.5, %v2655_v24 }
 0x401   : > { %v2666_v36 = vmul.f32 0.75, %v2654_v13  ;;  %vm2624_vm14 = vcmp.gt.f32.partialorder %v7751_v42, 0.0  ;;  %v2667_v30 = vmul.f32 0.75, %v2655_v24  ;;  %v2675_v43 = vmul.f32 1.875, %v2654_v13 }
 0x402   : > { %v2676_v34 = vmul.f32 1.875, %v2655_v24  ;;  %5820 = vrcp.f32 %v2740_v49  ;;  %v2615_v20 = vmul.f32 %v7840_v3, %v2612_v57  ;;  %vm2625_vm15 = vcmp.gt.f32.partialorder %v7755_v23, 0.0 }
 0x403   : > { %v2637_v55 = vmul.f32 2.0, %v5809_v16  ;;  %v2721_v62 = vmul.f32 %v2718_v29, %v7889_v7  ;;  %v2723_v0 = vmul.f32 1.442695, %v2720_v31  ;;  %v7964_v39 = vpop.eup %5812  ;;  %v2616_v8 = vmul.f32 %v7843_v2, %v2613_v40 }
 0x404   : > { %vm2626_vm0 = vcmp.gt.f32.partialorder %v7760_v9, 0.0  ;;  %v2638_v21 = vmul.f32 2.0, %v5811_v12  ;;  %v2662_v63 = vmul.f32 0.5, %v2656_v44  ;;  %v2668_v38 = vmul.f32 0.75, %v2656_v44 }
 0x405   : > { %v2617_v47 = vmul.f32 %v7850_v37, %v2614_v32  ;;  %v2663_v22 = vsub.f32 1.0, %v2660_v50  ;;  %v2669_v19 = vmul.f32 %v2666_v36, %v2654_v13  ;;  %v2677_v3 = vmul.f32 1.875, %v2656_v44  ;;  %v7969_v41 = vpop.eup %5814 }
 0x406   : > { %v2664_v28 = vsub.f32 1.0, %v2661_v10  ;;  %v2670_v18 = vmul.f32 %v2667_v30, %v2655_v24  ;;  %v2678_v51 = vmul.f32 %v2675_v43, %v2654_v13  ;;  %v2679_v49 = vmul.f32 %v2676_v34, %v2655_v24 }
 0x407   : > { %v2639_v57 = vsub.f32 %v2636_v52, %v2615_v20  ;;  %v2657_v29 = vmul.f32 0.5641896, %v7915_v6  ;;  %v2722_v2 = vmul.f32 %v2719_v59, %v7900_v26  ;;  %5822 = vpow2.f32 %v2723_v0  ;;  %v7973_v31 = vpop.eup %5816 }
 0x408   : > { %v2640_v16 = vsub.f32 %v2637_v55, %v2616_v8  ;;  %v2658_v37 = vmul.f32 0.5641896, %v7925_v14  ;;  %v2665_v40 = vsub.f32 1.0, %v2662_v63  ;;  %v2671_v12 = vmul.f32 %v2668_v38, %v2656_v44 }
 0x409   : > { %v7976_v32 = vpop.eup %5818  ;;  %v2641_v50 = vsub.f32 %v2638_v21, %v2617_v47  ;;  %v2672_v10 = vadd.f32 %v2669_v19, %v2663_v22  ;;  %v2680_v36 = vmul.f32 %v2677_v3, %v2656_v44  ;;  %v2772_v30 = vmax.f32 %v7889_v7, 0.0 }
 0x40a   : > { %v2673_v52 = vadd.f32 %v2670_v18, %v2664_v28  ;;  %v2681_v43 = vmul.f32 %v2678_v51, %v2654_v13  ;;  %v2682_v6 = vmul.f32 %v2679_v49, %v2655_v24  ;;  %v2774_v34 = vmin.f32 %v2771_v11, 6.0 }
 0x40b   : > { %v2642_v59 = vsel %vm2624_vm14, %v2639_v57, %v2615_v20  ;;  %v2659_v55 = vmul.f32 0.5641896, %v7942_v27  ;;  %v2744_v14 = vmul.f32 1.0614054, %v7973_v31  ;;  %v2773_v0 = vmax.f32 %v7900_v26, 0.0 }
 0x40c   : > { %v7984_v63 = vpop.eup %5820  ;;  %v2643_v21 = vsel %vm2625_vm15, %v2640_v16, %v2616_v8  ;;  %v2674_v38 = vadd.f32 %v2671_v12, %v2665_v40  ;;  %v2725_v22 = vmul.f32 1.442695, %v2721_v62  ;;  %v2745_v13 = vmul.f32 1.0614054, %v7976_v32 }
 0x40d   : > { %v2644_v24 = vsel %vm2626_vm0, %v2641_v50, %v2617_v47  ;;  %v2683_v11 = vmul.f32 %v2680_v36, %v2656_v44  ;;  %vm2690_vm1 = vcmp.le.f32.partialorder %v7751_v42, -3.0  ;;  %vm2691_vm2 = vcmp.le.f32.partialorder %v7755_v23, -3.0 }
 0x40e   : > { %v2775_v27 = vmin.f32 %v2772_v30, 6.0  ;;  %v2865_v20 = vmul.f32 0.064056896, %v9757_v1  ;;  %v2684_v19 = vsub.f32 %v2672_v10, %v2681_v43  ;;  %v2685_v3 = vsub.f32 %v2673_v52, %v2682_v6 }
 0x40f   : > { %v2727_v28 = vmul.f32 1.442695, %v2722_v2  ;;  %v2780_v18 = vmul.f32 %v2774_v34, %v2774_v34  ;;  %v2746_v8 = vmul.f32 1.0614054, %v7984_v63  ;;  %v5120_v62 = vadd.f32 -1.4531521, %v2744_v14 }
 0x410   : > { %v2776_v51 = vmin.f32 %v2773_v0, 6.0  ;;  %v2798_v49 = vsub.f32 0.0, %v7886_v48  ;;  %vm2692_vm3 = vcmp.le.f32.partialorder %v7760_v9, -3.0  ;;  %v5121_v44 = vadd.f32 -1.4531521, %v2745_v13 }
 0x411   : > { %v2799_v47 = vsub.f32 0.0, %v7889_v7  ;;  %v2866_v57 = vmul.f32 0.064056896, %v6610_v58  ;;  %v8001_v16 = vadd.f32 %v7953_v46, %v6616_v45  ;;  %v8003_v40 = vpop.eup %5822  ;;  %v2686_v2 = vsub.f32 %v2674_v38, %v2683_v11 }
 0x412   : > { %5824 = vpow2.f32 %v2725_v22  ;;  %v2781_v12 = vmul.f32 %v2775_v27, %v2775_v27  ;;  %v8006_v50 = vadd.f32 %v2865_v20, %v6618_v54  ;;  %v2687_v10 = vmul.f32 %v2684_v19, %v2657_v29 }
 0x413   : > { %9768 = vst [vmem:[#allocation21_spill] sm:$0xff] %v8001_v16  ;;  %v2688_v36 = vmul.f32 %v2685_v3, %v2658_v37  ;;  %v2783_v30 = vmul.f32 1.442695, %v2780_v18  ;;  %v2800_v52 = vsub.f32 0.0, %v7900_v26  ;;  %v5122_v43 = vadd.f32 -1.4531521, %v2746_v8 }
 0x414   : > { %9769 = vst [vmem:[#allocation24_spill] sm:$0xff] %v8006_v50  ;;  %v2750_v6 = vmul.f32 %v7973_v31, %v5120_v62  ;;  %v2782_v34 = vmul.f32 %v2776_v51, %v2776_v51  ;;  %v2801_v14 = vmax.f32 %v2798_v49, 3.0  ;;  %v2751_v46 = vmul.f32 %v7976_v32, %v5121_v44 }
 0x415   : > { %v2802_v0 = vmax.f32 %v2799_v47, 3.0  ;;  %v8012_v38 = vadd.f32 %v2866_v57, %v6628_v61  ;;  %v2885_v22 = vand.u32 2147483647, %v8001_v16  ;;  %v2689_v13 = vmul.f32 %v2686_v2, %v2659_v55 }
 0x416   : > { %5826 = vpow2.f32 %v2727_v28  ;;  %v2785_v29 = vmul.f32 1.442695, %v2781_v12  ;;  %v2886_v37 = vand.u32 2147483647, %v8006_v50  ;;  %v2693_v11 = vsel %vm2690_vm1, %v2687_v10, %v2642_v59 }
 0x417   : > { %v2694_v27 = vsel %vm2691_vm2, %v2688_v36, %v2643_v21  ;;  %5828 = vpow2.f32 %v2783_v30  ;;  %v2803_v20 = vmax.f32 %v2800_v52, 3.0  ;;  %v2752_v19 = vmul.f32 %v7984_v63, %v5122_v43  ;;  %v9770_v21 = vld [vmem:[#allocation19_spill] sm:$0xff] }
 0x418   : > { %v2753_v3 = vadd.f32 1.4214138, %v2750_v6  ;;  %v2787_v18 = vmul.f32 1.442695, %v2782_v34  ;;  %5830 = vrcp.f32 %v2801_v14  ;;  %v2754_v8 = vadd.f32 1.4214138, %v2751_v46 }
 0x419   : > { %5832 = vrcp.f32 %v2802_v0  ;;  %v2887_v55 = vand.u32 2147483647, %v8012_v38  ;;  %v2888_v28 = vmul.f32 0.3275911, %v2885_v22  ;;  %v2695_v62 = vsel %vm2692_vm3, %v2689_v13, %v2644_v24  ;;  %v9771_v36 = vld [vmem:[#allocation23_spill] sm:$0xff] }
 0x41a   : > { %v2696_v42 = vmul.f32 0.88622695, %v2693_v11  ;;  %5834 = vpow2.f32 %v2785_v29  ;;  %v2889_v59 = vmul.f32 0.3275911, %v2886_v37  ;;  %v2550_v23 = vmul.f32 %v7937_v17, %v7937_v17 }
 0x41b   : > { %v2577_v51 = vmul.f32 %v7964_v39, %v9770_v21  ;;  %v2697_v49 = vmul.f32 0.88622695, %v2694_v27  ;;  %5836 = vrcp.f32 %v2803_v20  ;;  %v2551_v47 = vmul.f32 %v7939_v4, %v7939_v4 }
 0x41c   : > { %v5825_v44 = vpop.eup %5824  ;;  %v2755_v57 = vadd.f32 1.4214138, %v2752_v19  ;;  %v2756_v2 = vmul.f32 %v7973_v31, %v2753_v3  ;;  %5838 = vpow2.f32 %v2787_v18  ;;  %v2698_v9 = vmul.f32 0.88622695, %v2695_v62 }
 0x41d   : > { %v2757_v24 = vmul.f32 %v7976_v32, %v2754_v8  ;;  %v2890_v12 = vmul.f32 0.3275911, %v2887_v55  ;;  %v2891_v10 = vadd.f32 1.0, %v2888_v28  ;;  %v2404_v17 = vadd.f32 %v7918_v56, %v9771_v36 }
 0x41e   : > { %v2552_v39 = vmul.f32 0.12167047, %v7944_v60  ;;  %v2699_v30 = vmul.f32 %v2696_v42, %v7932_v53  ;;  %v2892_v52 = vadd.f32 1.0, %v2889_v59  ;;  %v2553_v43 = vmul.f32 0.12167047, %v2550_v23 }
 0x41f   : > { %v2578_v4 = vmul.f32 %v7969_v41, %v9763_v5  ;;  %v2700_v6 = vmul.f32 %v2697_v49, %v2577_v51  ;;  %v2870_v34 = vmul.f32 -0.5, %v8001_v16  ;;  %v2554_v46 = vmul.f32 0.12167047, %v2551_v47 }
 0x420   : > { %v5827_v14 = vpop.eup %5826  ;;  %v8040_v0 = vadd.f32 %v2552_v39, %v7922_v33  ;;  %v2758_v22 = vmul.f32 %v7984_v63, %v2755_v57  ;;  %v5123_v56 = vadd.f32 -0.28449672, %v2756_v2  ;;  %v5124_v29 = vadd.f32 -0.28449672, %v2757_v24 }
 0x421   : > { %v5829_v13 = vpop.eup %5828  ;;  %v2701_v60 = vmul.f32 %v2698_v9, %v2578_v4  ;;  %v2893_v53 = vadd.f32 1.0, %v2890_v12  ;;  %5840 = vrcp.f32 %v2891_v10  ;;  %v8044_v11 = vadd.f32 %v2553_v43, %v7928_v35 }
 0x422   : > { %v5831_v37 = vpop.eup %5830  ;;  %v2702_v41 = vmul.f32 %v2699_v30, %v2699_v30  ;;  %v2871_v27 = vmul.f32 -0.5, %v8006_v50  ;;  %5842 = vrcp.f32 %v2892_v52  ;;  %v8047_v19 = vadd.f32 %v2554_v46, %v2404_v17 }
 0x423   : > { %v5833_v20 = vpop.eup %5832  ;;  %v2703_v33 = vmul.f32 %v2700_v6, %v2700_v6  ;;  %v2872_v3 = vmul.f32 -0.5, %v8012_v38  ;;  %v2873_v18 = vmul.f32 %v2870_v34, %v8001_v16  ;;  %v8053_v55 = vmul.f32 %v8003_v40, %v9761_v15 }
 0x424   : > { %9772 = vst [vmem:[#allocation22_spill] sm:$0xff] %v8047_v19  ;;  %v5835_v8 = vpop.eup %5834  ;;  %v8056_v35 = vmul.f32 %v5825_v44, %v9770_v21  ;;  %v5125_v28 = vadd.f32 -0.28449672, %v2758_v22  ;;  %v2762_v62 = vmul.f32 %v7973_v31, %v5123_v56  ;;  %v8059_v59 = vmul.f32 %v2701_v60, %v2701_v60 }
 0x425   : > { %v5837_v42 = vpop.eup %5836  ;;  %v8062_v23 = vmul.f32 %v5827_v14, %v9763_v5  ;;  %v2763_v51 = vmul.f32 %v7976_v32, %v5124_v29  ;;  %5844 = vrcp.f32 %v2893_v53  ;;  %v8065_v47 = vmul.f32 0.12583746, %v2702_v41 }
 0x426   : > { %v5839_v49 = vpop.eup %5838  ;;  %v2807_v40 = vmul.f32 %v5831_v37, %v5831_v37  ;;  %v8067_v57 = vmul.f32 %v5833_v20, %v5833_v20  ;;  %v2874_v44 = vmul.f32 %v2871_v27, %v8006_v50  ;;  %v8070_v2 = vmul.f32 0.12583746, %v2703_v33 }
 0x427   : > { %v2875_v9 = vmul.f32 %v2872_v3, %v8012_v38  ;;  %v2876_v24 = vmul.f32 1.442695, %v2873_v18  ;;  %v8074_v12 = vmul.f32 0.19111887, %v9767_v25  ;;  %v2764_v10 = vmul.f32 %v7984_v63, %v5125_v28 }
 0x428   : > { %v2765_v36 = vadd.f32 0.2548296, %v2762_v62  ;;  %v8077_v17 = vmul.f32 %v5837_v42, %v5837_v42  ;;  %v8080_v39 = vmul.f32 0.19111887, %v9757_v1  ;;  %v2766_v30 = vadd.f32 0.2548296, %v2763_v51 }
 0x429   : > { %v2789_v52 = vmul.f32 2.0, %v5829_v13  ;;  %v8082_v43 = vmul.f32 2.0, %v5835_v8  ;;  %v8084_v4 = vmul.f32 2.0, %v5839_v49  ;;  %v2813_v6 = vmul.f32 0.5, %v2807_v40 }
 0x42a   : > { %v2814_v34 = vmul.f32 0.5, %v8067_v57  ;;  %v2819_v14 = vmul.f32 0.75, %v2807_v40  ;;  %v8087_v46 = vmul.f32 1.442695, %v2874_v44  ;;  %v8091_v56 = vmul.f32 0.5641896, %v5831_v37 }
 0x42b   : > { %v8089_v22 = vpop.eup %5840  ;;  %v2820_v60 = vmul.f32 0.75, %v8067_v57  ;;  %5846 = vpow2.f32 %v2876_v24  ;;  %v8094_v29 = vmul.f32 1.442695, %v2875_v9  ;;  %v2767_v53 = vadd.f32 0.2548296, %v2764_v10 }
 0x42c   : > { %v8096_v13 = vpop.eup %5842  ;;  %v2768_v41 = vmul.f32 %v7973_v31, %v2765_v36  ;;  %vm2777_vm4 = vcmp.gt.f32.partialorder %v7886_v48, 0.0  ;;  %v2815_v27 = vmul.f32 0.5, %v8077_v17  ;;  %v2828_v33 = vmul.f32 1.875, %v2807_v40 }
 0x42d   : > { %v8102_v3 = vmul.f32 %v7976_v32, %v2766_v30  ;;  %v8104_v37 = vmul.f32 0.5641896, %v5833_v20  ;;  %v8106_v18 = vmul.f32 0.5641896, %v5837_v42  ;;  %v2821_v8 = vmul.f32 0.75, %v8077_v17 }
 0x42e   : > { %v2816_v28 = vsub.f32 1.0, %v2813_v6  ;;  %v2817_v62 = vsub.f32 1.0, %v2814_v34  ;;  %v2822_v51 = vmul.f32 %v2819_v14, %v2807_v40  ;;  %v2829_v49 = vmul.f32 1.875, %v8067_v57 }
 0x42f   : > { %v8110_v31 = vpop.eup %5844  ;;  %v2823_v44 = vmul.f32 %v2820_v60, %v8067_v57  ;;  %v2830_v9 = vmul.f32 1.875, %v8077_v17  ;;  %v2897_v32 = vmul.f32 1.0614054, %v8089_v22  ;;  %v2898_v20 = vmul.f32 1.0614054, %v8096_v13 }
 0x430   : > { %v2770_v42 = vmul.f32 %v7984_v63, %v2767_v53  ;;  %v2792_v24 = vsub.f32 %v2789_v52, %v2768_v41  ;;  %v2818_v10 = vsub.f32 1.0, %v2815_v27  ;;  %v2831_v36 = vmul.f32 %v2828_v33, %v2807_v40 }
 0x431   : > { %v2793_v30 = vsub.f32 %v8082_v43, %v8102_v3  ;;  %v2824_v6 = vmul.f32 %v2821_v8, %v8077_v17  ;;  %v2924_v34 = vmax.f32 %v8001_v16, 0.0  ;;  %v2951_v14 = vsub.f32 0.0, %v8001_v16 }
 0x432   : > { %v2825_v60 = vadd.f32 %v2822_v51, %v2816_v28  ;;  %v2832_v19 = vmul.f32 %v2829_v49, %v8067_v57  ;;  %v2899_v5 = vmul.f32 1.0614054, %v8110_v31  ;;  %v2952_v1 = vsub.f32 0.0, %v8006_v50 }
 0x433   : > { %vm2778_vm5 = vcmp.gt.f32.partialorder %v7889_v7, 0.0  ;;  %v2826_v63 = vadd.f32 %v2823_v44, %v2817_v62  ;;  %v2833_v52 = vmul.f32 %v2830_v9, %v8077_v17  ;;  %v5126_v53 = vadd.f32 -1.4531521, %v2897_v32 }
 0x434   : > { %v5127_v43 = vadd.f32 -1.4531521, %v2898_v20  ;;  %v2794_v27 = vsub.f32 %v8084_v4, %v2770_v42  ;;  %v2834_v33 = vmul.f32 %v2831_v36, %v2807_v40  ;;  %v2925_v8 = vmax.f32 %v8006_v50, 0.0 }
 0x435   : > { %v2953_v28 = vsub.f32 0.0, %v8012_v38  ;;  %v8130_v51 = vpop.eup %5846  ;;  %vm2779_vm6 = vcmp.gt.f32.partialorder %v7900_v26, 0.0  ;;  %v2795_v49 = vsel %vm2777_vm4, %v2792_v24, %v2768_v41  ;;  %v2926_v62 = vmax.f32 %v8012_v38, 0.0 }
 0x436   : > { %v2927_v44 = vmin.f32 %v2924_v34, 6.0  ;;  %v2954_v9 = vmax.f32 %v2951_v14, 3.0  ;;  %v2835_v32 = vmul.f32 %v2832_v19, %v8067_v57  ;;  %vm2843_vm7 = vcmp.le.f32.partialorder %v7886_v48, -3.0 }
 0x437   : > { %v5128_v40 = vadd.f32 -1.4531521, %v2899_v5  ;;  %v2955_v4 = vmax.f32 %v2952_v1, 3.0  ;;  %v3019_v20 = vmul.f32 0.19111887, %v6610_v58  ;;  %v2827_v36 = vadd.f32 %v2824_v6, %v2818_v10 }
 0x438   : > { %v2836_v50 = vmul.f32 %v2833_v52, %v8077_v17  ;;  %vm2844_vm8 = vcmp.le.f32.partialorder %v7889_v7, -3.0  ;;  %v2903_v16 = vmul.f32 %v8089_v22, %v5126_v53  ;;  %v2904_v41 = vmul.f32 %v8096_v13, %v5127_v43 }
 0x439   : > { %v2837_v24 = vsub.f32 %v2825_v60, %v2834_v33  ;;  %v2928_v34 = vmin.f32 %v2925_v8, 6.0  ;;  %v2956_v14 = vmax.f32 %v2953_v28, 3.0  ;;  %v8145_v19 = vadd.f32 %v8074_v12, %v6616_v45 }
 0x43a   : > { %v2929_v5 = vmin.f32 %v2926_v62, 6.0  ;;  %v2933_v1 = vmul.f32 %v2927_v44, %v2927_v44  ;;  %5848 = vrcp.f32 %v2954_v9  ;;  %v8149_v57 = vadd.f32 %v8080_v39, %v6618_v54 }
 0x43b   : > { %v2838_v17 = vsub.f32 %v2826_v63, %v2835_v32  ;;  %v2905_v10 = vmul.f32 %v8110_v31, %v5128_v40  ;;  %5850 = vrcp.f32 %v2955_v4  ;;  %v8153_v6 = vadd.f32 %v3019_v20, %v6628_v61 }
 0x43c   : > { %v2839_v60 = vsub.f32 %v2827_v36, %v2836_v50  ;;  %5852 = vpow2.f32 %v8087_v46  ;;  %v2906_v52 = vadd.f32 1.4214138, %v2903_v16  ;;  %v2907_v12 = vadd.f32 1.4214138, %v2904_v41 }
 0x43d   : > { %v2796_v53 = vsel %vm2778_vm5, %v2793_v30, %v8102_v3  ;;  %v2934_v43 = vmul.f32 %v2928_v34, %v2928_v34  ;;  %5854 = vrcp.f32 %v2956_v14  ;;  %v3038_v39 = vand.u32 2147483647, %v8145_v19 }
 0x43e   : > { %v2840_v63 = vmul.f32 %v2837_v24, %v8091_v56  ;;  %v2935_v33 = vmul.f32 %v2929_v5, %v2929_v5  ;;  %v2936_v8 = vmul.f32 1.442695, %v2933_v1  ;;  %v3039_v28 = vand.u32 2147483647, %v8149_v57 }
 0x43f   : > { %v2797_v50 = vsel %vm2779_vm6, %v2794_v27, %v2770_v42  ;;  %v2841_v16 = vmul.f32 %v2838_v17, %v8104_v37  ;;  %v2908_v46 = vadd.f32 1.4214138, %v2905_v10  ;;  %v3040_v62 = vand.u32 2147483647, %v8153_v6 }
 0x440   : > { %v2842_v3 = vmul.f32 %v2839_v60, %v8106_v18  ;;  %v2846_v30 = vsel %vm2843_vm7, %v2840_v63, %v2795_v49  ;;  %v2909_v44 = vmul.f32 %v8089_v22, %v2906_v52  ;;  %v2910_v56 = vmul.f32 %v8096_v13, %v2907_v12  ;;  %v9773_v63 = vld [vmem:[#allocation12_spill] sm:$0xff] }
 0x441   : > { %vm2845_vm9 = vcmp.le.f32.partialorder %v7900_v26, -3.0  ;;  %v2847_v9 = vsel %vm2844_vm8, %v2841_v16, %v2796_v53  ;;  %v2938_v42 = vmul.f32 1.442695, %v2934_v43  ;;  %v3041_v27 = vmul.f32 0.3275911, %v3038_v39 }
 0x442   : > { %v2848_v37 = vsel %vm2845_vm9, %v2842_v3, %v2797_v50  ;;  %5856 = vpow2.f32 %v2936_v8  ;;  %v2940_v32 = vmul.f32 1.442695, %v2935_v33  ;;  %v3042_v40 = vmul.f32 0.3275911, %v3039_v28 }
 0x443   : > { %v8175_v18 = vmul.f32 0.12583746, %v8059_v59  ;;  %v2849_v48 = vmul.f32 0.88622695, %v2846_v30  ;;  %v2911_v49 = vmul.f32 %v8110_v31, %v2908_v46  ;;  %v3043_v4 = vmul.f32 0.3275911, %v3040_v62 }
 0x444   : > { %v8178_v20 = vpop.eup %5848  ;;  %v8182_v26 = vadd.f32 %v8065_v47, %v8040_v0  ;;  %5858 = vpow2.f32 %v8094_v29  ;;  %v5129_v7 = vadd.f32 -0.28449672, %v2909_v44  ;;  %v5130_v36 = vadd.f32 -0.28449672, %v2910_v56 }
 0x445   : > { %v8185_v41 = vpop.eup %5850  ;;  %v2850_v24 = vmul.f32 0.88622695, %v2847_v9  ;;  %v2851_v34 = vmul.f32 0.88622695, %v2848_v37  ;;  %5860 = vpow2.f32 %v2938_v42  ;;  %v3044_v59 = vadd.f32 1.0, %v3041_v27 }
 0x446   : > { %v5853_v14 = vpop.eup %5852  ;;  %v8189_v5 = vadd.f32 %v8070_v2, %v8044_v11  ;;  %v8193_v1 = vmul.f32 %v8130_v51, %v9761_v15  ;;  %5862 = vpow2.f32 %v2940_v32  ;;  %v3045_v0 = vadd.f32 1.0, %v3042_v40 }
 0x447   : > { %v8195_v47 = vpop.eup %5854  ;;  %v8198_v29 = vmul.f32 %v2849_v48, %v8053_v55  ;;  %v5131_v17 = vadd.f32 -0.28449672, %v2911_v49  ;;  %v3023_v10 = vmul.f32 -0.5, %v8145_v19  ;;  %v3046_v60 = vadd.f32 1.0, %v3043_v4  ;;  %v9774_v49 = vld [vmem:[#allocation21_spill] sm:$0xff] }
 0x448   : > { %v2915_v52 = vmul.f32 %v8089_v22, %v5129_v7  ;;  %v2916_v11 = vmul.f32 %v8096_v13, %v5130_v36  ;;  %v2960_v2 = vmul.f32 %v8178_v20, %v8178_v20  ;;  %v2961_v51 = vmul.f32 %v8185_v41, %v8185_v41 }
 0x449   : > { %v8208_v12 = vmul.f32 %v2850_v24, %v8056_v35  ;;  %v8211_v55 = vmul.f32 %v2851_v34, %v8062_v23  ;;  %v8214_v53 = vmul.f32 %v5853_v14, %v9770_v21  ;;  %5864 = vrcp.f32 %v3044_v59  ;;  %v9775_v14 = vld [vmem:[#allocation24_spill] sm:$0xff] }
 0x44a   : > { %v2962_v43 = vmul.f32 %v8195_v47, %v8195_v47  ;;  %5866 = vrcp.f32 %v3045_v0  ;;  %v8219_v39 = vmul.f32 0.31504267, %v9767_v25  ;;  %v8222_v33 = vmul.f32 0.31504267, %v9773_v63 }
 0x44b   : > { %v2917_v35 = vmul.f32 %v8110_v31, %v5131_v17  ;;  %v3024_v8 = vmul.f32 -0.5, %v8149_v57  ;;  %v3026_v23 = vmul.f32 %v3023_v10, %v8145_v19  ;;  %5868 = vrcp.f32 %v3046_v60 }
 0x44c   : > { %v5857_v28 = vpop.eup %5856  ;;  %v2918_v50 = vadd.f32 0.2548296, %v2915_v52  ;;  %v2919_v16 = vadd.f32 0.2548296, %v2916_v11  ;;  %v2966_v46 = vmul.f32 0.5, %v2960_v2  ;;  %v2967_v62 = vmul.f32 0.5, %v2961_v51 }
 0x44d   : > { %v2972_v3 = vmul.f32 0.75, %v2960_v2  ;;  %v2973_v30 = vmul.f32 0.75, %v2961_v51  ;;  %v2981_v44 = vmul.f32 1.875, %v2960_v2  ;;  %v2982_v56 = vmul.f32 1.875, %v2961_v51 }
 0x44e   : > { %v8227_v9 = vpop.eup %5858  ;;  %v2968_v42 = vmul.f32 0.5, %v2962_v43  ;;  %v2974_v27 = vmul.f32 0.75, %v2962_v43  ;;  %v2983_v37 = vmul.f32 1.875, %v2962_v43  ;;  %v3025_v32 = vmul.f32 -0.5, %v8153_v6 }
 0x44f   : > { %v5861_v40 = vpop.eup %5860  ;;  %v2920_v48 = vadd.f32 0.2548296, %v2917_v35  ;;  %vm2930_vm10 = vcmp.gt.f32.partialorder %v9774_v49, 0.0  ;;  %v2942_v4 = vmul.f32 2.0, %v5857_v28  ;;  %v3027_v7 = vmul.f32 %v3024_v8, %v8149_v57 }
 0x450   : > { %v3029_v36 = vmul.f32 1.442695, %v3026_v23  ;;  %v5863_v24 = vpop.eup %5862  ;;  %v2921_v34 = vmul.f32 %v8089_v22, %v2918_v50  ;;  %v2922_v59 = vmul.f32 %v8096_v13, %v2919_v16  ;;  %vm2931_vm11 = vcmp.gt.f32.partialorder %v9775_v14, 0.0 }
 0x451   : > { %v2969_v0 = vsub.f32 1.0, %v2966_v46  ;;  %v2970_v17 = vsub.f32 1.0, %v2967_v62  ;;  %v2975_v10 = vmul.f32 %v2972_v3, %v2960_v2  ;;  %v2976_v60 = vmul.f32 %v2973_v30, %v2961_v51 }
 0x452   : > { %v2984_v52 = vmul.f32 %v2981_v44, %v2960_v2  ;;  %v2985_v11 = vmul.f32 %v2982_v56, %v2961_v51  ;;  %vm2932_vm12 = vcmp.gt.f32.partialorder %v8012_v38, 0.0  ;;  %v2943_v35 = vmul.f32 2.0, %v5861_v40 }
 0x453   : > { %v2971_v28 = vsub.f32 1.0, %v2968_v42  ;;  %v2977_v63 = vmul.f32 %v2974_v27, %v2962_v43  ;;  %v2986_v8 = vmul.f32 %v2983_v37, %v2962_v43  ;;  %v8236_v23 = vpop.eup %5864  ;;  %v2923_v22 = vmul.f32 %v8110_v31, %v2920_v48 }
 0x454   : > { %v2944_v50 = vmul.f32 2.0, %v5863_v24  ;;  %v3028_v13 = vmul.f32 %v3025_v32, %v8153_v6  ;;  %v3031_v16 = vmul.f32 1.442695, %v3027_v7  ;;  %v8240_v46 = vpop.eup %5866  ;;  %v2945_v62 = vsub.f32 %v2942_v4, %v2921_v34 }
 0x455   : > { %v2946_v3 = vsub.f32 %v2943_v35, %v2922_v59  ;;  %v2963_v30 = vmul.f32 0.5641896, %v8178_v20  ;;  %5870 = vpow2.f32 %v3029_v36  ;;  %v8243_v44 = vpop.eup %5868  ;;  %v2978_v56 = vadd.f32 %v2975_v10, %v2969_v0 }
 0x456   : > { %v2979_v42 = vadd.f32 %v2976_v60, %v2970_v17  ;;  %v2987_v27 = vmul.f32 %v2984_v52, %v2960_v2  ;;  %v2988_v37 = vmul.f32 %v2985_v11, %v2961_v51  ;;  %v2980_v40 = vadd.f32 %v2977_v63, %v2971_v28 }
 0x457   : > { %v2989_v25 = vmul.f32 %v2986_v8, %v2962_v43  ;;  %v3077_v31 = vmax.f32 %v8145_v19, 0.0  ;;  %v3078_v32 = vmax.f32 %v8149_v57, 0.0  ;;  %v2947_v48 = vsub.f32 %v2944_v50, %v2923_v22 }
 0x458   : > { %v2964_v7 = vmul.f32 0.5641896, %v8185_v41  ;;  %v3050_v4 = vmul.f32 1.0614054, %v8236_v23  ;;  %v3051_v20 = vmul.f32 1.0614054, %v8240_v46  ;;  %v2948_v36 = vsel %vm2930_vm10, %v2945_v62, %v2921_v34 }
 0x459   : > { %v2965_v24 = vmul.f32 0.5641896, %v8195_v47  ;;  %vm2996_vm13 = vcmp.le.f32.partialorder %v9774_v49, -3.0  ;;  %vm2997_vm14 = vcmp.le.f32.partialorder %v9775_v14, -3.0  ;;  %v3052_v2 = vmul.f32 1.0614054, %v8243_v44 }
 0x45a   : > { %v3104_v51 = vsub.f32 0.0, %v8145_v19  ;;  %v2949_v41 = vsel %vm2931_vm11, %v2946_v3, %v2922_v59  ;;  %v2990_v43 = vsub.f32 %v2978_v56, %v2987_v27  ;;  %v2991_v63 = vsub.f32 %v2979_v42, %v2988_v37 }
 0x45b   : > { %vm2998_vm15 = vcmp.le.f32.partialorder %v8012_v38, -3.0  ;;  %5872 = vpow2.f32 %v3031_v16  ;;  %v2992_v0 = vsub.f32 %v2980_v40, %v2989_v25  ;;  %v3079_v34 = vmax.f32 %v8153_v6, 0.0 }
 0x45c   : > { %v3080_v47 = vmin.f32 %v3077_v31, 6.0  ;;  %v3081_v17 = vmin.f32 %v3078_v32, 6.0  ;;  %v2950_v10 = vsel %vm2932_vm12, %v2947_v48, %v2923_v22  ;;  %v5132_v60 = vadd.f32 -1.4531521, %v3050_v4 }
 0x45d   : > { %v5133_v52 = vadd.f32 -1.4531521, %v3051_v20  ;;  %v3105_v11 = vsub.f32 0.0, %v8149_v57  ;;  %v5134_v35 = vadd.f32 -1.4531521, %v3052_v2  ;;  %v3106_v59 = vsub.f32 0.0, %v8153_v6 }
 0x45e   : > { %v3107_v28 = vmax.f32 %v3104_v51, 3.0  ;;  %v3172_v8 = vmul.f32 0.31504267, %v6610_v58  ;;  %v2993_v50 = vmul.f32 %v2990_v43, %v2963_v30  ;;  %v2994_v16 = vmul.f32 %v2991_v63, %v2964_v7 }
 0x45f   : > { %v3033_v25 = vmul.f32 1.442695, %v3028_v13  ;;  %v8268_v62 = vadd.f32 %v8219_v39, %v6616_v45  ;;  %v8270_v3 = vpop.eup %5870  ;;  %v2995_v22 = vmul.f32 %v2992_v0, %v2965_v24  ;;  %v3082_v56 = vmin.f32 %v3079_v34, 6.0 }
 0x460   : > { %v3086_v42 = vmul.f32 %v3080_v47, %v3080_v47  ;;  %v3087_v27 = vmul.f32 %v3081_v17, %v3081_v17  ;;  %v3056_v37 = vmul.f32 %v8236_v23, %v5132_v60  ;;  %v3057_v40 = vmul.f32 %v8240_v46, %v5133_v52 }
 0x461   : > { %v3108_v31 = vmax.f32 %v3105_v11, 3.0  ;;  %v8276_v30 = vadd.f32 %v8222_v33, %v6618_v54  ;;  %v3058_v13 = vmul.f32 %v8243_v44, %v5134_v35  ;;  %v3109_v32 = vmax.f32 %v3106_v59, 3.0  ;;  %v9776_v35 = vld [vmem:[#allocation20_spill] sm:$0xff] }
 0x462   : > { %5874 = vrcp.f32 %v3107_v28  ;;  %v8280_v39 = vadd.f32 %v3172_v8, %v6628_v61  ;;  %v2999_v48 = vsel %vm2996_vm13, %v2993_v50, %v2948_v36  ;;  %v3000_v7 = vsel %vm2997_vm14, %v2994_v16, %v2949_v41 }
 0x463   : > { %5876 = vpow2.f32 %v3033_v25  ;;  %v3191_v4 = vand.u32 2147483647, %v8268_v62  ;;  %v3001_v33 = vsel %vm2998_vm15, %v2995_v22, %v2950_v10  ;;  %v3088_v20 = vmul.f32 %v3082_v56, %v3082_v56 }
 0x464   : > { %v3089_v24 = vmul.f32 1.442695, %v3086_v42  ;;  %v3091_v2 = vmul.f32 1.442695, %v3087_v27  ;;  %v3059_v43 = vadd.f32 1.4214138, %v3056_v37  ;;  %5878 = vrcp.f32 %v3108_v31 }
 0x465   : > { %v5873_v51 = vpop.eup %5872  ;;  %v3060_v63 = vadd.f32 1.4214138, %v3057_v40  ;;  %v3192_v0 = vand.u32 2147483647, %v8276_v30  ;;  %v2855_v49 = vmul.f32 %v8198_v29, %v8198_v29  ;;  %v3061_v14 = vadd.f32 1.4214138, %v3058_v13 }
 0x466   : > { %5880 = vrcp.f32 %v3109_v32  ;;  %v3193_v36 = vand.u32 2147483647, %v8280_v39  ;;  %v2856_v38 = vmul.f32 %v8208_v12, %v8208_v12  ;;  %v2857_v41 = vmul.f32 %v8211_v55, %v8211_v55  ;;  %v9777_v55 = vld [vmem:[#allocation22_spill] sm:$0xff] }
 0x467   : > { %v3002_v34 = vmul.f32 0.88622695, %v2999_v48  ;;  %v3194_v47 = vmul.f32 0.3275911, %v3191_v4  ;;  %v3003_v17 = vmul.f32 0.88622695, %v3000_v7  ;;  %5882 = vpow2.f32 %v3089_v24 }
 0x468   : > { %v3004_v10 = vmul.f32 0.88622695, %v3001_v33  ;;  %v3093_v60 = vmul.f32 1.442695, %v3088_v20  ;;  %v3062_v52 = vmul.f32 %v8236_v23, %v3059_v43  ;;  %v3063_v29 = vmul.f32 %v8240_v46, %v3060_v63 }
 0x469   : > { %5884 = vpow2.f32 %v3091_v2  ;;  %v3195_v11 = vmul.f32 0.3275911, %v3192_v0  ;;  %v2884_v59 = vmul.f32 %v8227_v9, %v9776_v35  ;;  %v3064_v12 = vmul.f32 %v8243_v44, %v3061_v14 }
 0x46a   : > { %v3196_v28 = vmul.f32 0.3275911, %v3193_v36  ;;  %v3197_v8 = vadd.f32 1.0, %v3194_v47  ;;  %v2710_v50 = vadd.f32 %v8175_v18, %v9777_v55  ;;  %v2858_v16 = vmul.f32 0.1279382, %v2855_v49 }
 0x46b   : > { %v2859_v25 = vmul.f32 0.1279382, %v2856_v38  ;;  %v3005_v22 = vmul.f32 %v3002_v34, %v8193_v1  ;;  %v2860_v42 = vmul.f32 0.1279382, %v2857_v41  ;;  %v3006_v27 = vmul.f32 %v3003_v17, %v8214_v53 }
 0x46c   : > { %v8305_v56 = vpop.eup %5874  ;;  %v3007_v37 = vmul.f32 %v3004_v10, %v2884_v59  ;;  %5886 = vpow2.f32 %v3093_v60  ;;  %v8309_v9 = vadd.f32 %v2858_v16, %v8182_v26  ;;  %v5135_v31 = vadd.f32 -0.28449672, %v3062_v52 }
 0x46d   : > { %v5877_v40 = vpop.eup %5876  ;;  %v5136_v13 = vadd.f32 -0.28449672, %v3063_v29  ;;  %v3198_v32 = vadd.f32 1.0, %v3195_v11  ;;  %v8312_v18 = vadd.f32 %v2859_v25, %v8189_v5  ;;  %v5137_v48 = vadd.f32 -0.28449672, %v3064_v12  ;;  %v9778_v29 = vld [vmem:[#allocation11_spill] sm:$0xff] }
 0x46e   : > { %v3199_v7 = vadd.f32 1.0, %v3196_v28  ;;  %5888 = vrcp.f32 %v3197_v8  ;;  %v8314_v1 = vpop.eup %5878  ;;  %v8316_v4 = vadd.f32 %v2860_v42, %v2710_v50  ;;  %v3008_v53 = vmul.f32 %v3005_v22, %v3005_v22 }
 0x46f   : > { %v3113_v33 = vmul.f32 %v8305_v56, %v8305_v56  ;;  %v3176_v26 = vmul.f32 -0.5, %v8268_v62  ;;  %v3009_v24 = vmul.f32 %v3006_v27, %v3006_v27  ;;  %v8323_v2 = vmul.f32 %v3007_v37, %v3007_v37 }
 0x470   : > { %v8321_v20 = vpop.eup %5880  ;;  %v8327_v5 = vmul.f32 %v8270_v3, %v9761_v15  ;;  %v8330_v43 = vmul.f32 %v5873_v51, %v9770_v21  ;;  %v3068_v63 = vmul.f32 %v8236_v23, %v5135_v31  ;;  %v3069_v0 = vmul.f32 %v8240_v46, %v5136_v13 }
 0x471   : > { %v3177_v49 = vmul.f32 -0.5, %v8276_v30  ;;  %5890 = vrcp.f32 %v3198_v32  ;;  %v5883_v14 = vpop.eup %5882  ;;  %v8336_v36 = vmul.f32 %v5877_v40, %v9776_v35  ;;  %v3070_v38 = vmul.f32 %v8243_v44, %v5137_v48 }
 0x472   : > { %v3114_v3 = vmul.f32 %v8314_v1, %v8314_v1  ;;  %5892 = vrcp.f32 %v3199_v7  ;;  %v8341_v51 = vmul.f32 0.1279382, %v3008_v53  ;;  %v3115_v34 = vmul.f32 %v8321_v20, %v8321_v20 }
 0x473   : > { %v5885_v41 = vpop.eup %5884  ;;  %v3119_v47 = vmul.f32 0.5, %v3113_v33  ;;  %v3179_v17 = vmul.f32 %v3176_v26, %v8268_v62  ;;  %v8346_v10 = vmul.f32 0.1279382, %v3009_v24  ;;  %v3125_v60 = vmul.f32 0.75, %v3113_v33 }
 0x474   : > { %v3134_v52 = vmul.f32 1.875, %v3113_v33  ;;  %v8349_v11 = vmul.f32 0.43379351, %v9778_v29  ;;  %v3071_v59 = vadd.f32 0.2548296, %v3068_v63  ;;  %v3095_v28 = vmul.f32 2.0, %v5883_v14 }
 0x475   : > { %v3072_v12 = vadd.f32 0.2548296, %v3069_v0  ;;  %v3180_v8 = vmul.f32 %v3177_v49, %v8276_v30  ;;  %v3073_v50 = vadd.f32 0.2548296, %v3070_v38  ;;  %v3096_v16 = vmul.f32 2.0, %v5885_v41 }
 0x476   : > { %v5887_v55 = vpop.eup %5886  ;;  %v3120_v25 = vmul.f32 0.5, %v3114_v3  ;;  %v3126_v22 = vmul.f32 0.75, %v3114_v3  ;;  %v3121_v42 = vmul.f32 0.5, %v3115_v34  ;;  %v3122_v27 = vsub.f32 1.0, %v3119_v47 }
 0x477   : > { %v3135_v37 = vmul.f32 1.875, %v3114_v3  ;;  %v3182_v40 = vmul.f32 1.442695, %v3179_v17  ;;  %vm3083_vm0 = vcmp.gt.f32.partialorder %v8145_v19, 0.0  ;;  %v3127_v13 = vmul.f32 0.75, %v3115_v34 }
 0x478   : > { %v8352_v31 = vpop.eup %5888  ;;  %v3128_v32 = vmul.f32 %v3125_v60, %v3113_v33  ;;  %v3136_v48 = vmul.f32 1.875, %v3115_v34  ;;  %v3137_v7 = vmul.f32 %v3134_v52, %v3113_v33  ;;  %v3074_v53 = vmul.f32 %v8236_v23, %v3071_v59 }
 0x479   : > { %v3075_v26 = vmul.f32 %v8240_v46, %v3072_v12  ;;  %vm3084_vm1 = vcmp.gt.f32.partialorder %v8149_v57, 0.0  ;;  %v8358_v24 = vmul.f32 2.0, %v5887_v55  ;;  %v3184_v63 = vmul.f32 1.442695, %v3180_v8 }
 0x47a   : > { %v8361_v0 = vmul.f32 %v8243_v44, %v3073_v50  ;;  %v3116_v49 = vmul.f32 0.5641896, %v8305_v56  ;;  %v3123_v14 = vsub.f32 1.0, %v3120_v25  ;;  %v3129_v38 = vmul.f32 %v3126_v22, %v3114_v3 }
 0x47b   : > { %v8364_v41 = vpop.eup %5890  ;;  %v3124_v47 = vsub.f32 1.0, %v3121_v42  ;;  %v3138_v17 = vmul.f32 %v3135_v37, %v3114_v3  ;;  %5894 = vpow2.f32 %v3182_v40  ;;  %v3203_v23 = vmul.f32 1.0614054, %v8352_v31 }
 0x47c   : > { %v8367_v46 = vpop.eup %5892  ;;  %v3130_v60 = vmul.f32 %v3127_v13, %v3115_v34  ;;  %v3131_v52 = vadd.f32 %v3128_v32, %v3122_v27  ;;  %v3139_v59 = vmul.f32 %v3136_v48, %v3115_v34  ;;  %v3140_v12 = vmul.f32 %v3137_v7, %v3113_v33 }
 0x47d   : > { %v3098_v8 = vsub.f32 %v3095_v28, %v3074_v53  ;;  %v3099_v44 = vsub.f32 %v3096_v16, %v3075_v26  ;;  %v3117_v55 = vmul.f32 0.5641896, %v8314_v1  ;;  %v3257_v56 = vsub.f32 0.0, %v8268_v62 }
 0x47e   : > { %v3100_v50 = vsub.f32 %v8358_v24, %v8361_v0  ;;  %v3132_v25 = vadd.f32 %v3129_v38, %v3123_v14  ;;  %v3204_v22 = vmul.f32 1.0614054, %v8364_v41  ;;  %v3258_v42 = vsub.f32 0.0, %v8276_v30  ;;  %v9779_v38 = vld [vmem:[#allocation12_spill] sm:$0xff] }
 0x47f   : > { %vm3085_vm2 = vcmp.gt.f32.partialorder %v8153_v6, 0.0  ;;  %v3141_v37 = vmul.f32 %v3138_v17, %v3114_v3  ;;  %v3205_v27 = vmul.f32 1.0614054, %v8367_v46  ;;  %v5138_v33 = vadd.f32 -1.4531521, %v3203_v23 }
 0x480   : > { %v3259_v28 = vsub.f32 0.0, %v8280_v39  ;;  %v3133_v16 = vadd.f32 %v3130_v60, %v3124_v47  ;;  %v3142_v1 = vmul.f32 %v3139_v59, %v3115_v34  ;;  %v3143_v40 = vsub.f32 %v3131_v52, %v3140_v12 }
 0x481   : > { %vm3149_vm3 = vcmp.le.f32.partialorder %v8145_v19, -3.0  ;;  %vm3150_vm4 = vcmp.le.f32.partialorder %v8149_v57, -3.0  ;;  %v3230_v13 = vmax.f32 %v8268_v62, 0.0  ;;  %v3101_v32 = vsel %vm3083_vm0, %v3098_v8, %v3074_v53 }
 0x482   : > { %v3231_v48 = vmax.f32 %v8276_v30, 0.0  ;;  %v3232_v3 = vmax.f32 %v8280_v39, 0.0  ;;  %v3260_v7 = vmax.f32 %v3257_v56, 3.0  ;;  %v3102_v24 = vsel %vm3084_vm1, %v3099_v44, %v3075_v26 }
 0x483   : > { %v5139_v14 = vadd.f32 -1.4531521, %v3204_v22  ;;  %v3261_v34 = vmax.f32 %v3258_v42, 3.0  ;;  %v3324_v47 = vmul.f32 0.43379351, %v9779_v38  ;;  %v3144_v17 = vsub.f32 %v3132_v25, %v3141_v37 }
 0x484   : > { %v5140_v23 = vadd.f32 -1.4531521, %v3205_v27  ;;  %v3209_v60 = vmul.f32 %v8352_v31, %v5138_v33  ;;  %v3262_v52 = vmax.f32 %v3259_v28, 3.0  ;;  %v3145_v59 = vsub.f32 %v3133_v16, %v3142_v1 }
 0x485   : > { %v3146_v12 = vmul.f32 %v3143_v40, %v3116_v49  ;;  %5896 = vpow2.f32 %v3184_v63  ;;  %v3233_v53 = vmin.f32 %v3230_v13, 6.0  ;;  %v8389_v8 = vpop.eup %5894  ;;  %v3234_v35 = vmin.f32 %v3231_v48, 6.0 }
 0x486   : > { %v3235_v56 = vmin.f32 %v3232_v3, 6.0  ;;  %5898 = vrcp.f32 %v3260_v7  ;;  %v3325_v26 = vmul.f32 0.43379351, %v6610_v58  ;;  %v3210_v44 = vmul.f32 %v8364_v41, %v5139_v14 }
 0x487   : > { %5900 = vrcp.f32 %v3261_v34  ;;  %v8395_v25 = vadd.f32 %v8349_v11, %v6616_v45  ;;  %v8398_v22 = vadd.f32 %v3324_v47, %v6618_v54  ;;  %v3147_v49 = vmul.f32 %v3144_v17, %v3117_v55 }
 0x488   : > { %v3211_v63 = vmul.f32 %v8367_v46, %v5140_v23  ;;  %v3212_v42 = vadd.f32 1.4214138, %v3209_v60  ;;  %5902 = vrcp.f32 %v3262_v52  ;;  %v3103_v37 = vsel %vm3085_vm2, %v3100_v50, %v8361_v0 }
 0x489   : > { %v3118_v27 = vmul.f32 0.5641896, %v8321_v20  ;;  %v3178_v33 = vmul.f32 -0.5, %v8280_v39  ;;  %v3239_v28 = vmul.f32 %v3233_v53, %v3233_v53  ;;  %v3152_v11 = vsel %vm3149_vm3, %v3146_v12, %v3101_v32 }
 0x48a   : > { %v3153_v16 = vsel %vm3150_vm4, %v3147_v49, %v3102_v24  ;;  %v3240_v55 = vmul.f32 %v3234_v35, %v3234_v35  ;;  %v8411_v1 = vadd.f32 %v3325_v26, %v6628_v61  ;;  %v3213_v40 = vadd.f32 1.4214138, %v3210_v44 }
 0x48b   : > { %v3241_v13 = vmul.f32 %v3235_v56, %v3235_v56  ;;  %v3344_v48 = vand.u32 2147483647, %v8395_v25  ;;  %v3345_v0 = vand.u32 2147483647, %v8398_v22  ;;  %v3013_v20 = vmul.f32 0.1279382, %v8323_v2 }
 0x48c   : > { %v3148_v50 = vmul.f32 %v3145_v59, %v3118_v27  ;;  %v3214_v3 = vadd.f32 1.4214138, %v3211_v63  ;;  %v3215_v19 = vmul.f32 %v8352_v31, %v3212_v42  ;;  %vm3151_vm5 = vcmp.le.f32.partialorder %v8153_v6, -3.0 }
 0x48d   : > { %v3155_v57 = vmul.f32 0.88622695, %v3152_v11  ;;  %v3181_v35 = vmul.f32 %v3178_v33, %v8280_v39  ;;  %v3242_v32 = vmul.f32 1.442695, %v3239_v28  ;;  %v3156_v24 = vmul.f32 0.88622695, %v3153_v16 }
 0x48e   : > { %v3154_v7 = vsel %vm3151_vm5, %v3148_v50, %v3103_v37  ;;  %v3244_v14 = vmul.f32 1.442695, %v3240_v55  ;;  %v3346_v34 = vand.u32 2147483647, %v8411_v1  ;;  %v3216_v17 = vmul.f32 %v8364_v41, %v3213_v40 }
 0x48f   : > { %v5897_v47 = vpop.eup %5896  ;;  %v3246_v23 = vmul.f32 1.442695, %v3241_v13  ;;  %v3347_v2 = vmul.f32 0.3275911, %v3344_v48  ;;  %v3348_v60 = vmul.f32 0.3275911, %v3345_v0  ;;  %v8425_v6 = vadd.f32 %v8341_v51, %v8309_v9 }
 0x490   : > { %v8421_v52 = vpop.eup %5898  ;;  %v8429_v59 = vadd.f32 %v8346_v10, %v8312_v18  ;;  %v3217_v12 = vmul.f32 %v8367_v46, %v3214_v3  ;;  %v5141_v53 = vadd.f32 -0.28449672, %v3215_v19  ;;  %v8435_v26 = vadd.f32 %v3013_v20, %v8316_v4 }
 0x491   : > { %v8432_v56 = vpop.eup %5900  ;;  %v3157_v44 = vmul.f32 0.88622695, %v3154_v7  ;;  %v3186_v49 = vmul.f32 1.442695, %v3181_v35  ;;  %5904 = vpow2.f32 %v3242_v32  ;;  %v3158_v9 = vmul.f32 %v3155_v57, %v8327_v5 }
 0x492   : > { %v8437_v63 = vpop.eup %5902  ;;  %5906 = vpow2.f32 %v3244_v14  ;;  %v3349_v51 = vmul.f32 0.3275911, %v3346_v34  ;;  %v3350_v42 = vadd.f32 1.0, %v3347_v2  ;;  %v3159_v18 = vmul.f32 %v3156_v24, %v8330_v43 }
 0x493   : > { %v5142_v10 = vadd.f32 -0.28449672, %v3216_v17  ;;  %5908 = vpow2.f32 %v3246_v23  ;;  %v3351_v37 = vadd.f32 1.0, %v3348_v60  ;;  %v5143_v27 = vadd.f32 -0.28449672, %v3217_v12 }
 0x494   : > { %v3221_v33 = vmul.f32 %v8352_v31, %v5141_v53  ;;  %v3266_v4 = vmul.f32 %v8421_v52, %v8421_v52  ;;  %v8446_v28 = vmul.f32 %v8432_v56, %v8432_v56  ;;  %5910 = vpow2.f32 %v3186_v49 }
 0x495   : > { %v8450_v5 = vmul.f32 %v8389_v8, %v9761_v15  ;;  %v8453_v43 = vmul.f32 %v5897_v47, %v9770_v21  ;;  %v3268_v11 = vmul.f32 %v8437_v63, %v8437_v63  ;;  %v8458_v16 = vmul.f32 %v3157_v44, %v8336_v36 }
 0x496   : > { %v8460_v55 = vmul.f32 %v3158_v9, %v3158_v9  ;;  %v3352_v40 = vadd.f32 1.0, %v3349_v51  ;;  %5912 = vrcp.f32 %v3350_v42  ;;  %v8462_v13 = vmul.f32 %v3159_v18, %v3159_v18 }
 0x497   : > { %v3222_v48 = vmul.f32 %v8364_v41, %v5142_v10  ;;  %v3329_v8 = vmul.f32 -0.5, %v8395_v25  ;;  %5914 = vrcp.f32 %v3351_v37  ;;  %v3223_v0 = vmul.f32 %v8367_v46, %v5143_v27 }
 0x498   : > { %v3224_v20 = vadd.f32 0.2548296, %v3221_v33  ;;  %v3272_v50 = vmul.f32 0.5, %v3266_v4  ;;  %v3273_v3 = vmul.f32 0.5, %v8446_v28  ;;  %v3274_v19 = vmul.f32 0.5, %v3268_v11 }
 0x499   : > { %v3278_v36 = vmul.f32 0.75, %v3266_v4  ;;  %v3279_v57 = vmul.f32 0.75, %v8446_v28  ;;  %v3287_v35 = vmul.f32 1.875, %v3266_v4  ;;  %v3280_v32 = vmul.f32 0.75, %v3268_v11 }
 0x49a   : > { %v3288_v7 = vmul.f32 1.875, %v8446_v28  ;;  %v3289_v24 = vmul.f32 1.875, %v3268_v11  ;;  %5916 = vrcp.f32 %v3352_v40  ;;  %v3225_v34 = vadd.f32 0.2548296, %v3222_v48 }
 0x49b   : > { %v5905_v14 = vpop.eup %5904  ;;  %v3332_v47 = vmul.f32 %v3329_v8, %v8395_v25  ;;  %v3383_v17 = vmax.f32 %v8395_v25, 0.0  ;;  %v8473_v23 = vmul.f32 0.5454215, %v9778_v29  ;;  %v3226_v60 = vadd.f32 0.2548296, %v3223_v0 }
 0x49c   : > { %v5907_v2 = vpop.eup %5906  ;;  %v3227_v12 = vmul.f32 %v8352_v31, %v3224_v20  ;;  %v3275_v53 = vsub.f32 1.0, %v3272_v50  ;;  %v3330_v44 = vmul.f32 -0.5, %v8398_v22  ;;  %vm3236_vm6 = vcmp.gt.f32.partialorder %v8268_v62, 0.0 }
 0x49d   : > { %v5909_v49 = vpop.eup %5908  ;;  %v3276_v9 = vsub.f32 1.0, %v3273_v3  ;;  %v3277_v51 = vsub.f32 1.0, %v3274_v19  ;;  %v3281_v42 = vmul.f32 %v3278_v36, %v3266_v4  ;;  %v3290_v18 = vmul.f32 %v3287_v35, %v3266_v4 }
 0x49e   : > { %vm3237_vm7 = vcmp.gt.f32.partialorder %v8276_v30, 0.0  ;;  %v3282_v10 = vmul.f32 %v3279_v57, %v8446_v28  ;;  %v3283_v37 = vmul.f32 %v3280_v32, %v3268_v11  ;;  %v3291_v27 = vmul.f32 %v3288_v7, %v8446_v28  ;;  %v8481_v40 = vpop.eup %5910 }
 0x49f   : > { %v3292_v33 = vmul.f32 %v3289_v24, %v3268_v11  ;;  %v3228_v31 = vmul.f32 %v8364_v41, %v3225_v34  ;;  %vm3238_vm8 = vcmp.gt.f32.partialorder %v8280_v39, 0.0  ;;  %v3248_v48 = vmul.f32 2.0, %v5905_v14 }
 0x4a0   : > { %v8486_v8 = vmul.f32 -0.5, %v8411_v1  ;;  %v3335_v0 = vmul.f32 1.442695, %v3332_v47  ;;  %v8488_v20 = vpop.eup %5912  ;;  %v3229_v50 = vmul.f32 %v8367_v46, %v3226_v60  ;;  %v3249_v3 = vmul.f32 2.0, %v5907_v2 }
 0x4a1   : > { %v3250_v19 = vmul.f32 2.0, %v5909_v49  ;;  %v3333_v36 = vmul.f32 %v3330_v44, %v8398_v22  ;;  %v8492_v57 = vpop.eup %5914  ;;  %v3251_v35 = vsub.f32 %v3248_v48, %v3227_v12  ;;  %v3269_v41 = vmul.f32 0.5641896, %v8421_v52 }
 0x4a2   : > { %v3284_v32 = vadd.f32 %v3281_v42, %v3275_v53  ;;  %v3293_v7 = vmul.f32 %v3290_v18, %v3266_v4  ;;  %v3285_v24 = vadd.f32 %v3282_v10, %v3276_v9  ;;  %v3286_v14 = vadd.f32 %v3283_v37, %v3277_v51 }
 0x4a3   : > { %v3294_v34 = vmul.f32 %v3291_v27, %v8446_v28  ;;  %v3295_v47 = vmul.f32 %v3292_v33, %v3268_v11  ;;  %v3252_v29 = vsub.f32 %v3249_v3, %v3228_v31  ;;  %v3270_v21 = vmul.f32 0.5641896, %v8432_v56 }
 0x4a4   : > { %v3271_v46 = vmul.f32 0.5641896, %v8437_v63  ;;  %vm3302_vm9 = vcmp.le.f32.partialorder %v8268_v62, -3.0  ;;  %vm3303_vm10 = vcmp.le.f32.partialorder %v8276_v30, -3.0  ;;  %5918 = vpow2.f32 %v3335_v0  ;;  %v8500_v2 = vpop.eup %5916 }
 0x4a5   : > { %v3253_v52 = vsub.f32 %v3250_v19, %v3229_v50  ;;  %v3337_v60 = vmul.f32 1.442695, %v3333_v36  ;;  %v3356_v4 = vmul.f32 1.0614054, %v8488_v20  ;;  %v3357_v53 = vmul.f32 1.0614054, %v8492_v57 }
 0x4a6   : > { %v3296_v28 = vsub.f32 %v3284_v32, %v3293_v7  ;;  %vm3304_vm11 = vcmp.le.f32.partialorder %v8280_v39, -3.0  ;;  %v3384_v56 = vmax.f32 %v8398_v22, 0.0  ;;  %v3386_v11 = vmin.f32 %v3383_v17, 6.0 }
 0x4a7   : > { %v3410_v63 = vsub.f32 0.0, %v8395_v25  ;;  %v3254_v44 = vsel %vm3236_vm6, %v3251_v35, %v3227_v12  ;;  %v3297_v49 = vsub.f32 %v3285_v24, %v3294_v34  ;;  %v3298_v9 = vsub.f32 %v3286_v14, %v3295_v47 }
 0x4a8   : > { %v3411_v51 = vsub.f32 0.0, %v8398_v22  ;;  %v3255_v42 = vsel %vm3237_vm7, %v3252_v29, %v3228_v31  ;;  %v3358_v18 = vmul.f32 1.0614054, %v8500_v2  ;;  %v3385_v10 = vmax.f32 %v8411_v1, 0.0 }
 0x4a9   : > { %v3412_v37 = vsub.f32 0.0, %v8411_v1  ;;  %v3256_v17 = vsel %vm3238_vm8, %v3253_v52, %v3229_v50  ;;  %5920 = vpow2.f32 %v3337_v60  ;;  %v5144_v27 = vadd.f32 -1.4531521, %v3356_v4 }
 0x4aa   : > { %v5145_v33 = vadd.f32 -1.4531521, %v3357_v53  ;;  %v3299_v12 = vmul.f32 %v3296_v28, %v3269_v41  ;;  %v3387_v48 = vmin.f32 %v3384_v56, 6.0  ;;  %v3392_v0 = vmul.f32 %v3386_v11, %v3386_v11 }
 0x4ab   : > { %v3413_v3 = vmax.f32 %v3410_v63, 3.0  ;;  %v3300_v19 = vmul.f32 %v3297_v49, %v3270_v21  ;;  %v3301_v36 = vmul.f32 %v3298_v9, %v3271_v46  ;;  %v3414_v35 = vmax.f32 %v3411_v51, 3.0  ;;  %v9783_v51 = vld [vmem:[#allocation20_spill] sm:$0xff] }
 0x4ac   : > { %v3477_v29 = vmul.f32 0.5454215, %v9779_v38  ;;  %v5146_v31 = vadd.f32 -1.4531521, %v3358_v18  ;;  %v3388_v32 = vmin.f32 %v3385_v10, 6.0  ;;  %v3415_v7 = vmax.f32 %v3412_v37, 3.0 }
 0x4ad   : > { %v3478_v24 = vmul.f32 0.5454215, %v6610_v58  ;;  %v3305_v50 = vsel %vm3302_vm9, %v3299_v12, %v3254_v44  ;;  %v3306_v14 = vsel %vm3303_vm10, %v3300_v19, %v3255_v42  ;;  %v3362_v41 = vmul.f32 %v8488_v20, %v5144_v27 }
 0x4ae   : > { %v3363_v34 = vmul.f32 %v8492_v57, %v5145_v33  ;;  %v5919_v21 = vpop.eup %5918  ;;  %v3393_v47 = vmul.f32 %v3387_v48, %v3387_v48  ;;  %v3395_v46 = vmul.f32 1.442695, %v3392_v0  ;;  %5922 = vrcp.f32 %v3413_v3 }
 0x4af   : > { %v8527_v52 = vadd.f32 %v8473_v23, %v6616_v45  ;;  %v3163_v60 = vmul.f32 %v8458_v16, %v8458_v16  ;;  %v3307_v62 = vsel %vm3304_vm11, %v3301_v36, %v3256_v17  ;;  %5924 = vrcp.f32 %v3414_v35 }
 0x4b0   : > { %v8534_v30 = vadd.f32 %v3477_v29, %v6618_v54  ;;  %v3308_v4 = vmul.f32 0.88622695, %v3305_v50  ;;  %v3364_v53 = vmul.f32 %v8500_v2, %v5146_v31  ;;  %5926 = vrcp.f32 %v3415_v7 }
 0x4b1   : > { %9780 = vst [vmem:[#allocation23_spill] sm:$0xff] %v8527_v52  ;;  %v8538_v28 = vadd.f32 %v3478_v24, %v6628_v61  ;;  %v3309_v56 = vmul.f32 0.88622695, %v3306_v14  ;;  %v3334_v23 = vmul.f32 %v8486_v8, %v8411_v1  ;;  %v3365_v11 = vadd.f32 1.4214138, %v3362_v41 }
 0x4b2   : > { %9781 = vst [vmem:[#allocation21_spill] sm:$0xff] %v8534_v30  ;;  %v3366_v16 = vadd.f32 1.4214138, %v3363_v34  ;;  %v3394_v63 = vmul.f32 %v3388_v32, %v3388_v32  ;;  %5928 = vpow2.f32 %v3395_v46  ;;  %v3397_v39 = vmul.f32 1.442695, %v3393_v47  ;;  %v9784_v34 = vld [vmem:[#allocation19_spill] sm:$0xff] }
 0x4b3   : > { %9782 = vst [vmem:[#allocation24_spill] sm:$0xff] %v8538_v28  ;;  %v3497_v44 = vand.u32 2147483647, %v8527_v52  ;;  %v5921_v49 = vpop.eup %5920  ;;  %v3164_v9 = vmul.f32 0.12583746, %v8460_v55  ;;  %v3190_v42 = vmul.f32 %v8481_v40, %v9783_v51  ;;  %v3311_v8 = vmul.f32 %v3308_v4, %v8450_v5 }
 0x4b4   : > { %v3310_v18 = vmul.f32 0.88622695, %v3307_v62  ;;  %v3498_v10 = vand.u32 2147483647, %v8534_v30  ;;  %v3165_v37 = vmul.f32 0.12583746, %v8462_v13  ;;  %v3368_v48 = vmul.f32 %v8488_v20, %v3365_v11 }
 0x4b5   : > { %v3367_v17 = vadd.f32 1.4214138, %v3364_v53  ;;  %v3499_v27 = vand.u32 2147483647, %v8538_v28  ;;  %v3166_v33 = vmul.f32 0.12583746, %v3163_v60  ;;  %v3369_v0 = vmul.f32 %v8492_v57, %v3366_v16 }
 0x4b6   : > { %v3339_v12 = vmul.f32 1.442695, %v3334_v23  ;;  %v3312_v55 = vmul.f32 %v3309_v56, %v8453_v43  ;;  %5930 = vpow2.f32 %v3397_v39  ;;  %v3399_v40 = vmul.f32 1.442695, %v3394_v63 }
 0x4b7   : > { %v3500_v3 = vmul.f32 0.3275911, %v3497_v44  ;;  %v8554_v19 = vadd.f32 %v3164_v9, %v8425_v6  ;;  %v8557_v13 = vadd.f32 %v3165_v37, %v8429_v59  ;;  %v3313_v5 = vmul.f32 %v3310_v18, %v3190_v42 }
 0x4b8   : > { %v3501_v36 = vmul.f32 0.3275911, %v3498_v10  ;;  %v8559_v35 = vpop.eup %5922  ;;  %v3314_v29 = vmul.f32 %v3311_v8, %v3311_v8  ;;  %v3370_v31 = vmul.f32 %v8500_v2, %v3367_v17  ;;  %v3502_v32 = vmul.f32 0.3275911, %v3499_v27 }
 0x4b9   : > { %v3503_v7 = vadd.f32 1.0, %v3500_v3  ;;  %v8562_v24 = vpop.eup %5924  ;;  %v8565_v43 = vadd.f32 %v3166_v33, %v8435_v26  ;;  %5932 = vpow2.f32 %v3339_v12  ;;  %v5147_v6 = vadd.f32 -0.28449672, %v3368_v48 }
 0x4ba   : > { %v5148_v50 = vadd.f32 -0.28449672, %v3369_v0  ;;  %v8567_v14 = vpop.eup %5926  ;;  %v8569_v59 = vmul.f32 %v3312_v55, %v3312_v55  ;;  %v8572_v41 = vmul.f32 %v5919_v21, %v9761_v15  ;;  %v8575_v47 = vmul.f32 %v5921_v49, %v9784_v34  ;;  %v9785_v49 = vld [vmem:[#allocation11_spill] sm:$0xff] }
 0x4bb   : > { %5934 = vpow2.f32 %v3399_v40  ;;  %v8577_v46 = vmul.f32 %v3313_v5, %v3313_v5  ;;  %v3419_v26 = vmul.f32 %v8559_v35, %v8559_v35  ;;  %v3482_v60 = vmul.f32 -0.5, %v8527_v52 }
 0x4bc   : > { %v3504_v62 = vadd.f32 1.0, %v3501_v36  ;;  %v5929_v4 = vpop.eup %5928  ;;  %v8582_v53 = vmul.f32 0.12167047, %v3314_v29  ;;  %v5149_v56 = vadd.f32 -0.28449672, %v3370_v31  ;;  %v3505_v23 = vadd.f32 1.0, %v3502_v32 }
 0x4bd   : > { %5936 = vrcp.f32 %v3503_v7  ;;  %v3374_v21 = vmul.f32 %v8488_v20, %v5147_v6  ;;  %v3375_v11 = vmul.f32 %v8492_v57, %v5148_v50  ;;  %v3420_v16 = vmul.f32 %v8562_v24, %v8562_v24 }
 0x4be   : > { %v3421_v63 = vmul.f32 %v8567_v14, %v8567_v14  ;;  %v3483_v39 = vmul.f32 -0.5, %v8534_v30  ;;  %v3484_v44 = vmul.f32 -0.5, %v8538_v28  ;;  %v8593_v9 = vmul.f32 0.64809364, %v9785_v49 }
 0x4bf   : > { %v8596_v42 = vmul.f32 0.64809364, %v9779_v38  ;;  %v8598_v18 = vmul.f32 2.0, %v5929_v4  ;;  %v3425_v10 = vmul.f32 0.5, %v3419_v26  ;;  %v3485_v37 = vmul.f32 %v3482_v60, %v8527_v52 }
 0x4c0   : > { %5938 = vrcp.f32 %v3504_v62  ;;  %v5931_v8 = vpop.eup %5930  ;;  %v3376_v17 = vmul.f32 %v8500_v2, %v5149_v56  ;;  %v3431_v27 = vmul.f32 0.75, %v3419_v26  ;;  %v3440_v33 = vmul.f32 1.875, %v3419_v26 }
 0x4c1   : > { %5940 = vrcp.f32 %v3505_v23  ;;  %v3377_v12 = vadd.f32 0.2548296, %v3374_v21  ;;  %v3378_v48 = vadd.f32 0.2548296, %v3375_v11  ;;  %v3426_v0 = vmul.f32 0.5, %v3420_v16 }
 0x4c2   : > { %v3427_v55 = vmul.f32 0.5, %v3421_v63  ;;  %v3432_v40 = vmul.f32 0.75, %v3420_v16  ;;  %v3433_v3 = vmul.f32 0.75, %v3421_v63  ;;  %v3441_v5 = vmul.f32 1.875, %v3420_v16 }
 0x4c3   : > { %v3442_v36 = vmul.f32 1.875, %v3421_v63  ;;  %v8602_v29 = vpop.eup %5932  ;;  %v3402_v31 = vmul.f32 2.0, %v5931_v8  ;;  %v3486_v32 = vmul.f32 %v3483_v39, %v8534_v30  ;;  %v8606_v7 = vmul.f32 %v3484_v44, %v8538_v28 }
 0x4c4   : > { %v3488_v6 = vmul.f32 1.442695, %v3485_v37  ;;  %v3379_v60 = vadd.f32 0.2548296, %v3376_v17  ;;  %v3428_v62 = vsub.f32 1.0, %v3425_v10  ;;  %v3434_v4 = vmul.f32 %v3431_v27, %v3419_v26 }
 0x4c5   : > { %v5935_v50 = vpop.eup %5934  ;;  %v3443_v56 = vmul.f32 %v3440_v33, %v3419_v26  ;;  %v3380_v23 = vmul.f32 %v8488_v20, %v3377_v12  ;;  %v3381_v21 = vmul.f32 %v8492_v57, %v3378_v48  ;;  %vm3389_vm12 = vcmp.gt.f32.partialorder %v8395_v25, 0.0 }
 0x4c6   : > { %vm3390_vm13 = vcmp.gt.f32.partialorder %v8398_v22, 0.0  ;;  %v3429_v11 = vsub.f32 1.0, %v3426_v0  ;;  %v3430_v8 = vsub.f32 1.0, %v3427_v55  ;;  %v3435_v44 = vmul.f32 %v3432_v40, %v3420_v16 }
 0x4c7   : > { %v8612_v39 = vpop.eup %5936  ;;  %v3436_v38 = vmul.f32 %v3433_v3, %v3421_v63  ;;  %v3444_v37 = vmul.f32 %v3441_v5, %v3420_v16  ;;  %v3445_v49 = vmul.f32 %v3442_v36, %v3421_v63  ;;  %v3403_v17 = vmul.f32 2.0, %v5935_v50 }
 0x4c8   : > { %v3422_v10 = vmul.f32 0.5641896, %v8559_v35  ;;  %v3490_v27 = vmul.f32 1.442695, %v3486_v32  ;;  %v3536_v20 = vmax.f32 %v8527_v52, 0.0  ;;  %v3437_v33 = vadd.f32 %v3434_v4, %v3428_v62 }
 0x4c9   : > { %v3423_v57 = vmul.f32 0.5641896, %v8562_v24  ;;  %v3446_v12 = vmul.f32 %v3443_v56, %v3419_v26  ;;  %5942 = vpow2.f32 %v3488_v6  ;;  %v3382_v0 = vmul.f32 %v8500_v2, %v3379_v60 }
 0x4ca   : > { %v8617_v48 = vpop.eup %5938  ;;  %vm3391_vm14 = vcmp.gt.f32.partialorder %v8411_v1, 0.0  ;;  %v3404_v55 = vsub.f32 %v8598_v18, %v3380_v23  ;;  %v3405_v40 = vsub.f32 %v3402_v31, %v3381_v21  ;;  %vm3455_vm15 = vcmp.le.f32.partialorder %v8395_v25, -3.0 }
 0x4cb   : > { %v3509_v35 = vmul.f32 1.0614054, %v8612_v39  ;;  %v8624_v3 = vpop.eup %5940  ;;  %v3438_v5 = vadd.f32 %v3435_v44, %v3429_v11  ;;  %v3439_v24 = vadd.f32 %v3436_v38, %v3430_v8  ;;  %v3447_v36 = vmul.f32 %v3444_v37, %v3420_v16 }
 0x4cc   : > { %v3448_v26 = vmul.f32 %v3445_v49, %v3421_v63  ;;  %v3537_v32 = vmax.f32 %v8534_v30, 0.0  ;;  %v3538_v6 = vmax.f32 %v8538_v28, 0.0  ;;  %v3539_v2 = vmin.f32 %v3536_v20, 6.0 }
 0x4cd   : > { %v3563_v50 = vsub.f32 0.0, %v8527_v52  ;;  %v3424_v18 = vmul.f32 0.5641896, %v8567_v14  ;;  %v3449_v31 = vsub.f32 %v3437_v33, %v3446_v12  ;;  %v3510_v60 = vmul.f32 1.0614054, %v8617_v48 }
 0x4ce   : > { %v3564_v62 = vsub.f32 0.0, %v8534_v30  ;;  %v3406_v4 = vsub.f32 %v3403_v17, %v3382_v0  ;;  %vm3456_vm0 = vcmp.le.f32.partialorder %v8398_v22, -3.0  ;;  %v3511_v38 = vmul.f32 1.0614054, %v8624_v3 }
 0x4cf   : > { %v5150_v16 = vadd.f32 -1.4531521, %v3509_v35  ;;  %v3565_v63 = vsub.f32 0.0, %v8538_v28  ;;  %v3407_v49 = vsel %vm3389_vm12, %v3404_v55, %v3380_v23  ;;  %v3408_v56 = vsel %vm3390_vm13, %v3405_v40, %v3381_v21 }
 0x4d0   : > { %v3450_v14 = vsub.f32 %v3438_v5, %v3447_v36  ;;  %v3451_v11 = vsub.f32 %v3439_v24, %v3448_v26  ;;  %v3540_v8 = vmin.f32 %v3537_v32, 6.0  ;;  %v3541_v44 = vmin.f32 %v3538_v6, 6.0 }
 0x4d1   : > { %v3545_v37 = vmul.f32 %v3539_v2, %v3539_v2  ;;  %v3566_v20 = vmax.f32 %v3563_v50, 3.0  ;;  %v3452_v17 = vmul.f32 %v3449_v31, %v3422_v10  ;;  %5944 = vpow2.f32 %v3490_v27 }
 0x4d2   : > { %v5151_v33 = vadd.f32 -1.4531521, %v3510_v60  ;;  %v3567_v12 = vmax.f32 %v3564_v62, 3.0  ;;  %v5152_v30 = vadd.f32 -1.4531521, %v3511_v38  ;;  %v3515_v35 = vmul.f32 %v8612_v39, %v5150_v16 }
 0x4d3   : > { %v3568_v28 = vmax.f32 %v3565_v63, 3.0  ;;  %v3631_v52 = vmul.f32 0.64809364, %v6610_v58  ;;  %v5943_v23 = vpop.eup %5942  ;;  %v3409_v21 = vsel %vm3391_vm14, %v3406_v4, %v3382_v0  ;;  %v3453_v55 = vmul.f32 %v3450_v14, %v3423_v57 }
 0x4d4   : > { %v3454_v40 = vmul.f32 %v3451_v11, %v3424_v18  ;;  %v3458_v5 = vsel %vm3455_vm15, %v3452_v17, %v3407_v49  ;;  %v3546_v24 = vmul.f32 %v3540_v8, %v3540_v8  ;;  %v3547_v10 = vmul.f32 %v3541_v44, %v3541_v44 }
 0x4d5   : > { %v3548_v27 = vmul.f32 1.442695, %v3545_v37  ;;  %5946 = vrcp.f32 %v3566_v20  ;;  %v3516_v36 = vmul.f32 %v8617_v48, %v5151_v33  ;;  %v8648_v26 = vadd.f32 %v8593_v9, %v6616_v45 }
 0x4d6   : > { %5948 = vrcp.f32 %v3567_v12  ;;  %v8652_v32 = vadd.f32 %v8596_v42, %v6618_v54  ;;  %v3517_v57 = vmul.f32 %v8624_v3, %v5152_v30  ;;  %v3518_v0 = vadd.f32 1.4214138, %v3515_v35 }
 0x4d7   : > { %5950 = vrcp.f32 %v3568_v28  ;;  %v8656_v25 = vadd.f32 %v3631_v52, %v6628_v61  ;;  %v3318_v6 = vmul.f32 0.12167047, %v8569_v59  ;;  %v3319_v2 = vmul.f32 0.12167047, %v8577_v46 }
 0x4d8   : > { %vm3457_vm1 = vcmp.le.f32.partialorder %v8411_v1, -3.0  ;;  %v3459_v9 = vsel %vm3456_vm0, %v3453_v55, %v3408_v56  ;;  %v3461_v18 = vmul.f32 0.88622695, %v3458_v5  ;;  %v3550_v42 = vmul.f32 1.442695, %v3546_v24 }
 0x4d9   : > { %v3460_v50 = vsel %vm3457_vm1, %v3454_v40, %v3409_v21  ;;  %v3552_v31 = vmul.f32 1.442695, %v3547_v10  ;;  %v3519_v60 = vadd.f32 1.4214138, %v3516_v36  ;;  %5952 = vpow2.f32 %v3548_v27 }
 0x4da   : > { %v3650_v30 = vand.u32 2147483647, %v8648_v26  ;;  %v3651_v52 = vand.u32 2147483647, %v8652_v32  ;;  %v3492_v28 = vmul.f32 1.442695, %v8606_v7  ;;  %v3521_v46 = vmul.f32 %v8612_v39, %v3518_v0 }
 0x4db   : > { %v3520_v59 = vadd.f32 1.4214138, %v3517_v57  ;;  %v3652_v1 = vand.u32 2147483647, %v8656_v25  ;;  %v5945_v62 = vpop.eup %5944  ;;  %v8670_v22 = vadd.f32 %v8582_v53, %v8554_v19  ;;  %v3343_v4 = vmul.f32 %v8602_v29, %v9783_v51 }
 0x4dc   : > { %v3462_v38 = vmul.f32 0.88622695, %v3459_v9  ;;  %v3463_v16 = vmul.f32 0.88622695, %v3460_v50  ;;  %v8675_v63 = vadd.f32 %v3318_v6, %v8557_v13  ;;  %v8678_v7 = vadd.f32 %v3319_v2, %v8565_v43  ;;  %v9787_v6 = vld [vmem:[#allocation11_spill] sm:$0xff]  ;;  %v9788_v9 = vld [vmem:[#allocation12_spill] sm:$0xff] }
 0x4dd   : > { %v3464_v49 = vmul.f32 %v3461_v18, %v8572_v41  ;;  %5954 = vpow2.f32 %v3550_v42  ;;  %v3522_v56 = vmul.f32 %v8617_v48, %v3519_v60  ;;  %v3653_v14 = vmul.f32 0.3275911, %v3650_v30 }
 0x4de   : > { %9786 = vst [vmem:[#allocation22_spill] sm:$0xff] %v8678_v7  ;;  %5956 = vpow2.f32 %v3552_v31  ;;  %v3654_v19 = vmul.f32 0.3275911, %v3651_v52  ;;  %v3523_v29 = vmul.f32 %v8624_v3, %v3520_v59  ;;  %v5153_v11 = vadd.f32 -0.28449672, %v3521_v46 }
 0x4df   : > { %v8682_v53 = vpop.eup %5946  ;;  %5958 = vpow2.f32 %v3492_v28  ;;  %v3655_v8 = vmul.f32 0.3275911, %v3652_v1  ;;  %v3465_v43 = vmul.f32 %v3462_v38, %v8575_v47  ;;  %v3466_v44 = vmul.f32 %v3463_v16, %v3343_v4 }
 0x4e0   : > { %v8685_v13 = vpop.eup %5948  ;;  %v3656_v37 = vadd.f32 1.0, %v3653_v14  ;;  %v3657_v41 = vadd.f32 1.0, %v3654_v19  ;;  %v3467_v17 = vmul.f32 %v3464_v49, %v3464_v49  ;;  %v8691_v33 = vmul.f32 %v5943_v23, %v9761_v15 }
 0x4e1   : > { %v8688_v20 = vpop.eup %5950  ;;  %v8694_v12 = vmul.f32 %v5945_v62, %v9784_v34  ;;  %v3658_v35 = vadd.f32 1.0, %v3655_v8  ;;  %v5154_v21 = vadd.f32 -0.28449672, %v3522_v56  ;;  %v3635_v55 = vmul.f32 -0.5, %v8648_v26 }
 0x4e2   : > { %v3636_v40 = vmul.f32 -0.5, %v8652_v32  ;;  %5960 = vrcp.f32 %v3656_v37  ;;  %v5155_v47 = vadd.f32 -0.28449672, %v3523_v29  ;;  %v3527_v5 = vmul.f32 %v8612_v39, %v5153_v11 }
 0x4e3   : > { %v3572_v24 = vmul.f32 %v8682_v53, %v8682_v53  ;;  %5962 = vrcp.f32 %v3657_v41  ;;  %v5953_v10 = vpop.eup %5952  ;;  %v8701_v23 = vmul.f32 %v3465_v43, %v3465_v43  ;;  %v8703_v27 = vmul.f32 %v3466_v44, %v3466_v44 }
 0x4e4   : > { %v3573_v36 = vmul.f32 %v8685_v13, %v8685_v13  ;;  %v3574_v57 = vmul.f32 %v8688_v20, %v8688_v20  ;;  %v8709_v0 = vmul.f32 0.115505666, %v3467_v17  ;;  %5964 = vrcp.f32 %v3658_v35 }
 0x4e5   : > { %v8712_v2 = vmul.f32 0.74012417, %v9787_v6  ;;  %v8715_v50 = vmul.f32 0.74012417, %v9788_v9  ;;  %v3528_v18 = vmul.f32 %v8617_v48, %v5154_v21  ;;  %v3637_v42 = vmul.f32 -0.5, %v8656_v25 }
 0x4e6   : > { %v3638_v31 = vmul.f32 %v3635_v55, %v8648_v26  ;;  %v3639_v60 = vmul.f32 %v3636_v40, %v8652_v32  ;;  %v3529_v52 = vmul.f32 %v8624_v3, %v5155_v47  ;;  %v3530_v28 = vadd.f32 0.2548296, %v3527_v5  ;;  %v9789_v55 = vld [vmem:[#allocation23_spill] sm:$0xff] }
 0x4e7   : > { %v5955_v30 = vpop.eup %5954  ;;  %v8722_v59 = vmul.f32 2.0, %v5953_v10  ;;  %v3578_v46 = vmul.f32 0.5, %v3572_v24  ;;  %v3579_v62 = vmul.f32 0.5, %v3573_v36  ;;  %v3580_v4 = vmul.f32 0.5, %v3574_v57 }
 0x4e8   : > { %v5957_v1 = vpop.eup %5956  ;;  %v3584_v38 = vmul.f32 0.75, %v3572_v24  ;;  %v3593_v16 = vmul.f32 1.875, %v3572_v24  ;;  %v3585_v56 = vmul.f32 0.75, %v3573_v36  ;;  %v3586_v14 = vmul.f32 0.75, %v3574_v57 }
 0x4e9   : > { %v8724_v49 = vpop.eup %5958  ;;  %v3594_v19 = vmul.f32 1.875, %v3573_v36  ;;  %v3595_v29 = vmul.f32 1.875, %v3574_v57  ;;  %v3531_v11 = vadd.f32 0.2548296, %v3528_v18  ;;  %v3555_v8 = vmul.f32 2.0, %v5955_v30  ;;  %v9790_v18 = vld [vmem:[#allocation21_spill] sm:$0xff] }
 0x4ea   : > { %v8727_v43 = vmul.f32 %v3637_v42, %v8656_v25  ;;  %v3641_v44 = vmul.f32 1.442695, %v3638_v31  ;;  %v3532_v37 = vadd.f32 0.2548296, %v3529_v52  ;;  %v3533_v41 = vmul.f32 %v8612_v39, %v3530_v28  ;;  %v9791_v28 = vld [vmem:[#allocation24_spill] sm:$0xff] }
 0x4eb   : > { %v3556_v17 = vmul.f32 2.0, %v5957_v1  ;;  %v3581_v35 = vsub.f32 1.0, %v3578_v46  ;;  %vm3542_vm2 = vcmp.gt.f32.partialorder %v9789_v55, 0.0  ;;  %v3582_v40 = vsub.f32 1.0, %v3579_v62 }
 0x4ec   : > { %v8730_v21 = vpop.eup %5960  ;;  %v3583_v47 = vsub.f32 1.0, %v3580_v4  ;;  %v3587_v5 = vmul.f32 %v3584_v38, %v3572_v24  ;;  %v3596_v10 = vmul.f32 %v3593_v16, %v3572_v24  ;;  %vm3543_vm3 = vcmp.gt.f32.partialorder %v9790_v18, 0.0 }
 0x4ed   : > { %v8733_v7 = vpop.eup %5962  ;;  %v3588_v42 = vmul.f32 %v3585_v56, %v3573_v36  ;;  %v3589_v30 = vmul.f32 %v3586_v14, %v3574_v57  ;;  %v3597_v31 = vmul.f32 %v3594_v19, %v3573_v36  ;;  %v3598_v52 = vmul.f32 %v3595_v29, %v3574_v57 }
 0x4ee   : > { %v3534_v39 = vmul.f32 %v8617_v48, %v3531_v11  ;;  %vm3544_vm4 = vcmp.gt.f32.partialorder %v9791_v28, 0.0  ;;  %v3575_v46 = vmul.f32 0.5641896, %v8682_v53  ;;  %v3643_v1 = vmul.f32 1.442695, %v3639_v60  ;;  %v8740_v4 = vpop.eup %5964 }
 0x4ef   : > { %v3662_v62 = vmul.f32 1.0614054, %v8730_v21  ;;  %v3535_v38 = vmul.f32 %v8624_v3, %v3532_v37  ;;  %v3557_v16 = vsub.f32 %v8722_v59, %v3533_v41  ;;  %v3576_v56 = vmul.f32 0.5641896, %v8685_v13 }
 0x4f0   : > { %5966 = vpow2.f32 %v3641_v44  ;;  %v3590_v14 = vadd.f32 %v3587_v5, %v3581_v35  ;;  %v3599_v19 = vmul.f32 %v3596_v10, %v3572_v24  ;;  %v3663_v48 = vmul.f32 1.0614054, %v8733_v7 }
 0x4f1   : > { %v3716_v29 = vsub.f32 0.0, %v8648_v26  ;;  %v3591_v11 = vadd.f32 %v3588_v42, %v3582_v40  ;;  %v3592_v53 = vadd.f32 %v3589_v30, %v3583_v47  ;;  %v3600_v60 = vmul.f32 %v3597_v31, %v3573_v36 }
 0x4f2   : > { %v3601_v9 = vmul.f32 %v3598_v52, %v3574_v57  ;;  %vm3608_vm5 = vcmp.le.f32.partialorder %v9789_v55, -3.0  ;;  %v3558_v6 = vsub.f32 %v3555_v8, %v3534_v39  ;;  %vm3609_vm6 = vcmp.le.f32.partialorder %v9790_v18, -3.0 }
 0x4f3   : > { %vm3610_vm7 = vcmp.le.f32.partialorder %v9791_v28, -3.0  ;;  %v3664_v3 = vmul.f32 1.0614054, %v8740_v4  ;;  %v5156_v13 = vadd.f32 -1.4531521, %v3662_v62  ;;  %v3717_v24 = vsub.f32 0.0, %v8652_v32 }
 0x4f4   : > { %v3559_v59 = vsub.f32 %v3556_v17, %v3535_v38  ;;  %v3577_v44 = vmul.f32 0.5641896, %v8688_v20  ;;  %v3689_v37 = vmax.f32 %v8648_v26, 0.0  ;;  %v3718_v36 = vsub.f32 0.0, %v8656_v25 }
 0x4f5   : > { %v3602_v57 = vsub.f32 %v3590_v14, %v3599_v19  ;;  %v5157_v35 = vadd.f32 -1.4531521, %v3663_v48  ;;  %v3690_v8 = vmax.f32 %v8652_v32, 0.0  ;;  %v3719_v40 = vmax.f32 %v3716_v29, 3.0 }
 0x4f6   : > { %v3560_v47 = vsel %vm3542_vm2, %v3557_v16, %v3533_v41  ;;  %v3603_v5 = vsub.f32 %v3591_v11, %v3600_v60  ;;  %v3604_v10 = vsub.f32 %v3592_v53, %v3601_v9  ;;  %v3691_v42 = vmax.f32 %v8656_v25, 0.0 }
 0x4f7   : > { %v3561_v17 = vsel %vm3543_vm3, %v3558_v6, %v3534_v39  ;;  %v5158_v20 = vadd.f32 -1.4531521, %v3664_v3  ;;  %v3668_v30 = vmul.f32 %v8730_v21, %v5156_v13  ;;  %v3720_v31 = vmax.f32 %v3717_v24, 3.0 }
 0x4f8   : > { %v3562_v52 = vsel %vm3544_vm4, %v3559_v59, %v3535_v38  ;;  %5968 = vpow2.f32 %v3643_v1  ;;  %v3692_v62 = vmin.f32 %v3689_v37, 6.0  ;;  %v3721_v14 = vmax.f32 %v3718_v36, 3.0 }
 0x4f9   : > { %v3605_v19 = vmul.f32 %v3602_v57, %v3575_v46  ;;  %v3669_v41 = vmul.f32 %v8733_v7, %v5157_v35  ;;  %v3693_v16 = vmin.f32 %v3690_v8, 6.0  ;;  %5970 = vrcp.f32 %v3719_v40 }
 0x4fa   : > { %v5967_v9 = vpop.eup %5966  ;;  %v3606_v48 = vmul.f32 %v3603_v5, %v3576_v56  ;;  %v3607_v29 = vmul.f32 %v3604_v10, %v3577_v44  ;;  %v3694_v11 = vmin.f32 %v3691_v42, 6.0  ;;  %v3784_v6 = vmul.f32 0.74012417, %v6610_v58 }
 0x4fb   : > { %v3611_v39 = vsel %vm3608_vm5, %v3605_v19, %v3560_v47  ;;  %v3670_v53 = vmul.f32 %v8740_v4, %v5158_v20  ;;  %v3671_v38 = vadd.f32 1.4214138, %v3668_v30  ;;  %5972 = vrcp.f32 %v3720_v31 }
 0x4fc   : > { %v3612_v46 = vsel %vm3609_vm6, %v3606_v48, %v3561_v17  ;;  %v3613_v1 = vsel %vm3610_vm7, %v3607_v29, %v3562_v52  ;;  %v3698_v60 = vmul.f32 %v3692_v62, %v3692_v62  ;;  %5974 = vrcp.f32 %v3721_v14 }
 0x4fd   : > { %v3672_v56 = vadd.f32 1.4214138, %v3669_v41  ;;  %v3699_v3 = vmul.f32 %v3693_v16, %v3693_v16  ;;  %v8775_v13 = vadd.f32 %v8712_v2, %v6616_v45  ;;  %v8779_v55 = vadd.f32 %v8715_v50, %v6618_v54 }
 0x4fe   : > { %v3471_v24 = vmul.f32 0.115505666, %v8701_v23  ;;  %v8783_v18 = vmul.f32 0.115505666, %v8703_v27  ;;  %v3700_v59 = vmul.f32 %v3694_v11, %v3694_v11  ;;  %v8786_v28 = vadd.f32 %v3784_v6, %v6628_v61 }
 0x4ff   : > { %v3614_v44 = vmul.f32 0.88622695, %v3611_v39  ;;  %v3645_v37 = vmul.f32 1.442695, %v8727_v43  ;;  %v3673_v36 = vadd.f32 1.4214138, %v3670_v53  ;;  %v3674_v2 = vmul.f32 %v8730_v21, %v3671_v38 }
 0x500   : > { %v3496_v57 = vmul.f32 %v8724_v49, %v9783_v51  ;;  %v3615_v50 = vmul.f32 0.88622695, %v3612_v46  ;;  %v3616_v35 = vmul.f32 0.88622695, %v3613_v1  ;;  %v3701_v8 = vmul.f32 1.442695, %v3698_v60 }
 0x501   : > { %v3675_v23 = vmul.f32 %v8733_v7, %v3672_v56  ;;  %v3703_v27 = vmul.f32 1.442695, %v3699_v3  ;;  %v3803_v40 = vand.u32 2147483647, %v8775_v13  ;;  %v3804_v47 = vand.u32 2147483647, %v8779_v55 }
 0x502   : > { %v5969_v5 = vpop.eup %5968  ;;  %v8797_v43 = vadd.f32 %v8709_v0, %v8670_v22  ;;  %v8800_v10 = vadd.f32 %v3471_v24, %v8675_v63  ;;  %v3705_v42 = vmul.f32 1.442695, %v3700_v59  ;;  %v3805_v49 = vand.u32 2147483647, %v8786_v28 }
 0x503   : > { %v8803_v17 = vpop.eup %5970  ;;  %5976 = vpow2.f32 %v3645_v37  ;;  %v8806_v20 = vmul.f32 %v5967_v9, %v9761_v15  ;;  %v3676_v30 = vmul.f32 %v8740_v4, %v3673_v36  ;;  %v5159_v31 = vadd.f32 -0.28449672, %v3674_v2 }
 0x504   : > { %v3617_v52 = vmul.f32 %v3614_v44, %v8691_v33  ;;  %v3618_v22 = vmul.f32 %v3615_v50, %v8694_v12  ;;  %v3619_v0 = vmul.f32 %v3616_v35, %v3496_v57  ;;  %5978 = vpow2.f32 %v3701_v8 }
 0x505   : > { %v8811_v63 = vpop.eup %5972  ;;  %v5160_v62 = vadd.f32 -0.28449672, %v3675_v23  ;;  %5980 = vpow2.f32 %v3703_v27  ;;  %v3806_v14 = vmul.f32 0.3275911, %v3803_v40  ;;  %v3807_v19 = vmul.f32 0.3275911, %v3804_v47 }
 0x506   : > { %v8813_v41 = vpop.eup %5974  ;;  %v8816_v16 = vmul.f32 %v5969_v5, %v9784_v34  ;;  %5982 = vpow2.f32 %v3705_v42  ;;  %v3725_v9 = vmul.f32 %v8803_v17, %v8803_v17  ;;  %v3808_v33 = vmul.f32 0.3275911, %v3805_v49 }
 0x507   : > { %v5161_v48 = vadd.f32 -0.28449672, %v3676_v30  ;;  %v3680_v12 = vmul.f32 %v8730_v21, %v5159_v31  ;;  %v3809_v29 = vadd.f32 1.0, %v3806_v14  ;;  %v3810_v11 = vadd.f32 1.0, %v3807_v19  ;;  %v9792_v30 = vld [vmem:[#allocation11_spill] sm:$0xff] }
 0x508   : > { %v8821_v6 = vmul.f32 %v3617_v52, %v3617_v52  ;;  %v8823_v39 = vmul.f32 %v3618_v22, %v3618_v22  ;;  %v3726_v53 = vmul.f32 %v8811_v63, %v8811_v63  ;;  %v3811_v38 = vadd.f32 1.0, %v3808_v33 }
 0x509   : > { %v8827_v46 = vmul.f32 %v3619_v0, %v3619_v0  ;;  %v3681_v1 = vmul.f32 %v8733_v7, %v5160_v62  ;;  %v3727_v60 = vmul.f32 %v8813_v41, %v8813_v41  ;;  %5984 = vrcp.f32 %v3809_v29 }
 0x50a   : > { %v3731_v56 = vmul.f32 0.5, %v3725_v9  ;;  %v3737_v3 = vmul.f32 0.75, %v3725_v9  ;;  %v3746_v24 = vmul.f32 1.875, %v3725_v9  ;;  %v3788_v59 = vmul.f32 -0.5, %v8775_v13 }
 0x50b   : > { %v3682_v44 = vmul.f32 %v8740_v4, %v5161_v48  ;;  %v3683_v37 = vadd.f32 0.2548296, %v3680_v12  ;;  %v3789_v36 = vmul.f32 -0.5, %v8779_v55  ;;  %5986 = vrcp.f32 %v3810_v11 }
 0x50c   : > { %v3732_v2 = vmul.f32 0.5, %v3726_v53  ;;  %v3738_v57 = vmul.f32 0.75, %v3726_v53  ;;  %v3747_v50 = vmul.f32 1.875, %v3726_v53  ;;  %5988 = vrcp.f32 %v3811_v38 }
 0x50d   : > { %v8835_v35 = vpop.eup %5976  ;;  %v3684_v8 = vadd.f32 0.2548296, %v3681_v1  ;;  %v3733_v23 = vmul.f32 0.5, %v3727_v60  ;;  %v3739_v27 = vmul.f32 0.75, %v3727_v60  ;;  %v3748_v40 = vmul.f32 1.875, %v3727_v60 }
 0x50e   : > { %v5979_v47 = vpop.eup %5978  ;;  %v3734_v5 = vsub.f32 1.0, %v3731_v56  ;;  %v3740_v42 = vmul.f32 %v3737_v3, %v3725_v9  ;;  %v3749_v49 = vmul.f32 %v3746_v24, %v3725_v9  ;;  %v8838_v31 = vmul.f32 0.82000196, %v9792_v30 }
 0x50f   : > { %v5981_v52 = vpop.eup %5980  ;;  %v3685_v22 = vadd.f32 0.2548296, %v3682_v44  ;;  %vm3695_vm8 = vcmp.gt.f32.partialorder %v8648_v26, 0.0  ;;  %v3790_v0 = vmul.f32 -0.5, %v8786_v28  ;;  %v3791_v62 = vmul.f32 %v3788_v59, %v8775_v13 }
 0x510   : > { %v3792_v14 = vmul.f32 %v3789_v36, %v8779_v55  ;;  %v5983_v19 = vpop.eup %5982  ;;  %v3686_v33 = vmul.f32 %v8730_v21, %v3683_v37  ;;  %vm3696_vm9 = vcmp.gt.f32.partialorder %v8652_v32, 0.0  ;;  %v3735_v48 = vsub.f32 1.0, %v3732_v2 }
 0x511   : > { %v3741_v12 = vmul.f32 %v3738_v57, %v3726_v53  ;;  %v3750_v29 = vmul.f32 %v3747_v50, %v3726_v53  ;;  %v3687_v11 = vmul.f32 %v8733_v7, %v3684_v8  ;;  %v3736_v38 = vsub.f32 1.0, %v3733_v23 }
 0x512   : > { %v3742_v1 = vmul.f32 %v3739_v27, %v3727_v60  ;;  %v3751_v56 = vmul.f32 %v3748_v40, %v3727_v60  ;;  %vm3697_vm10 = vcmp.gt.f32.partialorder %v8656_v25, 0.0  ;;  %v3707_v3 = vmul.f32 2.0, %v5979_v47 }
 0x513   : > { %v3708_v24 = vmul.f32 2.0, %v5981_v52  ;;  %v3743_v59 = vadd.f32 %v3740_v42, %v3734_v5  ;;  %v3752_v44 = vmul.f32 %v3749_v49, %v3725_v9  ;;  %v8848_v36 = vpop.eup %5984  ;;  %v3688_v21 = vmul.f32 %v8740_v4, %v3685_v22 }
 0x514   : > { %v3709_v37 = vmul.f32 2.0, %v5983_v19  ;;  %vm3761_vm11 = vcmp.le.f32.partialorder %v8648_v26, -3.0  ;;  %v3793_v2 = vmul.f32 %v3790_v0, %v8786_v28  ;;  %v3794_v57 = vmul.f32 1.442695, %v3791_v62 }
 0x515   : > { %v3710_v7 = vsub.f32 %v3707_v3, %v3686_v33  ;;  %v3744_v50 = vadd.f32 %v3741_v12, %v3735_v48  ;;  %v3753_v8 = vmul.f32 %v3750_v29, %v3726_v53  ;;  %v3796_v23 = vmul.f32 1.442695, %v3792_v14  ;;  %v8853_v27 = vpop.eup %5986 }
 0x516   : > { %v3711_v40 = vsub.f32 %v3708_v24, %v3687_v11  ;;  %v3745_v47 = vadd.f32 %v3742_v1, %v3736_v38  ;;  %v3754_v5 = vmul.f32 %v3751_v56, %v3727_v60  ;;  %vm3762_vm12 = vcmp.le.f32.partialorder %v8652_v32, -3.0  ;;  %v8857_v4 = vpop.eup %5988 }
 0x517   : > { %v3842_v9 = vmax.f32 %v8775_v13, 0.0  ;;  %v3728_v42 = vmul.f32 0.5641896, %v8803_v17  ;;  %v3755_v49 = vsub.f32 %v3743_v59, %v3752_v44  ;;  %vm3763_vm13 = vcmp.le.f32.partialorder %v8656_v25, -3.0 }
 0x518   : > { %v3815_v52 = vmul.f32 1.0614054, %v8848_v36  ;;  %v3843_v53 = vmax.f32 %v8779_v55, 0.0  ;;  %v3712_v22 = vsub.f32 %v3709_v37, %v3688_v21  ;;  %v3729_v0 = vmul.f32 0.5641896, %v8811_v63 }
 0x519   : > { %5990 = vpow2.f32 %v3794_v57  ;;  %v3844_v60 = vmax.f32 %v8786_v28, 0.0  ;;  %v3713_v62 = vsel %vm3695_vm8, %v3710_v7, %v3686_v33  ;;  %v3730_v14 = vmul.f32 0.5641896, %v8813_v41 }
 0x51a   : > { %v3756_v19 = vsub.f32 %v3744_v50, %v3753_v8  ;;  %v3816_v17 = vmul.f32 1.0614054, %v8853_v27  ;;  %v3714_v48 = vsel %vm3696_vm9, %v3711_v40, %v3687_v11  ;;  %v3757_v12 = vsub.f32 %v3745_v47, %v3754_v5 }
 0x51b   : > { %v3817_v29 = vmul.f32 1.0614054, %v8857_v4  ;;  %v3845_v38 = vmin.f32 %v3842_v9, 6.0  ;;  %v3758_v1 = vmul.f32 %v3755_v49, %v3728_v42  ;;  %v5162_v63 = vadd.f32 -1.4531521, %v3815_v52 }
 0x51c   : > { %v3846_v56 = vmin.f32 %v3843_v53, 6.0  ;;  %v3869_v3 = vsub.f32 0.0, %v8775_v13  ;;  %v3715_v33 = vsel %vm3697_vm10, %v3712_v22, %v3688_v21  ;;  %v3798_v24 = vmul.f32 1.442695, %v3793_v2 }
 0x51d   : > { %v3847_v41 = vmin.f32 %v3844_v60, 6.0  ;;  %v3870_v59 = vsub.f32 0.0, %v8779_v55  ;;  %v3759_v44 = vmul.f32 %v3756_v19, %v3729_v0  ;;  %v3764_v11 = vsel %vm3761_vm11, %v3758_v1, %v3713_v62  ;;  %v9796_v1 = vld [vmem:[#allocation22_spill] sm:$0xff] }
 0x51e   : > { %v5163_v37 = vadd.f32 -1.4531521, %v3816_v17  ;;  %v3871_v57 = vsub.f32 0.0, %v8786_v28  ;;  %v3760_v7 = vmul.f32 %v3757_v12, %v3730_v14  ;;  %5992 = vpow2.f32 %v3796_v23  ;;  %v9793_v23 = vld [vmem:[#allocation12_spill] sm:$0xff] }
 0x51f   : > { %v5164_v50 = vadd.f32 -1.4531521, %v3817_v29  ;;  %v3851_v8 = vmul.f32 %v3845_v38, %v3845_v38  ;;  %v3765_v40 = vsel %vm3762_vm12, %v3759_v44, %v3714_v48  ;;  %v3821_v21 = vmul.f32 %v8848_v36, %v5162_v63 }
 0x520   : > { %v3852_v2 = vmul.f32 %v3846_v56, %v3846_v56  ;;  %v3872_v47 = vmax.f32 %v3869_v3, 3.0  ;;  %v3766_v5 = vsel %vm3763_vm13, %v3760_v7, %v3715_v33  ;;  %v3767_v9 = vmul.f32 0.88622695, %v3764_v11 }
 0x521   : > { %v3853_v26 = vmul.f32 %v3847_v41, %v3847_v41  ;;  %v3873_v42 = vmax.f32 %v3870_v59, 3.0  ;;  %5994 = vpow2.f32 %v3798_v24  ;;  %v3822_v49 = vmul.f32 %v8853_v27, %v5163_v37 }
 0x522   : > { %v3874_v52 = vmax.f32 %v3871_v57, 3.0  ;;  %v3936_v53 = vmul.f32 0.82000196, %v9793_v23  ;;  %v3649_v32 = vmul.f32 %v8835_v35, %v9783_v51  ;;  %v3768_v0 = vmul.f32 0.88622695, %v3765_v40 }
 0x523   : > { %v5991_v22 = vpop.eup %5990  ;;  %v3823_v60 = vmul.f32 %v8857_v4, %v5164_v50  ;;  %v3854_v62 = vmul.f32 1.442695, %v3851_v8  ;;  %v3769_v14 = vmul.f32 0.88622695, %v3766_v5  ;;  %v3824_v25 = vadd.f32 1.4214138, %v3821_v21 }
 0x524   : > { %v3856_v19 = vmul.f32 1.442695, %v3852_v2  ;;  %5996 = vrcp.f32 %v3872_v47  ;;  %v3770_v17 = vmul.f32 %v3767_v9, %v8806_v20  ;;  %v3858_v48 = vmul.f32 1.442695, %v3853_v26 }
 0x525   : > { %5998 = vrcp.f32 %v3873_v42  ;;  %v3937_v12 = vmul.f32 0.82000196, %v6610_v58  ;;  %v3825_v29 = vadd.f32 1.4214138, %v3822_v49  ;;  %v8893_v38 = vadd.f32 %v8838_v31, %v6616_v45 }
 0x526   : > { %6000 = vrcp.f32 %v3874_v52  ;;  %v8896_v35 = vadd.f32 %v3936_v53, %v6618_v54  ;;  %v3475_v63 = vadd.f32 %v8783_v18, %v9796_v1  ;;  %v3771_v56 = vmul.f32 %v3768_v0, %v8816_v16 }
 0x527   : > { %9794 = vst [vmem:[#allocation23_spill] sm:$0xff] %v8893_v38  ;;  %v3826_v3 = vadd.f32 1.4214138, %v3823_v60  ;;  %6002 = vpow2.f32 %v3854_v62  ;;  %v3623_v20 = vmul.f32 0.10744427, %v8821_v6  ;;  %v3772_v33 = vmul.f32 %v3769_v14, %v3649_v32 }
 0x528   : > { %9795 = vst [vmem:[#allocation21_spill] sm:$0xff] %v8896_v35  ;;  %v3827_v24 = vmul.f32 %v8848_v36, %v3824_v25  ;;  %6004 = vpow2.f32 %v3856_v19  ;;  %v5993_v41 = vpop.eup %5992  ;;  %v3624_v31 = vmul.f32 0.10744427, %v8823_v39  ;;  %v3773_v59 = vmul.f32 %v3770_v17, %v3770_v17 }
 0x529   : > { %6006 = vpow2.f32 %v3858_v48  ;;  %v8905_v44 = vadd.f32 %v3937_v12, %v6628_v61  ;;  %v3625_v18 = vmul.f32 0.10744427, %v8827_v46  ;;  %v3828_v16 = vmul.f32 %v8853_v27, %v3825_v29 }
 0x52a   : > { %v3956_v11 = vand.u32 2147483647, %v8893_v38  ;;  %v3957_v6 = vand.u32 2147483647, %v8896_v35  ;;  %v8912_v37 = vadd.f32 %v3623_v20, %v8797_v43  ;;  %v3774_v57 = vmul.f32 %v3771_v56, %v3771_v56 }
 0x52b   : > { %v3829_v7 = vmul.f32 %v8857_v4, %v3826_v3  ;;  %v5995_v39 = vpop.eup %5994  ;;  %v8916_v50 = vadd.f32 %v3624_v31, %v8800_v10  ;;  %v8918_v8 = vadd.f32 %v3625_v18, %v3475_v63  ;;  %v3775_v40 = vmul.f32 %v3772_v33, %v3772_v33 }
 0x52c   : > { %v5165_v46 = vadd.f32 -0.28449672, %v3827_v24  ;;  %v8920_v21 = vmul.f32 0.097618654, %v3773_v59  ;;  %v8923_v2 = vmul.f32 %v5991_v22, %v9761_v15  ;;  %v3941_v47 = vmul.f32 -0.5, %v8893_v38 }
 0x52d   : > { %v3958_v43 = vand.u32 2147483647, %v8905_v44  ;;  %v8928_v9 = vmul.f32 %v5993_v41, %v9784_v34  ;;  %v5166_v26 = vadd.f32 -0.28449672, %v3828_v16  ;;  %v3959_v10 = vmul.f32 0.3275911, %v3956_v11 }
 0x52e   : > { %v5997_v5 = vpop.eup %5996  ;;  %v3960_v42 = vmul.f32 0.3275911, %v3957_v6  ;;  %v8930_v52 = vmul.f32 0.097618654, %v3774_v57  ;;  %v8933_v53 = vmul.f32 %v5995_v39, %v9783_v51  ;;  %v5167_v32 = vadd.f32 -0.28449672, %v3829_v7 }
 0x52f   : > { %v5999_v49 = vpop.eup %5998  ;;  %v3961_v22 = vmul.f32 0.3275911, %v3958_v43  ;;  %v8937_v60 = vmul.f32 0.097618654, %v3775_v40  ;;  %v3833_v62 = vmul.f32 %v8848_v36, %v5165_v46  ;;  %v3962_v14 = vadd.f32 1.0, %v3959_v10 }
 0x530   : > { %v8935_v0 = vpop.eup %6000  ;;  %v3963_v25 = vadd.f32 1.0, %v3960_v42  ;;  %v3878_v17 = vmul.f32 %v5997_v5, %v5997_v5  ;;  %v3995_v12 = vmax.f32 %v8893_v38, 0.0  ;;  %v8942_v29 = vmul.f32 0.88641554, %v9792_v30 }
 0x531   : > { %v6003_v19 = vpop.eup %6002  ;;  %v3964_v48 = vadd.f32 1.0, %v3961_v22  ;;  %v3834_v63 = vmul.f32 %v8853_v27, %v5166_v26  ;;  %v3942_v56 = vmul.f32 -0.5, %v8896_v35  ;;  %v3944_v3 = vmul.f32 %v3941_v47, %v8893_v38 }
 0x532   : > { %v6005_v1 = vpop.eup %6004  ;;  %6008 = vrcp.f32 %v3962_v14  ;;  %v3835_v33 = vmul.f32 %v8857_v4, %v5167_v32  ;;  %v3879_v24 = vmul.f32 %v5999_v49, %v5999_v49  ;;  %v3880_v41 = vmul.f32 %v8935_v0, %v8935_v0 }
 0x533   : > { %v6007_v20 = vpop.eup %6006  ;;  %6010 = vrcp.f32 %v3963_v25  ;;  %v3836_v31 = vadd.f32 0.2548296, %v3833_v62  ;;  %v8950_v59 = vmul.f32 2.0, %v6003_v19  ;;  %v3943_v18 = vmul.f32 -0.5, %v8905_v44 }
 0x534   : > { %6012 = vrcp.f32 %v3964_v48  ;;  %v8953_v16 = vmul.f32 2.0, %v6005_v1  ;;  %v3884_v11 = vmul.f32 0.5, %v3878_v17  ;;  %v3890_v6 = vmul.f32 0.75, %v3878_v17 }
 0x535   : > { %v3899_v57 = vmul.f32 1.875, %v3878_v17  ;;  %v3837_v7 = vadd.f32 0.2548296, %v3834_v63  ;;  %v8955_v39 = vmul.f32 2.0, %v6007_v20  ;;  %v8958_v40 = vmul.f32 %v3942_v56, %v8896_v35 }
 0x536   : > { %v3947_v46 = vmul.f32 1.442695, %v3944_v3  ;;  %v3838_v47 = vadd.f32 0.2548296, %v3835_v33  ;;  %v3885_v43 = vmul.f32 0.5, %v3879_v24  ;;  %v3886_v26 = vmul.f32 0.5, %v3880_v41 }
 0x537   : > { %v3891_v10 = vmul.f32 0.75, %v3879_v24  ;;  %v3839_v42 = vmul.f32 %v8848_v36, %v3836_v31  ;;  %v3892_v32 = vmul.f32 0.75, %v3880_v41  ;;  %v3900_v22 = vmul.f32 1.875, %v3879_v24 }
 0x538   : > { %v8962_v62 = vmul.f32 %v3943_v18, %v8905_v44  ;;  %v3887_v14 = vsub.f32 1.0, %v3884_v11  ;;  %v3893_v25 = vmul.f32 %v3890_v6, %v3878_v17  ;;  %v3901_v19 = vmul.f32 1.875, %v3880_v41 }
 0x539   : > { %v3902_v48 = vmul.f32 %v3899_v57, %v3878_v17  ;;  %v3840_v1 = vmul.f32 %v8853_v27, %v3837_v7  ;;  %vm3848_vm14 = vcmp.gt.f32.partialorder %v8775_v13, 0.0  ;;  %v3881_v63 = vmul.f32 0.5641896, %v5997_v5 }
 0x53a   : > { %v3882_v56 = vmul.f32 0.5641896, %v5999_v49  ;;  %6014 = vpow2.f32 %v3947_v46  ;;  %v3841_v3 = vmul.f32 %v8857_v4, %v3838_v47  ;;  %vm3849_vm15 = vcmp.gt.f32.partialorder %v8779_v55, 0.0 }
 0x53b   : > { %v3888_v36 = vsub.f32 1.0, %v3885_v43  ;;  %v3889_v20 = vsub.f32 1.0, %v3886_v26  ;;  %v3894_v33 = vmul.f32 %v3891_v10, %v3879_v24  ;;  %v3863_v18 = vsub.f32 %v8950_v59, %v3839_v42 }
 0x53c   : > { %v8968_v31 = vpop.eup %6008  ;;  %v3895_v11 = vmul.f32 %v3892_v32, %v3880_v41  ;;  %v3903_v6 = vmul.f32 %v3900_v22, %v3879_v24  ;;  %v3998_v57 = vmin.f32 %v3995_v12, 6.0  ;;  %vm3850_vm0 = vcmp.gt.f32.partialorder %v8786_v28, 0.0 }
 0x53d   : > { %v8971_v27 = vpop.eup %6010  ;;  %v3896_v5 = vadd.f32 %v3893_v25, %v3887_v14  ;;  %v3904_v49 = vmul.f32 %v3901_v19, %v3880_v41  ;;  %v3905_v7 = vmul.f32 %v3902_v48, %v3878_v17  ;;  %v3968_v4 = vmul.f32 1.0614054, %v8968_v31 }
 0x53e   : > { %v8975_v46 = vpop.eup %6012  ;;  %v3864_v47 = vsub.f32 %v8953_v16, %v3840_v1  ;;  %vm3914_vm1 = vcmp.le.f32.partialorder %v8775_v13, -3.0  ;;  %v3969_v59 = vmul.f32 1.0614054, %v8971_v27  ;;  %v3996_v43 = vmax.f32 %v8896_v35, 0.0 }
 0x53f   : > { %v4022_v12 = vsub.f32 0.0, %v8893_v38  ;;  %v3897_v26 = vadd.f32 %v3894_v33, %v3888_v36  ;;  %v3970_v10 = vmul.f32 1.0614054, %v8975_v46  ;;  %v3997_v32 = vmax.f32 %v8905_v44, 0.0 }
 0x540   : > { %v4023_v17 = vsub.f32 0.0, %v8896_v35  ;;  %v3898_v22 = vadd.f32 %v3895_v11, %v3889_v20  ;;  %v3906_v14 = vmul.f32 %v3903_v6, %v3879_v24  ;;  %v5168_v25 = vadd.f32 -1.4531521, %v3968_v4 }
 0x541   : > { %v4004_v19 = vmul.f32 %v3998_v57, %v3998_v57  ;;  %v3907_v16 = vmul.f32 %v3904_v49, %v3880_v41  ;;  %v3908_v48 = vsub.f32 %v3896_v5, %v3905_v7  ;;  %vm3915_vm2 = vcmp.le.f32.partialorder %v8779_v55, -3.0 }
 0x542   : > { %v5169_v51 = vadd.f32 -1.4531521, %v3969_v59  ;;  %v4024_v34 = vsub.f32 0.0, %v8905_v44  ;;  %v3865_v38 = vsub.f32 %v8955_v39, %v3841_v3  ;;  %v3883_v36 = vmul.f32 0.5641896, %v8935_v0 }
 0x543   : > { %v3999_v33 = vmin.f32 %v3996_v43, 6.0  ;;  %v4025_v30 = vmax.f32 %v4022_v12, 3.0  ;;  %v3866_v35 = vsel %vm3848_vm14, %v3863_v18, %v3839_v42  ;;  %v5170_v20 = vadd.f32 -1.4531521, %v3970_v10 }
 0x544   : > { %v4000_v24 = vmin.f32 %v3997_v32, 6.0  ;;  %v4026_v11 = vmax.f32 %v4023_v17, 3.0  ;;  %v6015_v6 = vpop.eup %6014  ;;  %v3867_v41 = vsel %vm3849_vm15, %v3864_v47, %v3840_v1  ;;  %v3909_v57 = vsub.f32 %v3897_v26, %v3906_v14 }
 0x545   : > { %v3974_v5 = vmul.f32 %v8968_v31, %v5168_v25  ;;  %v4007_v49 = vmul.f32 1.442695, %v4004_v19  ;;  %v3910_v7 = vsub.f32 %v3898_v22, %v3907_v16  ;;  %v3911_v39 = vmul.f32 %v3908_v48, %v3881_v63 }
 0x546   : > { %v3975_v0 = vmul.f32 %v8971_v27, %v5169_v51  ;;  %v4027_v4 = vmax.f32 %v4024_v34, 3.0  ;;  %v3868_v59 = vsel %vm3850_vm0, %v3865_v38, %v3841_v3  ;;  %v3949_v42 = vmul.f32 1.442695, %v8958_v40 }
 0x547   : > { %v4005_v18 = vmul.f32 %v3999_v33, %v3999_v33  ;;  %6016 = vrcp.f32 %v4025_v30  ;;  %v3917_v43 = vsel %vm3914_vm1, %v3911_v39, %v3866_v35  ;;  %v3976_v1 = vmul.f32 %v8975_v46, %v5170_v20 }
 0x548   : > { %v4006_v47 = vmul.f32 %v4000_v24, %v4000_v24  ;;  %6018 = vrcp.f32 %v4026_v11  ;;  %v3912_v12 = vmul.f32 %v3909_v57, %v3882_v56  ;;  %v3977_v26 = vadd.f32 1.4214138, %v3974_v5  ;;  %v9797_v57 = vld [vmem:[#allocation11_spill] sm:$0xff] }
 0x549   : > { %6020 = vpow2.f32 %v4007_v49  ;;  %v4089_v51 = vmul.f32 0.88641554, %v9793_v23  ;;  %v3913_v34 = vmul.f32 %v3910_v7, %v3883_v36  ;;  %v3978_v63 = vadd.f32 1.4214138, %v3975_v0 }
 0x54a   : > { %6022 = vrcp.f32 %v4027_v4  ;;  %v4090_v38 = vmul.f32 0.88641554, %v6610_v58  ;;  %vm3916_vm3 = vcmp.le.f32.partialorder %v8786_v28, -3.0  ;;  %v3918_v13 = vsel %vm3915_vm2, %v3912_v12, %v3867_v41 }
 0x54b   : > { %v3920_v30 = vmul.f32 0.88622695, %v3917_v43  ;;  %v4009_v35 = vmul.f32 1.442695, %v4005_v18  ;;  %v9008_v40 = vadd.f32 %v8920_v21, %v8912_v37  ;;  %v3919_v56 = vsel %vm3916_vm3, %v3913_v34, %v3868_v59 }
 0x54c   : > { %v3979_v3 = vadd.f32 1.4214138, %v3976_v1  ;;  %v4011_v10 = vmul.f32 1.442695, %v4006_v47  ;;  %v3951_v32 = vmul.f32 1.442695, %v8962_v62  ;;  %v3980_v17 = vmul.f32 %v8968_v31, %v3977_v26 }
 0x54d   : > { %v9014_v22 = vadd.f32 %v8942_v29, %v6616_v45  ;;  %v9017_v55 = vadd.f32 %v4089_v51, %v6618_v54  ;;  %v3921_v28 = vmul.f32 0.88622695, %v3918_v13  ;;  %6024 = vpow2.f32 %v3949_v42 }
 0x54e   : > { %v3981_v14 = vmul.f32 %v8971_v27, %v3978_v63  ;;  %v9021_v37 = vadd.f32 %v4090_v38, %v6628_v61  ;;  %v9025_v21 = vadd.f32 %v8930_v52, %v8916_v50  ;;  %v3922_v62 = vmul.f32 0.88622695, %v3919_v56 }
 0x54f   : > { %v3923_v25 = vmul.f32 %v3920_v30, %v8923_v2  ;;  %6026 = vpow2.f32 %v4009_v35  ;;  %v9030_v29 = vadd.f32 %v8937_v60, %v8918_v8  ;;  %v9033_v19 = vmul.f32 %v6015_v6, %v9761_v15 }
 0x550   : > { %v3982_v16 = vmul.f32 %v8975_v46, %v3979_v3  ;;  %6028 = vpow2.f32 %v4011_v10  ;;  %v5171_v36 = vadd.f32 -0.28449672, %v3980_v17  ;;  %v4109_v50 = vand.u32 2147483647, %v9014_v22 }
 0x551   : > { %v9036_v48 = vpop.eup %6016  ;;  %6030 = vpow2.f32 %v3951_v32  ;;  %v4110_v52 = vand.u32 2147483647, %v9017_v55  ;;  %v9043_v33 = vmul.f32 %v3921_v28, %v8928_v9  ;;  %v5172_v8 = vadd.f32 -0.28449672, %v3981_v14 }
 0x552   : > { %v9040_v2 = vpop.eup %6018  ;;  %v4094_v60 = vmul.f32 -0.5, %v9014_v22  ;;  %v4111_v20 = vand.u32 2147483647, %v9021_v37  ;;  %v9048_v11 = vmul.f32 %v3922_v62, %v8933_v53  ;;  %v9050_v6 = vmul.f32 %v3923_v25, %v3923_v25 }
 0x553   : > { %v6021_v24 = vpop.eup %6020  ;;  %v4095_v41 = vmul.f32 -0.5, %v9017_v55  ;;  %v9054_v5 = vmul.f32 0.93827456, %v9797_v57  ;;  %v5173_v9 = vadd.f32 -0.28449672, %v3982_v16  ;;  %v4031_v7 = vmul.f32 %v9036_v48, %v9036_v48 }
 0x554   : > { %v9056_v49 = vpop.eup %6022  ;;  %v9061_v39 = vmul.f32 -0.5, %v9021_v37  ;;  %v9064_v0 = vmul.f32 0.93827456, %v9793_v23  ;;  %v3986_v53 = vmul.f32 %v8968_v31, %v5171_v36  ;;  %v4032_v4 = vmul.f32 %v9040_v2, %v9040_v2 }
 0x555   : > { %v4112_v59 = vmul.f32 0.3275911, %v4109_v50  ;;  %v4113_v42 = vmul.f32 0.3275911, %v4110_v52  ;;  %v3987_v18 = vmul.f32 %v8971_v27, %v5172_v8  ;;  %v9070_v43 = vmul.f32 2.0, %v6021_v24 }
 0x556   : > { %v4097_v1 = vmul.f32 %v4094_v60, %v9014_v22  ;;  %v4114_v47 = vmul.f32 0.3275911, %v4111_v20  ;;  %v4033_v12 = vmul.f32 %v9056_v49, %v9056_v49  ;;  %v4098_v26 = vmul.f32 %v4095_v41, %v9017_v55 }
 0x557   : > { %v4115_v51 = vadd.f32 1.0, %v4112_v59  ;;  %v4116_v34 = vadd.f32 1.0, %v4113_v42  ;;  %v9076_v63 = vpop.eup %6024  ;;  %v4037_v38 = vmul.f32 0.5, %v4031_v7  ;;  %v4043_v13 = vmul.f32 0.75, %v4031_v7  ;;  %v9798_v42 = vld [vmem:[#allocation23_spill] sm:$0xff] }
 0x558   : > { %v4052_v30 = vmul.f32 1.875, %v4031_v7  ;;  %v4117_v35 = vadd.f32 1.0, %v4114_v47  ;;  %v3988_v3 = vmul.f32 %v8975_v46, %v5173_v9  ;;  %v3989_v10 = vadd.f32 0.2548296, %v3986_v53 }
 0x559   : > { %v6027_v56 = vpop.eup %6026  ;;  %v4038_v32 = vmul.f32 0.5, %v4032_v4  ;;  %6032 = vrcp.f32 %v4115_v51  ;;  %v3990_v28 = vadd.f32 0.2548296, %v3987_v18  ;;  %v4044_v14 = vmul.f32 0.75, %v4032_v4  ;;  %v9799_v18 = vld [vmem:[#allocation21_spill] sm:$0xff] }
 0x55a   : > { %v6029_v17 = vpop.eup %6028  ;;  %v4053_v62 = vmul.f32 1.875, %v4032_v4  ;;  %6034 = vrcp.f32 %v4116_v34  ;;  %v4039_v16 = vmul.f32 0.5, %v4033_v12  ;;  %v4045_v36 = vmul.f32 0.75, %v4033_v12 }
 0x55b   : > { %v9079_v25 = vpop.eup %6030  ;;  %v4054_v50 = vmul.f32 1.875, %v4033_v12  ;;  %6036 = vrcp.f32 %v4117_v35  ;;  %v4040_v52 = vsub.f32 1.0, %v4037_v38  ;;  %v4046_v8 = vmul.f32 %v4043_v13, %v4031_v7 }
 0x55c   : > { %v4055_v60 = vmul.f32 %v4052_v30, %v4031_v7  ;;  %v4148_v20 = vmax.f32 %v9014_v22, 0.0  ;;  %v3991_v24 = vadd.f32 0.2548296, %v3988_v3  ;;  %v3992_v41 = vmul.f32 %v8968_v31, %v3989_v10 }
 0x55d   : > { %v4014_v9 = vmul.f32 2.0, %v6027_v56  ;;  %v9083_v53 = vmul.f32 2.0, %v6029_v17  ;;  %v3993_v59 = vmul.f32 %v8971_v27, %v3990_v28  ;;  %vm4001_vm4 = vcmp.gt.f32.partialorder %v9798_v42, 0.0 }
 0x55e   : > { %vm4002_vm5 = vcmp.gt.f32.partialorder %v9799_v18, 0.0  ;;  %v4041_v47 = vsub.f32 1.0, %v4038_v32  ;;  %v4047_v51 = vmul.f32 %v4044_v14, %v4032_v4  ;;  %v4056_v34 = vmul.f32 %v4053_v62, %v4032_v4 }
 0x55f   : > { %v4042_v38 = vsub.f32 1.0, %v4039_v16  ;;  %v4048_v13 = vmul.f32 %v4045_v36, %v4033_v12  ;;  %v4057_v30 = vmul.f32 %v4054_v50, %v4033_v12  ;;  %v4149_v35 = vmax.f32 %v9017_v55, 0.0 }
 0x560   : > { %v4049_v3 = vadd.f32 %v4046_v8, %v4040_v52  ;;  %v4058_v23 = vmul.f32 %v4055_v60, %v4031_v7  ;;  %v4150_v31 = vmax.f32 %v9021_v37, 0.0  ;;  %v4151_v56 = vmin.f32 %v4148_v20, 6.0 }
 0x561   : > { %v9092_v27 = vmul.f32 %v9043_v33, %v9043_v33  ;;  %v4034_v10 = vmul.f32 0.5641896, %v9036_v48  ;;  %v4100_v17 = vmul.f32 1.442695, %v4097_v1  ;;  %v4102_v32 = vmul.f32 1.442695, %v4098_v26 }
 0x562   : > { %v3994_v28 = vmul.f32 %v8975_v46, %v3991_v24  ;;  %vm4003_vm6 = vcmp.gt.f32.partialorder %v8905_v44, 0.0  ;;  %v4016_v14 = vsub.f32 %v9070_v43, %v3992_v41  ;;  %v4050_v62 = vadd.f32 %v4047_v51, %v4041_v47 }
 0x563   : > { %v4059_v16 = vmul.f32 %v4056_v34, %v4032_v4  ;;  %vm4067_vm7 = vcmp.le.f32.partialorder %v9798_v42, -3.0  ;;  %v9099_v7 = vpop.eup %6032  ;;  %v4017_v36 = vsub.f32 %v4014_v9, %v3993_v59  ;;  %v4051_v50 = vadd.f32 %v4048_v13, %v4042_v38 }
 0x564   : > { %v4060_v33 = vmul.f32 %v4057_v30, %v4033_v12  ;;  %vm4068_vm8 = vcmp.le.f32.partialorder %v9799_v18, -3.0  ;;  %v4152_v48 = vmin.f32 %v4149_v35, 6.0  ;;  %v9102_v1 = vpop.eup %6034  ;;  %v4061_v26 = vsub.f32 %v4049_v3, %v4058_v23 }
 0x565   : > { %v4121_v46 = vmul.f32 1.0614054, %v9099_v7  ;;  %v4153_v52 = vmin.f32 %v4150_v31, 6.0  ;;  %v4157_v8 = vmul.f32 %v4151_v56, %v4151_v56  ;;  %v9105_v43 = vpop.eup %6036  ;;  %v4035_v4 = vmul.f32 0.5641896, %v9040_v2 }
 0x566   : > { %vm4069_vm9 = vcmp.le.f32.partialorder %v8905_v44, -3.0  ;;  %6038 = vpow2.f32 %v4100_v17  ;;  %v4122_v60 = vmul.f32 1.0614054, %v9102_v1  ;;  %v4175_v12 = vsub.f32 0.0, %v9014_v22 }
 0x567   : > { %v4018_v20 = vsub.f32 %v9083_v53, %v3994_v28  ;;  %v4062_v24 = vsub.f32 %v4050_v62, %v4059_v16  ;;  %v4123_v23 = vmul.f32 1.0614054, %v9105_v43  ;;  %v4176_v9 = vsub.f32 0.0, %v9017_v55 }
 0x568   : > { %v4019_v47 = vsel %vm4001_vm4, %v4016_v14, %v3992_v41  ;;  %v4020_v2 = vsel %vm4002_vm5, %v4017_v36, %v3993_v59  ;;  %v5174_v51 = vadd.f32 -1.4531521, %v4121_v46  ;;  %v4158_v34 = vmul.f32 %v4152_v48, %v4152_v48 }
 0x569   : > { %v4063_v38 = vsub.f32 %v4051_v50, %v4060_v33  ;;  %v4064_v13 = vmul.f32 %v4061_v26, %v4034_v10  ;;  %v4159_v30 = vmul.f32 %v4153_v52, %v4153_v52  ;;  %v4160_v35 = vmul.f32 1.442695, %v4157_v8 }
 0x56a   : > { %v5175_v3 = vadd.f32 -1.4531521, %v4122_v60  ;;  %v5176_v31 = vadd.f32 -1.4531521, %v4123_v23  ;;  %v4177_v53 = vsub.f32 0.0, %v9021_v37  ;;  %v4178_v56 = vmax.f32 %v4175_v12, 3.0 }
 0x56b   : > { %v4036_v17 = vmul.f32 0.5641896, %v9056_v49  ;;  %v4065_v62 = vmul.f32 %v4062_v24, %v4035_v4  ;;  %6040 = vpow2.f32 %v4102_v32  ;;  %v4179_v16 = vmax.f32 %v4176_v9, 3.0 }
 0x56c   : > { %v4021_v41 = vsel %vm4003_vm6, %v4018_v20, %v3994_v28  ;;  %v4070_v59 = vsel %vm4067_vm7, %v4064_v13, %v4019_v47  ;;  %v4127_v10 = vmul.f32 %v9099_v7, %v5174_v51  ;;  %v4162_v14 = vmul.f32 1.442695, %v4158_v34  ;;  %v9800_v47 = vld [vmem:[#allocation19_spill] sm:$0xff]  ;;  %v9801_v51 = vld [vmem:[#allocation20_spill] sm:$0xff] }
 0x56d   : > { %v4066_v36 = vmul.f32 %v4063_v38, %v4036_v17  ;;  %v4071_v50 = vsel %vm4068_vm8, %v4065_v62, %v4020_v2  ;;  %6042 = vpow2.f32 %v4160_v35  ;;  %v4164_v33 = vmul.f32 1.442695, %v4159_v30 }
 0x56e   : > { %v4128_v49 = vmul.f32 %v9102_v1, %v5175_v3  ;;  %v4129_v32 = vmul.f32 %v9105_v43, %v5176_v31  ;;  %v4180_v48 = vmax.f32 %v4177_v53, 3.0  ;;  %6044 = vrcp.f32 %v4178_v56 }
 0x56f   : > { %v4072_v28 = vsel %vm4069_vm9, %v4066_v36, %v4021_v41  ;;  %v4073_v42 = vmul.f32 0.88622695, %v4070_v59  ;;  %v4099_v26 = vmul.f32 %v9061_v39, %v9021_v37  ;;  %6046 = vrcp.f32 %v4179_v16 }
 0x570   : > { %v6039_v46 = vpop.eup %6038  ;;  %v3928_v18 = vmul.f32 %v9048_v11, %v9048_v11  ;;  %v3929_v52 = vmul.f32 0.086190164, %v9050_v6  ;;  %v4130_v8 = vadd.f32 1.4214138, %v4127_v10  ;;  %6048 = vpow2.f32 %v4162_v14 }
 0x571   : > { %v4074_v4 = vmul.f32 0.88622695, %v4071_v50  ;;  %6050 = vpow2.f32 %v4164_v33  ;;  %v4243_v60 = vmul.f32 0.93827456, %v6610_v58  ;;  %v9139_v44 = vadd.f32 %v9054_v5, %v6616_v45 }
 0x572   : > { %v4075_v12 = vmul.f32 0.88622695, %v4072_v28  ;;  %v4131_v20 = vadd.f32 1.4214138, %v4128_v49  ;;  %v4132_v39 = vadd.f32 1.4214138, %v4129_v32  ;;  %6052 = vrcp.f32 %v4180_v48 }
 0x573   : > { %v3930_v24 = vmul.f32 0.086190164, %v9092_v27  ;;  %v4076_v11 = vmul.f32 %v4073_v42, %v9033_v19  ;;  %v4104_v23 = vmul.f32 1.442695, %v4099_v26  ;;  %v9145_v6 = vadd.f32 %v9064_v0, %v6618_v54 }
 0x574   : > { %v3931_v9 = vmul.f32 0.086190164, %v3928_v18  ;;  %v3954_v2 = vmul.f32 %v9076_v63, %v9800_v47  ;;  %v3955_v5 = vmul.f32 %v9079_v25, %v9801_v51  ;;  %v4133_v34 = vmul.f32 %v9099_v7, %v4130_v8 }
 0x575   : > { %v6041_v38 = vpop.eup %6040  ;;  %v9153_v13 = vadd.f32 %v3929_v52, %v9008_v40  ;;  %v9156_v19 = vadd.f32 %v3930_v24, %v9025_v21  ;;  %v9159_v27 = vadd.f32 %v4243_v60, %v6628_v61  ;;  %v4247_v0 = vmul.f32 -0.5, %v9139_v44 }
 0x576   : > { %v4077_v30 = vmul.f32 %v4074_v4, %v3954_v2  ;;  %v4078_v35 = vmul.f32 %v4075_v12, %v3955_v5  ;;  %v4134_v63 = vmul.f32 %v9102_v1, %v4131_v20  ;;  %v4135_v25 = vmul.f32 %v9105_v43, %v4132_v39 }
 0x577   : > { %v6043_v3 = vpop.eup %6042  ;;  %v9165_v31 = vadd.f32 %v3931_v9, %v9030_v29  ;;  %v4079_v40 = vmul.f32 %v4076_v11, %v4076_v11  ;;  %6054 = vpow2.f32 %v4104_v23  ;;  %v4248_v21 = vmul.f32 -0.5, %v9145_v6 }
 0x578   : > { %v6045_v53 = vpop.eup %6044  ;;  %v9169_v56 = vmul.f32 %v6039_v46, %v9761_v15  ;;  %v5177_v17 = vadd.f32 -0.28449672, %v4133_v34  ;;  %v4262_v62 = vand.u32 2147483647, %v9139_v44  ;;  %v4263_v16 = vand.u32 2147483647, %v9145_v6 }
 0x579   : > { %v9173_v41 = vpop.eup %6046  ;;  %v9176_v59 = vmul.f32 %v6041_v38, %v9800_v47  ;;  %v4249_v29 = vmul.f32 -0.5, %v9159_v27  ;;  %v4250_v10 = vmul.f32 %v4247_v0, %v9139_v44  ;;  %v4264_v14 = vand.u32 2147483647, %v9159_v27 }
 0x57a   : > { %v6049_v36 = vpop.eup %6048  ;;  %v9181_v50 = vmul.f32 %v4077_v30, %v4077_v30  ;;  %v9183_v33 = vmul.f32 %v4078_v35, %v4078_v35  ;;  %v5178_v49 = vadd.f32 -0.28449672, %v4134_v63  ;;  %v5179_v32 = vadd.f32 -0.28449672, %v4135_v25 }
 0x57b   : > { %v6051_v48 = vpop.eup %6050  ;;  %v9185_v28 = vmul.f32 0.07334648, %v4079_v40  ;;  %v9187_v42 = vmul.f32 2.0, %v6043_v3  ;;  %v4184_v26 = vmul.f32 %v6045_v53, %v6045_v53  ;;  %v4251_v46 = vmul.f32 %v4248_v21, %v9145_v6 }
 0x57c   : > { %v6053_v18 = vpop.eup %6052  ;;  %v4139_v52 = vmul.f32 %v9099_v7, %v5177_v17  ;;  %v4185_v8 = vmul.f32 %v9173_v41, %v9173_v41  ;;  %v4265_v4 = vmul.f32 0.3275911, %v4262_v62  ;;  %v4266_v60 = vmul.f32 0.3275911, %v4263_v16 }
 0x57d   : > { %v9193_v12 = vmul.f32 2.0, %v6049_v36  ;;  %v9196_v20 = vmul.f32 %v4249_v29, %v9159_v27  ;;  %v4253_v39 = vmul.f32 1.442695, %v4250_v10  ;;  %v4267_v24 = vmul.f32 0.3275911, %v4264_v14 }
 0x57e   : > { %v4140_v11 = vmul.f32 %v9102_v1, %v5178_v49  ;;  %v4141_v23 = vmul.f32 %v9105_v43, %v5179_v32  ;;  %v4268_v9 = vadd.f32 1.0, %v4265_v4  ;;  %v4269_v2 = vadd.f32 1.0, %v4266_v60 }
 0x57f   : > { %v9200_v5 = vmul.f32 2.0, %v6051_v48  ;;  %v4186_v34 = vmul.f32 %v6053_v18, %v6053_v18  ;;  %v4190_v38 = vmul.f32 0.5, %v4184_v26  ;;  %v4270_v0 = vadd.f32 1.0, %v4267_v24 }
 0x580   : > { %v4142_v30 = vadd.f32 0.2548296, %v4139_v52  ;;  %v4191_v35 = vmul.f32 0.5, %v4185_v8  ;;  %v4196_v63 = vmul.f32 0.75, %v4184_v26  ;;  %6056 = vrcp.f32 %v4268_v9 }
 0x581   : > { %v9202_v25 = vpop.eup %6054  ;;  %v4197_v3 = vmul.f32 0.75, %v4185_v8  ;;  %v4205_v40 = vmul.f32 1.875, %v4184_v26  ;;  %v4206_v21 = vmul.f32 1.875, %v4185_v8  ;;  %6058 = vrcp.f32 %v4269_v2 }
 0x582   : > { %v4143_v17 = vadd.f32 0.2548296, %v4140_v11  ;;  %v4144_v62 = vadd.f32 0.2548296, %v4141_v23  ;;  %v4255_v16 = vmul.f32 1.442695, %v4251_v46  ;;  %6060 = vrcp.f32 %v4270_v0 }
 0x583   : > { %v9204_v29 = vmul.f32 0.5641896, %v6045_v53  ;;  %v4192_v10 = vmul.f32 0.5, %v4186_v34  ;;  %v4198_v14 = vmul.f32 0.75, %v4186_v34  ;;  %v4207_v36 = vmul.f32 1.875, %v4186_v34 }
 0x584   : > { %v4145_v49 = vmul.f32 %v9099_v7, %v4142_v30  ;;  %v4193_v32 = vsub.f32 1.0, %v4190_v38  ;;  %v4194_v48 = vsub.f32 1.0, %v4191_v35  ;;  %6062 = vpow2.f32 %v4253_v39 }
 0x585   : > { %v4199_v52 = vmul.f32 %v4196_v63, %v4184_v26  ;;  %v4200_v4 = vmul.f32 %v4197_v3, %v4185_v8  ;;  %v4208_v60 = vmul.f32 %v4205_v40, %v4184_v26  ;;  %v4209_v24 = vmul.f32 %v4206_v21, %v4185_v8 }
 0x586   : > { %v4146_v9 = vmul.f32 %v9102_v1, %v4143_v17  ;;  %v4147_v11 = vmul.f32 %v9105_v43, %v4144_v62  ;;  %v4301_v46 = vmax.f32 %v9139_v44, 0.0  ;;  %v4328_v53 = vsub.f32 0.0, %v9139_v44 }
 0x587   : > { %vm4154_vm10 = vcmp.gt.f32.partialorder %v9014_v22, 0.0  ;;  %v4195_v23 = vsub.f32 1.0, %v4192_v10  ;;  %v4201_v2 = vmul.f32 %v4198_v14, %v4186_v34  ;;  %v4210_v7 = vmul.f32 %v4207_v36, %v4186_v34 }
 0x588   : > { %v4329_v38 = vsub.f32 0.0, %v9145_v6  ;;  %vm4155_vm11 = vcmp.gt.f32.partialorder %v9017_v55, 0.0  ;;  %v4169_v39 = vsub.f32 %v9187_v42, %v4145_v49  ;;  %v4188_v0 = vmul.f32 0.5641896, %v9173_v41 }
 0x589   : > { %v4189_v1 = vmul.f32 0.5641896, %v6053_v18  ;;  %v4330_v43 = vsub.f32 0.0, %v9159_v27  ;;  %v4202_v30 = vadd.f32 %v4199_v52, %v4193_v32  ;;  %v4203_v35 = vadd.f32 %v4200_v4, %v4194_v48 }
 0x58a   : > { %v4211_v63 = vmul.f32 %v4208_v60, %v4184_v26  ;;  %v4212_v3 = vmul.f32 %v4209_v24, %v4185_v8  ;;  %v9217_v40 = vpop.eup %6056  ;;  %vm4156_vm12 = vcmp.gt.f32.partialorder %v9021_v37, 0.0  ;;  %v4170_v21 = vsub.f32 %v9193_v12, %v4146_v9 }
 0x58b   : > { %v4171_v17 = vsub.f32 %v9200_v5, %v4147_v11  ;;  %vm4220_vm13 = vcmp.le.f32.partialorder %v9014_v22, -3.0  ;;  %v4304_v42 = vmin.f32 %v4301_v46, 6.0  ;;  %v4331_v62 = vmax.f32 %v4328_v53, 3.0  ;;  %v9223_v41 = vpop.eup %6058 }
 0x58c   : > { %v4204_v18 = vadd.f32 %v4201_v2, %v4195_v23  ;;  %v4213_v10 = vmul.f32 %v4210_v7, %v4186_v34  ;;  %v4274_v14 = vmul.f32 1.0614054, %v9217_v40  ;;  %v4332_v26 = vmax.f32 %v4329_v38, 3.0  ;;  %v9226_v8 = vpop.eup %6060 }
 0x58d   : > { %6064 = vpow2.f32 %v4255_v16  ;;  %v4275_v36 = vmul.f32 1.0614054, %v9223_v41  ;;  %v4302_v12 = vmax.f32 %v9145_v6, 0.0  ;;  %v4333_v32 = vmax.f32 %v4330_v43, 3.0 }
 0x58e   : > { %v4214_v5 = vsub.f32 %v4202_v30, %v4211_v63  ;;  %v4215_v48 = vsub.f32 %v4203_v35, %v4212_v3  ;;  %v4276_v52 = vmul.f32 1.0614054, %v9226_v8  ;;  %v5180_v4 = vadd.f32 -1.4531521, %v4274_v14  ;;  %v6063_v60 = vpop.eup %6062 }
 0x58f   : > { %v5181_v24 = vadd.f32 -1.4531521, %v4275_v36  ;;  %v4303_v34 = vmax.f32 %v9159_v27, 0.0  ;;  %v4310_v46 = vmul.f32 %v4304_v42, %v4304_v42  ;;  %6066 = vrcp.f32 %v4331_v62  ;;  %v9802_v36 = vld [vmem:[#allocation12_spill] sm:$0xff] }
 0x590   : > { %v4216_v53 = vsub.f32 %v4204_v18, %v4213_v10  ;;  %v5182_v23 = vadd.f32 -1.4531521, %v4276_v52  ;;  %v4280_v16 = vmul.f32 %v9217_v40, %v5180_v4  ;;  %6068 = vrcp.f32 %v4332_v26 }
 0x591   : > { %v4172_v2 = vsel %vm4154_vm10, %v4169_v39, %v4145_v49  ;;  %v4281_v7 = vmul.f32 %v9223_v41, %v5181_v24  ;;  %v4305_v38 = vmin.f32 %v4302_v12, 6.0  ;;  %6070 = vrcp.f32 %v4333_v32 }
 0x592   : > { %v4173_v43 = vsel %vm4155_vm11, %v4170_v21, %v4146_v9  ;;  %v4217_v30 = vmul.f32 %v4214_v5, %v9204_v29  ;;  %v4282_v35 = vmul.f32 %v9226_v8, %v5182_v23  ;;  %v4283_v63 = vadd.f32 1.4214138, %v4280_v16 }
 0x593   : > { %v4218_v3 = vmul.f32 %v4215_v48, %v4188_v0  ;;  %v4284_v42 = vadd.f32 1.4214138, %v4281_v7  ;;  %v4306_v62 = vmin.f32 %v4303_v34, 6.0  ;;  %v4313_v18 = vmul.f32 1.442695, %v4310_v46 }
 0x594   : > { %v4174_v10 = vsel %vm4156_vm12, %v4171_v17, %v4147_v11  ;;  %v4219_v49 = vmul.f32 %v4216_v53, %v4189_v1  ;;  %vm4221_vm14 = vcmp.le.f32.partialorder %v9017_v55, -3.0  ;;  %v4223_v39 = vsel %vm4220_vm13, %v4217_v30, %v4172_v2 }
 0x595   : > { %v4224_v14 = vsel %vm4221_vm14, %v4218_v3, %v4173_v43  ;;  %v4285_v9 = vadd.f32 1.4214138, %v4282_v35  ;;  %v4286_v29 = vmul.f32 %v9217_v40, %v4283_v63  ;;  %v4311_v21 = vmul.f32 %v4305_v38, %v4305_v38  ;;  %v9276_v38 = vpop.f32.mrb[4].mxu1 }
 0x596   : > { %vm4222_vm15 = vcmp.le.f32.partialorder %v9021_v37, -3.0  ;;  %v4287_v0 = vmul.f32 %v9223_v41, %v4284_v42  ;;  %v4394_v26 = vmul.f32 0.9747286, %v9797_v57  ;;  %v4395_v12 = vmul.f32 0.9747286, %v9802_v36  ;;  %9803 = vst [vmem:[#allocation24_spill] sm:$0xff] %v9276_v38 }
 0x597   : > { %v6065_v11 = vpop.eup %6064  ;;  %v4225_v1 = vsel %vm4222_vm15, %v4219_v49, %v4174_v10  ;;  %v4257_v55 = vmul.f32 1.442695, %v9196_v20  ;;  %v4312_v17 = vmul.f32 %v4306_v62, %v4306_v62  ;;  %6072 = vpow2.f32 %v4313_v18 }
 0x598   : > { %v4108_v22 = vmul.f32 %v9202_v25, %v9801_v51  ;;  %v4226_v32 = vmul.f32 0.88622695, %v4223_v39  ;;  %v4227_v5 = vmul.f32 0.88622695, %v4224_v14  ;;  %v4396_v48 = vmul.f32 0.9747286, %v6610_v58 }
 0x599   : > { %v9254_v37 = vpop.eup %6066  ;;  %v9257_v52 = vmul.f32 0.07334648, %v9181_v50  ;;  %v4288_v4 = vmul.f32 %v9226_v8, %v4285_v9  ;;  %v5183_v24 = vadd.f32 -0.28449672, %v4286_v29  ;;  %v4315_v34 = vmul.f32 1.442695, %v4311_v21 }
 0x59a   : > { %v9260_v46 = vpop.eup %6068  ;;  %v9263_v20 = vmul.f32 0.07334648, %v9183_v33  ;;  %v4228_v53 = vmul.f32 0.88622695, %v4225_v1  ;;  %v9266_v25 = vmul.f32 %v6063_v60, %v9761_v15  ;;  %v5184_v23 = vadd.f32 -0.28449672, %v4287_v0 }
 0x59b   : > { %v9268_v16 = vpop.eup %6070  ;;  %6074 = vpow2.f32 %v4257_v55  ;;  %v4317_v2 = vmul.f32 1.442695, %v4312_v17  ;;  %v9271_v50 = vadd.f32 %v4394_v26, %v6616_v45  ;;  %v9274_v7 = vadd.f32 %v4395_v12, %v6618_v54 }
 0x59c   : > { %v9279_v33 = vmul.f32 %v4226_v32, %v9169_v56  ;;  %v9282_v43 = vmul.f32 %v4227_v5, %v9176_v59  ;;  %v9286_v60 = vmul.f32 %v9254_v37, %v9254_v37  ;;  %v9289_v30 = vadd.f32 %v4396_v48, %v6628_v61 }
 0x59d   : > { %v5185_v35 = vadd.f32 -0.28449672, %v4288_v4  ;;  %v4292_v63 = vmul.f32 %v9217_v40, %v5183_v24  ;;  %6076 = vpow2.f32 %v4315_v34  ;;  %v9294_v3 = vmul.f32 %v9260_v46, %v9260_v46  ;;  %v9323_v24 = vpop.f32.mrb[5].mxu1 }
 0x59e   : > { %v9296_v56 = vmul.f32 %v4228_v53, %v4108_v22  ;;  %v9299_v59 = vmul.f32 %v6065_v11, %v9800_v47  ;;  %v4293_v42 = vmul.f32 %v9223_v41, %v5184_v23  ;;  %v9304_v62 = vmul.f32 %v9268_v16, %v9268_v16  ;;  %9804 = vst [vmem:[#allocation22_spill] sm:$0xff] %v9323_v24 }
 0x59f   : > { %6078 = vpow2.f32 %v4317_v2  ;;  %v4400_v18 = vmul.f32 -0.5, %v9271_v50  ;;  %v4415_v10 = vand.u32 2147483647, %v9271_v50  ;;  %v4416_v49 = vand.u32 2147483647, %v9274_v7 }
 0x5a0   : > { %v4343_v39 = vmul.f32 0.5, %v9286_v60  ;;  %v4401_v14 = vmul.f32 -0.5, %v9274_v7  ;;  %v9312_v9 = vmul.f32 -0.5, %v9289_v30  ;;  %v4417_v29 = vand.u32 2147483647, %v9289_v30 }
 0x5a1   : > { %v6073_v21 = vpop.eup %6072  ;;  %v4294_v0 = vmul.f32 %v9226_v8, %v5185_v35  ;;  %v4295_v26 = vadd.f32 0.2548296, %v4292_v63  ;;  %v4344_v12 = vmul.f32 0.5, %v9294_v3  ;;  %v4349_v11 = vmul.f32 0.75, %v9286_v60  ;;  %v9329_v35 = vpop.f32.mrb[6].mxu1 }
 0x5a2   : > { %v4296_v1 = vadd.f32 0.2548296, %v4293_v42  ;;  %v4345_v55 = vmul.f32 0.5, %v9304_v62  ;;  %v4350_v17 = vmul.f32 0.75, %v9294_v3  ;;  %v4358_v22 = vmul.f32 1.875, %v9286_v60  ;;  %9805 = vst [vmem:[#allocation11_spill] sm:$0xff] %v9329_v35 }
 0x5a3   : > { %v4359_v32 = vmul.f32 1.875, %v9294_v3  ;;  %v4403_v5 = vmul.f32 %v4400_v18, %v9271_v50  ;;  %v4418_v48 = vmul.f32 0.3275911, %v4415_v10  ;;  %v4419_v4 = vmul.f32 0.3275911, %v4416_v49  ;;  %v9333_v18 = vpop.f32.mrb[7].mxu1 }
 0x5a4   : > { %v9325_v34 = vmul.f32 2.0, %v6073_v21  ;;  %v4351_v53 = vmul.f32 0.75, %v9304_v62  ;;  %v4360_v23 = vmul.f32 1.875, %v9304_v62  ;;  %v4420_v2 = vmul.f32 0.3275911, %v4417_v29 }
 0x5a5   : > { %v9331_v63 = vpop.eup %6074  ;;  %v4297_v42 = vadd.f32 0.2548296, %v4294_v0  ;;  %v4346_v38 = vsub.f32 1.0, %v4343_v39  ;;  %v4421_v47 = vadd.f32 1.0, %v4418_v48  ;;  %v4422_v61 = vadd.f32 1.0, %v4419_v4 }
 0x5a6   : > { %v4347_v10 = vsub.f32 1.0, %v4344_v12  ;;  %v4352_v49 = vmul.f32 %v4349_v11, %v9286_v60  ;;  %v4361_v21 = vmul.f32 %v4358_v22, %v9286_v60  ;;  %v4423_v24 = vadd.f32 1.0, %v4420_v2 }
 0x5a7   : > { %v6077_v15 = vpop.eup %6076  ;;  %v4348_v54 = vsub.f32 1.0, %v4345_v55  ;;  %v4353_v29 = vmul.f32 %v4350_v17, %v9294_v3  ;;  %v4362_v35 = vmul.f32 %v4359_v32, %v9294_v3  ;;  %6080 = vrcp.f32 %v4421_v47 }
 0x5a8   : > { %vm4307_vm0 = vcmp.gt.f32.partialorder %v9139_v44, 0.0  ;;  %vm4308_vm1 = vcmp.gt.f32.partialorder %v9145_v6, 0.0  ;;  %v4354_v39 = vmul.f32 %v4351_v53, %v9304_v62  ;;  %v4363_v0 = vmul.f32 %v4360_v23, %v9304_v62 }
 0x5a9   : > { %6082 = vrcp.f32 %v4422_v61  ;;  %v4454_v12 = vmax.f32 %v9271_v50, 0.0  ;;  %v6079_v11 = vpop.eup %6078  ;;  %v4298_v22 = vmul.f32 %v9217_v40, %v4295_v26  ;;  %v4299_v55 = vmul.f32 %v9223_v41, %v4296_v1 }
 0x5aa   : > { %v4404_v17 = vmul.f32 %v4401_v14, %v9274_v7  ;;  %6084 = vrcp.f32 %v4423_v24  ;;  %vm4309_vm2 = vcmp.gt.f32.partialorder %v9159_v27, 0.0  ;;  %v4320_v47 = vmul.f32 2.0, %v6077_v15 }
 0x5ab   : > { %v4355_v32 = vadd.f32 %v4352_v49, %v4346_v38  ;;  %v4364_v48 = vmul.f32 %v4361_v21, %v9286_v60  ;;  %v4455_v4 = vmax.f32 %v9274_v7, 0.0  ;;  %v4300_v61 = vmul.f32 %v9226_v8, %v4297_v42 }
 0x5ac   : > { %v4356_v53 = vadd.f32 %v4353_v29, %v4347_v10  ;;  %v4365_v23 = vmul.f32 %v4362_v35, %v9294_v3  ;;  %vm4373_vm3 = vcmp.le.f32.partialorder %v9139_v44, -3.0  ;;  %v4406_v40 = vmul.f32 1.442695, %v4403_v5 }
 0x5ad   : > { %v4357_v41 = vadd.f32 %v4354_v39, %v4348_v54  ;;  %v4366_v14 = vmul.f32 %v4363_v0, %v9304_v62  ;;  %v4456_v26 = vmax.f32 %v9289_v30, 0.0  ;;  %v4457_v1 = vmin.f32 %v4454_v12, 6.0 }
 0x5ae   : > { %v4321_v15 = vmul.f32 2.0, %v6079_v11  ;;  %v4322_v38 = vsub.f32 %v9325_v34, %v4298_v22  ;;  %v4323_v60 = vsub.f32 %v4320_v47, %v4299_v55  ;;  %v4408_v24 = vmul.f32 1.442695, %v4404_v17 }
 0x5af   : > { %v4367_v2 = vsub.f32 %v4355_v32, %v4364_v48  ;;  %vm4374_vm4 = vcmp.le.f32.partialorder %v9145_v6, -3.0  ;;  %v4405_v8 = vmul.f32 %v9312_v9, %v9289_v30  ;;  %v4458_v3 = vmin.f32 %v4455_v4, 6.0 }
 0x5b0   : > { %v4324_v35 = vsub.f32 %v4321_v15, %v4300_v61  ;;  %v4340_v54 = vmul.f32 0.5641896, %v9254_v37  ;;  %v4368_v5 = vsub.f32 %v4356_v53, %v4365_v23  ;;  %6086 = vpow2.f32 %v4406_v40 }
 0x5b1   : > { %v4341_v62 = vmul.f32 0.5641896, %v9260_v46  ;;  %v4369_v42 = vsub.f32 %v4357_v41, %v4366_v14  ;;  %v4459_v10 = vmin.f32 %v4456_v26, 6.0  ;;  %v4463_v49 = vmul.f32 %v4457_v1, %v4457_v1  ;;  %v9361_v34 = vpop.eup %6080 }
 0x5b2   : > { %v4325_v21 = vsel %vm4307_vm0, %v4322_v38, %v4298_v22  ;;  %v4326_v29 = vsel %vm4308_vm1, %v4323_v60, %v4299_v55  ;;  %v4342_v9 = vmul.f32 0.5641896, %v9268_v16  ;;  %6088 = vpow2.f32 %v4408_v24 }
 0x5b3   : > { %v9368_v39 = vpop.eup %6082  ;;  %v4370_v37 = vmul.f32 %v4367_v2, %v4340_v54  ;;  %v4410_v0 = vmul.f32 1.442695, %v4405_v8  ;;  %v4427_v46 = vmul.f32 1.0614054, %v9361_v34  ;;  %v4464_v12 = vmul.f32 %v4458_v3, %v4458_v3 }
 0x5b4   : > { %v9371_v11 = vpop.eup %6084  ;;  %v4327_v17 = vsel %vm4309_vm2, %v4324_v35, %v4300_v61  ;;  %v4371_v47 = vmul.f32 %v4368_v5, %v4341_v62  ;;  %v4428_v22 = vmul.f32 1.0614054, %v9368_v39  ;;  %v4481_v55 = vsub.f32 0.0, %v9271_v50 }
 0x5b5   : > { %v4372_v32 = vmul.f32 %v4369_v42, %v4342_v9  ;;  %v4376_v16 = vsel %vm4373_vm3, %v4370_v37, %v4325_v21  ;;  %v4465_v48 = vmul.f32 %v4459_v10, %v4459_v10  ;;  %v4466_v4 = vmul.f32 1.442695, %v4463_v49 }
 0x5b6   : > { %v4377_v53 = vsel %vm4374_vm4, %v4371_v47, %v4326_v29  ;;  %v4429_v23 = vmul.f32 1.0614054, %v9371_v11  ;;  %v5186_v40 = vadd.f32 -1.4531521, %v4427_v46  ;;  %v4482_v41 = vsub.f32 0.0, %v9274_v7 }
 0x5b7   : > { %vm4375_vm5 = vcmp.le.f32.partialorder %v9159_v27, -3.0  ;;  %6090 = vpow2.f32 %v4410_v0  ;;  %v4468_v61 = vmul.f32 1.442695, %v4464_v12  ;;  %v4547_v14 = vmul.f32 0.9951872, %v9797_v57 }
 0x5b8   : > { %v4378_v26 = vsel %vm4375_vm5, %v4372_v32, %v4327_v17  ;;  %v5187_v1 = vadd.f32 -1.4531521, %v4428_v22  ;;  %v4483_v44 = vsub.f32 0.0, %v9289_v30  ;;  %v4484_v15 = vmax.f32 %v4481_v55, 3.0  ;;  %v9806_v55 = vld [vmem:[#allocation13_spill] sm:$0xff] }
 0x5b9   : > { %v4232_v6 = vmul.f32 %v9279_v33, %v9279_v33  ;;  %v4379_v38 = vmul.f32 0.88622695, %v4376_v16  ;;  %v4380_v60 = vmul.f32 0.88622695, %v4377_v53  ;;  %v4470_v24 = vmul.f32 1.442695, %v4465_v48 }
 0x5ba   : > { %v6087_v2 = vpop.eup %6086  ;;  %v5188_v8 = vadd.f32 -1.4531521, %v4429_v23  ;;  %v4433_v3 = vmul.f32 %v9361_v34, %v5186_v40  ;;  %6092 = vpow2.f32 %v4466_v4  ;;  %v4485_v27 = vmax.f32 %v4482_v41, 3.0  ;;  %v9807_v53 = vld [vmem:[#allocation18_spill] sm:$0xff] }
 0x5bb   : > { %v4233_v35 = vmul.f32 %v9282_v43, %v9282_v43  ;;  %v4234_v54 = vmul.f32 %v9296_v56, %v9296_v56  ;;  %v4381_v5 = vmul.f32 0.88622695, %v4378_v26  ;;  %6094 = vpow2.f32 %v4468_v61  ;;  %v9808_v41 = vld [vmem:[#allocation14_spill] sm:$0xff] }
 0x5bc   : > { %v6089_v62 = vpop.eup %6088  ;;  %v4261_v33 = vmul.f32 %v9331_v63, %v9801_v51  ;;  %v4434_v42 = vmul.f32 %v9368_v39, %v5187_v1  ;;  %v4486_v10 = vmax.f32 %v4483_v44, 3.0  ;;  %6096 = vrcp.f32 %v4484_v15  ;;  %v9809_v1 = vld [vmem:[#allocation19_spill] sm:$0xff] }
 0x5bd   : > { %v4382_v49 = vmul.f32 %v4379_v38, %v9266_v25  ;;  %v4383_v21 = vmul.f32 %v4380_v60, %v9299_v59  ;;  %6098 = vpow2.f32 %v4470_v24  ;;  %v4548_v43 = vmul.f32 0.9951872, %v9802_v36 }
 0x5be   : > { %v4435_v29 = vmul.f32 %v9371_v11, %v5188_v8  ;;  %v4436_v56 = vadd.f32 1.4214138, %v4433_v3  ;;  %6100 = vrcp.f32 %v4485_v27  ;;  %v9401_v9 = vadd.f32 %v4547_v14, %v6616_v45 }
 0x5bf   : > { %v4085_v63 = vadd.f32 %v9185_v28, %v9153_v13  ;;  %v4086_v37 = vadd.f32 %v9257_v52, %v9156_v19  ;;  %v4087_v25 = vadd.f32 %v9263_v20, %v9165_v31  ;;  %v4384_v59 = vmul.f32 %v4381_v5, %v4261_v33 }
 0x5c0   : > { %v4235_v0 = vmul.f32 0.059298586, %v4232_v6  ;;  %v4437_v46 = vadd.f32 1.4214138, %v4434_v42  ;;  %6102 = vrcp.f32 %v4486_v10  ;;  %v4549_v12 = vmul.f32 0.9951872, %v6610_v58 }
 0x5c1   : > { %v6091_v17 = vpop.eup %6090  ;;  %v4236_v47 = vmul.f32 0.059298586, %v4233_v35  ;;  %v4237_v22 = vmul.f32 0.059298586, %v4234_v54  ;;  %v4385_v45 = vmul.f32 %v4382_v49, %v4382_v49  ;;  %v9411_v32 = vadd.f32 %v4548_v43, %v9806_v55 }
 0x5c2   : > { %v4386_v13 = vmul.f32 %v4383_v21, %v4383_v21  ;;  %v4438_v28 = vadd.f32 1.4214138, %v4435_v29  ;;  %v4439_v19 = vmul.f32 %v9361_v34, %v4436_v56  ;;  %v4553_v52 = vmul.f32 -0.5, %v9401_v9 }
 0x5c3   : > { %v4238_v31 = vadd.f32 %v4235_v0, %v4085_v63  ;;  %v4239_v20 = vadd.f32 %v4236_v47, %v4086_v37  ;;  %v4387_v16 = vmul.f32 %v4384_v59, %v4384_v59  ;;  %v9415_v4 = vadd.f32 %v4237_v22, %v4087_v25 }
 0x5c4   : > { %v6093_v48 = vpop.eup %6092  ;;  %v9418_v23 = vmul.f32 %v6087_v2, %v9807_v53  ;;  %v4440_v40 = vmul.f32 %v9368_v39, %v4437_v46  ;;  %v9422_v61 = vadd.f32 %v4549_v12, %v9808_v41  ;;  %v4388_v26 = vmul.f32 0.044277437, %v4385_v45 }
 0x5c5   : > { %v6095_v14 = vpop.eup %6094  ;;  %v9425_v44 = vmul.f32 %v6089_v62, %v9809_v1  ;;  %v9428_v15 = vmul.f32 %v6091_v17, %v9801_v51  ;;  %v4554_v6 = vmul.f32 -0.5, %v9411_v32  ;;  %v4389_v60 = vmul.f32 0.044277437, %v4386_v13 }
 0x5c6   : > { %v6097_v38 = vpop.eup %6096  ;;  %v4441_v24 = vmul.f32 %v9371_v11, %v4438_v28  ;;  %v5189_v2 = vadd.f32 -0.28449672, %v4439_v19  ;;  %v4556_v8 = vmul.f32 %v4553_v52, %v9401_v9  ;;  %v9433_v27 = vmul.f32 0.044277437, %v4387_v16 }
 0x5c7   : > { %v6099_v3 = vpop.eup %6098  ;;  %v9435_v35 = vadd.f32 %v4388_v26, %v4238_v31  ;;  %v4568_v54 = vand.u32 2147483647, %v9401_v9  ;;  %v4569_v5 = vand.u32 2147483647, %v9411_v32  ;;  %v9439_v33 = vadd.f32 %v4389_v60, %v4239_v20 }
 0x5c8   : > { %v6101_v62 = vpop.eup %6100  ;;  %v5190_v42 = vadd.f32 -0.28449672, %v4440_v40  ;;  %v4555_v10 = vmul.f32 -0.5, %v9422_v61  ;;  %v4607_v49 = vmax.f32 %v9401_v9, 0.0  ;;  %v9443_v21 = vmul.f32 2.0, %v6093_v48 }
 0x5c9   : > { %v9445_v43 = vmul.f32 2.0, %v6095_v14  ;;  %v9447_v29 = vmul.f32 %v6097_v38, %v6097_v38  ;;  %v9450_v56 = vmul.f32 %v4554_v6, %v9411_v32  ;;  %v5191_v37 = vadd.f32 -0.28449672, %v4441_v24 }
 0x5ca   : > { %v6103_v63 = vpop.eup %6102  ;;  %v4445_v25 = vmul.f32 %v9361_v34, %v5189_v2  ;;  %v4559_v59 = vmul.f32 1.442695, %v4556_v8  ;;  %v4570_v0 = vand.u32 2147483647, %v9422_v61  ;;  %v9454_v46 = vmul.f32 2.0, %v6099_v3 }
 0x5cb   : > { %v9456_v12 = vmul.f32 %v6101_v62, %v6101_v62  ;;  %v4571_v17 = vmul.f32 0.3275911, %v4568_v54  ;;  %v4572_v47 = vmul.f32 0.3275911, %v4569_v5  ;;  %v4446_v22 = vmul.f32 %v9368_v39, %v5190_v42 }
 0x5cc   : > { %v9459_v45 = vmul.f32 0.5641896, %v6097_v38  ;;  %v9462_v55 = vmul.f32 %v4555_v10, %v9422_v61  ;;  %v4573_v13 = vmul.f32 0.3275911, %v4570_v0  ;;  %v9464_v28 = vmul.f32 %v6103_v63, %v6103_v63 }
 0x5cd   : > { %v4496_v19 = vmul.f32 0.5, %v9447_v29  ;;  %v4574_v52 = vadd.f32 1.0, %v4571_v17  ;;  %v4575_v31 = vadd.f32 1.0, %v4572_v47  ;;  %v4447_v20 = vmul.f32 %v9371_v11, %v5191_v37 }
 0x5ce   : > { %v4448_v16 = vadd.f32 0.2548296, %v4445_v25  ;;  %6104 = vpow2.f32 %v4559_v59  ;;  %v4576_v48 = vadd.f32 1.0, %v4573_v13  ;;  %v9468_v40 = vmul.f32 0.5641896, %v6101_v62 }
 0x5cf   : > { %v9470_v41 = vmul.f32 0.5641896, %v6103_v63  ;;  %v4497_v14 = vmul.f32 0.5, %v9456_v12  ;;  %6106 = vrcp.f32 %v4574_v52  ;;  %v4449_v26 = vadd.f32 0.2548296, %v4446_v22 }
 0x5d0   : > { %v4502_v6 = vmul.f32 0.75, %v9447_v29  ;;  %6108 = vrcp.f32 %v4575_v31  ;;  %v4608_v38 = vmax.f32 %v9411_v32, 0.0  ;;  %v4498_v60 = vmul.f32 0.5, %v9464_v28 }
 0x5d1   : > { %v4499_v24 = vsub.f32 1.0, %v4496_v19  ;;  %6110 = vrcp.f32 %v4576_v48  ;;  %v4609_v2 = vmax.f32 %v9422_v61, 0.0  ;;  %v4450_v8 = vadd.f32 0.2548296, %v4447_v20 }
 0x5d2   : > { %v9478_v3 = vmul.f32 %v9361_v34, %v4448_v16  ;;  %v4503_v54 = vmul.f32 0.75, %v9456_v12  ;;  %v4511_v5 = vmul.f32 1.875, %v9447_v29  ;;  %v4500_v62 = vsub.f32 1.0, %v4497_v14 }
 0x5d3   : > { %v4504_v42 = vmul.f32 0.75, %v9464_v28  ;;  %v4512_v10 = vmul.f32 1.875, %v9456_v12  ;;  %v4610_v63 = vmin.f32 %v4607_v49, 6.0  ;;  %v9485_v37 = vmul.f32 %v9368_v39, %v4449_v26 }
 0x5d4   : > { %v4611_v25 = vmin.f32 %v4608_v38, 6.0  ;;  %v4634_v59 = vsub.f32 0.0, %v9401_v9  ;;  %v4635_v0 = vsub.f32 0.0, %v9411_v32  ;;  %v4501_v34 = vsub.f32 1.0, %v4498_v60 }
 0x5d5   : > { %v4505_v17 = vmul.f32 %v4502_v6, %v9447_v29  ;;  %v4513_v47 = vmul.f32 1.875, %v9464_v28  ;;  %v4612_v22 = vmin.f32 %v4609_v2, 6.0  ;;  %v4453_v13 = vmul.f32 %v9371_v11, %v4450_v8 }
 0x5d6   : > { %v4475_v19 = vsub.f32 %v9443_v21, %v9478_v3  ;;  %v4506_v49 = vmul.f32 %v4503_v54, %v9456_v12  ;;  %v4514_v39 = vmul.f32 %v4511_v5, %v9447_v29  ;;  %v4507_v52 = vmul.f32 %v4504_v42, %v9464_v28 }
 0x5d7   : > { %v4515_v31 = vmul.f32 %v4512_v10, %v9456_v12  ;;  %v4616_v20 = vmul.f32 %v4610_v63, %v4610_v63  ;;  %v4636_v16 = vsub.f32 0.0, %v9422_v61  ;;  %vm4460_vm6 = vcmp.gt.f32.partialorder %v9271_v50, 0.0 }
 0x5d8   : > { %v6105_v48 = vpop.eup %6104  ;;  %v4476_v11 = vsub.f32 %v9445_v43, %v9485_v37  ;;  %v4617_v14 = vmul.f32 %v4611_v25, %v4611_v25  ;;  %v4637_v26 = vmax.f32 %v4634_v59, 3.0  ;;  %v4638_v21 = vmax.f32 %v4635_v0, 3.0 }
 0x5d9   : > { %v9502_v6 = vpop.eup %6106  ;;  %vm4461_vm7 = vcmp.gt.f32.partialorder %v9274_v7, 0.0  ;;  %vm4462_vm8 = vcmp.gt.f32.partialorder %v9289_v30, 0.0  ;;  %v4508_v38 = vadd.f32 %v4505_v17, %v4499_v24  ;;  %v4516_v60 = vmul.f32 %v4513_v47, %v9464_v28 }
 0x5da   : > { %v4618_v2 = vmul.f32 %v4612_v22, %v4612_v22  ;;  %v4639_v8 = vmax.f32 %v4636_v16, 3.0  ;;  %v9507_v54 = vpop.eup %6108  ;;  %v4509_v5 = vadd.f32 %v4506_v49, %v4500_v62  ;;  %v4517_v42 = vmul.f32 %v4514_v39, %v9447_v29 }
 0x5db   : > { %v4580_v43 = vmul.f32 1.0614054, %v9502_v6  ;;  %6112 = vrcp.f32 %v4637_v26  ;;  %v9511_v10 = vpop.eup %6110  ;;  %v4518_v63 = vmul.f32 %v4515_v31, %v9456_v12  ;;  %v4581_v25 = vmul.f32 1.0614054, %v9507_v54 }
 0x5dc   : > { %v4619_v59 = vmul.f32 1.442695, %v4616_v20  ;;  %6114 = vrcp.f32 %v4638_v21  ;;  %vm4526_vm9 = vcmp.le.f32.partialorder %v9271_v50, -3.0  ;;  %v4582_v24 = vmul.f32 1.0614054, %v9511_v10 }
 0x5dd   : > { %v5192_v0 = vadd.f32 -1.4531521, %v4580_v43  ;;  %v4621_v17 = vmul.f32 1.442695, %v4617_v14  ;;  %6116 = vrcp.f32 %v4639_v8  ;;  %v4510_v62 = vadd.f32 %v4507_v52, %v4501_v34 }
 0x5de   : > { %v4519_v29 = vmul.f32 %v4516_v60, %v9464_v28  ;;  %vm4527_vm10 = vcmp.le.f32.partialorder %v9274_v7, -3.0  ;;  %v5193_v47 = vadd.f32 -1.4531521, %v4581_v25  ;;  %v4623_v22 = vmul.f32 1.442695, %v4618_v2 }
 0x5df   : > { %v4477_v12 = vsub.f32 %v9454_v46, %v4453_v13  ;;  %vm4528_vm11 = vcmp.le.f32.partialorder %v9289_v30, -3.0  ;;  %v4561_v49 = vmul.f32 1.442695, %v9450_v56  ;;  %v5194_v39 = vadd.f32 -1.4531521, %v4582_v24 }
 0x5e0   : > { %v4586_v31 = vmul.f32 %v9502_v6, %v5192_v0  ;;  %v4520_v20 = vsub.f32 %v4508_v38, %v4517_v42  ;;  %v4563_v16 = vmul.f32 1.442695, %v9462_v55  ;;  %v4587_v34 = vmul.f32 %v9507_v54, %v5193_v47 }
 0x5e1   : > { %6118 = vpow2.f32 %v4619_v59  ;;  %v4521_v28 = vsub.f32 %v4509_v5, %v4518_v63  ;;  %v4588_v52 = vmul.f32 %v9511_v10, %v5194_v39  ;;  %v4478_v46 = vsel %vm4460_vm6, %v4475_v19, %v9478_v3 }
 0x5e2   : > { %v4589_v14 = vadd.f32 1.4214138, %v4586_v31  ;;  %6120 = vpow2.f32 %v4621_v17  ;;  %v4522_v26 = vsub.f32 %v4510_v62, %v4519_v29  ;;  %v4590_v56 = vadd.f32 1.4214138, %v4587_v34 }
 0x5e3   : > { %6122 = vpow2.f32 %v4623_v22  ;;  %v4479_v21 = vsel %vm4461_vm7, %v4476_v11, %v9485_v37  ;;  %v4480_v55 = vsel %vm4462_vm8, %v4477_v12, %v4453_v13  ;;  %v4591_v38 = vadd.f32 1.4214138, %v4588_v52 }
 0x5e4   : > { %v4592_v60 = vmul.f32 %v9502_v6, %v4589_v14  ;;  %v4523_v2 = vmul.f32 %v4520_v20, %v9459_v45  ;;  %6124 = vpow2.f32 %v4561_v49  ;;  %v9537_v8 = vmul.f32 %v6105_v48, %v9807_v53 }
 0x5e5   : > { %v4593_v3 = vmul.f32 %v9507_v54, %v4590_v56  ;;  %v9540_v19 = vpop.eup %6112  ;;  %v4524_v5 = vmul.f32 %v4521_v28, %v9468_v40  ;;  %6126 = vpow2.f32 %v4563_v16  ;;  %v4594_v37 = vmul.f32 %v9511_v10, %v4591_v38 }
 0x5e6   : > { %v5195_v11 = vadd.f32 -0.28449672, %v4592_v60  ;;  %v9544_v13 = vpop.eup %6114  ;;  %v4525_v42 = vmul.f32 %v4522_v26, %v9470_v41  ;;  %v4529_v45 = vsel %vm4526_vm9, %v4523_v2, %v4478_v46  ;;  %v4643_v53 = vmul.f32 %v9540_v19, %v9540_v19 }
 0x5e7   : > { %v5196_v43 = vadd.f32 -0.28449672, %v4593_v3  ;;  %v9551_v48 = vpop.eup %6116  ;;  %v4530_v40 = vsel %vm4527_vm10, %v4524_v5, %v4479_v21  ;;  %v5197_v63 = vadd.f32 -0.28449672, %v4594_v37  ;;  %v4644_v59 = vmul.f32 %v9544_v13, %v9544_v13 }
 0x5e8   : > { %v4598_v25 = vmul.f32 %v9502_v6, %v5195_v11  ;;  %v4531_v41 = vsel %vm4528_vm11, %v4525_v42, %v4480_v55  ;;  %v4645_v24 = vmul.f32 %v9551_v48, %v9551_v48  ;;  %v4649_v0 = vmul.f32 0.5, %v4643_v53 }
 0x5e9   : > { %v4599_v50 = vmul.f32 %v9507_v54, %v5196_v43  ;;  %v4600_v17 = vmul.f32 %v9511_v10, %v5197_v63  ;;  %v4650_v7 = vmul.f32 0.5, %v4644_v59  ;;  %v4655_v29 = vmul.f32 0.75, %v4643_v53 }
 0x5ea   : > { %v4601_v62 = vadd.f32 0.2548296, %v4598_v25  ;;  %v4532_v22 = vmul.f32 0.88622695, %v4529_v45  ;;  %v4651_v49 = vmul.f32 0.5, %v4645_v24  ;;  %v4656_v39 = vmul.f32 0.75, %v4644_v59 }
 0x5eb   : > { %v6119_v47 = vpop.eup %6118  ;;  %v4602_v12 = vadd.f32 0.2548296, %v4599_v50  ;;  %v4533_v20 = vmul.f32 0.88622695, %v4530_v40  ;;  %v4603_v30 = vadd.f32 0.2548296, %v4600_v17  ;;  %v4658_v46 = vmul.f32 %v4655_v29, %v4643_v53 }
 0x5ec   : > { %v6121_v31 = vpop.eup %6120  ;;  %v4652_v16 = vsub.f32 1.0, %v4649_v0  ;;  %v4657_v34 = vmul.f32 0.75, %v4645_v24  ;;  %v4604_v52 = vmul.f32 %v9502_v6, %v4601_v62  ;;  %vm4613_vm12 = vcmp.gt.f32.partialorder %v9401_v9, 0.0 }
 0x5ed   : > { %v6123_v28 = vpop.eup %6122  ;;  %v4653_v14 = vsub.f32 1.0, %v4650_v7  ;;  %v4659_v26 = vmul.f32 %v4656_v39, %v4644_v59  ;;  %v4605_v56 = vmul.f32 %v9507_v54, %v4602_v12  ;;  %v4654_v21 = vsub.f32 1.0, %v4651_v49 }
 0x5ee   : > { %v4660_v55 = vmul.f32 %v4657_v34, %v4645_v24  ;;  %v4664_v38 = vmul.f32 1.875, %v4643_v53  ;;  %v6125_v60 = vpop.eup %6124  ;;  %v4534_v2 = vmul.f32 0.88622695, %v4531_v41  ;;  %v4606_v3 = vmul.f32 %v9511_v10, %v4603_v30 }
 0x5ef   : > { %vm4614_vm13 = vcmp.gt.f32.partialorder %v9411_v32, 0.0  ;;  %v4665_v5 = vmul.f32 1.875, %v4644_v59  ;;  %v6127_v37 = vpop.eup %6126  ;;  %v4625_v11 = vmul.f32 2.0, %v6119_v47  ;;  %v4626_v6 = vmul.f32 2.0, %v6121_v31 }
 0x5f0   : > { %v4627_v42 = vmul.f32 2.0, %v6123_v28  ;;  %v4666_v45 = vmul.f32 1.875, %v4645_v24  ;;  %v4661_v43 = vadd.f32 %v4658_v46, %v4652_v16  ;;  %v4662_v40 = vadd.f32 %v4659_v26, %v4653_v14 }
 0x5f1   : > { %v4667_v63 = vmul.f32 %v4664_v38, %v4643_v53  ;;  %v4668_v25 = vmul.f32 %v4665_v5, %v4644_v59  ;;  %v4628_v54 = vsub.f32 %v4625_v11, %v4604_v52  ;;  %v4629_v50 = vsub.f32 %v4626_v6, %v4605_v56 }
 0x5f2   : > { %v4663_v0 = vadd.f32 %v4660_v55, %v4654_v21  ;;  %v4669_v17 = vmul.f32 %v4666_v45, %v4645_v24  ;;  %v4535_v41 = vmul.f32 %v4532_v22, %v9418_v23  ;;  %v4630_v62 = vsub.f32 %v4627_v42, %v4606_v3 }
 0x5f3   : > { %v4670_v10 = vmul.f32 %v4667_v63, %v4643_v53  ;;  %v4671_v7 = vmul.f32 %v4668_v25, %v4644_v59  ;;  %v4536_v29 = vmul.f32 %v4533_v20, %v9425_v44  ;;  %v4537_v47 = vmul.f32 %v4534_v2, %v9428_v15  ;;  %v9810_v63 = vld [vmem:[#allocation8_spill] sm:$0xff]  ;;  %v9811_v25 = vld [vmem:[#allocation9_spill] sm:$0xff] }
 0x5f4   : > { %vm4615_vm14 = vcmp.gt.f32.partialorder %v9422_v61, 0.0  ;;  %v4672_v12 = vmul.f32 %v4669_v17, %v4645_v24  ;;  %v4646_v49 = vmul.f32 0.5641896, %v9540_v19  ;;  %v4647_v39 = vmul.f32 0.5641896, %v9544_v13 }
 0x5f5   : > { %v4673_v31 = vsub.f32 %v4661_v43, %v4670_v10  ;;  %v4674_v30 = vsub.f32 %v4662_v40, %v4671_v7  ;;  %v4631_v16 = vsel %vm4613_vm12, %v4628_v54, %v4604_v52  ;;  %v4632_v23 = vsel %vm4614_vm13, %v4629_v50, %v4605_v56  ;;  %v9812_v54 = vld [vmem:[#allocation10_spill] sm:$0xff] }
 0x5f6   : > { %v4648_v53 = vmul.f32 0.5641896, %v9551_v48  ;;  %v4675_v44 = vsub.f32 %v4663_v0, %v4672_v12  ;;  %v4538_v59 = vmul.f32 %v4535_v41, %v4535_v41  ;;  %v4633_v15 = vsel %vm4615_vm14, %v4630_v62, %v4606_v3  ;;  %v9813_v12 = vld [vmem:[#allocation17_spill] sm:$0xff] }
 0x5f7   : > { %v4676_v22 = vmul.f32 %v4673_v31, %v4646_v49  ;;  %v4677_v20 = vmul.f32 %v4674_v30, %v4647_v39  ;;  %v4539_v24 = vmul.f32 %v4536_v29, %v4536_v29  ;;  %vm4679_vm15 = vcmp.le.f32.partialorder %v9401_v9, -3.0  ;;  %v9816_v39 = vld [vmem:[#allocation7_spill] sm:$0xff] }
 0x5f8   : > { %v4678_v34 = vmul.f32 %v4675_v44, %v4648_v53  ;;  %vm4680_vm0 = vcmp.le.f32.partialorder %v9411_v32, -3.0  ;;  %v4540_v19 = vmul.f32 %v4537_v47, %v4537_v47  ;;  %vm4681_vm1 = vcmp.le.f32.partialorder %v9422_v61, -3.0  ;;  %v9817_v30 = vld [vmem:[#allocation11_spill] sm:$0xff]  ;;  %v9818_v44 = vld [vmem:[#allocation16_spill] sm:$0xff] }
 0x5f9   : > { %v4682_v13 = vsel %vm4679_vm15, %v4676_v22, %v4631_v16  ;;  %v4683_v28 = vsel %vm4680_vm0, %v4677_v20, %v4632_v23  ;;  %v4566_v52 = vmul.f32 %v6125_v60, %v9809_v1  ;;  %v4393_v26 = vadd.f32 %v9433_v27, %v9415_v4  ;;  %v6128_v22 = vld [vmem:[%s9639_s7 + $0x8] sm:$0xff] }
 0x5fa   : > { %v4684_v14 = vsel %vm4681_vm1, %v4678_v34, %v4633_v15  ;;  %v4685_v48 = vmul.f32 0.88622695, %v4682_v13  ;;  %v4686_v46 = vmul.f32 0.88622695, %v4683_v28  ;;  %v4567_v56 = vmul.f32 %v6127_v37, %v9801_v51  ;;  %v6129_v28 = vld [vmem:[%s9639_s7] sm:$0xff] }
 0x5fb   : > { %v4687_v21 = vmul.f32 0.88622695, %v4684_v14  ;;  %v4541_v55 = vmul.f32 0.02853139, %v4538_v59  ;;  %v4542_v9 = vmul.f32 0.02853139, %v4539_v24  ;;  %v4916_v16 = vmul.f32 %v9817_v30, %v9813_v12 }
 0x5fc   : > { %v4688_v32 = vmul.f32 %v4685_v48, %v9537_v8  ;;  %v4689_v38 = vmul.f32 %v4686_v46, %v4566_v52  ;;  %v4543_v2 = vmul.f32 0.02853139, %v4540_v19  ;;  %v4915_v23 = vmul.f32 %v9333_v18, %v9813_v12  ;;  %v9819_v59 = vld [vmem:[#allocation15_spill] sm:$0xff]  ;;  %v9821_v19 = vld [vmem:[#allocation4_spill] sm:$0xff]  ;;  %v6130_v18 = vld [vmem:[%s9639_s7 + $0x18] sm:$0xff] }
 0x5fd   : > { %v4690_v61 = vmul.f32 %v4687_v21, %v4567_v56  ;;  %v4544_v3 = vadd.f32 %v4541_v55, %v9435_v35  ;;  %v4545_v1 = vadd.f32 %v4542_v9, %v9439_v33  ;;  %v4717_v15 = vmul.f32 %v9819_v59, %v9818_v44  ;;  %v9820_v24 = vld [vmem:[#allocation3_spill] sm:$0xff]  ;;  %v9822_v46 = vld [vmem:[#allocation5_spill] sm:$0xff]  ;;  %v9823_v56 = vld [vmem:[#allocation6_spill] sm:$0xff] }
 0x5fe   : > { %v4691_v60 = vmul.f32 %v4688_v32, %v4688_v32  ;;  %v4692_v5 = vmul.f32 %v4689_v38, %v4689_v38  ;;  %v4546_v11 = vadd.f32 %v4543_v2, %v4393_v26  ;;  %v4922_v20 = vsub.f32 1.0, %v6128_v22  ;;  %v6131_v55 = vld [vmem:[%s9639_s7 + $0x10] sm:$0xff]  ;;  %v9824_v2 = vld [vmem:[#allocation2_spill] sm:$0xff] }
 0x5ff   : > { %v4693_v6 = vmul.f32 %v4690_v61, %v4690_v61  ;;  %v4921_v52 = vsub.f32 1.0, %v6129_v28  ;;  %v4924_v14 = vsub.f32 1.0, %v6130_v18  ;;  %v4920_v26 = vmul.f32 %v4916_v16, %v9822_v46 }
 0x600   : > { %v4694_v42 = vmul.f32 0.01234123, %v4691_v60  ;;  %v4695_v4 = vmul.f32 0.01234123, %v4692_v5  ;;  %v4919_v21 = vmul.f32 %v4915_v23, %v9823_v56  ;;  %v4923_v9 = vsub.f32 1.0, %v6131_v55 }
 0x601   : > { %v4696_v27 = vmul.f32 0.01234123, %v4693_v6 }
 0x602   : > { %v4697_v51 = vadd.f32 %v4694_v42, %v4544_v3  ;;  %v4698_v37 = vadd.f32 %v4695_v4, %v4545_v1  ;;  %v4928_v1 = vmul.f32 %v4924_v14, %v4920_v26  ;;  %v4927_v60 = vmul.f32 %v4923_v9, %v4919_v21 }
 0x603   : > { %v4699_v45 = vadd.f32 %v4696_v27, %v4546_v11 }
 0x604   : > { %v4700_v43 = vmul.f32 %v4697_v51, %v9797_v57  ;;  %v4701_v8 = vmul.f32 %v4698_v37, %v9802_v36  ;;  %v9814_v57 = vld [vmem:[#allocation24_spill] sm:$0xff]  ;;  %v9815_v36 = vld [vmem:[#allocation22_spill] sm:$0xff] }
 0x605   : > { %v4702_v40 = vmul.f32 %v4699_v45, %v6610_v58  ;;  %v4914_v49 = vmul.f32 %v9814_v57, %v9813_v12  ;;  %v4913_v58 = vmul.f32 %v9815_v36, %v9813_v12 }
 0x606   : > { %v4703_v35 = vmul.f32 %v4700_v43, %v9810_v63  ;;  %v4704_v33 = vmul.f32 %v4701_v8, %v9811_v25 }
 0x607   : > { %v4705_v50 = vmul.f32 %v4702_v40, %v9812_v54  ;;  %v4918_v34 = vmul.f32 %v4914_v49, %v9820_v24  ;;  %v4917_v13 = vmul.f32 %v4913_v58, %v9821_v19 }
 0x608   : > { %v4706_v0 = vadd.f32 %v4704_v33, %v4703_v35 }
 0x609   : > { %v4926_v38 = vmul.f32 %v4922_v20, %v4918_v34  ;;  %v4925_v3 = vmul.f32 %v4921_v52, %v4917_v13 }
 0x60a   : > { %v4707_v17 = vadd.f32 %v4706_v0, %v4705_v50 }
 0x60c   : > { %v4708_v41 = vrot.slane %v4707_v17, 4 }
 0x60e   : > { %v4709_v62 = vadd.f32 %v4708_v41, %v4707_v17 }
 0x610   : > { %v4710_v10 = vrot.slane %v4709_v62, 2 }
 0x612   : > { %v4711_v7 = vadd.f32 %v4710_v10, %v4709_v62 }
 0x614   : > { %v4712_v29 = vrot.slane %v4711_v7, 1 }
 0x616   : > { %v4713_v47 = vadd.f32 %v4712_v29, %v4711_v7 }
 0x618   : > { %v4714_v31 = vmul.f32 %v4713_v47, %v9816_v39 }
 0x61a   : > { %v4715_v53 = vmul.f32 3200.0, %v4714_v31 }
 0x61c   : > { %v4718_v48 = vmul.f32 %v4717_v15, %v4715_v53 }
 0x61e   : > { %v4719_v32 = vmax.f32 %v4718_v48, 0.0 }
 0x620   : > { %v4932_v61 = vrot.slane %v4719_v32, %v9824_v2 }
 0x622   : > { %v4934_v5 = vmul.f32 %v6128_v22, %v4932_v61  ;;  %v4933_v11 = vmul.f32 %v6129_v28, %v4932_v61  ;;  %v4936_v6 = vmul.f32 %v6130_v18, %v4932_v61  ;;  %v4935_v42 = vmul.f32 %v6131_v55, %v4932_v61 }
 0x624   : > { %v4938_v4 = vadd.f32 %v4934_v5, %v4926_v38  ;;  %v4937_v27 = vadd.f32 %v4933_v11, %v4925_v3  ;;  %v4940_v51 = vadd.f32 %v4936_v6, %v4928_v1  ;;  %v4939_v37 = vadd.f32 %v4935_v42, %v4927_v60 }
 0x626   : > { %4943 = vst [vmem:[%s436_s27 + $0x8] sm:$0xff] %v4938_v4  ;;  %4942 = vst [vmem:[%s436_s27] sm:$0xff] %v4937_v27 }
 0x627   : > { %4945 = vst [vmem:[%s436_s27 + $0x18] sm:$0xff] %v4940_v51  ;;  %4944 = vst [vmem:[%s436_s27 + $0x10] sm:$0xff] %v4939_v37 }
 0x628 PF: > { %s23_s21 = sadd.s32 1, %s6138_s21  }
 0x629   : > { %p20_p4 = scmp.ge.s32.totalorder %s23_s21, 4  }
 0x62b   :  { %22 = sbr.rel (!%p20_p4) target bundleno = 1 (0x1), region = 109 }

</bundles_post_ra>
